<compile_context>
chip_gen: v7x
topology: tpu7x:2x2x1
jax: 0.10.0
libtpu: 0.0.40
codegen_flags: <defaults>
</compile_context>

<pallas_src>
import jax
import jax.numpy as jnp
from jax.experimental import pallas as pl
from jax.experimental.pallas import tpu as pltpu

_BN_EPS = 1e-5
_FC_TK = 1280  # 6400 = 5 * 1280; 1280 % 128 == 0


# ----------------------------------------------------------------------------
# Pallas kernels
# ----------------------------------------------------------------------------
def _conv_bn_relu_kernel(p_ref, w_ref, b_ref, o_ref):
    # p_ref: (M, K) bf16 im2col patches of one tower, w_ref: (K, C) bf16,
    # b_ref: (1, C) f32, o_ref: (M, C) bf16.
    y = jnp.dot(p_ref[...], w_ref[...], preferred_element_type=jnp.float32)
    y = y + b_ref[...]
    # BatchNorm2d (training mode, gamma=1, beta=0): per-channel stats over
    # (N, H, W) == rows of this full-tower block.  One-pass variance.
    mean = jnp.mean(y, axis=0, keepdims=True)
    var = jnp.mean(y * y, axis=0, keepdims=True) - mean * mean
    y = (y - mean) * jax.lax.rsqrt(var + _BN_EPS)
    o_ref[...] = jnp.maximum(y, 0.0).astype(o_ref.dtype)


def _fc_towers_kernel(x_ref, w1_ref, b1_ref, w2_ref, b2_ref, w3_ref, b3_ref,
                      o_ref, acc_ref):
    # Grid: (tower, k_tile).  fc1 is K-tiled with an f32 VMEM accumulator;
    # the per-tower epilogue (predictor: relu+fc2+relu+fc3, target: bias only)
    # runs on the last k step, gated by the tower id.
    t = pl.program_id(0)
    k = pl.program_id(1)

    @pl.when(k == 0)
    def _():
        acc_ref[...] = jnp.zeros_like(acc_ref)

    acc_ref[...] += jnp.dot(x_ref[...], w1_ref[...],
                            preferred_element_type=jnp.float32)

    last = k == pl.num_programs(1) - 1

    @pl.when(jnp.logical_and(last, t == 0))
    def _():  # predictor head: fc1+relu -> fc2+relu -> fc3
        h1 = jnp.maximum(acc_ref[...] + b1_ref[...], 0.0)
        h2 = jnp.dot(h1.astype(jnp.bfloat16), w2_ref[...],
                     preferred_element_type=jnp.float32) + b2_ref[...]
        h2 = jnp.maximum(h2, 0.0)
        o_ref[...] = jnp.dot(h2.astype(jnp.bfloat16), w3_ref[...],
                             preferred_element_type=jnp.float32) + b3_ref[...]

    @pl.when(jnp.logical_and(last, t == 1))
    def _():  # target head: fc1 only (no relu)
        o_ref[...] = acc_ref[...] + b1_ref[...]


# ----------------------------------------------------------------------------
# pallas_call wrappers
# ----------------------------------------------------------------------------
def _conv_bn_relu_towers(patches, w_col, b):
    # patches: (T, M, K) bf16, w_col: (T, K, C) bf16, b: (T, 1, C) f32.
    # One grid step per tower (full-tower block => exact BN stats).
    T, M, K = patches.shape
    C = w_col.shape[-1]
    flops = 2 * T * M * K * C
    bytes_accessed = patches.size * 2 + w_col.size * 2 + b.size * 4 + T * M * C * 2
    return pl.pallas_call(
        _conv_bn_relu_kernel,
        out_shape=jax.ShapeDtypeStruct((T, M, C), jnp.bfloat16),
        grid=(T,),
        in_specs=[
            pl.BlockSpec((None, M, K), lambda t: (t, 0, 0)),
            pl.BlockSpec((None, K, C), lambda t: (t, 0, 0)),
            pl.BlockSpec((None, 1, C), lambda t: (t, 0, 0)),
        ],
        out_specs=pl.BlockSpec((None, M, C), lambda t: (t, 0, 0)),
        compiler_params=pltpu.CompilerParams(
            dimension_semantics=("parallel",)),
        cost_estimate=pl.CostEstimate(flops=flops, transcendentals=0,
                                      bytes_accessed=int(bytes_accessed)),
    )(patches, w_col, b)


def _fc_towers(flat, w1, b1, w2, b2, w3, b3):
    # flat: (2, N, 6400) bf16; w1: (2, 6400, 512) bf16; b1: (2, 1, 512) f32;
    # w2/w3: (512, 512) bf16 (predictor only); b2/b3: (1, 512) f32.
    T, N, K = flat.shape
    H = w1.shape[-1]
    kt = K // _FC_TK
    flops = 2 * T * N * K * H + 4 * N * H * H
    bytes_accessed = (flat.size + w1.size + w2.size + w3.size) * 2 \
        + (b1.size + b2.size + b3.size + T * N * H) * 4
    return pl.pallas_call(
        _fc_towers_kernel,
        out_shape=jax.ShapeDtypeStruct((T, N, H), jnp.float32),
        grid=(T, kt),
        in_specs=[
            pl.BlockSpec((None, N, _FC_TK), lambda t, k: (t, 0, k)),
            pl.BlockSpec((None, _FC_TK, H), lambda t, k: (t, k, 0)),
            pl.BlockSpec((None, 1, H), lambda t, k: (t, 0, 0)),
            pl.BlockSpec((H, H), lambda t, k: (0, 0)),
            pl.BlockSpec((1, H), lambda t, k: (0, 0)),
            pl.BlockSpec((H, H), lambda t, k: (0, 0)),
            pl.BlockSpec((1, H), lambda t, k: (0, 0)),
        ],
        out_specs=pl.BlockSpec((None, N, H), lambda t, k: (t, 0, 0)),
        scratch_shapes=[pltpu.VMEM((N, H), jnp.float32)],
        compiler_params=pltpu.CompilerParams(
            dimension_semantics=("parallel", "arbitrary")),
        cost_estimate=pl.CostEstimate(flops=flops, transcendentals=0,
                                      bytes_accessed=int(bytes_accessed)),
    )(flat, w1, b1, w2, b2, w3, b3)


# ----------------------------------------------------------------------------
# Plain-JAX glue: NHWC im2col, layer composition
# ----------------------------------------------------------------------------
def _im2col_nhwc(x, kh, kw, stride, pad):
    # x: (N, H, W, C) -> (N*OH*OW, KH*KW*C); columns ordered (kh, kw, c).
    x = jnp.pad(x, ((0, 0), (pad, pad), (pad, pad), (0, 0)))
    n, h, w, c = x.shape
    oh = (h - kh) // stride + 1
    ow = (w - kw) // stride + 1
    cols = []
    for i in range(kh):
        for j in range(kw):
            cols.append(x[:, i:i + stride * oh:stride, j:j + stride * ow:stride, :])
    p = jnp.stack(cols, axis=3)                       # (N, OH, OW, KH*KW, C)
    return p.reshape(n * oh * ow, kh * kw * c), oh, ow


def rnd_forward(params, x):
    # x: NCHW (N, C, 84, 84) at the interface; internally NHWC / bf16.
    n = x.shape[0]
    x = x.transpose(0, 2, 3, 1).astype(jnp.bfloat16)            # NHWC

    # conv1: shared patches, predictor+target weights concatenated on C_out.
    p1, oh1, ow1 = _im2col_nhwc(x, 8, 8, 4, 1)                  # (N*400, 256)
    y1 = _conv_bn_relu_towers(p1[None], params["conv1_w"],
                              params["conv1_b"])                # (1, N*400, 64)
    y1 = y1.reshape(n, oh1, ow1, 64)
    h = jnp.stack([y1[..., :32], y1[..., 32:]], axis=0)         # (2, N, 20, 20, 32)

    # conv2 + conv3: one grid step per tower ("parallel" -> 2 TCs on v7x).
    p2 = jnp.stack([_im2col_nhwc(h[t], 4, 4, 2, 1)[0] for t in range(2)])
    y2 = _conv_bn_relu_towers(p2, params["conv2_w"], params["conv2_b"])
    h = y2.reshape(2, n, 10, 10, 64)

    p3 = jnp.stack([_im2col_nhwc(h[t], 3, 3, 1, 1)[0] for t in range(2)])
    y3 = _conv_bn_relu_towers(p3, params["conv3_w"], params["conv3_b"])
    flat = y3.reshape(2, n, 6400)                               # NHWC flatten

    # Both FC heads fused in one call (tower axis parallel, fc1 K-tiled).
    feats = _fc_towers(
        flat,
        params["fc1_w"], params["fc1_b"],
        params["p_fc2_w"], params["p_fc2_b"],
        params["p_fc3_w"], params["p_fc3_b"])
    predict_feature = feats[0]
    target_feature = feats[1]
    return predict_feature, target_feature


# ----------------------------------------------------------------------------
# Parameters (torch-layout synthetic weights -> kernel layout, bf16)
# ----------------------------------------------------------------------------
def init_params(key, c):
    # TODO(synk): PyTorch uses orthogonal init (gain=sqrt(2)); deterministic
    # scaled-normal weights stand in here, biases are zero as in the original.
    def w(k, shape):
        return 0.05 * jax.random.normal(k, shape, dtype=jnp.float32)

    keys = jax.random.split(key, 12)
    predictor = {
        "conv1_w": w(keys[0], (32, c, 8, 8)), "conv1_b": jnp.zeros((32,), jnp.float32),
        "conv2_w": w(keys[1], (64, 32, 4, 4)), "conv2_b": jnp.zeros((64,), jnp.float32),
        "conv3_w": w(keys[2], (64, 64, 3, 3)), "conv3_b": jnp.zeros((64,), jnp.float32),
        "fc1_w": w(keys[3], (6400, 512)), "fc1_b": jnp.zeros((512,), jnp.float32),
        "fc2_w": w(keys[4], (512, 512)), "fc2_b": jnp.zeros((512,), jnp.float32),
        "fc3_w": w(keys[5], (512, 512)), "fc3_b": jnp.zeros((512,), jnp.float32),
    }
    target = {
        "conv1_w": w(keys[6], (32, c, 8, 8)), "conv1_b": jnp.zeros((32,), jnp.float32),
        "conv2_w": w(keys[7], (64, 32, 4, 4)), "conv2_b": jnp.zeros((64,), jnp.float32),
        "conv3_w": w(keys[8], (64, 64, 3, 3)), "conv3_b": jnp.zeros((64,), jnp.float32),
        "fc1_w": w(keys[9], (6400, 512)), "fc1_b": jnp.zeros((512,), jnp.float32),
    }
    return {"predictor": predictor, "target": target}


def _conv_w_col(w):
    # torch (C_out, C_in, KH, KW) -> (KH*KW*C_in, C_out), matching im2col cols.
    c_out, c_in, kh, kw = w.shape
    return jnp.transpose(w, (2, 3, 1, 0)).reshape(kh * kw * c_in, c_out)


def _fc1_nhwc(w):
    # torch nn.Flatten on NCHW orders fc1 rows as (c, h, w); our flatten is
    # NHWC (h, w, c).  Permute rows once to preserve the original semantics.
    return w.reshape(64, 10, 10, 512).transpose(1, 2, 0, 3).reshape(6400, 512)


def prepare_params(raw):
    p, t = raw["predictor"], raw["target"]
    bf = jnp.bfloat16
    return {
        # conv1 shared between towers (concat along C_out; BN is per-column).
        "conv1_w": jnp.concatenate(
            [_conv_w_col(p["conv1_w"]), _conv_w_col(t["conv1_w"])], axis=1
        ).astype(bf)[None],                                          # (1,256,64)
        "conv1_b": jnp.concatenate(
            [p["conv1_b"], t["conv1_b"]]).reshape(1, 1, 64),         # (1,1,64)
        # conv2/conv3 stacked on a tower axis (0 = predictor, 1 = target).
        "conv2_w": jnp.stack([_conv_w_col(p["conv2_w"]),
                              _conv_w_col(t["conv2_w"])]).astype(bf),  # (2,512,64)
        "conv2_b": jnp.stack([p["conv2_b"], t["conv2_b"]])[:, None, :],
        "conv3_w": jnp.stack([_conv_w_col(p["conv3_w"]),
                              _conv_w_col(t["conv3_w"])]).astype(bf),  # (2,576,64)
        "conv3_b": jnp.stack([p["conv3_b"], t["conv3_b"]])[:, None, :],
        # fc1 weights/biases stacked on the tower axis (0=predictor, 1=target);
        # bf16 in HBM, f32 accumulation inside the kernel.
        "fc1_w": jnp.stack([_fc1_nhwc(p["fc1_w"]),
                            _fc1_nhwc(t["fc1_w"])]).astype(bf),        # (2,6400,512)
        "fc1_b": jnp.stack([p["fc1_b"], t["fc1_b"]])[:, None, :],      # (2,1,512)
        # fc2/fc3 exist only in the predictor tower.
        "p_fc2_w": p["fc2_w"].astype(bf),
        "p_fc2_b": p["fc2_b"].reshape(1, 512),
        "p_fc3_w": p["fc3_w"].astype(bf),
        "p_fc3_b": p["fc3_b"].reshape(1, 512),
    }


if __name__ == "__main__":
    key = jax.random.PRNGKey(0)
    k_param, k_x = jax.random.split(key)

    batch, c = 2, 4                      # module requires 84x84 spatial input
    x = jax.random.normal(k_x, (batch, c, 84, 84), dtype=jnp.float32)
    params = prepare_params(init_params(k_param, c))

    fwd = jax.jit(rnd_forward)
    predict_feature, target_feature = fwd(params, x)
    jax.block_until_ready((predict_feature, target_feature))

    assert predict_feature.shape == (batch, 512)
    assert target_feature.shape == (batch, 512)
    assert predict_feature.dtype == jnp.float32
    assert target_feature.dtype == jnp.float32
    print("KERNEL_OK")
</pallas_src>

<mosaic_0001>
module attributes {stable_mosaic.version = 11 : i64} {
  func.func @_conv_bn_relu_kernel(%arg0: i32, %arg1: memref<1x800x256xbf16, #tpu.memory_space<vmem>>, %arg2: memref<1x256x64xbf16, #tpu.memory_space<vmem>>, %arg3: memref<1x1x64xf32, #tpu.memory_space<vmem>>, %arg4: memref<1x800x64xbf16, #tpu.memory_space<vmem>>) attributes {dimension_semantics = [#tpu.dimension_semantics<parallel>], iteration_bounds = array<i64: 1>, scalar_prefetch = 0 : i64, scratch_operands = 0 : i64, tpu.core_type = #tpu.core_type<tc>, window_params = [{transform_indices = @transform_0, window_bounds = array<i64: 1, 800, 256>}, {transform_indices = @transform_1, window_bounds = array<i64: 1, 256, 64>}, {transform_indices = @transform_2, window_bounds = array<i64: 1, 1, 64>}, {transform_indices = @transform_3, window_bounds = array<i64: 1, 800, 64>}]} {
    %c0 = arith.constant 0 : index
    %c0_0 = arith.constant 0 : index
    %c0_1 = arith.constant 0 : index
    %0 = vector.load %arg1[%c0, %c0_0, %c0_1] : memref<1x800x256xbf16, #tpu.memory_space<vmem>>, vector<1x800x256xbf16>
    %1 = vector.shape_cast %0 : vector<1x800x256xbf16> to vector<800x256xbf16>
    %c0_2 = arith.constant 0 : index
    %c0_3 = arith.constant 0 : index
    %c0_4 = arith.constant 0 : index
    %2 = vector.load %arg2[%c0_2, %c0_3, %c0_4] : memref<1x256x64xbf16, #tpu.memory_space<vmem>>, vector<1x256x64xbf16>
    %3 = vector.shape_cast %2 : vector<1x256x64xbf16> to vector<256x64xbf16>
    %cst = arith.constant dense<0.000000e+00> : vector<800x64xf32>
    %4 = tpu.matmul %1, %3, %cst {dimension_numbers = #tpu.dot_dimension_numbers<[1], [0], [0], [1], [0, 0, 1, 1], [], []>} : vector<800x256xbf16>, vector<256x64xbf16>, vector<800x64xf32> -> vector<800x64xf32>
    %c0_5 = arith.constant 0 : index
    %c0_6 = arith.constant 0 : index
    %c0_7 = arith.constant 0 : index
    %5 = vector.load %arg3[%c0_5, %c0_6, %c0_7] : memref<1x1x64xf32, #tpu.memory_space<vmem>>, vector<1x1x64xf32>
    %6 = vector.shape_cast %5 : vector<1x1x64xf32> to vector<1x64xf32>
    %7 = vector.broadcast %6 : vector<1x64xf32> to vector<800x64xf32>
    %8 = arith.addf %4, %7 : vector<800x64xf32>
    %cst_8 = arith.constant dense<0.000000e+00> : vector<64xf32>
    %9 = vector.multi_reduction <add>, %8, %cst_8 [0] : vector<800x64xf32> to vector<64xf32>
    %10 = vector.shape_cast %9 : vector<64xf32> to vector<1x64xf32>
    %cst_9 = arith.constant 8.000000e+02 : f32
    %11 = vector.broadcast %cst_9 : f32 to vector<1x64xf32>
    %12 = arith.divf %10, %11 : vector<1x64xf32>
    %13 = arith.mulf %8, %8 : vector<800x64xf32>
    %cst_10 = arith.constant dense<0.000000e+00> : vector<64xf32>
    %14 = vector.multi_reduction <add>, %13, %cst_10 [0] : vector<800x64xf32> to vector<64xf32>
    %15 = vector.shape_cast %14 : vector<64xf32> to vector<1x64xf32>
    %cst_11 = arith.constant 8.000000e+02 : f32
    %16 = vector.broadcast %cst_11 : f32 to vector<1x64xf32>
    %17 = arith.divf %15, %16 : vector<1x64xf32>
    %18 = arith.mulf %12, %12 : vector<1x64xf32>
    %19 = arith.subf %17, %18 : vector<1x64xf32>
    %20 = vector.broadcast %12 : vector<1x64xf32> to vector<800x64xf32>
    %21 = arith.subf %8, %20 : vector<800x64xf32>
    %cst_12 = arith.constant 9.99999974E-6 : f32
    %22 = vector.broadcast %cst_12 : f32 to vector<1x64xf32>
    %23 = arith.addf %19, %22 : vector<1x64xf32>
    %24 = math.rsqrt %23 : vector<1x64xf32>
    %25 = vector.broadcast %24 : vector<1x64xf32> to vector<800x64xf32>
    %26 = arith.mulf %21, %25 : vector<800x64xf32>
    %cst_13 = arith.constant 0.000000e+00 : f32
    %27 = vector.broadcast %cst_13 : f32 to vector<800x64xf32>
    %28 = arith.maximumf %26, %27 : vector<800x64xf32>
    %29 = arith.truncf %28 : vector<800x64xf32> to vector<800x64xbf16>
    %c0_14 = arith.constant 0 : index
    %c0_15 = arith.constant 0 : index
    %c0_16 = arith.constant 0 : index
    %30 = vector.load %arg4[%c0_14, %c0_15, %c0_16] : memref<1x800x64xbf16, #tpu.memory_space<vmem>>, vector<1x800x64xbf16>
    %31 = vector.shape_cast %30 : vector<1x800x64xbf16> to vector<800x64xbf16>
    %32 = vector.shape_cast %29 : vector<800x64xbf16> to vector<1x800x64xbf16>
    tpu.vector_store %arg4[%c0_14, %c0_15, %c0_16], %32 {strides = array<i32>} : memref<1x800x64xbf16, #tpu.memory_space<vmem>>, vector<1x800x64xbf16>,
    return
  }
  func.func @transform_0(%arg0: i32) -> (i32, i32, i32) {
    %c0_i32 = arith.constant 0 : i32
    %c0_i32_0 = arith.constant 0 : i32
    %c0_i32_1 = arith.constant 0 : i32
    return %arg0, %c0_i32, %c0_i32_0 : i32, i32, i32
  }
  func.func @transform_1(%arg0: i32) -> (i32, i32, i32) {
    %c0_i32 = arith.constant 0 : i32
    %c0_i32_0 = arith.constant 0 : i32
    %c0_i32_1 = arith.constant 0 : i32
    return %arg0, %c0_i32, %c0_i32_0 : i32, i32, i32
  }
  func.func @transform_2(%arg0: i32) -> (i32, i32, i32) {
    %c0_i32 = arith.constant 0 : i32
    %c0_i32_0 = arith.constant 0 : i32
    %c0_i32_1 = arith.constant 0 : i32
    return %arg0, %c0_i32, %c0_i32_0 : i32, i32, i32
  }
  func.func @transform_3(%arg0: i32) -> (i32, i32, i32) {
    %c0_i32 = arith.constant 0 : i32
    %c0_i32_0 = arith.constant 0 : i32
    %c0_i32_1 = arith.constant 0 : i32
    return %arg0, %c0_i32, %c0_i32_0 : i32, i32, i32
  }
}

module attributes {stable_mosaic.version = 11 : i64} {
  func.func @_conv_bn_relu_kernel(%arg0: i32, %arg1: memref<1x200x512xbf16, #tpu.memory_space<vmem>>, %arg2: memref<1x512x64xbf16, #tpu.memory_space<vmem>>, %arg3: memref<1x1x64xf32, #tpu.memory_space<vmem>>, %arg4: memref<1x200x64xbf16, #tpu.memory_space<vmem>>) attributes {dimension_semantics = [#tpu.dimension_semantics<parallel>], iteration_bounds = array<i64: 2>, scalar_prefetch = 0 : i64, scratch_operands = 0 : i64, tpu.core_type = #tpu.core_type<tc>, window_params = [{transform_indices = @transform_0, window_bounds = array<i64: 1, 200, 512>}, {transform_indices = @transform_1, window_bounds = array<i64: 1, 512, 64>}, {transform_indices = @transform_2, window_bounds = array<i64: 1, 1, 64>}, {transform_indices = @transform_3, window_bounds = array<i64: 1, 200, 64>}]} {
    %c0 = arith.constant 0 : index
    %c0_0 = arith.constant 0 : index
    %c0_1 = arith.constant 0 : index
    %0 = vector.load %arg1[%c0, %c0_0, %c0_1] : memref<1x200x512xbf16, #tpu.memory_space<vmem>>, vector<1x200x512xbf16>
    %1 = vector.shape_cast %0 : vector<1x200x512xbf16> to vector<200x512xbf16>
    %c0_2 = arith.constant 0 : index
    %c0_3 = arith.constant 0 : index
    %c0_4 = arith.constant 0 : index
    %2 = vector.load %arg2[%c0_2, %c0_3, %c0_4] : memref<1x512x64xbf16, #tpu.memory_space<vmem>>, vector<1x512x64xbf16>
    %3 = vector.shape_cast %2 : vector<1x512x64xbf16> to vector<512x64xbf16>
    %cst = arith.constant dense<0.000000e+00> : vector<200x64xf32>
    %4 = tpu.matmul %1, %3, %cst {dimension_numbers = #tpu.dot_dimension_numbers<[1], [0], [0], [1], [0, 0, 1, 1], [], []>} : vector<200x512xbf16>, vector<512x64xbf16>, vector<200x64xf32> -> vector<200x64xf32>
    %c0_5 = arith.constant 0 : index
    %c0_6 = arith.constant 0 : index
    %c0_7 = arith.constant 0 : index
    %5 = vector.load %arg3[%c0_5, %c0_6, %c0_7] : memref<1x1x64xf32, #tpu.memory_space<vmem>>, vector<1x1x64xf32>
    %6 = vector.shape_cast %5 : vector<1x1x64xf32> to vector<1x64xf32>
    %7 = vector.broadcast %6 : vector<1x64xf32> to vector<200x64xf32>
    %8 = arith.addf %4, %7 : vector<200x64xf32>
    %cst_8 = arith.constant dense<0.000000e+00> : vector<64xf32>
    %9 = vector.multi_reduction <add>, %8, %cst_8 [0] : vector<200x64xf32> to vector<64xf32>
    %10 = vector.shape_cast %9 : vector<64xf32> to vector<1x64xf32>
    %cst_9 = arith.constant 2.000000e+02 : f32
    %11 = vector.broadcast %cst_9 : f32 to vector<1x64xf32>
    %12 = arith.divf %10, %11 : vector<1x64xf32>
    %13 = arith.mulf %8, %8 : vector<200x64xf32>
    %cst_10 = arith.constant dense<0.000000e+00> : vector<64xf32>
    %14 = vector.multi_reduction <add>, %13, %cst_10 [0] : vector<200x64xf32> to vector<64xf32>
    %15 = vector.shape_cast %14 : vector<64xf32> to vector<1x64xf32>
    %cst_11 = arith.constant 2.000000e+02 : f32
    %16 = vector.broadcast %cst_11 : f32 to vector<1x64xf32>
    %17 = arith.divf %15, %16 : vector<1x64xf32>
    %18 = arith.mulf %12, %12 : vector<1x64xf32>
    %19 = arith.subf %17, %18 : vector<1x64xf32>
    %20 = vector.broadcast %12 : vector<1x64xf32> to vector<200x64xf32>
    %21 = arith.subf %8, %20 : vector<200x64xf32>
    %cst_12 = arith.constant 9.99999974E-6 : f32
    %22 = vector.broadcast %cst_12 : f32 to vector<1x64xf32>
    %23 = arith.addf %19, %22 : vector<1x64xf32>
    %24 = math.rsqrt %23 : vector<1x64xf32>
    %25 = vector.broadcast %24 : vector<1x64xf32> to vector<200x64xf32>
    %26 = arith.mulf %21, %25 : vector<200x64xf32>
    %cst_13 = arith.constant 0.000000e+00 : f32
    %27 = vector.broadcast %cst_13 : f32 to vector<200x64xf32>
    %28 = arith.maximumf %26, %27 : vector<200x64xf32>
    %29 = arith.truncf %28 : vector<200x64xf32> to vector<200x64xbf16>
    %c0_14 = arith.constant 0 : index
    %c0_15 = arith.constant 0 : index
    %c0_16 = arith.constant 0 : index
    %30 = vector.load %arg4[%c0_14, %c0_15, %c0_16] : memref<1x200x64xbf16, #tpu.memory_space<vmem>>, vector<1x200x64xbf16>
    %31 = vector.shape_cast %30 : vector<1x200x64xbf16> to vector<200x64xbf16>
    %32 = vector.shape_cast %29 : vector<200x64xbf16> to vector<1x200x64xbf16>
    tpu.vector_store %arg4[%c0_14, %c0_15, %c0_16], %32 {strides = array<i32>} : memref<1x200x64xbf16, #tpu.memory_space<vmem>>, vector<1x200x64xbf16>,
    return
  }
  func.func @transform_0(%arg0: i32) -> (i32, i32, i32) {
    %c0_i32 = arith.constant 0 : i32
    %c0_i32_0 = arith.constant 0 : i32
    %c0_i32_1 = arith.constant 0 : i32
    return %arg0, %c0_i32, %c0_i32_0 : i32, i32, i32
  }
  func.func @transform_1(%arg0: i32) -> (i32, i32, i32) {
    %c0_i32 = arith.constant 0 : i32
    %c0_i32_0 = arith.constant 0 : i32
    %c0_i32_1 = arith.constant 0 : i32
    return %arg0, %c0_i32, %c0_i32_0 : i32, i32, i32
  }
  func.func @transform_2(%arg0: i32) -> (i32, i32, i32) {
    %c0_i32 = arith.constant 0 : i32
    %c0_i32_0 = arith.constant 0 : i32
    %c0_i32_1 = arith.constant 0 : i32
    return %arg0, %c0_i32, %c0_i32_0 : i32, i32, i32
  }
  func.func @transform_3(%arg0: i32) -> (i32, i32, i32) {
    %c0_i32 = arith.constant 0 : i32
    %c0_i32_0 = arith.constant 0 : i32
    %c0_i32_1 = arith.constant 0 : i32
    return %arg0, %c0_i32, %c0_i32_0 : i32, i32, i32
  }
}

module attributes {stable_mosaic.version = 11 : i64} {
  func.func @_conv_bn_relu_kernel(%arg0: i32, %arg1: memref<1x200x576xbf16, #tpu.memory_space<vmem>>, %arg2: memref<1x576x64xbf16, #tpu.memory_space<vmem>>, %arg3: memref<1x1x64xf32, #tpu.memory_space<vmem>>, %arg4: memref<1x200x64xbf16, #tpu.memory_space<vmem>>) attributes {dimension_semantics = [#tpu.dimension_semantics<parallel>], iteration_bounds = array<i64: 2>, scalar_prefetch = 0 : i64, scratch_operands = 0 : i64, tpu.core_type = #tpu.core_type<tc>, window_params = [{transform_indices = @transform_0, window_bounds = array<i64: 1, 200, 576>}, {transform_indices = @transform_1, window_bounds = array<i64: 1, 576, 64>}, {transform_indices = @transform_2, window_bounds = array<i64: 1, 1, 64>}, {transform_indices = @transform_3, window_bounds = array<i64: 1, 200, 64>}]} {
    %c0 = arith.constant 0 : index
    %c0_0 = arith.constant 0 : index
    %c0_1 = arith.constant 0 : index
    %0 = vector.load %arg1[%c0, %c0_0, %c0_1] : memref<1x200x576xbf16, #tpu.memory_space<vmem>>, vector<1x200x576xbf16>
    %1 = vector.shape_cast %0 : vector<1x200x576xbf16> to vector<200x576xbf16>
    %c0_2 = arith.constant 0 : index
    %c0_3 = arith.constant 0 : index
    %c0_4 = arith.constant 0 : index
    %2 = vector.load %arg2[%c0_2, %c0_3, %c0_4] : memref<1x576x64xbf16, #tpu.memory_space<vmem>>, vector<1x576x64xbf16>
    %3 = vector.shape_cast %2 : vector<1x576x64xbf16> to vector<576x64xbf16>
    %cst = arith.constant dense<0.000000e+00> : vector<200x64xf32>
    %4 = tpu.matmul %1, %3, %cst {dimension_numbers = #tpu.dot_dimension_numbers<[1], [0], [0], [1], [0, 0, 1, 1], [], []>} : vector<200x576xbf16>, vector<576x64xbf16>, vector<200x64xf32> -> vector<200x64xf32>
    %c0_5 = arith.constant 0 : index
    %c0_6 = arith.constant 0 : index
    %c0_7 = arith.constant 0 : index
    %5 = vector.load %arg3[%c0_5, %c0_6, %c0_7] : memref<1x1x64xf32, #tpu.memory_space<vmem>>, vector<1x1x64xf32>
    %6 = vector.shape_cast %5 : vector<1x1x64xf32> to vector<1x64xf32>
    %7 = vector.broadcast %6 : vector<1x64xf32> to vector<200x64xf32>
    %8 = arith.addf %4, %7 : vector<200x64xf32>
    %cst_8 = arith.constant dense<0.000000e+00> : vector<64xf32>
    %9 = vector.multi_reduction <add>, %8, %cst_8 [0] : vector<200x64xf32> to vector<64xf32>
    %10 = vector.shape_cast %9 : vector<64xf32> to vector<1x64xf32>
    %cst_9 = arith.constant 2.000000e+02 : f32
    %11 = vector.broadcast %cst_9 : f32 to vector<1x64xf32>
    %12 = arith.divf %10, %11 : vector<1x64xf32>
    %13 = arith.mulf %8, %8 : vector<200x64xf32>
    %cst_10 = arith.constant dense<0.000000e+00> : vector<64xf32>
    %14 = vector.multi_reduction <add>, %13, %cst_10 [0] : vector<200x64xf32> to vector<64xf32>
    %15 = vector.shape_cast %14 : vector<64xf32> to vector<1x64xf32>
    %cst_11 = arith.constant 2.000000e+02 : f32
    %16 = vector.broadcast %cst_11 : f32 to vector<1x64xf32>
    %17 = arith.divf %15, %16 : vector<1x64xf32>
    %18 = arith.mulf %12, %12 : vector<1x64xf32>
    %19 = arith.subf %17, %18 : vector<1x64xf32>
    %20 = vector.broadcast %12 : vector<1x64xf32> to vector<200x64xf32>
    %21 = arith.subf %8, %20 : vector<200x64xf32>
    %cst_12 = arith.constant 9.99999974E-6 : f32
    %22 = vector.broadcast %cst_12 : f32 to vector<1x64xf32>
    %23 = arith.addf %19, %22 : vector<1x64xf32>
    %24 = math.rsqrt %23 : vector<1x64xf32>
    %25 = vector.broadcast %24 : vector<1x64xf32> to vector<200x64xf32>
    %26 = arith.mulf %21, %25 : vector<200x64xf32>
    %cst_13 = arith.constant 0.000000e+00 : f32
    %27 = vector.broadcast %cst_13 : f32 to vector<200x64xf32>
    %28 = arith.maximumf %26, %27 : vector<200x64xf32>
    %29 = arith.truncf %28 : vector<200x64xf32> to vector<200x64xbf16>
    %c0_14 = arith.constant 0 : index
    %c0_15 = arith.constant 0 : index
    %c0_16 = arith.constant 0 : index
    %30 = vector.load %arg4[%c0_14, %c0_15, %c0_16] : memref<1x200x64xbf16, #tpu.memory_space<vmem>>, vector<1x200x64xbf16>
    %31 = vector.shape_cast %30 : vector<1x200x64xbf16> to vector<200x64xbf16>
    %32 = vector.shape_cast %29 : vector<200x64xbf16> to vector<1x200x64xbf16>
    tpu.vector_store %arg4[%c0_14, %c0_15, %c0_16], %32 {strides = array<i32>} : memref<1x200x64xbf16, #tpu.memory_space<vmem>>, vector<1x200x64xbf16>,
    return
  }
  func.func @transform_0(%arg0: i32) -> (i32, i32, i32) {
    %c0_i32 = arith.constant 0 : i32
    %c0_i32_0 = arith.constant 0 : i32
    %c0_i32_1 = arith.constant 0 : i32
    return %arg0, %c0_i32, %c0_i32_0 : i32, i32, i32
  }
  func.func @transform_1(%arg0: i32) -> (i32, i32, i32) {
    %c0_i32 = arith.constant 0 : i32
    %c0_i32_0 = arith.constant 0 : i32
    %c0_i32_1 = arith.constant 0 : i32
    return %arg0, %c0_i32, %c0_i32_0 : i32, i32, i32
  }
  func.func @transform_2(%arg0: i32) -> (i32, i32, i32) {
    %c0_i32 = arith.constant 0 : i32
    %c0_i32_0 = arith.constant 0 : i32
    %c0_i32_1 = arith.constant 0 : i32
    return %arg0, %c0_i32, %c0_i32_0 : i32, i32, i32
  }
  func.func @transform_3(%arg0: i32) -> (i32, i32, i32) {
    %c0_i32 = arith.constant 0 : i32
    %c0_i32_0 = arith.constant 0 : i32
    %c0_i32_1 = arith.constant 0 : i32
    return %arg0, %c0_i32, %c0_i32_0 : i32, i32, i32
  }
}

module attributes {stable_mosaic.version = 11 : i64} {
  func.func @_fc_towers_kernel(%arg0: i32, %arg1: i32, %arg2: memref<1x2x1280xbf16, #tpu.memory_space<vmem>>, %arg3: memref<1x1280x512xbf16, #tpu.memory_space<vmem>>, %arg4: memref<1x1x512xf32, #tpu.memory_space<vmem>>, %arg5: memref<512x512xbf16, #tpu.memory_space<vmem>>, %arg6: memref<1x512xf32, #tpu.memory_space<vmem>>, %arg7: memref<512x512xbf16, #tpu.memory_space<vmem>>, %arg8: memref<1x512xf32, #tpu.memory_space<vmem>>, %arg9: memref<1x2x512xf32, #tpu.memory_space<vmem>>, %arg10: memref<2x512xf32, #tpu.memory_space<vmem>>) attributes {dimension_semantics = [#tpu.dimension_semantics<parallel>, #tpu.dimension_semantics<arbitrary>], iteration_bounds = array<i64: 2, 5>, scalar_prefetch = 0 : i64, scratch_operands = 1 : i64, tpu.core_type = #tpu.core_type<tc>, window_params = [{transform_indices = @transform_0, window_bounds = array<i64: 1, 2, 1280>}, {transform_indices = @transform_1, window_bounds = array<i64: 1, 1280, 512>}, {transform_indices = @transform_2, window_bounds = array<i64: 1, 1, 512>}, {pipeline_mode = #tpu.pipeline_mode<synchronous>, transform_indices = @transform_3, window_bounds = array<i64: 512, 512>}, {pipeline_mode = #tpu.pipeline_mode<synchronous>, transform_indices = @transform_4, window_bounds = array<i64: 1, 512>}, {pipeline_mode = #tpu.pipeline_mode<synchronous>, transform_indices = @transform_5, window_bounds = array<i64: 512, 512>}, {pipeline_mode = #tpu.pipeline_mode<synchronous>, transform_indices = @transform_6, window_bounds = array<i64: 1, 512>}, {transform_indices = @transform_7, window_bounds = array<i64: 1, 2, 512>}]} {
    %c0_i32 = arith.constant 0 : i32
    %0 = arith.cmpi eq, %arg1, %c0_i32 : i32
    %1 = arith.extui %0 : i1 to i32
    %c0_i32_0 = arith.constant 0 : i32
    %2 = arith.cmpi ne, %1, %c0_i32_0 : i32
    scf.if %2 {
      %cst_13 = arith.constant 0.000000e+00 : f32
      %20 = vector.broadcast %cst_13 : f32 to vector<2x512xf32>
      %c0_14 = arith.constant 0 : index
      %c0_15 = arith.constant 0 : index
      %21 = vector.load %arg10[%c0_14, %c0_15] : memref<2x512xf32, #tpu.memory_space<vmem>>, vector<2x512xf32>
      tpu.vector_store %arg10[%c0_14, %c0_15], %20 {strides = array<i32>} : memref<2x512xf32, #tpu.memory_space<vmem>>, vector<2x512xf32>,
    } else {
    }
    %c0 = arith.constant 0 : index
    %c0_1 = arith.constant 0 : index
    %3 = vector.load %arg10[%c0, %c0_1] : memref<2x512xf32, #tpu.memory_space<vmem>>, vector<2x512xf32>
    %c0_2 = arith.constant 0 : index
    %c0_3 = arith.constant 0 : index
    %c0_4 = arith.constant 0 : index
    %4 = vector.load %arg2[%c0_2, %c0_3, %c0_4] : memref<1x2x1280xbf16, #tpu.memory_space<vmem>>, vector<1x2x1280xbf16>
    %5 = vector.shape_cast %4 : vector<1x2x1280xbf16> to vector<2x1280xbf16>
    %c0_5 = arith.constant 0 : index
    %c0_6 = arith.constant 0 : index
    %c0_7 = arith.constant 0 : index
    %6 = vector.load %arg3[%c0_5, %c0_6, %c0_7] : memref<1x1280x512xbf16, #tpu.memory_space<vmem>>, vector<1x1280x512xbf16>
    %7 = vector.shape_cast %6 : vector<1x1280x512xbf16> to vector<1280x512xbf16>
    %cst = arith.constant dense<0.000000e+00> : vector<2x512xf32>
    %8 = tpu.matmul %5, %7, %cst {dimension_numbers = #tpu.dot_dimension_numbers<[1], [0], [0], [1], [0, 0, 1, 1], [], []>} : vector<2x1280xbf16>, vector<1280x512xbf16>, vector<2x512xf32> -> vector<2x512xf32>
    %9 = arith.addf %3, %8 : vector<2x512xf32>
    %c0_8 = arith.constant 0 : index
    %c0_9 = arith.constant 0 : index
    %10 = vector.load %arg10[%c0_8, %c0_9] : memref<2x512xf32, #tpu.memory_space<vmem>>, vector<2x512xf32>
    tpu.vector_store %arg10[%c0_8, %c0_9], %9 {strides = array<i32>} : memref<2x512xf32, #tpu.memory_space<vmem>>, vector<2x512xf32>,
    %c4_i32 = arith.constant 4 : i32
    %11 = arith.cmpi eq, %arg1, %c4_i32 : i32
    %c0_i32_10 = arith.constant 0 : i32
    %12 = arith.cmpi eq, %arg0, %c0_i32_10 : i32
    %13 = arith.andi %11, %12 : i1
    %14 = arith.extui %13 : i1 to i32
    %c0_i32_11 = arith.constant 0 : i32
    %15 = arith.cmpi ne, %14, %c0_i32_11 : i32
    scf.if %15 {
      %c0_13 = arith.constant 0 : index
      %c0_14 = arith.constant 0 : index
      %20 = vector.load %arg10[%c0_13, %c0_14] : memref<2x512xf32, #tpu.memory_space<vmem>>, vector<2x512xf32>
      %c0_15 = arith.constant 0 : index
      %c0_16 = arith.constant 0 : index
      %c0_17 = arith.constant 0 : index
      %21 = vector.load %arg4[%c0_15, %c0_16, %c0_17] : memref<1x1x512xf32, #tpu.memory_space<vmem>>, vector<1x1x512xf32>
      %22 = vector.shape_cast %21 : vector<1x1x512xf32> to vector<1x512xf32>
      %23 = vector.broadcast %22 : vector<1x512xf32> to vector<2x512xf32>
      %24 = arith.addf %20, %23 : vector<2x512xf32>
      %cst_18 = arith.constant 0.000000e+00 : f32
      %25 = vector.broadcast %cst_18 : f32 to vector<2x512xf32>
      %26 = arith.maximumf %24, %25 : vector<2x512xf32>
      %27 = arith.truncf %26 : vector<2x512xf32> to vector<2x512xbf16>
      %c0_19 = arith.constant 0 : index
      %c0_20 = arith.constant 0 : index
      %28 = vector.load %arg5[%c0_19, %c0_20] : memref<512x512xbf16, #tpu.memory_space<vmem>>, vector<512x512xbf16>
      %cst_21 = arith.constant dense<0.000000e+00> : vector<2x512xf32>
      %29 = tpu.matmul %27, %28, %cst_21 {dimension_numbers = #tpu.dot_dimension_numbers<[1], [0], [0], [1], [0, 0, 1, 1], [], []>} : vector<2x512xbf16>, vector<512x512xbf16>, vector<2x512xf32> -> vector<2x512xf32>
      %c0_22 = arith.constant 0 : index
      %c0_23 = arith.constant 0 : index
      %30 = vector.load %arg6[%c0_22, %c0_23] : memref<1x512xf32, #tpu.memory_space<vmem>>, vector<1x512xf32>
      %31 = vector.broadcast %30 : vector<1x512xf32> to vector<2x512xf32>
      %32 = arith.addf %29, %31 : vector<2x512xf32>
      %cst_24 = arith.constant 0.000000e+00 : f32
      %33 = vector.broadcast %cst_24 : f32 to vector<2x512xf32>
      %34 = arith.maximumf %32, %33 : vector<2x512xf32>
      %35 = arith.truncf %34 : vector<2x512xf32> to vector<2x512xbf16>
      %c0_25 = arith.constant 0 : index
      %c0_26 = arith.constant 0 : index
      %36 = vector.load %arg7[%c0_25, %c0_26] : memref<512x512xbf16, #tpu.memory_space<vmem>>, vector<512x512xbf16>
      %cst_27 = arith.constant dense<0.000000e+00> : vector<2x512xf32>
      %37 = tpu.matmul %35, %36, %cst_27 {dimension_numbers = #tpu.dot_dimension_numbers<[1], [0], [0], [1], [0, 0, 1, 1], [], []>} : vector<2x512xbf16>, vector<512x512xbf16>, vector<2x512xf32> -> vector<2x512xf32>
      %c0_28 = arith.constant 0 : index
      %c0_29 = arith.constant 0 : index
      %38 = vector.load %arg8[%c0_28, %c0_29] : memref<1x512xf32, #tpu.memory_space<vmem>>, vector<1x512xf32>
      %39 = vector.broadcast %38 : vector<1x512xf32> to vector<2x512xf32>
      %40 = arith.addf %37, %39 : vector<2x512xf32>
      %c0_30 = arith.constant 0 : index
      %c0_31 = arith.constant 0 : index
      %c0_32 = arith.constant 0 : index
      %41 = vector.load %arg9[%c0_30, %c0_31, %c0_32] : memref<1x2x512xf32, #tpu.memory_space<vmem>>, vector<1x2x512xf32>
      %42 = vector.shape_cast %41 : vector<1x2x512xf32> to vector<2x512xf32>
      %43 = vector.shape_cast %40 : vector<2x512xf32> to vector<1x2x512xf32>
      tpu.vector_store %arg9[%c0_30, %c0_31, %c0_32], %43 {strides = array<i32>} : memref<1x2x512xf32, #tpu.memory_space<vmem>>, vector<1x2x512xf32>,
    } else {
    }
    %c1_i32 = arith.constant 1 : i32
    %16 = arith.cmpi eq, %arg0, %c1_i32 : i32
    %17 = arith.andi %11, %16 : i1
    %18 = arith.extui %17 : i1 to i32
    %c0_i32_12 = arith.constant 0 : i32
    %19 = arith.cmpi ne, %18, %c0_i32_12 : i32
    scf.if %19 {
      %c0_13 = arith.constant 0 : index
      %c0_14 = arith.constant 0 : index
      %20 = vector.load %arg10[%c0_13, %c0_14] : memref<2x512xf32, #tpu.memory_space<vmem>>, vector<2x512xf32>
      %c0_15 = arith.constant 0 : index
      %c0_16 = arith.constant 0 : index
      %c0_17 = arith.constant 0 : index
      %21 = vector.load %arg4[%c0_15, %c0_16, %c0_17] : memref<1x1x512xf32, #tpu.memory_space<vmem>>, vector<1x1x512xf32>
      %22 = vector.shape_cast %21 : vector<1x1x512xf32> to vector<1x512xf32>
      %23 = vector.broadcast %22 : vector<1x512xf32> to vector<2x512xf32>
      %24 = arith.addf %20, %23 : vector<2x512xf32>
      %c0_18 = arith.constant 0 : index
      %c0_19 = arith.constant 0 : index
      %c0_20 = arith.constant 0 : index
      %25 = vector.load %arg9[%c0_18, %c0_19, %c0_20] : memref<1x2x512xf32, #tpu.memory_space<vmem>>, vector<1x2x512xf32>
      %26 = vector.shape_cast %25 : vector<1x2x512xf32> to vector<2x512xf32>
      %27 = vector.shape_cast %24 : vector<2x512xf32> to vector<1x2x512xf32>
      tpu.vector_store %arg9[%c0_18, %c0_19, %c0_20], %27 {strides = array<i32>} : memref<1x2x512xf32, #tpu.memory_space<vmem>>, vector<1x2x512xf32>,
    } else {
    }
    return
  }
  func.func @transform_0(%arg0: i32, %arg1: i32) -> (i32, i32, i32) {
    %c0_i32 = arith.constant 0 : i32
    %c0_i32_0 = arith.constant 0 : i32
    return %arg0, %c0_i32, %arg1 : i32, i32, i32
  }
  func.func @transform_1(%arg0: i32, %arg1: i32) -> (i32, i32, i32) {
    %c0_i32 = arith.constant 0 : i32
    %c0_i32_0 = arith.constant 0 : i32
    return %arg0, %arg1, %c0_i32 : i32, i32, i32
  }
  func.func @transform_2(%arg0: i32, %arg1: i32) -> (i32, i32, i32) {
    %c0_i32 = arith.constant 0 : i32
    %c0_i32_0 = arith.constant 0 : i32
    %c0_i32_1 = arith.constant 0 : i32
    return %arg0, %c0_i32, %c0_i32_0 : i32, i32, i32
  }
  func.func @transform_3(%arg0: i32, %arg1: i32) -> (i32, i32) {
    %c0_i32 = arith.constant 0 : i32
    %c0_i32_0 = arith.constant 0 : i32
    %c0_i32_1 = arith.constant 0 : i32
    return %c0_i32, %c0_i32_0 : i32, i32
  }
  func.func @transform_4(%arg0: i32, %arg1: i32) -> (i32, i32) {
    %c0_i32 = arith.constant 0 : i32
    %c0_i32_0 = arith.constant 0 : i32
    %c0_i32_1 = arith.constant 0 : i32
    return %c0_i32, %c0_i32_0 : i32, i32
  }
  func.func @transform_5(%arg0: i32, %arg1: i32) -> (i32, i32) {
    %c0_i32 = arith.constant 0 : i32
    %c0_i32_0 = arith.constant 0 : i32
    %c0_i32_1 = arith.constant 0 : i32
    return %c0_i32, %c0_i32_0 : i32, i32
  }
  func.func @transform_6(%arg0: i32, %arg1: i32) -> (i32, i32) {
    %c0_i32 = arith.constant 0 : i32
    %c0_i32_0 = arith.constant 0 : i32
    %c0_i32_1 = arith.constant 0 : i32
    return %c0_i32, %c0_i32_0 : i32, i32
  }
  func.func @transform_7(%arg0: i32, %arg1: i32) -> (i32, i32, i32) {
    %c0_i32 = arith.constant 0 : i32
    %c0_i32_0 = arith.constant 0 : i32
    %c0_i32_1 = arith.constant 0 : i32
    return %arg0, %c0_i32, %c0_i32_0 : i32, i32, i32
  }
}

</mosaic_0001>

<bundles_post_ra>
// kernel: rnd_forward.4
= control target key start
LH: loop header
LB: loop body
LE: loop exit
PB: predicated region body
PF: predicated region fallthrough
CT: control target
= control target key end

     0   :  { %v3025_v0 = vmov 0   ;;  %vm1183_vm0 = vcmask 523264   ;;  %vm2401_vm1 = vcmask 519168   ;;  %s6049_s1 = inlined_call_operand.vmem [shape: bf16[1,256,64], index: 1, kind: input, shape index: {}]   ;;  %s6050_s0 = inlined_call_operand.vmem [shape: bf16[1,800,256], index: 0, kind: input, shape index: {}]   ;;  %s6051_s2 = inlined_call_operand.vmem [shape: f32[1,1,64], index: 2, kind: input, shape index: {}]   ;;  %s6052_s3 = inlined_call_operand.vmem [shape: bf16[1,800,64], index: 3, kind: output, shape index: {}]  }
   0x1   :  { %750 = vmatprep.subr.bf16.mxu0 %v3025_v0  ;;  %v2856_v1 = vld [vmem:[%s6049_s1] sm:$0xff]   ;;  %2823 = vmatprep.subr.bf16.mxu1 %v3025_v0  ;;  %v2857_v2 = vld [vmem:[%s6049_s1 + $0x8] sm:$0xff]   ;;  %v2858_v3 = vld [vmem:[%s6049_s1 + $0x10] sm:$0xff]  }
   0x2   :  { %751 = vmatpush1.bf16.msra.mxu0 %v2856_v1  ;;  %2839 = vmatpush1.bf16.msra.mxu1 %v2856_v1  ;;  %v2859_v4 = vld [vmem:[%s6049_s1 + $0x18] sm:$0xff]   ;;  %v2860_v5 = vld [vmem:[%s6049_s1 + $0x20] sm:$0xff]   ;;  %v2861_v7 = vld [vmem:[%s6049_s1 + $0x28] sm:$0xff]  }
   0x3   :  { %752 = vmatprep.subr.bf16.mxu0 %v3025_v0  ;;  %2824 = vmatprep.subr.bf16.mxu1 %v3025_v0  ;;  %v2874_v6 = vld [vmem:[%s6050_s0 + $0x4] ss:$8 sps:$4 sm:$0xff]   ;;  %v2862_v8 = vld [vmem:[%s6049_s1 + $0x30] sm:$0xff]   ;;  %v2863_v9 = vld [vmem:[%s6049_s1 + $0x38] sm:$0xff]  }
   0x4   :  { %782 = vmatprep.mubr.bf16.mxu0 %v2874_v6  ;;  %v2864_v10 = vld [vmem:[%s6049_s1 + $0x40] sm:$0xff]   ;;  %v2865_v11 = vld [vmem:[%s6049_s1 + $0x48] sm:$0xff]   ;;  %v2913_v12 = vld [vmem:[%s6050_s0 + $0x194] ss:$8 sps:$4 sm:$0xff]  }
   0x5   :  { %v2866_v13 = vld [vmem:[%s6049_s1 + $0x50] sm:$0xff]   ;;  %982 = vmatprep.mubr.bf16.mxu1 %v2913_v12  ;;  %v2867_v14 = vld [vmem:[%s6049_s1 + $0x58] sm:$0xff]   ;;  %v2868_v15 = vld [vmem:[%s6049_s1 + $0x60] sm:$0xff]  }
   0x6   :  { %753 = vmatpush1.bf16.msra.mxu0 %v2857_v2  ;;  %2840 = vmatpush1.bf16.msra.mxu1 %v2857_v2  ;;  %v2869_v16 = vld [vmem:[%s6049_s1 + $0x68] sm:$0xff]   ;;  %v2870_v17 = vld [vmem:[%s6049_s1 + $0x70] sm:$0xff]   ;;  %v2871_v18 = vld [vmem:[%s6049_s1 + $0x78] sm:$0xff]  }
   0x7   :  { %754 = vmatprep.subr.bf16.mxu0 %v3025_v0  ;;  %2825 = vmatprep.subr.bf16.mxu1 %v3025_v0  ;;  %v2872_v19 = vld [vmem:[%s6050_s0] ss:$8 sps:$4 sm:$0xff]   ;;  %v2911_v20 = vld [vmem:[%s6050_s0 + $0x190] ss:$8 sps:$4 sm:$0xff]   ;;  %v2875_v21 = vld [vmem:[%s6050_s0 + $0x14] ss:$8 sps:$4 sm:$0xff]  }
   0x8   :  { %v2917_v22 = vld [vmem:[%s6050_s0 + $0x1a4] ss:$8 sps:$4 sm:$0xff]   ;;  %v2877_v23 = vld [vmem:[%s6050_s0 + $0x10] ss:$8 sps:$4 sm:$0xff]   ;;  %v2919_v24 = vld [vmem:[%s6050_s0 + $0x1a0] ss:$8 sps:$4 sm:$0xff]  }
   0x9   :  { %v2878_v25 = vld [vmem:[%s6050_s0 + $0x24] ss:$8 sps:$4 sm:$0xff]   ;;  %v2923_v26 = vld [vmem:[%s6050_s0 + $0x1b4] ss:$8 sps:$4 sm:$0xff]   ;;  %v2880_v27 = vld [vmem:[%s6050_s0 + $0x20] ss:$8 sps:$4 sm:$0xff]  }
   0xa   :  { %755 = vmatpush1.bf16.msra.mxu0 %v2858_v3  ;;  %2841 = vmatpush1.bf16.msra.mxu1 %v2858_v3  ;;  %v2925_v28 = vld [vmem:[%s6050_s0 + $0x1b0] ss:$8 sps:$4 sm:$0xff]   ;;  %v2881_v29 = vld [vmem:[%s6050_s0 + $0x34] ss:$8 sps:$4 sm:$0xff]   ;;  %v2929_v30 = vld [vmem:[%s6050_s0 + $0x1c4] ss:$8 sps:$4 sm:$0xff]  }
   0xb   :  { %756 = vmatprep.subr.bf16.mxu0 %v3025_v0  ;;  %2826 = vmatprep.subr.bf16.mxu1 %v3025_v0  ;;  %v2883_v31 = vld [vmem:[%s6050_s0 + $0x30] ss:$8 sps:$4 sm:$0xff]   ;;  %v2931_v32 = vld [vmem:[%s6050_s0 + $0x1c0] ss:$8 sps:$4 sm:$0xff]   ;;  %v2884_v33 = vld [vmem:[%s6050_s0 + $0x44] ss:$8 sps:$4 sm:$0xff]  }
   0xc   :  { %v2935_v34 = vld [vmem:[%s6050_s0 + $0x1d4] ss:$8 sps:$4 sm:$0xff]   ;;  %v2886_v35 = vld [vmem:[%s6050_s0 + $0x40] ss:$8 sps:$4 sm:$0xff]   ;;  %v2937_v36 = vld [vmem:[%s6050_s0 + $0x1d0] ss:$8 sps:$4 sm:$0xff]  }
   0xd   :  { %v2887_v37 = vld [vmem:[%s6050_s0 + $0x54] ss:$8 sps:$4 sm:$0xff]   ;;  %v2941_v38 = vld [vmem:[%s6050_s0 + $0x1e4] ss:$8 sps:$4 sm:$0xff]   ;;  %v2889_v39 = vld [vmem:[%s6050_s0 + $0x50] ss:$8 sps:$4 sm:$0xff]  }
   0xe   :  { %757 = vmatpush1.bf16.msra.mxu0 %v2859_v4  ;;  %2842 = vmatpush1.bf16.msra.mxu1 %v2859_v4  ;;  %v2943_v40 = vld [vmem:[%s6050_s0 + $0x1e0] ss:$8 sps:$4 sm:$0xff]   ;;  %v2890_v41 = vld [vmem:[%s6050_s0 + $0x64] ss:$8 sps:$4 sm:$0xff]   ;;  %v2947_v42 = vld [vmem:[%s6050_s0 + $0x1f4] ss:$8 sps:$4 sm:$0xff]  }
   0xf   :  { %758 = vmatprep.subr.bf16.mxu0 %v3025_v0  ;;  %2827 = vmatprep.subr.bf16.mxu1 %v3025_v0  ;;  %v2892_v43 = vld [vmem:[%s6050_s0 + $0x60] ss:$8 sps:$4 sm:$0xff]   ;;  %v2949_v44 = vld [vmem:[%s6050_s0 + $0x1f0] ss:$8 sps:$4 sm:$0xff]   ;;  %v2893_v45 = vld [vmem:[%s6050_s0 + $0x74] ss:$8 sps:$4 sm:$0xff]  }
  0x10   :  { %v2953_v46 = vld [vmem:[%s6050_s0 + $0x204] ss:$8 sps:$4 sm:$0xff]   ;;  %v2895_v47 = vld [vmem:[%s6050_s0 + $0x70] ss:$8 sps:$4 sm:$0xff]   ;;  %v2955_v48 = vld [vmem:[%s6050_s0 + $0x200] ss:$8 sps:$4 sm:$0xff]  }
  0x11   :  { %v2896_v49 = vld [vmem:[%s6050_s0 + $0x84] ss:$8 sps:$4 sm:$0xff]   ;;  %v2959_v50 = vld [vmem:[%s6050_s0 + $0x214] ss:$8 sps:$4 sm:$0xff]   ;;  %v2898_v51 = vld [vmem:[%s6050_s0 + $0x80] ss:$8 sps:$4 sm:$0xff]  }
  0x12   :  { %759 = vmatpush1.bf16.msra.mxu0 %v2860_v5  ;;  %2843 = vmatpush1.bf16.msra.mxu1 %v2860_v5  ;;  %v2961_v52 = vld [vmem:[%s6050_s0 + $0x210] ss:$8 sps:$4 sm:$0xff]   ;;  %v2899_v53 = vld [vmem:[%s6050_s0 + $0x94] ss:$8 sps:$4 sm:$0xff]   ;;  %v2965_v54 = vld [vmem:[%s6050_s0 + $0x224] ss:$8 sps:$4 sm:$0xff]  }
  0x13   :  { %760 = vmatprep.subr.bf16.mxu0 %v3025_v0  ;;  %2828 = vmatprep.subr.bf16.mxu1 %v3025_v0  ;;  %v2901_v55 = vld [vmem:[%s6050_s0 + $0x90] ss:$8 sps:$4 sm:$0xff]   ;;  %v2967_v56 = vld [vmem:[%s6050_s0 + $0x220] ss:$8 sps:$4 sm:$0xff]   ;;  %v2902_v57 = vld [vmem:[%s6050_s0 + $0xa4] ss:$8 sps:$4 sm:$0xff]  }
  0x14   :  { %v2971_v58 = vld [vmem:[%s6050_s0 + $0x234] ss:$8 sps:$4 sm:$0xff]   ;;  %v2904_v59 = vld [vmem:[%s6050_s0 + $0xa0] ss:$8 sps:$4 sm:$0xff]   ;;  %v2973_v60 = vld [vmem:[%s6050_s0 + $0x230] ss:$8 sps:$4 sm:$0xff]  }
  0x15   :  { %v2905_v61 = vld [vmem:[%s6050_s0 + $0xb4] ss:$8 sps:$4 sm:$0xff]   ;;  %v2977_v62 = vld [vmem:[%s6050_s0 + $0x244] ss:$8 sps:$4 sm:$0xff]   ;;  %v2907_v63 = vld [vmem:[%s6050_s0 + $0xb0] ss:$8 sps:$4 sm:$0xff]  }
  0x16   :  { %761 = vmatpush1.bf16.msra.mxu0 %v2861_v7  ;;  %2844 = vmatpush1.bf16.msra.mxu1 %v2861_v7  ;;  %v2908_v1 = vld [vmem:[%s6050_s0 + $0xc4] ss:$8 sps:$4 sm:$0xff]   ;;  %v2983_v2 = vld [vmem:[%s6050_s0 + $0x254] ss:$8 sps:$4 sm:$0xff]   ;;  %v2910_v3 = vld [vmem:[%s6050_s0 + $0xc0] ss:$8 sps:$4 sm:$0xff]  }
  0x17   :  { %762 = vmatprep.subr.bf16.mxu0 %v3025_v0  ;;  %2829 = vmatprep.subr.bf16.mxu1 %v3025_v0  ;;  %v2985_v4 = vld [vmem:[%s6050_s0 + $0x250] ss:$8 sps:$4 sm:$0xff]   ;;  %v2914_v5 = vld [vmem:[%s6050_s0 + $0xd4] ss:$8 sps:$4 sm:$0xff]   ;;  %v2986_v6 = vld [vmem:[%s6050_s0 + $0x264] ss:$8 sps:$4 sm:$0xff]  }
  0x18   :  { %v2916_v7 = vld [vmem:[%s6050_s0 + $0xd0] ss:$8 sps:$4 sm:$0xff]  }
  0x19   :  { %v2991_v12 = vld [vmem:[%s6050_s0 + $0x270] ss:$8 sps:$4 sm:$0xff]  }
  0x1a   :  { %763 = vmatpush1.bf16.msra.mxu0 %v2862_v8  ;;  %2845 = vmatpush1.bf16.msra.mxu1 %v2862_v8  ;;  %v2988_v8 = vld [vmem:[%s6050_s0 + $0x260] ss:$8 sps:$4 sm:$0xff]  }
  0x1b   :  { %764 = vmatprep.subr.bf16.mxu0 %v3025_v0  ;;  %2830 = vmatprep.subr.bf16.mxu1 %v3025_v0 }
  0x1e   :  { %765 = vmatpush1.bf16.msra.mxu0 %v2863_v9  ;;  %2846 = vmatpush1.bf16.msra.mxu1 %v2863_v9  ;;  %v2920_v9 = vld [vmem:[%s6050_s0 + $0xe4] ss:$8 sps:$4 sm:$0xff]  }
  0x1f   :  { %766 = vmatprep.subr.bf16.mxu0 %v3025_v0  ;;  %2831 = vmatprep.subr.bf16.mxu1 %v3025_v0 }
  0x22   :  { %767 = vmatpush1.bf16.msra.mxu0 %v2864_v10  ;;  %2847 = vmatpush1.bf16.msra.mxu1 %v2864_v10  ;;  %v2989_v10 = vld [vmem:[%s6050_s0 + $0x274] ss:$8 sps:$4 sm:$0xff]  }
  0x23   :  { %768 = vmatprep.subr.bf16.mxu0 %v3025_v0  ;;  %2832 = vmatprep.subr.bf16.mxu1 %v3025_v0 }
  0x26   :  { %769 = vmatpush1.bf16.msra.mxu0 %v2865_v11  ;;  %2848 = vmatpush1.bf16.msra.mxu1 %v2865_v11  ;;  %v2922_v11 = vld [vmem:[%s6050_s0 + $0xe0] ss:$8 sps:$4 sm:$0xff]  }
  0x27   :  { %770 = vmatprep.subr.bf16.mxu0 %v3025_v0  ;;  %2833 = vmatprep.subr.bf16.mxu1 %v3025_v0 }
  0x2a   :  { %771 = vmatpush1.bf16.msra.mxu0 %v2866_v13  ;;  %2849 = vmatpush1.bf16.msra.mxu1 %v2866_v13  ;;  %v2926_v13 = vld [vmem:[%s6050_s0 + $0xf4] ss:$8 sps:$4 sm:$0xff]  }
  0x2b   :  { %772 = vmatprep.subr.bf16.mxu0 %v3025_v0  ;;  %2834 = vmatprep.subr.bf16.mxu1 %v3025_v0 }
  0x2e   :  { %773 = vmatpush1.bf16.msra.mxu0 %v2867_v14  ;;  %2850 = vmatpush1.bf16.msra.mxu1 %v2867_v14  ;;  %v2992_v14 = vld [vmem:[%s6050_s0 + $0x284] ss:$8 sps:$4 sm:$0xff]  }
  0x2f   :  { %774 = vmatprep.subr.bf16.mxu0 %v3025_v0  ;;  %2835 = vmatprep.subr.bf16.mxu1 %v3025_v0 }
  0x32   :  { %775 = vmatpush1.bf16.msra.mxu0 %v2868_v15  ;;  %2851 = vmatpush1.bf16.msra.mxu1 %v2868_v15  ;;  %v2928_v15 = vld [vmem:[%s6050_s0 + $0xf0] ss:$8 sps:$4 sm:$0xff]  }
  0x33   :  { %776 = vmatprep.subr.bf16.mxu0 %v3025_v0  ;;  %2836 = vmatprep.subr.bf16.mxu1 %v3025_v0 }
  0x36   :  { %777 = vmatpush1.bf16.msra.mxu0 %v2869_v16  ;;  %2852 = vmatpush1.bf16.msra.mxu1 %v2869_v16  ;;  %v2994_v16 = vld [vmem:[%s6050_s0 + $0x280] ss:$8 sps:$4 sm:$0xff]  }
  0x37   :  { %778 = vmatprep.subr.bf16.mxu0 %v3025_v0  ;;  %2837 = vmatprep.subr.bf16.mxu1 %v3025_v0 }
  0x3a   :  { %779 = vmatpush1.bf16.msra.mxu0 %v2870_v17  ;;  %2853 = vmatpush1.bf16.msra.mxu1 %v2870_v17  ;;  %v2932_v17 = vld [vmem:[%s6050_s0 + $0x104] ss:$8 sps:$4 sm:$0xff]  }
  0x3b   :  { %780 = vmatprep.subr.bf16.mxu0 %v3025_v0  ;;  %2838 = vmatprep.subr.bf16.mxu1 %v3025_v0  ;;  %v2979_v0 = vld [vmem:[%s6050_s0 + $0x240] ss:$8 sps:$4 sm:$0xff]  }
  0x3e   :  { %781 = vmatpush1.bf16.msra.mxu0 %v2871_v18  ;;  %2854 = vmatpush1.bf16.msra.mxu1 %v2871_v18  ;;  %v2995_v18 = vld [vmem:[%s6050_s0 + $0x294] ss:$8 sps:$4 sm:$0xff]  }
  0x41   :  { %783 = vmatmul.mubr.bf16.vlgmr.msra.gmra.mrb[0].mxu0 %v2872_v19  ;;  %983 = vmatmul.mubr.bf16.vlgmr.msra.gmra.mrb[0].mxu1 %v2911_v20  ;;  %v2934_v19 = vld [vmem:[%s6050_s0 + $0x100] ss:$8 sps:$4 sm:$0xff]   ;;  %v2997_v20 = vld [vmem:[%s6050_s0 + $0x290] ss:$8 sps:$4 sm:$0xff]  }
  0x42   :  { %790 = vmatprep.mubr.bf16.mxu0 %v2875_v21  ;;  %990 = vmatprep.mubr.bf16.mxu1 %v2917_v22  ;;  %v2938_v21 = vld [vmem:[%s6050_s0 + $0x114] ss:$8 sps:$4 sm:$0xff]   ;;  %v2998_v22 = vld [vmem:[%s6050_s0 + $0x2a4] ss:$8 sps:$4 sm:$0xff]  }
  0x49   :  { %791 = vmatmul.mubr.bf16.gmra.mrb[4].mxu0 %v2877_v23  ;;  %991 = vmatmul.mubr.bf16.gmra.mrb[4].mxu1 %v2919_v24  ;;  %v2940_v23 = vld [vmem:[%s6050_s0 + $0x110] ss:$8 sps:$4 sm:$0xff]   ;;  %v3000_v24 = vld [vmem:[%s6050_s0 + $0x2a0] ss:$8 sps:$4 sm:$0xff]  }
  0x4a   :  { %798 = vmatprep.mubr.bf16.mxu0 %v2878_v25  ;;  %998 = vmatprep.mubr.bf16.mxu1 %v2923_v26  ;;  %v2944_v25 = vld [vmem:[%s6050_s0 + $0x124] ss:$8 sps:$4 sm:$0xff]   ;;  %v3001_v26 = vld [vmem:[%s6050_s0 + $0x2b4] ss:$8 sps:$4 sm:$0xff]  }
  0x51   :  { %799 = vmatmul.mubr.bf16.gmra.mrb[8].mxu0 %v2880_v27  ;;  %999 = vmatmul.mubr.bf16.gmra.mrb[8].mxu1 %v2925_v28  ;;  %v2946_v27 = vld [vmem:[%s6050_s0 + $0x120] ss:$8 sps:$4 sm:$0xff]   ;;  %v3003_v28 = vld [vmem:[%s6050_s0 + $0x2b0] ss:$8 sps:$4 sm:$0xff]  }
  0x52   :  { %806 = vmatprep.mubr.bf16.mxu0 %v2881_v29  ;;  %1006 = vmatprep.mubr.bf16.mxu1 %v2929_v30  ;;  %v2950_v29 = vld [vmem:[%s6050_s0 + $0x134] ss:$8 sps:$4 sm:$0xff]   ;;  %v3004_v30 = vld [vmem:[%s6050_s0 + $0x2c4] ss:$8 sps:$4 sm:$0xff]  }
  0x59   :  { %807 = vmatmul.mubr.bf16.gmra.mrb[12].mxu0 %v2883_v31  ;;  %1007 = vmatmul.mubr.bf16.gmra.mrb[12].mxu1 %v2931_v32  ;;  %v2952_v31 = vld [vmem:[%s6050_s0 + $0x130] ss:$8 sps:$4 sm:$0xff]   ;;  %v3006_v32 = vld [vmem:[%s6050_s0 + $0x2c0] ss:$8 sps:$4 sm:$0xff]  }
  0x5a   :  { %814 = vmatprep.mubr.bf16.mxu0 %v2884_v33  ;;  %1014 = vmatprep.mubr.bf16.mxu1 %v2935_v34  ;;  %v2956_v33 = vld [vmem:[%s6050_s0 + $0x144] ss:$8 sps:$4 sm:$0xff]   ;;  %v3007_v34 = vld [vmem:[%s6050_s0 + $0x2d4] ss:$8 sps:$4 sm:$0xff]  }
  0x61   :  { %815 = vmatmul.mubr.bf16.gmra.mrb[16].mxu0 %v2886_v35  ;;  %1015 = vmatmul.mubr.bf16.gmra.mrb[16].mxu1 %v2937_v36  ;;  %v2958_v35 = vld [vmem:[%s6050_s0 + $0x140] ss:$8 sps:$4 sm:$0xff]   ;;  %v3009_v36 = vld [vmem:[%s6050_s0 + $0x2d0] ss:$8 sps:$4 sm:$0xff]  }
  0x62   :  { %822 = vmatprep.mubr.bf16.mxu0 %v2887_v37  ;;  %1022 = vmatprep.mubr.bf16.mxu1 %v2941_v38  ;;  %v2962_v37 = vld [vmem:[%s6050_s0 + $0x154] ss:$8 sps:$4 sm:$0xff]   ;;  %v3010_v38 = vld [vmem:[%s6050_s0 + $0x2e4] ss:$8 sps:$4 sm:$0xff]  }
  0x69   :  { %823 = vmatmul.mubr.bf16.gmra.mrb[20].mxu0 %v2889_v39  ;;  %1023 = vmatmul.mubr.bf16.gmra.mrb[20].mxu1 %v2943_v40  ;;  %v2964_v39 = vld [vmem:[%s6050_s0 + $0x150] ss:$8 sps:$4 sm:$0xff]   ;;  %v3012_v40 = vld [vmem:[%s6050_s0 + $0x2e0] ss:$8 sps:$4 sm:$0xff]  }
  0x6a   :  { %830 = vmatprep.mubr.bf16.mxu0 %v2890_v41  ;;  %1030 = vmatprep.mubr.bf16.mxu1 %v2947_v42  ;;  %v2968_v41 = vld [vmem:[%s6050_s0 + $0x164] ss:$8 sps:$4 sm:$0xff]   ;;  %v3013_v42 = vld [vmem:[%s6050_s0 + $0x2f4] ss:$8 sps:$4 sm:$0xff]  }
  0x71   :  { %831 = vmatmul.mubr.bf16.gmra.mrb[24].mxu0 %v2892_v43  ;;  %1031 = vmatmul.mubr.bf16.gmra.mrb[24].mxu1 %v2949_v44  ;;  %v2970_v43 = vld [vmem:[%s6050_s0 + $0x160] ss:$8 sps:$4 sm:$0xff]   ;;  %v3015_v44 = vld [vmem:[%s6050_s0 + $0x2f0] ss:$8 sps:$4 sm:$0xff]  }
  0x72   :  { %838 = vmatprep.mubr.bf16.mxu0 %v2893_v45  ;;  %1038 = vmatprep.mubr.bf16.mxu1 %v2953_v46  ;;  %v2974_v45 = vld [vmem:[%s6050_s0 + $0x174] ss:$8 sps:$4 sm:$0xff]   ;;  %v3016_v46 = vld [vmem:[%s6050_s0 + $0x304] ss:$8 sps:$4 sm:$0xff]  }
  0x79   :  { %839 = vmatmul.mubr.bf16.gmra.mrb[28].mxu0 %v2895_v47  ;;  %1039 = vmatmul.mubr.bf16.gmra.mrb[28].mxu1 %v2955_v48  ;;  %v2976_v47 = vld [vmem:[%s6050_s0 + $0x170] ss:$8 sps:$4 sm:$0xff]   ;;  %v3018_v48 = vld [vmem:[%s6050_s0 + $0x300] ss:$8 sps:$4 sm:$0xff]  }
  0x7a   :  { %846 = vmatprep.mubr.bf16.mxu0 %v2896_v49  ;;  %1046 = vmatprep.mubr.bf16.mxu1 %v2959_v50  ;;  %v2980_v49 = vld [vmem:[%s6050_s0 + $0x184] ss:$8 sps:$4 sm:$0xff]   ;;  %v3019_v50 = vld [vmem:[%s6050_s0 + $0x314] ss:$8 sps:$4 sm:$0xff]  }
  0x81   :  { %847 = vmatmul.mubr.bf16.gmra.mrb[32].mxu0 %v2898_v51  ;;  %1047 = vmatmul.mubr.bf16.gmra.mrb[32].mxu1 %v2961_v52  ;;  %v2982_v51 = vld [vmem:[%s6050_s0 + $0x180] ss:$8 sps:$4 sm:$0xff]   ;;  %v3021_v52 = vld [vmem:[%s6050_s0 + $0x310] ss:$8 sps:$4 sm:$0xff]  }
  0x82   :  { %854 = vmatprep.mubr.bf16.mxu0 %v2899_v53  ;;  %1054 = vmatprep.mubr.bf16.mxu1 %v2965_v54 }
  0x89   :  { %855 = vmatmul.mubr.bf16.gmra.mrb[36].mxu0 %v2901_v55  ;;  %1055 = vmatmul.mubr.bf16.gmra.mrb[36].mxu1 %v2967_v56 }
  0x8a   :  { %862 = vmatprep.mubr.bf16.mxu0 %v2902_v57  ;;  %1062 = vmatprep.mubr.bf16.mxu1 %v2971_v58 }
  0x91   :  { %863 = vmatmul.mubr.bf16.gmra.mrb[40].mxu0 %v2904_v59  ;;  %1063 = vmatmul.mubr.bf16.gmra.mrb[40].mxu1 %v2973_v60 }
  0x92   :  { %870 = vmatprep.mubr.bf16.mxu0 %v2905_v61  ;;  %1070 = vmatprep.mubr.bf16.mxu1 %v2977_v62 }
  0x99   :  { %871 = vmatmul.mubr.bf16.gmra.mrb[44].mxu0 %v2907_v63  ;;  %1071 = vmatmul.mubr.bf16.gmra.mrb[44].mxu1 %v2979_v0 }
  0x9a   :  { %878 = vmatprep.mubr.bf16.mxu0 %v2908_v1  ;;  %1078 = vmatprep.mubr.bf16.mxu1 %v2983_v2 }
  0xa1   :  { %879 = vmatmul.mubr.bf16.gmra.mrb[48].mxu0 %v2910_v3  ;;  %1079 = vmatmul.mubr.bf16.gmra.mrb[48].mxu1 %v2985_v4 }
  0xa2   :  { %886 = vmatprep.mubr.bf16.mxu0 %v2914_v5  ;;  %1086 = vmatprep.mubr.bf16.mxu1 %v2986_v6 }
  0xa9   :  { %887 = vmatmul.mubr.bf16.gmra.mrb[52].mxu0 %v2916_v7  ;;  %1087 = vmatmul.mubr.bf16.gmra.mrb[52].mxu1 %v2988_v8 }
  0xaa   :  { %894 = vmatprep.mubr.bf16.mxu0 %v2920_v9  ;;  %1094 = vmatprep.mubr.bf16.mxu1 %v2989_v10 }
  0xb1   :  { %895 = vmatmul.mubr.bf16.gmra.mrb[56].mxu0 %v2922_v11  ;;  %1095 = vmatmul.mubr.bf16.gmra.mrb[56].mxu1 %v2991_v12 }
  0xb2   :  { %902 = vmatprep.mubr.bf16.mxu0 %v2926_v13  ;;  %1102 = vmatprep.mubr.bf16.mxu1 %v2992_v14 }
  0xb9   :  { %903 = vmatmul.mubr.bf16.gmra.mrb[60].mxu0 %v2928_v15  ;;  %1103 = vmatmul.mubr.bf16.gmra.mrb[60].mxu1 %v2994_v16 }
  0xba   :  { %910 = vmatprep.mubr.bf16.mxu0 %v2932_v17  ;;  %1110 = vmatprep.mubr.bf16.mxu1 %v2995_v18 }
  0xc1   :  { %911 = vmatmul.mubr.bf16.gmra.mrb[64].mxu0 %v2934_v19  ;;  %1111 = vmatmul.mubr.bf16.gmra.mrb[64].mxu1 %v2997_v20 }
  0xc2   :  { %918 = vmatprep.mubr.bf16.mxu0 %v2938_v21  ;;  %1118 = vmatprep.mubr.bf16.mxu1 %v2998_v22 }
  0xc9   :  { %919 = vmatmul.mubr.bf16.gmra.mrb[68].mxu0 %v2940_v23  ;;  %1119 = vmatmul.mubr.bf16.gmra.mrb[68].mxu1 %v3000_v24 }
  0xca   :  { %926 = vmatprep.mubr.bf16.mxu0 %v2944_v25  ;;  %1126 = vmatprep.mubr.bf16.mxu1 %v3001_v26 }
  0xd1   :  { %927 = vmatmul.mubr.bf16.gmra.mrb[72].mxu0 %v2946_v27  ;;  %1127 = vmatmul.mubr.bf16.gmra.mrb[72].mxu1 %v3003_v28 }
  0xd2   :  { %934 = vmatprep.mubr.bf16.mxu0 %v2950_v29  ;;  %1134 = vmatprep.mubr.bf16.mxu1 %v3004_v30 }
  0xd9   :  { %935 = vmatmul.mubr.bf16.gmra.mrb[76].mxu0 %v2952_v31  ;;  %1135 = vmatmul.mubr.bf16.gmra.mrb[76].mxu1 %v3006_v32 }
  0xda   :  { %942 = vmatprep.mubr.bf16.mxu0 %v2956_v33  ;;  %1142 = vmatprep.mubr.bf16.mxu1 %v3007_v34 }
  0xe1   :  { %943 = vmatmul.mubr.bf16.gmra.mrb[80].mxu0 %v2958_v35  ;;  %1143 = vmatmul.mubr.bf16.gmra.mrb[80].mxu1 %v3009_v36 }
  0xe2   :  { %950 = vmatprep.mubr.bf16.mxu0 %v2962_v37  ;;  %1150 = vmatprep.mubr.bf16.mxu1 %v3010_v38  ;;  %v3467_v37 = vld [vmem:[%s6051_s2] ss:$0 sm:$0xff] }
  0xe9   :  { %951 = vmatmul.mubr.bf16.gmra.mrb[84].mxu0 %v2964_v39  ;;  %1151 = vmatmul.mubr.bf16.gmra.mrb[84].mxu1 %v3012_v40 }
  0xea   :  { %958 = vmatprep.mubr.bf16.mxu0 %v2968_v41  ;;  %1158 = vmatprep.mubr.bf16.mxu1 %v3013_v42 }
  0xf1   :  { %959 = vmatmul.mubr.bf16.gmra.mrb[88].mxu0 %v2970_v43  ;;  %1159 = vmatmul.mubr.bf16.gmra.mrb[88].mxu1 %v3015_v44 }
  0xf2   :  { %966 = vmatprep.mubr.bf16.mxu0 %v2974_v45  ;;  %1166 = vmatprep.mubr.bf16.mxu1 %v3016_v46 }
  0xf9   :  { %967 = vmatmul.mubr.bf16.gmra.mrb[92].mxu0 %v2976_v47  ;;  %1167 = vmatmul.mubr.bf16.gmra.mrb[92].mxu1 %v3018_v48 }
  0xfa   :  { %974 = vmatprep.mubr.bf16.mxu0 %v2980_v49  ;;  %1174 = vmatprep.mubr.bf16.mxu1 %v3019_v50 }
 0x101   :  { %975 = vmatmul.mubr.bf16.gmra.mrb[96].mxu0 %v2982_v51  ;;  %1175 = vmatmul.mubr.bf16.gmra.mrb[96].mxu1 %v3021_v52 }
 0x114   :  { %v784_v53 = vpop.f32.mrb[0].mxu0  ;;  %v3426_v54 = vpop.f32.mrb[0].mxu1 }
 0x115   :  { %v786_v55 = vpop.f32.mrb[1].mxu0  ;;  %v986_v56 = vpop.f32.mrb[1].mxu1  ;;  %v3477_v41 = vadd.f32 %v3467_v37, %v784_v53 }
 0x116   :  { %v787_v57 = vpop.f32.mrb[2].mxu0  ;;  %v3428_v58 = vpop.f32.mrb[2].mxu1 }
 0x117   :  { %v789_v59 = vpop.f32.mrb[3].mxu0  ;;  %v989_v60 = vpop.f32.mrb[3].mxu1  ;;  %v3470_v38 = vadd.f32 %v3467_v37, %v787_v57  ;;  %6247 = vst [vmem:[#allocation3_spill] sm:$0xff] %v3477_v41  ;;  %v1391_v50 = vmul.f32 %v3477_v41, %v3477_v41  ;;  %v1184_v55 = vsel %vm1183_vm0, %v3477_v41, 0.0 }
 0x119   :  { %6246 = vst [vmem:[#allocation2_spill] sm:$0xff] %v3470_v38  ;;  %v1392_v47 = vmul.f32 %v3470_v38, %v3470_v38  ;;  %v1185_v51 = vsel %vm1183_vm0, %v3470_v38, 0.0 }
 0x11a   :  { %v1186_v60 = vadd.f32 %v1185_v51, %v1184_v55 }
 0x11b   :  { %v1492_v56 = vsel %vm1183_vm0, %v1392_v47, 0.0 }
 0x11c   :  { %v792_v61 = vpop.f32.mrb[4].mxu0  ;;  %v3430_v62 = vpop.f32.mrb[4].mxu1 }
 0x11d   :  { %v794_v63 = vpop.f32.mrb[5].mxu0  ;;  %v994_v0 = vpop.f32.mrb[5].mxu1  ;;  %v3480_v42 = vadd.f32 %v3467_v37, %v792_v61 }
 0x11e   :  { %v795_v1 = vpop.f32.mrb[6].mxu0  ;;  %v3432_v2 = vpop.f32.mrb[6].mxu1  ;;  %v1491_v0 = vsel %vm1183_vm0, %v1391_v50, 0.0 }
 0x11f   :  { %v797_v3 = vpop.f32.mrb[7].mxu0  ;;  %v997_v4 = vpop.f32.mrb[7].mxu1  ;;  %6248 = vst [vmem:[#allocation4_spill] sm:$0xff] %v3480_v42  ;;  %v1393_v52 = vmul.f32 %v3480_v42, %v3480_v42  ;;  %v3495_v53 = vadd.f32 %v3467_v37, %v795_v1  ;;  %v1187_v57 = vsel %vm1183_vm0, %v3480_v42, 0.0 }
 0x121   :  { %6249 = vst [vmem:[#allocation5_spill] sm:$0xff] %v3495_v53  ;;  %v1494_v1 = vsel %vm1183_vm0, %v1393_v52, 0.0  ;;  %v1394_v3 = vmul.f32 %v3495_v53, %v3495_v53 }
 0x124   :  { %v800_v5 = vpop.f32.mrb[8].mxu0  ;;  %v3434_v6 = vpop.f32.mrb[8].mxu1 }
 0x125   :  { %v802_v7 = vpop.f32.mrb[9].mxu0  ;;  %v1002_v8 = vpop.f32.mrb[9].mxu1  ;;  %v3503_v59 = vadd.f32 %v3467_v37, %v800_v5 }
 0x126   :  { %v3436_v9 = vpop.f32.mrb[10].mxu0  ;;  %v3438_v10 = vpop.f32.mrb[10].mxu1  ;;  %v1493_v8 = vadd.f32 %v1492_v56, %v1491_v0 }
 0x127   :  { %v805_v11 = vpop.f32.mrb[11].mxu0  ;;  %v1005_v12 = vpop.f32.mrb[11].mxu1  ;;  %6250 = vst [vmem:[#allocation6_spill] sm:$0xff] %v3503_v59 }
 0x128   :  { %v1188_v11 = vadd.f32 %v1187_v57, %v1186_v60 }
 0x12c   :  { %v3440_v13 = vpop.f32.mrb[12].mxu0  ;;  %v3442_v14 = vpop.f32.mrb[12].mxu1 }
 0x12d   :  { %v810_v15 = vpop.f32.mrb[13].mxu0  ;;  %v1010_v16 = vpop.f32.mrb[13].mxu1 }
 0x12e   :  { %v3444_v17 = vpop.f32.mrb[14].mxu0  ;;  %v3446_v18 = vpop.f32.mrb[14].mxu1  ;;  %v1189_v15 = vsel %vm1183_vm0, %v3495_v53, 0.0  ;;  %v1395_v16 = vmul.f32 %v3503_v59, %v3503_v59 }
 0x12f   :  { %v813_v19 = vpop.f32.mrb[15].mxu0  ;;  %v1013_v20 = vpop.f32.mrb[15].mxu1 }
 0x130   :  { %v3523_v19 = vadd.f32 %v3467_v37, %v3436_v9 }
 0x132   :  { %6251 = vst [vmem:[#allocation7_spill] sm:$0xff] %v3523_v19 }
 0x134   :  { %v3448_v21 = vpop.f32.mrb[16].mxu0  ;;  %v3450_v22 = vpop.f32.mrb[16].mxu1 }
 0x135   :  { %v818_v23 = vpop.f32.mrb[17].mxu0  ;;  %v1018_v24 = vpop.f32.mrb[17].mxu1  ;;  %v3556_v0 = vadd.f32 %v3467_v37, %v3448_v21 }
 0x136   :  { %v3452_v25 = vpop.f32.mrb[18].mxu0  ;;  %v3454_v26 = vpop.f32.mrb[18].mxu1  ;;  %v1495_v24 = vadd.f32 %v1494_v1, %v1493_v8 }
 0x137   :  { %v821_v27 = vpop.f32.mrb[19].mxu0  ;;  %v1021_v28 = vpop.f32.mrb[19].mxu1  ;;  %6254 = vst [vmem:[#allocation10_spill] sm:$0xff] %v3556_v0  ;;  %v3567_v21 = vadd.f32 %v3467_v37, %v3452_v25 }
 0x138   :  { %v1496_v27 = vsel %vm1183_vm0, %v1394_v3, 0.0  ;;  %v1191_v28 = vsel %vm1183_vm0, %v3503_v59, 0.0 }
 0x139   :  { %v1497_v9 = vadd.f32 %v1496_v27, %v1495_v24  ;;  %6255 = vst [vmem:[#allocation11_spill] sm:$0xff] %v3567_v21 }
 0x13c   :  { %v3456_v29 = vpop.f32.mrb[20].mxu0  ;;  %v3458_v30 = vpop.f32.mrb[20].mxu1 }
 0x13d   :  { %v826_v31 = vpop.f32.mrb[21].mxu0  ;;  %v1026_v32 = vpop.f32.mrb[21].mxu1 }
 0x13e   :  { %v3460_v33 = vpop.f32.mrb[22].mxu0  ;;  %v3462_v34 = vpop.f32.mrb[22].mxu1  ;;  %v3530_v31 = vadd.f32 %v3467_v37, %v3440_v13  ;;  %v1190_v32 = vadd.f32 %v1189_v15, %v1188_v11  ;;  %v3545_v13 = vadd.f32 %v3467_v37, %v3444_v17 }
 0x13f   :  { %v829_v35 = vpop.f32.mrb[23].mxu0  ;;  %v1029_v36 = vpop.f32.mrb[23].mxu1 }
 0x140   :  { %6252 = vst [vmem:[#allocation8_spill] sm:$0xff] %v3530_v31  ;;  %v1498_v35 = vsel %vm1183_vm0, %v1395_v16, 0.0  ;;  %v1396_v36 = vmul.f32 %v3523_v19, %v3523_v19  ;;  %6253 = vst [vmem:[#allocation9_spill] sm:$0xff] %v3545_v13  ;;  %v1195_v60 = vsel %vm1183_vm0, %v3530_v31, 0.0  ;;  %v1197_v15 = vsel %vm1183_vm0, %v3545_v13, 0.0 }
 0x141   :  { %v1499_v52 = vadd.f32 %v1498_v35, %v1497_v9  ;;  %v1399_v16 = vmul.f32 %v3556_v0, %v3556_v0 }
 0x142   :  { %v1500_v57 = vsel %vm1183_vm0, %v1396_v36, 0.0 }
 0x143   :  { %v1501_v8 = vadd.f32 %v1500_v57, %v1499_v52 }
 0x144   :  { %v3472_v39 = vpop.f32.mrb[24].mxu0  ;;  %v3474_v40 = vpop.f32.mrb[24].mxu1 }
 0x145   :  { %v834_v43 = vpop.f32.mrb[25].mxu0  ;;  %v1034_v44 = vpop.f32.mrb[25].mxu1 }
 0x146   :  { %v3482_v45 = vpop.f32.mrb[26].mxu0  ;;  %v3484_v46 = vpop.f32.mrb[26].mxu1  ;;  %v1192_v43 = vadd.f32 %v1191_v28, %v1190_v32  ;;  %v1199_v28 = vsel %vm1183_vm0, %v3556_v0, 0.0  ;;  %v3578_v32 = vadd.f32 %v3467_v37, %v3456_v29  ;;  %v1201_v29 = vsel %vm1183_vm0, %v3567_v21, 0.0 }
 0x147   :  { %v837_v48 = vpop.f32.mrb[27].mxu0  ;;  %v1037_v49 = vpop.f32.mrb[27].mxu1 }
 0x148   :  { %v1193_v48 = vsel %vm1183_vm0, %v3523_v19, 0.0  ;;  %v1397_v49 = vmul.f32 %v3530_v31, %v3530_v31  ;;  %6256 = vst [vmem:[#allocation12_spill] sm:$0xff] %v3578_v32 }
 0x149   :  { %v1194_v17 = vadd.f32 %v1193_v48, %v1192_v43  ;;  %v1506_v48 = vsel %vm1183_vm0, %v1399_v16, 0.0 }
 0x14b   :  { %v1196_v11 = vadd.f32 %v1195_v60, %v1194_v17  ;;  %v1401_v60 = vmul.f32 %v3578_v32, %v3578_v32 }
 0x14c   :  { %v3505_v61 = vpop.f32.mrb[28].mxu0  ;;  %v3507_v63 = vpop.f32.mrb[28].mxu1 }
 0x14d   :  { %v842_v4 = vpop.f32.mrb[29].mxu0  ;;  %v1042_v7 = vpop.f32.mrb[29].mxu1  ;;  %v1198_v9 = vadd.f32 %v1197_v15, %v1196_v11  ;;  %v1510_v16 = vsel %vm1183_vm0, %v1401_v60, 0.0  ;;  %v3626_v60 = vadd.f32 %v3467_v37, %v3505_v61 }
 0x14e   :  { %v3513_v12 = vpop.f32.mrb[30].mxu0  ;;  %v3515_v5 = vpop.f32.mrb[30].mxu1  ;;  %v1502_v4 = vsel %vm1183_vm0, %v1397_v49, 0.0  ;;  %v1398_v7 = vmul.f32 %v3545_v13, %v3545_v13  ;;  %v1400_v49 = vmul.f32 %v3567_v21, %v3567_v21 }
 0x14f   :  { %v845_v20 = vpop.f32.mrb[31].mxu0  ;;  %v1045_v23 = vpop.f32.mrb[31].mxu1  ;;  %v1200_v57 = vadd.f32 %v1199_v28, %v1198_v9  ;;  %6260 = vst [vmem:[#allocation16_spill] sm:$0xff] %v3626_v60  ;;  %v3641_v61 = vadd.f32 %v3467_v37, %v3513_v12 }
 0x150   :  { %v1503_v20 = vadd.f32 %v1502_v4, %v1501_v8  ;;  %v1504_v27 = vsel %vm1183_vm0, %v1398_v7, 0.0  ;;  %v1508_v17 = vsel %vm1183_vm0, %v1400_v49, 0.0  ;;  %v1203_v4 = vsel %vm1183_vm0, %v3578_v32, 0.0 }
 0x151   :  { %v3600_v7 = vadd.f32 %v3467_v37, %v3472_v39  ;;  %v1202_v8 = vadd.f32 %v1201_v29, %v1200_v57  ;;  %v3619_v49 = vadd.f32 %v3467_v37, %v3482_v45  ;;  %6261 = vst [vmem:[#allocation17_spill] sm:$0xff] %v3641_v61 }
 0x152   :  { %v1505_v52 = vadd.f32 %v1504_v27, %v1503_v20 }
 0x153   :  { %6258 = vst [vmem:[#allocation14_spill] sm:$0xff] %v3600_v7  ;;  %6259 = vst [vmem:[#allocation15_spill] sm:$0xff] %v3619_v49  ;;  %v1207_v29 = vsel %vm1183_vm0, %v3600_v7, 0.0 }
 0x154   :  { %v3535_v44 = vpop.f32.mrb[32].mxu0  ;;  %v3537_v47 = vpop.f32.mrb[32].mxu1 }
 0x155   :  { %v850_v50 = vpop.f32.mrb[33].mxu0  ;;  %v1050_v51 = vpop.f32.mrb[33].mxu1 }
 0x156   :  { %v3547_v55 = vpop.f32.mrb[34].mxu0  ;;  %v3549_v56 = vpop.f32.mrb[34].mxu1 }
 0x157   :  { %v853_v1 = vpop.f32.mrb[35].mxu0  ;;  %v1053_v3 = vpop.f32.mrb[35].mxu1 }
 0x158   :  { %v3593_v1 = vadd.f32 %v3467_v37, %v3460_v33  ;;  %v1507_v3 = vadd.f32 %v1506_v48, %v1505_v52  ;;  %v1403_v48 = vmul.f32 %v3600_v7, %v3600_v7 }
 0x15a   :  { %6257 = vst [vmem:[#allocation13_spill] sm:$0xff] %v3593_v1  ;;  %v1402_v33 = vmul.f32 %v3593_v1, %v3593_v1  ;;  %v1509_v28 = vadd.f32 %v1508_v17, %v1507_v3  ;;  %v1205_v39 = vsel %vm1183_vm0, %v3593_v1, 0.0  ;;  %v1514_v17 = vsel %vm1183_vm0, %v1403_v48, 0.0 }
 0x15c   :  { %v3569_v23 = vpop.f32.mrb[36].mxu0  ;;  %v3571_v24 = vpop.f32.mrb[36].mxu1  ;;  %v1511_v52 = vadd.f32 %v1510_v16, %v1509_v28  ;;  %v1512_v57 = vsel %vm1183_vm0, %v1402_v33, 0.0  ;;  %v1209_v33 = vsel %vm1183_vm0, %v3619_v49, 0.0 }
 0x15d   :  { %v858_v35 = vpop.f32.mrb[37].mxu0  ;;  %v1058_v36 = vpop.f32.mrb[37].mxu1 }
 0x15e   :  { %v3580_v43 = vpop.f32.mrb[38].mxu0  ;;  %v3582_v25 = vpop.f32.mrb[38].mxu1  ;;  %v1204_v35 = vadd.f32 %v1203_v4, %v1202_v8  ;;  %v1404_v4 = vmul.f32 %v3619_v49, %v3619_v49  ;;  %v1513_v45 = vadd.f32 %v1512_v57, %v1511_v52  ;;  %v1211_v52 = vsel %vm1183_vm0, %v3626_v60, 0.0 }
 0x15f   :  { %v861_v50 = vpop.f32.mrb[39].mxu0  ;;  %v1061_v51 = vpop.f32.mrb[39].mxu1  ;;  %v3652_v57 = vadd.f32 %v3467_v37, %v3535_v44  ;;  %v3663_v44 = vadd.f32 %v3467_v37, %v3547_v55 }
 0x160   :  { %v1206_v3 = vadd.f32 %v1205_v39, %v1204_v35  ;;  %v1515_v39 = vadd.f32 %v1514_v17, %v1513_v45  ;;  %v1406_v17 = vmul.f32 %v3641_v61, %v3641_v61 }
 0x161   :  { %6262 = vst [vmem:[#allocation18_spill] sm:$0xff] %v3652_v57  ;;  %6263 = vst [vmem:[#allocation19_spill] sm:$0xff] %v3663_v44 }
 0x162   :  { %v1208_v8 = vadd.f32 %v1207_v29, %v1206_v3 }
 0x164   :  { %v3602_v11 = vpop.f32.mrb[40].mxu0  ;;  %v3604_v15 = vpop.f32.mrb[40].mxu1  ;;  %v1210_v12 = vadd.f32 %v1209_v33, %v1208_v8  ;;  %v1520_v33 = vsel %vm1183_vm0, %v1406_v17, 0.0 }
 0x165   :  { %v866_v20 = vpop.f32.mrb[41].mxu0  ;;  %v1066_v27 = vpop.f32.mrb[41].mxu1 }
 0x166   :  { %v3609_v36 = vpop.f32.mrb[42].mxu0  ;;  %v3611_v9 = vpop.f32.mrb[42].mxu1  ;;  %v1405_v27 = vmul.f32 %v3626_v60, %v3626_v60  ;;  %v1407_v60 = vmul.f32 %v3652_v57, %v3652_v57 }
 0x167   :  { %v869_v50 = vpop.f32.mrb[43].mxu0  ;;  %v1069_v51 = vpop.f32.mrb[43].mxu1 }
 0x168   :  { %v1516_v51 = vsel %vm1183_vm0, %v1404_v4, 0.0  ;;  %v1213_v4 = vsel %vm1183_vm0, %v3641_v61, 0.0  ;;  %v1522_v55 = vsel %vm1183_vm0, %v1407_v60, 0.0 }
 0x169   :  { %v1517_v45 = vadd.f32 %v1516_v51, %v1515_v39  ;;  %v3672_v39 = vadd.f32 %v3467_v37, %v3569_v23 }
 0x16b   :  { %6264 = vst [vmem:[#allocation20_spill] sm:$0xff] %v3672_v39  ;;  %v1409_v23 = vmul.f32 %v3672_v39, %v3672_v39 }
 0x16c   :  { %v3631_v20 = vpop.f32.mrb[44].mxu0  ;;  %v3633_v16 = vpop.f32.mrb[44].mxu1 }
 0x16d   :  { %v874_v28 = vpop.f32.mrb[45].mxu0  ;;  %v1074_v35 = vpop.f32.mrb[45].mxu1 }
 0x16e   :  { %v3643_v48 = vpop.f32.mrb[46].mxu0  ;;  %v3645_v50 = vpop.f32.mrb[46].mxu1  ;;  %v1518_v28 = vsel %vm1183_vm0, %v1405_v27, 0.0  ;;  %v1212_v35 = vadd.f32 %v1211_v52, %v1210_v12  ;;  %v1215_v27 = vsel %vm1183_vm0, %v3652_v57, 0.0  ;;  %v1217_v57 = vsel %vm1183_vm0, %v3663_v44, 0.0 }
 0x16f   :  { %v877_v29 = vpop.f32.mrb[47].mxu0  ;;  %v1077_v3 = vpop.f32.mrb[47].mxu1 }
 0x170   :  { %v1519_v29 = vadd.f32 %v1518_v28, %v1517_v45  ;;  %v1214_v12 = vadd.f32 %v1213_v4, %v1212_v35  ;;  %v1408_v28 = vmul.f32 %v3663_v44, %v3663_v44  ;;  %v3685_v35 = vadd.f32 %v3467_v37, %v3580_v43 }
 0x172   :  { %v1521_v7 = vadd.f32 %v1520_v33, %v1519_v29  ;;  %v1216_v1 = vadd.f32 %v1215_v27, %v1214_v12  ;;  %6265 = vst [vmem:[#allocation21_spill] sm:$0xff] %v3685_v35  ;;  %v1524_v60 = vsel %vm1183_vm0, %v1408_v28, 0.0  ;;  %v3692_v29 = vadd.f32 %v3467_v37, %v3602_v11 }
 0x173   :  { %v1526_v12 = vsel %vm1183_vm0, %v1409_v23, 0.0  ;;  %v1410_v43 = vmul.f32 %v3685_v35, %v3685_v35  ;;  %v1221_v11 = vsel %vm1183_vm0, %v3685_v35, 0.0 }
 0x174   :  { %v880_v3 = vpop.f32.mrb[48].mxu0  ;;  %v3665_v8 = vpop.f32.mrb[48].mxu1  ;;  %v1523_v4 = vadd.f32 %v1522_v55, %v1521_v7  ;;  %6266 = vst [vmem:[#allocation22_spill] sm:$0xff] %v3692_v29  ;;  %v1218_v33 = vadd.f32 %v1217_v57, %v1216_v1  ;;  %v1411_v1 = vmul.f32 %v3692_v29, %v3692_v29  ;;  %v3707_v57 = vadd.f32 %v3467_v37, %v3609_v36 }
 0x175   :  { %v882_v51 = vpop.f32.mrb[49].mxu0  ;;  %v1082_v52 = vpop.f32.mrb[49].mxu1 }
 0x176   :  { %v883_v61 = vpop.f32.mrb[50].mxu0  ;;  %v3674_v49 = vpop.f32.mrb[50].mxu1  ;;  %v1219_v51 = vsel %vm1183_vm0, %v3672_v39, 0.0  ;;  %v1525_v55 = vadd.f32 %v1524_v60, %v1523_v4  ;;  %6267 = vst [vmem:[#allocation23_spill] sm:$0xff] %v3707_v57  ;;  %v1223_v4 = vsel %vm1183_vm0, %v3692_v29, 0.0  ;;  %v3714_v60 = vadd.f32 %v3467_v37, %v3631_v20 }
 0x177   :  { %v885_v45 = vpop.f32.mrb[51].mxu0  ;;  %v1085_v17 = vpop.f32.mrb[51].mxu1  ;;  %v1220_v28 = vadd.f32 %v1219_v51, %v1218_v33  ;;  %v1530_v33 = vsel %vm1183_vm0, %v1411_v1, 0.0  ;;  %v3727_v20 = vadd.f32 %v3467_v37, %v3643_v48 }
 0x178   :  { %v1527_v32 = vadd.f32 %v1526_v12, %v1525_v55  ;;  %6268 = vst [vmem:[#allocation24_spill] sm:$0xff] %v3714_v60  ;;  %v1225_v12 = vsel %vm1183_vm0, %v3707_v57, 0.0 }
 0x179   :  { %v1222_v51 = vadd.f32 %v1221_v11, %v1220_v28  ;;  %6269 = vst [vmem:[#allocation25_spill] sm:$0xff] %v3727_v20 }
 0x17b   :  { %v1224_v35 = vadd.f32 %v1223_v4, %v1222_v51  ;;  %v3735_v4 = vadd.f32 %v3467_v37, %v880_v3 }
 0x17c   :  { %v888_v27 = vpop.f32.mrb[52].mxu0  ;;  %v3694_v52 = vpop.f32.mrb[52].mxu1 }
 0x17d   :  { %v890_v45 = vpop.f32.mrb[53].mxu0  ;;  %v1090_v7 = vpop.f32.mrb[53].mxu1  ;;  %6270 = vst [vmem:[#allocation26_spill] sm:$0xff] %v3735_v4  ;;  %v1226_v21 = vadd.f32 %v1225_v12, %v1224_v35  ;;  %v1231_v12 = vsel %vm1183_vm0, %v3735_v4, 0.0 }
 0x17e   :  { %v891_v17 = vpop.f32.mrb[54].mxu0  ;;  %v3699_v44 = vpop.f32.mrb[54].mxu1  ;;  %v1528_v45 = vsel %vm1183_vm0, %v1410_v43, 0.0  ;;  %v1412_v7 = vmul.f32 %v3707_v57, %v3707_v57  ;;  %v1413_v43 = vmul.f32 %v3714_v60, %v3714_v60 }
 0x17f   :  { %v893_v23 = vpop.f32.mrb[55].mxu0  ;;  %v1093_v39 = vpop.f32.mrb[55].mxu1  ;;  %v1529_v36 = vadd.f32 %v1528_v45, %v1527_v32  ;;  %v1227_v45 = vsel %vm1183_vm0, %v3714_v60, 0.0  ;;  %v3745_v60 = vadd.f32 %v3467_v37, %v883_v61 }
 0x180   :  { %v1532_v32 = vsel %vm1183_vm0, %v1412_v7, 0.0  ;;  %v1534_v48 = vsel %vm1183_vm0, %v1413_v43, 0.0  ;;  %v1415_v7 = vmul.f32 %v3735_v4, %v3735_v4 }
 0x181   :  { %v1531_v11 = vadd.f32 %v1530_v33, %v1529_v36  ;;  %v1228_v36 = vadd.f32 %v1227_v45, %v1226_v21  ;;  %6271 = vst [vmem:[#allocation27_spill] sm:$0xff] %v3745_v60  ;;  %v3753_v21 = vadd.f32 %v3467_v37, %v888_v27  ;;  %v1233_v4 = vsel %vm1183_vm0, %v3745_v60, 0.0 }
 0x182   :  { %v1538_v61 = vsel %vm1183_vm0, %v1415_v7, 0.0 }
 0x183   :  { %v1533_v33 = vadd.f32 %v1532_v32, %v1531_v11  ;;  %6272 = vst [vmem:[#allocation28_spill] sm:$0xff] %v3753_v21  ;;  %v1417_v27 = vmul.f32 %v3753_v21, %v3753_v21  ;;  %v1235_v7 = vsel %vm1183_vm0, %v3753_v21, 0.0 }
 0x184   :  { %v896_v23 = vpop.f32.mrb[56].mxu0  ;;  %v3719_v39 = vpop.f32.mrb[56].mxu1 }
 0x185   :  { %v898_v55 = vpop.f32.mrb[57].mxu0  ;;  %v1098_v28 = vpop.f32.mrb[57].mxu1  ;;  %v1535_v3 = vadd.f32 %v1534_v48, %v1533_v33  ;;  %v1416_v48 = vmul.f32 %v3745_v60, %v3745_v60 }
 0x186   :  { %v899_v1 = vpop.f32.mrb[58].mxu0  ;;  %v3729_v29 = vpop.f32.mrb[58].mxu1  ;;  %v1414_v55 = vmul.f32 %v3727_v20, %v3727_v20  ;;  %v1229_v28 = vsel %vm1183_vm0, %v3727_v20, 0.0 }
 0x187   :  { %v901_v51 = vpop.f32.mrb[59].mxu0  ;;  %v1101_v57 = vpop.f32.mrb[59].mxu1  ;;  %v1230_v32 = vadd.f32 %v1229_v28, %v1228_v36  ;;  %v3765_v36 = vadd.f32 %v3467_v37, %v891_v17 }
 0x188   :  { %v1536_v35 = vsel %vm1183_vm0, %v1414_v55, 0.0 }
 0x189   :  { %v1537_v55 = vadd.f32 %v1536_v35, %v1535_v3  ;;  %v1232_v13 = vadd.f32 %v1231_v12, %v1230_v32  ;;  %6273 = vst [vmem:[#allocation29_spill] sm:$0xff] %v3765_v36  ;;  %v1542_v12 = vsel %vm1183_vm0, %v1417_v27, 0.0  ;;  %v1418_v32 = vmul.f32 %v3765_v36, %v3765_v36 }
 0x18b   :  { %v1539_v28 = vadd.f32 %v1538_v61, %v1537_v55 }
 0x18c   :  { %v904_v51 = vpop.f32.mrb[60].mxu0  ;;  %v3747_v57 = vpop.f32.mrb[60].mxu1 }
 0x18d   :  { %v906_v43 = vpop.f32.mrb[61].mxu0  ;;  %v1106_v11 = vpop.f32.mrb[61].mxu1 }
 0x18e   :  { %v907_v45 = vpop.f32.mrb[62].mxu0  ;;  %v3755_v20 = vpop.f32.mrb[62].mxu1  ;;  %v1540_v43 = vsel %vm1183_vm0, %v1416_v48, 0.0  ;;  %v3771_v11 = vadd.f32 %v3467_v37, %v896_v23  ;;  %v1237_v23 = vsel %vm1183_vm0, %v3765_v36, 0.0 }
 0x18f   :  { %v909_v33 = vpop.f32.mrb[63].mxu0  ;;  %v1109_v0 = vpop.f32.mrb[63].mxu1  ;;  %v1541_v61 = vadd.f32 %v1540_v43, %v1539_v28  ;;  %v3791_v43 = vadd.f32 %v3467_v37, %v904_v51  ;;  %v3803_v51 = vadd.f32 %v3467_v37, %v907_v45 }
 0x190   :  { %6274 = vst [vmem:[#allocation30_spill] sm:$0xff] %v3771_v11  ;;  %v1234_v0 = vadd.f32 %v1233_v4, %v1232_v13  ;;  %v1419_v13 = vmul.f32 %v3771_v11, %v3771_v11  ;;  %v3785_v4 = vadd.f32 %v3467_v37, %v899_v1  ;;  %v1239_v28 = vsel %vm1183_vm0, %v3771_v11, 0.0 }
 0x191   :  { %v1543_v31 = vadd.f32 %v1542_v12, %v1541_v61  ;;  %6276 = vst [vmem:[#allocation32_spill] sm:$0xff] %v3791_v43  ;;  %v1421_v12 = vmul.f32 %v3791_v43, %v3791_v43  ;;  %6277 = vst [vmem:[#allocation33_spill] sm:$0xff] %v3803_v51 }
 0x192   :  { %v1236_v55 = vadd.f32 %v1235_v7, %v1234_v0  ;;  %6275 = vst [vmem:[#allocation31_spill] sm:$0xff] %v3785_v4  ;;  %v1546_v0 = vsel %vm1183_vm0, %v1419_v13, 0.0 }
 0x193   :  { %v1550_v45 = vsel %vm1183_vm0, %v1421_v12, 0.0 }
 0x194   :  { %v912_v3 = vpop.f32.mrb[64].mxu0  ;;  %v3773_v35 = vpop.f32.mrb[64].mxu1  ;;  %v1238_v7 = vadd.f32 %v1237_v23, %v1236_v55 }
 0x195   :  { %v914_v17 = vpop.f32.mrb[65].mxu0  ;;  %v1114_v33 = vpop.f32.mrb[65].mxu1 }
 0x196   :  { %v915_v48 = vpop.f32.mrb[66].mxu0  ;;  %v3778_v60 = vpop.f32.mrb[66].mxu1  ;;  %v1544_v17 = vsel %vm1183_vm0, %v1418_v32, 0.0  ;;  %v1420_v33 = vmul.f32 %v3785_v4, %v3785_v4  ;;  %v1240_v1 = vadd.f32 %v1239_v28, %v1238_v7  ;;  %v3811_v28 = vadd.f32 %v3467_v37, %v912_v3 }
 0x197   :  { %v917_v27 = vpop.f32.mrb[67].mxu0  ;;  %v1117_v21 = vpop.f32.mrb[67].mxu1  ;;  %v1545_v36 = vadd.f32 %v1544_v17, %v1543_v31  ;;  %v1243_v17 = vsel %vm1183_vm0, %v3791_v43, 0.0  ;;  %v3821_v43 = vadd.f32 %v3467_v37, %v915_v48 }
 0x198   :  { %v1241_v21 = vsel %vm1183_vm0, %v3785_v4, 0.0  ;;  %v1548_v31 = vsel %vm1183_vm0, %v1420_v33, 0.0  ;;  %6278 = vst [vmem:[#allocation34_spill] sm:$0xff] %v3811_v28  ;;  %v1423_v33 = vmul.f32 %v3811_v28, %v3811_v28 }
 0x199   :  { %v1547_v55 = vadd.f32 %v1546_v0, %v1545_v36  ;;  %v1242_v11 = vadd.f32 %v1241_v21, %v1240_v1  ;;  %6279 = vst [vmem:[#allocation35_spill] sm:$0xff] %v3821_v43  ;;  %v1247_v21 = vsel %vm1183_vm0, %v3811_v28, 0.0  ;;  %v1249_v28 = vsel %vm1183_vm0, %v3821_v43, 0.0 }
 0x19a   :  { %v1554_v48 = vsel %vm1183_vm0, %v1423_v33, 0.0 }
 0x19b   :  { %v1549_v36 = vadd.f32 %v1548_v31, %v1547_v55  ;;  %v1244_v0 = vadd.f32 %v1243_v17, %v1242_v11 }
 0x19c   :  { %v920_v19 = vpop.f32.mrb[68].mxu0  ;;  %v3796_v27 = vpop.f32.mrb[68].mxu1 }
 0x19d   :  { %v922_v32 = vpop.f32.mrb[69].mxu0  ;;  %v1122_v61 = vpop.f32.mrb[69].mxu1  ;;  %v1551_v3 = vadd.f32 %v1550_v45, %v1549_v36  ;;  %v3829_v11 = vadd.f32 %v3467_v37, %v920_v19  ;;  %v1424_v45 = vmul.f32 %v3821_v43, %v3821_v43 }
 0x19e   :  { %v923_v23 = vpop.f32.mrb[70].mxu0  ;;  %v3805_v13 = vpop.f32.mrb[70].mxu1  ;;  %v1422_v32 = vmul.f32 %v3803_v51, %v3803_v51  ;;  %v1245_v61 = vsel %vm1183_vm0, %v3803_v51, 0.0 }
 0x19f   :  { %v925_v7 = vpop.f32.mrb[71].mxu0  ;;  %v1125_v4 = vpop.f32.mrb[71].mxu1  ;;  %6280 = vst [vmem:[#allocation36_spill] sm:$0xff] %v3829_v11  ;;  %v1246_v31 = vadd.f32 %v1245_v61, %v1244_v0  ;;  %v1425_v19 = vmul.f32 %v3829_v11, %v3829_v11  ;;  %v3841_v0 = vadd.f32 %v3467_v37, %v923_v23  ;;  %v1251_v33 = vsel %vm1183_vm0, %v3829_v11, 0.0 }
 0x1a0   :  { %v1552_v1 = vsel %vm1183_vm0, %v1422_v32, 0.0 }
 0x1a1   :  { %v1553_v32 = vadd.f32 %v1552_v1, %v1551_v3  ;;  %v1248_v53 = vadd.f32 %v1247_v21, %v1246_v31  ;;  %6281 = vst [vmem:[#allocation37_spill] sm:$0xff] %v3841_v0  ;;  %v1558_v21 = vsel %vm1183_vm0, %v1425_v19, 0.0  ;;  %v1426_v31 = vmul.f32 %v3841_v0, %v3841_v0 }
 0x1a3   :  { %v1555_v61 = vadd.f32 %v1554_v48, %v1553_v32 }
 0x1a4   :  { %v928_v7 = vpop.f32.mrb[72].mxu0  ;;  %v3823_v4 = vpop.f32.mrb[72].mxu1 }
 0x1a5   :  { %v930_v12 = vpop.f32.mrb[73].mxu0  ;;  %v1130_v55 = vpop.f32.mrb[73].mxu1 }
 0x1a6   :  { %v931_v17 = vpop.f32.mrb[74].mxu0  ;;  %v3831_v51 = vpop.f32.mrb[74].mxu1  ;;  %v1556_v12 = vsel %vm1183_vm0, %v1424_v45, 0.0  ;;  %v3847_v55 = vadd.f32 %v3467_v37, %v928_v7  ;;  %v1253_v7 = vsel %vm1183_vm0, %v3841_v0, 0.0 }
 0x1a7   :  { %v933_v36 = vpop.f32.mrb[75].mxu0  ;;  %v1133_v59 = vpop.f32.mrb[75].mxu1  ;;  %v1557_v48 = vadd.f32 %v1556_v12, %v1555_v61 }
 0x1a8   :  { %6282 = vst [vmem:[#allocation38_spill] sm:$0xff] %v3847_v55  ;;  %v1250_v59 = vadd.f32 %v1249_v28, %v1248_v53  ;;  %v1427_v53 = vmul.f32 %v3847_v55, %v3847_v55  ;;  %v3861_v28 = vadd.f32 %v3467_v37, %v931_v17  ;;  %v1255_v61 = vsel %vm1183_vm0, %v3847_v55, 0.0 }
 0x1a9   :  { %v1559_v42 = vadd.f32 %v1558_v21, %v1557_v48 }
 0x1aa   :  { %v1252_v32 = vadd.f32 %v1251_v33, %v1250_v59  ;;  %6283 = vst [vmem:[#allocation39_spill] sm:$0xff] %v3861_v28  ;;  %v1562_v59 = vsel %vm1183_vm0, %v1427_v53, 0.0 }
 0x1ac   :  { %v936_v3 = vpop.f32.mrb[76].mxu0  ;;  %v3849_v1 = vpop.f32.mrb[76].mxu1  ;;  %v1254_v33 = vadd.f32 %v1253_v7, %v1252_v32 }
 0x1ad   :  { %v938_v23 = vpop.f32.mrb[77].mxu0  ;;  %v1138_v36 = vpop.f32.mrb[77].mxu1  ;;  %v3867_v12 = vadd.f32 %v3467_v37, %v936_v3 }
 0x1ae   :  { %v939_v45 = vpop.f32.mrb[78].mxu0  ;;  %v3854_v43 = vpop.f32.mrb[78].mxu1  ;;  %v1560_v23 = vsel %vm1183_vm0, %v1426_v31, 0.0  ;;  %v1428_v36 = vmul.f32 %v3861_v28, %v3861_v28  ;;  %v1256_v17 = vadd.f32 %v1255_v61, %v1254_v33 }
 0x1af   :  { %v941_v19 = vpop.f32.mrb[79].mxu0  ;;  %v1141_v11 = vpop.f32.mrb[79].mxu1  ;;  %6284 = vst [vmem:[#allocation40_spill] sm:$0xff] %v3867_v12  ;;  %v1561_v0 = vadd.f32 %v1560_v23, %v1559_v42  ;;  %v1429_v21 = vmul.f32 %v3867_v12, %v3867_v12  ;;  %v3879_v3 = vadd.f32 %v3467_v37, %v939_v45  ;;  %v1259_v23 = vsel %vm1183_vm0, %v3867_v12, 0.0 }
 0x1b0   :  { %v1257_v11 = vsel %vm1183_vm0, %v3861_v28, 0.0  ;;  %v1564_v42 = vsel %vm1183_vm0, %v1428_v36, 0.0 }
 0x1b1   :  { %6285 = vst [vmem:[#allocation41_spill] sm:$0xff] %v3879_v3  ;;  %v1563_v32 = vadd.f32 %v1562_v59, %v1561_v0  ;;  %v1258_v55 = vadd.f32 %v1257_v11, %v1256_v17  ;;  %v1566_v45 = vsel %vm1183_vm0, %v1429_v21, 0.0 }
 0x1b3   :  { %v1565_v0 = vadd.f32 %v1564_v42, %v1563_v32  ;;  %v1260_v59 = vadd.f32 %v1259_v23, %v1258_v55 }
 0x1b4   :  { %v944_v38 = vpop.f32.mrb[80].mxu0  ;;  %v3872_v19 = vpop.f32.mrb[80].mxu1 }
 0x1b5   :  { %v946_v31 = vpop.f32.mrb[81].mxu0  ;;  %v1146_v48 = vpop.f32.mrb[81].mxu1  ;;  %v3887_v61 = vadd.f32 %v3467_v37, %v944_v38  ;;  %v1567_v38 = vadd.f32 %v1566_v45, %v1565_v0 }
 0x1b6   :  { %v947_v7 = vpop.f32.mrb[82].mxu0  ;;  %v3881_v53 = vpop.f32.mrb[82].mxu1  ;;  %v1430_v31 = vmul.f32 %v3879_v3, %v3879_v3  ;;  %v1261_v48 = vsel %vm1183_vm0, %v3879_v3, 0.0 }
 0x1b7   :  { %6286 = vst [vmem:[#allocation42_spill] sm:$0xff] %v3887_v61  ;;  %v949_v33 = vpop.f32.mrb[83].mxu0  ;;  %v1149_v28 = vpop.f32.mrb[83].mxu1  ;;  %v1431_v36 = vmul.f32 %v3887_v61, %v3887_v61  ;;  %v3897_v12 = vadd.f32 %v3467_v37, %v947_v7  ;;  %v1263_v11 = vsel %vm1183_vm0, %v3887_v61, 0.0  ;;  %v1262_v42 = vadd.f32 %v1261_v48, %v1260_v59 }
 0x1b8   :  { %v1568_v17 = vsel %vm1183_vm0, %v1430_v31, 0.0 }
 0x1b9   :  { %6287 = vst [vmem:[#allocation43_spill] sm:$0xff] %v3897_v12  ;;  %v1570_v7 = vsel %vm1183_vm0, %v1431_v36, 0.0  ;;  %v1432_v45 = vmul.f32 %v3897_v12, %v3897_v12  ;;  %v1569_v31 = vadd.f32 %v1568_v17, %v1567_v38  ;;  %v1265_v61 = vsel %vm1183_vm0, %v3897_v12, 0.0 }
 0x1bb   :  { %v1571_v48 = vadd.f32 %v1570_v7, %v1569_v31 }
 0x1bc   :  { %v952_v33 = vpop.f32.mrb[84].mxu0  ;;  %v3899_v28 = vpop.f32.mrb[84].mxu1 }
 0x1bd   :  { %6288 = vst [vmem:[#allocation44_spill] sm:$0xff] %v3899_v28  ;;  %v3905_v55 = vadd.f32 %v3467_v37, %v952_v33  ;;  %v954_v21 = vpop.f32.mrb[85].mxu0  ;;  %v1154_v32 = vpop.f32.mrb[85].mxu1  ;;  %v1264_v28 = vadd.f32 %v1263_v11, %v1262_v42 }
 0x1be   :  { %v955_v23 = vpop.f32.mrb[86].mxu0  ;;  %v3907_v3 = vpop.f32.mrb[86].mxu1  ;;  %v1572_v21 = vsel %vm1183_vm0, %v1432_v45, 0.0 }
 0x1bf   :  { %6289 = vst [vmem:[#allocation45_spill] sm:$0xff] %v3905_v55  ;;  %6290 = vst [vmem:[#allocation46_spill] sm:$0xff] %v3907_v3  ;;  %v957_v0 = vpop.f32.mrb[87].mxu0  ;;  %v1157_v41 = vpop.f32.mrb[87].mxu1  ;;  %v1433_v33 = vmul.f32 %v3905_v55, %v3905_v55  ;;  %v3917_v59 = vadd.f32 %v3467_v37, %v955_v23  ;;  %v1267_v36 = vsel %vm1183_vm0, %v3905_v55, 0.0  ;;  %v1266_v32 = vadd.f32 %v1265_v61, %v1264_v28 }
 0x1c0   :  { %v1573_v7 = vadd.f32 %v1572_v21, %v1571_v48 }
 0x1c1   :  { %6291 = vst [vmem:[#allocation47_spill] sm:$0xff] %v3917_v59  ;;  %v1574_v38 = vsel %vm1183_vm0, %v1433_v33, 0.0  ;;  %v1434_v17 = vmul.f32 %v3917_v59, %v3917_v59  ;;  %v1268_v31 = vadd.f32 %v1267_v36, %v1266_v32  ;;  %v1269_v61 = vsel %vm1183_vm0, %v3917_v59, 0.0 }
 0x1c3   :  { %v1270_v21 = vadd.f32 %v1269_v61, %v1268_v31 }
 0x1c4   :  { %v960_v0 = vpop.f32.mrb[88].mxu0  ;;  %v3922_v41 = vpop.f32.mrb[88].mxu1 }
 0x1c5   :  { %6292 = vst [vmem:[#allocation48_spill] sm:$0xff] %v3922_v41  ;;  %v3928_v11 = vadd.f32 %v3467_v37, %v960_v0  ;;  %v962_v42 = vpop.f32.mrb[89].mxu0  ;;  %v1162_v23 = vpop.f32.mrb[89].mxu1  ;;  %v1575_v0 = vadd.f32 %v1574_v38, %v1573_v7 }
 0x1c6   :  { %v963_v45 = vpop.f32.mrb[90].mxu0  ;;  %v3930_v12 = vpop.f32.mrb[90].mxu1  ;;  %v1576_v42 = vsel %vm1183_vm0, %v1434_v17, 0.0 }
 0x1c7   :  { %6293 = vst [vmem:[#allocation49_spill] sm:$0xff] %v3928_v11  ;;  %6294 = vst [vmem:[#allocation50_spill] sm:$0xff] %v3930_v12  ;;  %v1435_v28 = vmul.f32 %v3928_v11, %v3928_v11  ;;  %v3937_v33 = vadd.f32 %v3467_v37, %v963_v45  ;;  %v965_v55 = vpop.f32.mrb[91].mxu0  ;;  %v1165_v41 = vpop.f32.mrb[91].mxu1  ;;  %v1271_v48 = vsel %vm1183_vm0, %v3928_v11, 0.0  ;;  %v1577_v23 = vadd.f32 %v1576_v42, %v1575_v0 }
 0x1c8   :  { %v1272_v59 = vadd.f32 %v1271_v48, %v1270_v21 }
 0x1c9   :  { %6295 = vst [vmem:[#allocation51_spill] sm:$0xff] %v3937_v33  ;;  %v1578_v36 = vsel %vm1183_vm0, %v1435_v28, 0.0  ;;  %v1436_v32 = vmul.f32 %v3937_v33, %v3937_v33  ;;  %v1273_v55 = vsel %vm1183_vm0, %v3937_v33, 0.0  ;;  %v3969_v33 = vadd.f32 %v3467_v37, %v3426_v54 }
 0x1ca   :  { %v1579_v7 = vadd.f32 %v1578_v36, %v1577_v23  ;;  %v1274_v21 = vadd.f32 %v1273_v55, %v1272_v59 }
 0x1cb   :  { %v1580_v61 = vsel %vm1183_vm0, %v1436_v32, 0.0  ;;  %6297 = vst [vmem:[#allocation53_spill] sm:$0xff] %v3969_v33 }
 0x1cc   :  { %v968_v12 = vpop.f32.mrb[92].mxu0  ;;  %v3945_v3 = vpop.f32.mrb[92].mxu1  ;;  %v1581_v23 = vadd.f32 %v1580_v61, %v1579_v7 }
 0x1cd   :  { %v3950_v41 = vadd.f32 %v3467_v37, %v968_v12  ;;  %v970_v38 = vpop.f32.mrb[93].mxu0  ;;  %v1170_v17 = vpop.f32.mrb[93].mxu1 }
 0x1ce   :  { %v971_v31 = vpop.f32.mrb[94].mxu0  ;;  %v3952_v45 = vpop.f32.mrb[94].mxu1 }
 0x1cf   :  { %6296 = vst [vmem:[#allocation52_spill] sm:$0xff] %v3950_v41  ;;  %v1275_v28 = vsel %vm1183_vm0, %v3950_v41, 0.0  ;;  %v1437_v0 = vmul.f32 %v3950_v41, %v3950_v41  ;;  %v3960_v42 = vadd.f32 %v3467_v37, %v971_v31  ;;  %v973_v48 = vpop.f32.mrb[95].mxu0  ;;  %v1173_v12 = vpop.f32.mrb[95].mxu1 }
 0x1d0   :  { %v1276_v17 = vadd.f32 %v1275_v28, %v1274_v21  ;;  %v3981_v12 = vadd.f32 %v3467_v37, %v3428_v58  ;;  %v3994_v58 = vadd.f32 %v3467_v37, %v3430_v62  ;;  %v4007_v62 = vadd.f32 %v3467_v37, %v3432_v2 }
 0x1d1   :  { %v1582_v38 = vsel %vm1183_vm0, %v1437_v0, 0.0  ;;  %v1438_v36 = vmul.f32 %v3960_v42, %v3960_v42  ;;  %v1277_v32 = vsel %vm1183_vm0, %v3960_v42, 0.0 }
 0x1d2   :  { %v1583_v41 = vadd.f32 %v1582_v38, %v1581_v23  ;;  %v1278_v7 = vadd.f32 %v1277_v32, %v1276_v17  ;;  %v1441_v17 = vmul.f32 %v3969_v33, %v3969_v33 }
 0x1d3   :  { %v1584_v59 = vsel %vm1183_vm0, %v1438_v36, 0.0 }
 0x1d4   :  { %v976_v31 = vpop.f32.mrb[96].mxu0  ;;  %v3971_v11 = vpop.f32.mrb[96].mxu1  ;;  %v1585_v32 = vadd.f32 %v1584_v59, %v1583_v41  ;;  %v1442_v41 = vmul.f32 %v3981_v12, %v3981_v12 }
 0x1d5   :  { %v3975_v55 = vadd.f32 %v3467_v37, %v976_v31  ;;  %v978_v0 = vpop.f32.mrb[97].mxu0  ;;  %v1178_v48 = vpop.f32.mrb[97].mxu1 }
 0x1d6   :  { %v979_v61 = vpop.f32.mrb[98].mxu0  ;;  %v3977_v28 = vpop.f32.mrb[98].mxu1  ;;  %v1592_v2 = vsel %vm1183_vm0, %v1442_v41, 0.0 }
 0x1d7   :  { %6298 = vst [vmem:[#allocation54_spill] sm:$0xff] %v3975_v55  ;;  %v1279_v54 = vsel %vm1183_vm0, %v3975_v55, 0.0  ;;  %v1439_v21 = vmul.f32 %v3975_v55, %v3975_v55  ;;  %v3988_v38 = vadd.f32 %v3467_v37, %v979_v61  ;;  %v981_v36 = vpop.f32.mrb[99].mxu0  ;;  %v1181_v23 = vpop.f32.mrb[99].mxu1 }
 0x1d8   :  { %v1280_v31 = vadd.f32 %v1279_v54, %v1278_v7  ;;  %v1283_v23 = vsel %vm1183_vm0, %v3969_v33, 0.0 }
 0x1d9   :  { %v1586_v0 = vsel %vm1183_vm0, %v1439_v21, 0.0  ;;  %v1281_v48 = vsel %vm1183_vm0, %v3988_v38, 0.0  ;;  %v1440_v61 = vmul.f32 %v3988_v38, %v3988_v38  ;;  %v1590_v21 = vsel %vm1183_vm0, %v1441_v17, 0.0 }
 0x1da   :  { %v1587_v55 = vadd.f32 %v1586_v0, %v1585_v32  ;;  %v1282_v36 = vadd.f32 %v1281_v48, %v1280_v31  ;;  %v1285_v32 = vsel %vm1183_vm0, %v3981_v12, 0.0  ;;  %v1443_v31 = vmul.f32 %v3994_v58, %v3994_v58 }
 0x1db   :  { %v1588_v59 = vsel %vm1183_vm0, %v1440_v61, 0.0  ;;  %v4017_v0 = vadd.f32 %v3467_v37, %v3434_v6  ;;  %v1287_v61 = vsel %vm1183_vm0, %v3994_v58, 0.0  ;;  %v4026_v17 = vadd.f32 %v3467_v37, %v3438_v10 }
 0x1dc   :  { %v1284_v7 = vadd.f32 %v1283_v23, %v1282_v36  ;;  %v1589_v54 = vadd.f32 %v1588_v59, %v1587_v55  ;;  %v1444_v55 = vmul.f32 %v4007_v62, %v4007_v62  ;;  %v1594_v59 = vsel %vm1183_vm0, %v1443_v31, 0.0 }
 0x1dd   :  { %v1289_v6 = vsel %vm1183_vm0, %v4007_v62, 0.0  ;;  %v1445_v41 = vmul.f32 %v4017_v0, %v4017_v0  ;;  %v1291_v10 = vsel %vm1183_vm0, %v4017_v0, 0.0  ;;  %v4044_v31 = vadd.f32 %v3467_v37, %v3446_v18 }
 0x1de   :  { %v1286_v48 = vadd.f32 %v1285_v32, %v1284_v7  ;;  %v1591_v33 = vadd.f32 %v1590_v21, %v1589_v54  ;;  %v4035_v7 = vadd.f32 %v3467_v37, %v3442_v14  ;;  %v1596_v32 = vsel %vm1183_vm0, %v1444_v55, 0.0 }
 0x1df   :  { %v1293_v14 = vsel %vm1183_vm0, %v4026_v17, 0.0 }
 0x1e0   :  { %v1288_v36 = vadd.f32 %v1287_v61, %v1286_v48  ;;  %v1593_v23 = vadd.f32 %v1592_v2, %v1591_v33  ;;  %v1446_v33 = vmul.f32 %v4026_v17, %v4026_v17  ;;  %v1598_v61 = vsel %vm1183_vm0, %v1445_v41, 0.0 }
 0x1e1   :  { %v1447_v55 = vmul.f32 %v4035_v7, %v4035_v7  ;;  %v1295_v18 = vsel %vm1183_vm0, %v4035_v7, 0.0  ;;  %v1448_v41 = vmul.f32 %v4044_v31, %v4044_v31 }
 0x1e2   :  { %v1290_v54 = vadd.f32 %v1289_v6, %v1288_v36  ;;  %v1595_v21 = vadd.f32 %v1594_v59, %v1593_v23  ;;  %v4053_v36 = vadd.f32 %v3467_v37, %v3450_v22  ;;  %v1600_v6 = vsel %vm1183_vm0, %v1446_v33, 0.0 }
 0x1e3   :  { %v1297_v22 = vsel %vm1183_vm0, %v4044_v31, 0.0 }
 0x1e4   :  { %v1292_v48 = vadd.f32 %v1291_v10, %v1290_v54  ;;  %v1597_v2 = vadd.f32 %v1596_v32, %v1595_v21  ;;  %v4062_v54 = vadd.f32 %v3467_v37, %v3454_v26  ;;  %v1602_v10 = vsel %vm1183_vm0, %v1447_v55, 0.0 }
 0x1e5   :  { %v1449_v33 = vmul.f32 %v4053_v36, %v4053_v36  ;;  %v1299_v26 = vsel %vm1183_vm0, %v4053_v36, 0.0 }
 0x1e6   :  { %v1294_v23 = vadd.f32 %v1293_v14, %v1292_v48  ;;  %v1599_v59 = vadd.f32 %v1598_v61, %v1597_v2  ;;  %v4071_v48 = vadd.f32 %v3467_v37, %v3458_v30  ;;  %v1604_v14 = vsel %vm1183_vm0, %v1448_v41, 0.0 }
 0x1e7   :  { %v1450_v55 = vmul.f32 %v4062_v54, %v4062_v54  ;;  %v1301_v30 = vsel %vm1183_vm0, %v4062_v54, 0.0 }
 0x1e8   :  { %v1296_v21 = vadd.f32 %v1295_v18, %v1294_v23  ;;  %v1601_v32 = vadd.f32 %v1600_v6, %v1599_v59  ;;  %v4080_v23 = vadd.f32 %v3467_v37, %v3462_v34  ;;  %v1606_v18 = vsel %vm1183_vm0, %v1449_v33, 0.0 }
 0x1e9   :  { %v1451_v41 = vmul.f32 %v4071_v48, %v4071_v48  ;;  %v1303_v34 = vsel %vm1183_vm0, %v4071_v48, 0.0 }
 0x1ea   :  { %v1298_v2 = vadd.f32 %v1297_v22, %v1296_v21  ;;  %v1603_v61 = vadd.f32 %v1602_v10, %v1601_v32  ;;  %v4089_v21 = vadd.f32 %v3467_v37, %v3474_v40  ;;  %v1608_v22 = vsel %vm1183_vm0, %v1450_v55, 0.0 }
 0x1eb   :  { %v1452_v33 = vmul.f32 %v4080_v23, %v4080_v23 }
 0x1ec   :  { %v1300_v59 = vadd.f32 %v1299_v26, %v1298_v2  ;;  %v1605_v6 = vadd.f32 %v1604_v14, %v1603_v61  ;;  %v4099_v2 = vld [vmem:[%s6051_s2] ss:$0 sm:$0xff]  ;;  %v1610_v14 = vsel %vm1183_vm0, %v1451_v41, 0.0  ;;  %v1305_v26 = vsel %vm1183_vm0, %v4080_v23, 0.0 }
 0x1ed   :  { %v4103_v61 = vadd.f32 %v4099_v2, %v3484_v46  ;;  %v1453_v55 = vmul.f32 %v4089_v21, %v4089_v21  ;;  %v1307_v46 = vsel %vm1183_vm0, %v4089_v21, 0.0 }
 0x1ee   :  { %v1302_v32 = vadd.f32 %v1301_v30, %v1300_v59  ;;  %v1607_v10 = vadd.f32 %v1606_v18, %v1605_v6  ;;  %v4112_v59 = vadd.f32 %v4099_v2, %v3507_v63  ;;  %v1612_v30 = vsel %vm1183_vm0, %v1452_v33, 0.0 }
 0x1ef   :  { %v1454_v41 = vmul.f32 %v4103_v61, %v4103_v61  ;;  %v1309_v63 = vsel %vm1183_vm0, %v4103_v61, 0.0 }
 0x1f0   :  { %v1304_v37 = vadd.f32 %v1303_v34, %v1302_v32  ;;  %v1609_v40 = vadd.f32 %v1608_v22, %v1607_v10  ;;  %v4121_v32 = vadd.f32 %v4099_v2, %v3515_v5  ;;  %v1614_v34 = vsel %vm1183_vm0, %v1453_v55, 0.0 }
 0x1f1   :  { %v1455_v33 = vmul.f32 %v4112_v59, %v4112_v59  ;;  %v1311_v5 = vsel %vm1183_vm0, %v4112_v59, 0.0 }
 0x1f2   :  { %v1306_v6 = vadd.f32 %v1305_v26, %v1304_v37  ;;  %v1611_v18 = vadd.f32 %v1610_v14, %v1609_v40  ;;  %v4130_v37 = vadd.f32 %v4099_v2, %v3537_v47  ;;  %v1616_v26 = vsel %vm1183_vm0, %v1454_v41, 0.0 }
 0x1f3   :  { %v1456_v55 = vmul.f32 %v4121_v32, %v4121_v32  ;;  %v1313_v47 = vsel %vm1183_vm0, %v4121_v32, 0.0 }
 0x1f4   :  { %v1613_v10 = vadd.f32 %v1612_v30, %v1611_v18  ;;  %v1308_v22 = vadd.f32 %v1307_v46, %v1306_v6  ;;  %v4139_v6 = vadd.f32 %v4099_v2, %v3549_v56  ;;  %v1618_v46 = vsel %vm1183_vm0, %v1455_v33, 0.0 }
 0x1f5   :  { %v1457_v41 = vmul.f32 %v4130_v37, %v4130_v37  ;;  %v1315_v56 = vsel %vm1183_vm0, %v4130_v37, 0.0 }
 0x1f6   :  { %v1310_v40 = vadd.f32 %v1309_v63, %v1308_v22  ;;  %v1615_v14 = vadd.f32 %v1614_v34, %v1613_v10  ;;  %v4148_v10 = vadd.f32 %v4099_v2, %v3571_v24  ;;  %v1620_v63 = vsel %vm1183_vm0, %v1456_v55, 0.0 }
 0x1f7   :  { %v1458_v33 = vmul.f32 %v4139_v6, %v4139_v6  ;;  %v1317_v24 = vsel %vm1183_vm0, %v4139_v6, 0.0 }
 0x1f8   :  { %v1312_v18 = vadd.f32 %v1311_v5, %v1310_v40  ;;  %v1617_v30 = vadd.f32 %v1616_v26, %v1615_v14  ;;  %v4157_v40 = vadd.f32 %v4099_v2, %v3582_v25  ;;  %v1622_v5 = vsel %vm1183_vm0, %v1457_v41, 0.0 }
 0x1f9   :  { %v1459_v55 = vmul.f32 %v4148_v10, %v4148_v10  ;;  %v1319_v25 = vsel %vm1183_vm0, %v4148_v10, 0.0 }
 0x1fa   :  { %v1314_v22 = vadd.f32 %v1313_v47, %v1312_v18  ;;  %v1619_v34 = vadd.f32 %v1618_v46, %v1617_v30  ;;  %v4166_v18 = vadd.f32 %v4099_v2, %v3604_v15  ;;  %v1624_v47 = vsel %vm1183_vm0, %v1458_v33, 0.0 }
 0x1fb   :  { %v1460_v41 = vmul.f32 %v4157_v40, %v4157_v40  ;;  %v1321_v15 = vsel %vm1183_vm0, %v4157_v40, 0.0 }
 0x1fc   :  { %v1316_v14 = vadd.f32 %v1315_v56, %v1314_v22  ;;  %v1621_v26 = vadd.f32 %v1620_v63, %v1619_v34  ;;  %v4175_v22 = vadd.f32 %v4099_v2, %v3611_v9  ;;  %v1626_v56 = vsel %vm1183_vm0, %v1459_v55, 0.0 }
 0x1fd   :  { %v1461_v33 = vmul.f32 %v4166_v18, %v4166_v18  ;;  %v1323_v9 = vsel %vm1183_vm0, %v4166_v18, 0.0 }
 0x1fe   :  { %v1318_v30 = vadd.f32 %v1317_v24, %v1316_v14  ;;  %v1623_v46 = vadd.f32 %v1622_v5, %v1621_v26  ;;  %v4184_v14 = vadd.f32 %v4099_v2, %v3633_v16  ;;  %v1628_v24 = vsel %vm1183_vm0, %v1460_v41, 0.0 }
 0x1ff   :  { %v1462_v55 = vmul.f32 %v4175_v22, %v4175_v22  ;;  %v1325_v16 = vsel %vm1183_vm0, %v4175_v22, 0.0 }
 0x200   :  { %v1320_v34 = vadd.f32 %v1319_v25, %v1318_v30  ;;  %v1625_v63 = vadd.f32 %v1624_v47, %v1623_v46  ;;  %v4193_v30 = vadd.f32 %v4099_v2, %v3645_v50  ;;  %v1630_v25 = vsel %vm1183_vm0, %v1461_v33, 0.0 }
 0x201   :  { %v1463_v41 = vmul.f32 %v4184_v14, %v4184_v14  ;;  %v1327_v50 = vsel %vm1183_vm0, %v4184_v14, 0.0 }
 0x202   :  { %v1322_v26 = vadd.f32 %v1321_v15, %v1320_v34  ;;  %v1627_v5 = vadd.f32 %v1626_v56, %v1625_v63  ;;  %v4202_v34 = vadd.f32 %v4099_v2, %v3665_v8  ;;  %v1632_v15 = vsel %vm1183_vm0, %v1462_v55, 0.0 }
 0x203   :  { %v1464_v33 = vmul.f32 %v4193_v30, %v4193_v30  ;;  %v1329_v8 = vsel %vm1183_vm0, %v4193_v30, 0.0 }
 0x204   :  { %v1324_v46 = vadd.f32 %v1323_v9, %v1322_v26  ;;  %v1629_v47 = vadd.f32 %v1628_v24, %v1627_v5  ;;  %v4211_v26 = vadd.f32 %v4099_v2, %v3674_v49  ;;  %v1634_v9 = vsel %vm1183_vm0, %v1463_v41, 0.0 }
 0x205   :  { %v1465_v55 = vmul.f32 %v4202_v34, %v4202_v34  ;;  %v1331_v49 = vsel %vm1183_vm0, %v4202_v34, 0.0 }
 0x206   :  { %v1326_v63 = vadd.f32 %v1325_v16, %v1324_v46  ;;  %v1631_v56 = vadd.f32 %v1630_v25, %v1629_v47  ;;  %v4220_v46 = vadd.f32 %v4099_v2, %v3694_v52  ;;  %v1636_v16 = vsel %vm1183_vm0, %v1464_v33, 0.0 }
 0x207   :  { %v1466_v41 = vmul.f32 %v4211_v26, %v4211_v26  ;;  %v1333_v52 = vsel %vm1183_vm0, %v4211_v26, 0.0 }
 0x208   :  { %v1328_v5 = vadd.f32 %v1327_v50, %v1326_v63  ;;  %v1633_v24 = vadd.f32 %v1632_v15, %v1631_v56  ;;  %v4229_v63 = vadd.f32 %v4099_v2, %v3699_v44  ;;  %v1638_v50 = vsel %vm1183_vm0, %v1465_v55, 0.0 }
 0x209   :  { %v1467_v33 = vmul.f32 %v4220_v46, %v4220_v46  ;;  %v1335_v44 = vsel %vm1183_vm0, %v4220_v46, 0.0 }
 0x20a   :  { %v1330_v47 = vadd.f32 %v1329_v8, %v1328_v5  ;;  %v1635_v25 = vadd.f32 %v1634_v9, %v1633_v24  ;;  %v4238_v5 = vadd.f32 %v4099_v2, %v3719_v39  ;;  %v1640_v8 = vsel %vm1183_vm0, %v1466_v41, 0.0 }
 0x20b   :  { %v1468_v55 = vmul.f32 %v4229_v63, %v4229_v63  ;;  %v1337_v39 = vsel %vm1183_vm0, %v4229_v63, 0.0 }
 0x20c   :  { %v1332_v56 = vadd.f32 %v1331_v49, %v1330_v47  ;;  %v1637_v15 = vadd.f32 %v1636_v16, %v1635_v25  ;;  %v4247_v47 = vadd.f32 %v4099_v2, %v3729_v29  ;;  %v1642_v49 = vsel %vm1183_vm0, %v1467_v33, 0.0 }
 0x20d   :  { %v1469_v41 = vmul.f32 %v4238_v5, %v4238_v5  ;;  %v1339_v29 = vsel %vm1183_vm0, %v4238_v5, 0.0 }
 0x20e   :  { %v1334_v24 = vadd.f32 %v1333_v52, %v1332_v56  ;;  %v1639_v9 = vadd.f32 %v1638_v50, %v1637_v15  ;;  %v4256_v56 = vadd.f32 %v4099_v2, %v3747_v57  ;;  %v1644_v52 = vsel %vm1183_vm0, %v1468_v55, 0.0 }
 0x20f   :  { %v1470_v33 = vmul.f32 %v4247_v47, %v4247_v47  ;;  %v1341_v57 = vsel %vm1183_vm0, %v4247_v47, 0.0 }
 0x210   :  { %v1641_v25 = vadd.f32 %v1640_v8, %v1639_v9  ;;  %v1336_v16 = vadd.f32 %v1335_v44, %v1334_v24  ;;  %v4265_v24 = vadd.f32 %v4099_v2, %v3755_v20  ;;  %v1646_v44 = vsel %vm1183_vm0, %v1469_v41, 0.0 }
 0x211   :  { %v1471_v55 = vmul.f32 %v4256_v56, %v4256_v56  ;;  %v1343_v20 = vsel %vm1183_vm0, %v4256_v56, 0.0 }
 0x212   :  { %v1643_v15 = vadd.f32 %v1642_v49, %v1641_v25  ;;  %v1338_v50 = vadd.f32 %v1337_v39, %v1336_v16  ;;  %v4274_v25 = vadd.f32 %v4099_v2, %v3773_v35  ;;  %v1648_v39 = vsel %vm1183_vm0, %v1470_v33, 0.0 }
 0x213   :  { %v1472_v41 = vmul.f32 %v4265_v24, %v4265_v24  ;;  %v1345_v35 = vsel %vm1183_vm0, %v4265_v24, 0.0 }
 0x214   :  { %v1645_v9 = vadd.f32 %v1644_v52, %v1643_v15  ;;  %v1340_v8 = vadd.f32 %v1339_v29, %v1338_v50  ;;  %v4283_v15 = vadd.f32 %v4099_v2, %v3778_v60  ;;  %v1650_v29 = vsel %vm1183_vm0, %v1471_v55, 0.0 }
 0x215   :  { %v1473_v33 = vmul.f32 %v4274_v25, %v4274_v25  ;;  %v1347_v60 = vsel %vm1183_vm0, %v4274_v25, 0.0 }
 0x216   :  { %v1647_v16 = vadd.f32 %v1646_v44, %v1645_v9  ;;  %v1342_v49 = vadd.f32 %v1341_v57, %v1340_v8  ;;  %6299 = vst [vmem:[#allocation55_spill] sm:$0xff] %v4283_v15  ;;  %v4292_v9 = vadd.f32 %v4099_v2, %v3796_v27  ;;  %v1652_v57 = vsel %vm1183_vm0, %v1472_v41, 0.0 }
 0x217   :  { %v1474_v55 = vmul.f32 %v4283_v15, %v4283_v15  ;;  %v1349_v27 = vsel %vm1183_vm0, %v4283_v15, 0.0 }
 0x218   :  { %v1649_v50 = vadd.f32 %v1648_v39, %v1647_v16  ;;  %v1344_v52 = vadd.f32 %v1343_v20, %v1342_v49  ;;  %v4301_v16 = vadd.f32 %v4099_v2, %v3805_v13  ;;  %v1654_v20 = vsel %vm1183_vm0, %v1473_v33, 0.0 }
 0x219   :  { %v1475_v41 = vmul.f32 %v4292_v9, %v4292_v9  ;;  %v1351_v13 = vsel %vm1183_vm0, %v4292_v9, 0.0 }
 0x21a   :  { %v1651_v8 = vadd.f32 %v1650_v29, %v1649_v50  ;;  %v1346_v44 = vadd.f32 %v1345_v35, %v1344_v52  ;;  %6300 = vst [vmem:[#allocation56_spill] sm:$0xff] %v4301_v16  ;;  %v4310_v50 = vadd.f32 %v4099_v2, %v3823_v4  ;;  %v1656_v35 = vsel %vm1183_vm0, %v1474_v55, 0.0 }
 0x21b   :  { %v1476_v33 = vmul.f32 %v4301_v16, %v4301_v16  ;;  %v1353_v4 = vsel %vm1183_vm0, %v4301_v16, 0.0 }
 0x21c   :  { %v1653_v49 = vadd.f32 %v1652_v57, %v1651_v8  ;;  %v1348_v39 = vadd.f32 %v1347_v60, %v1346_v44  ;;  %6301 = vst [vmem:[#allocation57_spill] sm:$0xff] %v4310_v50  ;;  %v4319_v8 = vadd.f32 %v4099_v2, %v3831_v51  ;;  %v1658_v60 = vsel %vm1183_vm0, %v1475_v41, 0.0 }
 0x21d   :  { %v1477_v55 = vmul.f32 %v4310_v50, %v4310_v50  ;;  %v1355_v51 = vsel %vm1183_vm0, %v4310_v50, 0.0 }
 0x21e   :  { %v1655_v52 = vadd.f32 %v1654_v20, %v1653_v49  ;;  %v1350_v29 = vadd.f32 %v1349_v27, %v1348_v39  ;;  %6302 = vst [vmem:[#allocation58_spill] sm:$0xff] %v4319_v8  ;;  %v4328_v49 = vadd.f32 %v4099_v2, %v3849_v1  ;;  %v1660_v27 = vsel %vm1183_vm0, %v1476_v33, 0.0 }
 0x21f   :  { %v1478_v41 = vmul.f32 %v4319_v8, %v4319_v8  ;;  %v1357_v1 = vsel %vm1183_vm0, %v4319_v8, 0.0 }
 0x220   :  { %v1657_v44 = vadd.f32 %v1656_v35, %v1655_v52  ;;  %v1352_v57 = vadd.f32 %v1351_v13, %v1350_v29  ;;  %6303 = vst [vmem:[#allocation59_spill] sm:$0xff] %v4328_v49  ;;  %v4337_v52 = vadd.f32 %v4099_v2, %v3854_v43  ;;  %v1662_v13 = vsel %vm1183_vm0, %v1477_v55, 0.0 }
 0x221   :  { %v1479_v33 = vmul.f32 %v4328_v49, %v4328_v49  ;;  %v1359_v43 = vsel %vm1183_vm0, %v4328_v49, 0.0 }
 0x222   :  { %v1659_v39 = vadd.f32 %v1658_v60, %v1657_v44  ;;  %v1354_v20 = vadd.f32 %v1353_v4, %v1352_v57  ;;  %6304 = vst [vmem:[#allocation60_spill] sm:$0xff] %v4337_v52  ;;  %v4346_v44 = vadd.f32 %v4099_v2, %v3872_v19  ;;  %v1664_v4 = vsel %vm1183_vm0, %v1478_v41, 0.0 }
 0x223   :  { %v1480_v55 = vmul.f32 %v4337_v52, %v4337_v52  ;;  %v1361_v19 = vsel %vm1183_vm0, %v4337_v52, 0.0 }
 0x224   :  { %v1661_v29 = vadd.f32 %v1660_v27, %v1659_v39  ;;  %v1356_v35 = vadd.f32 %v1355_v51, %v1354_v20  ;;  %6305 = vst [vmem:[#allocation61_spill] sm:$0xff] %v4346_v44  ;;  %v4355_v39 = vadd.f32 %v4099_v2, %v3881_v53  ;;  %v1666_v51 = vsel %vm1183_vm0, %v1479_v33, 0.0 }
 0x225   :  { %v1481_v41 = vmul.f32 %v4346_v44, %v4346_v44  ;;  %v1668_v49 = vsel %vm1183_vm0, %v1480_v55, 0.0  ;;  %v1363_v53 = vsel %vm1183_vm0, %v4346_v44, 0.0  ;;  %v6313_v44 = vld [vmem:[#allocation50_spill] sm:$0xff] }
 0x226   :  { %v1663_v57 = vadd.f32 %v1662_v13, %v1661_v29  ;;  %v1358_v60 = vadd.f32 %v1357_v1, %v1356_v35  ;;  %6306 = vst [vmem:[#allocation62_spill] sm:$0xff] %v4355_v39  ;;  %v6307_v29 = vld [vmem:[#allocation44_spill] sm:$0xff]  ;;  %v1482_v33 = vmul.f32 %v4355_v39, %v4355_v39 }
 0x227   :  { %v4364_v35 = vadd.f32 %v4099_v2, %v6307_v29  ;;  %v1670_v52 = vsel %vm1183_vm0, %v1481_v41, 0.0 }
 0x228   :  { %v1665_v20 = vadd.f32 %v1664_v4, %v1663_v57  ;;  %v1360_v27 = vadd.f32 %v1359_v43, %v1358_v60  ;;  %v6309_v57 = vld [vmem:[#allocation46_spill] sm:$0xff] }
 0x229   :  { %6308 = vst [vmem:[#allocation44_spill] sm:$0xff] %v4364_v35  ;;  %v4373_v60 = vadd.f32 %v4099_v2, %v6309_v57  ;;  %v1483_v55 = vmul.f32 %v4364_v35, %v4364_v35  ;;  %v4386_v57 = vadd.f32 %v4099_v2, %v6313_v44  ;;  %v1367_v41 = vsel %vm1183_vm0, %v4364_v35, 0.0 }
 0x22a   :  { %v1667_v13 = vadd.f32 %v1666_v51, %v1665_v20  ;;  %v1362_v1 = vadd.f32 %v1361_v19, %v1360_v27  ;;  %v1365_v20 = vsel %vm1183_vm0, %v4355_v39, 0.0  ;;  %v6311_v27 = vld [vmem:[#allocation48_spill] sm:$0xff]  ;;  %v4400_v44 = vadd.f32 %v4099_v2, %v3945_v3 }
 0x22b   :  { %6310 = vst [vmem:[#allocation46_spill] sm:$0xff] %v4373_v60  ;;  %v4382_v51 = vadd.f32 %v4099_v2, %v6311_v27  ;;  %6314 = vst [vmem:[#allocation50_spill] sm:$0xff] %v4386_v57  ;;  %v1674_v39 = vsel %vm1183_vm0, %v1483_v55, 0.0 }
 0x22c   :  { %v1669_v4 = vadd.f32 %v1668_v49, %v1667_v13  ;;  %v1364_v43 = vadd.f32 %v1363_v53, %v1362_v1  ;;  %v1672_v49 = vsel %vm1183_vm0, %v1482_v33, 0.0  ;;  %v1484_v13 = vmul.f32 %v4373_v60, %v4373_v60  ;;  %6315 = vst [vmem:[#allocation63_spill] sm:$0xff] %v4400_v44 }
 0x22d   :  { %6312 = vst [vmem:[#allocation48_spill] sm:$0xff] %v4382_v51  ;;  %v1371_v55 = vsel %vm1183_vm0, %v4382_v51, 0.0 }
 0x22e   :  { %v1671_v19 = vadd.f32 %v1670_v52, %v1669_v4  ;;  %v1366_v29 = vadd.f32 %v1365_v20, %v1364_v43  ;;  %v1369_v52 = vsel %vm1183_vm0, %v4373_v60, 0.0  ;;  %v1485_v4 = vmul.f32 %v4382_v51, %v4382_v51 }
 0x22f   :  { %v1486_v20 = vmul.f32 %v4386_v57, %v4386_v57  ;;  %v1676_v27 = vsel %vm1183_vm0, %v1484_v13, 0.0  ;;  %v1487_v13 = vmul.f32 %v4400_v44, %v4400_v44 }
 0x230   :  { %v1673_v1 = vadd.f32 %v1672_v49, %v1671_v19  ;;  %v1368_v53 = vadd.f32 %v1367_v41, %v1366_v29  ;;  %v4409_v19 = vadd.f32 %v4099_v2, %v3952_v45  ;;  %v4413_v29 = vadd.f32 %v4099_v2, %v3971_v11 }
 0x231   :  { %v1373_v41 = vsel %vm1183_vm0, %v4386_v57, 0.0  ;;  %v1375_v45 = vsel %vm1183_vm0, %v4400_v44, 0.0  ;;  %v6375_v57 = vld [vmem:[#allocation44_spill] sm:$0xff] }
 0x232   :  { %v1675_v33 = vadd.f32 %v1674_v39, %v1673_v1  ;;  %v1370_v43 = vadd.f32 %v1369_v52, %v1368_v53  ;;  %6316 = vst [vmem:[#allocation64_spill] sm:$0xff] %v4409_v19  ;;  %6317 = vst [vmem:[#allocation65_spill] sm:$0xff] %v4413_v29  ;;  %v1678_v39 = vsel %vm1183_vm0, %v1485_v4, 0.0  ;;  %v1680_v52 = vsel %vm1183_vm0, %v1486_v20, 0.0 }
 0x233   :  { %v1488_v11 = vmul.f32 %v4409_v19, %v4409_v19  ;;  %v4429_v4 = vadd.f32 %v4099_v2, %v3977_v28  ;;  %v1377_v20 = vsel %vm1183_vm0, %v4409_v19, 0.0 }
 0x234   :  { %v1677_v3 = vadd.f32 %v1676_v27, %v1675_v33  ;;  %v1372_v49 = vadd.f32 %v1371_v55, %v1370_v43  ;;  %v1489_v33 = vmul.f32 %v4413_v29, %v4413_v29  ;;  %v1682_v55 = vsel %vm1183_vm0, %v1487_v13, 0.0 }
 0x235   :  { %6318 = vst [vmem:[#allocation66_spill] sm:$0xff] %v4429_v4  ;;  %v1490_v28 = vmul.f32 %v4429_v4, %v4429_v4  ;;  %v1381_v13 = vsel %vm1183_vm0, %v4429_v4, 0.0 }
 0x236   :  { %v1679_v1 = vadd.f32 %v1678_v39, %v1677_v3  ;;  %v1374_v53 = vadd.f32 %v1373_v41, %v1372_v49  ;;  %v1379_v3 = vsel %vm1183_vm0, %v4413_v29, 0.0  ;;  %v1684_v41 = vsel %vm1183_vm0, %v1488_v11, 0.0 }
 0x237   :  { %v1686_v51 = vsel %vm1183_vm0, %v1489_v33, 0.0 }
 0x238   :  { %v1681_v43 = vadd.f32 %v1680_v52, %v1679_v1  ;;  %v1376_v27 = vadd.f32 %v1375_v45, %v1374_v53  ;;  %v1688_v45 = vsel %vm1183_vm0, %v1490_v28, 0.0 }
 0x23a   :  { %v1683_v49 = vadd.f32 %v1682_v55, %v1681_v43  ;;  %v1378_v39 = vadd.f32 %v1377_v20, %v1376_v27 }
 0x23c   :  { %v1685_v2 = vadd.f32 %v1684_v41, %v1683_v49  ;;  %v1380_v1 = vadd.f32 %v1379_v3, %v1378_v39 }
 0x23e   :  { %v1687_v53 = vadd.f32 %v1686_v51, %v1685_v2  ;;  %v1382_v52 = vadd.f32 %v1381_v13, %v1380_v1  ;;  %v6319_v2 = vld [vmem:[#allocation3_spill] sm:$0xff]  ;;  %v6320_v1 = vld [vmem:[#allocation2_spill] sm:$0xff]  ;;  %v6321_v13 = vld [vmem:[#allocation4_spill] sm:$0xff] }
 0x240   :  { %v1383_v60 = vrot.slane %v1382_v52, 4  ;;  %v1689_v35 = vadd.f32 %v1688_v45, %v1687_v53  ;;  %v6324_v45 = vld [vmem:[#allocation7_spill] sm:$0xff] }
 0x242   :  { %v1384_v43 = vadd.f32 %v1383_v60, %v1382_v52  ;;  %v1690_v27 = vrot.slane %v1689_v35, 4  ;;  %v6367_v60 = vld [vmem:[#allocation53_spill] sm:$0xff] }
 0x244   :  { %v1385_v55 = vrot.slane %v1384_v43, 2  ;;  %v1691_v11 = vadd.f32 %v1690_v27, %v1689_v35  ;;  %v6325_v27 = vld [vmem:[#allocation8_spill] sm:$0xff]  ;;  %v6374_v35 = vld [vmem:[#allocation62_spill] sm:$0xff] }
 0x246   :  { %v1386_v20 = vadd.f32 %v1385_v55, %v1384_v43  ;;  %v1692_v33 = vrot.slane %v1691_v11, 2  ;;  %v6359_v43 = vld [vmem:[#allocation42_spill] sm:$0xff]  ;;  %v6360_v55 = vld [vmem:[#allocation43_spill] sm:$0xff] }
 0x248   :  { %v1387_v8 = vrot.slane %v1386_v20, 1  ;;  %v1693_v50 = vadd.f32 %v1692_v33, %v1691_v11  ;;  %v6376_v11 = vld [vmem:[#allocation46_spill] sm:$0xff]  ;;  %v6377_v33 = vld [vmem:[#allocation48_spill] sm:$0xff] }
 0x24a   :  { %v1388_v16 = vadd.f32 %v1387_v8, %v1386_v20  ;;  %v1694_v49 = vrot.slane %v1693_v50, 1  ;;  %v6322_v8 = vld [vmem:[#allocation5_spill] sm:$0xff] }
 0x24b   :  { %v6361_v20 = vld [vmem:[#allocation45_spill] sm:$0xff] }
 0x24c   :  { %v4443_v3 = vmul.f32 0.00125, %v1388_v16  ;;  %v1695_v39 = vadd.f32 %v1694_v49, %v1693_v50  ;;  %v6323_v16 = vld [vmem:[#allocation6_spill] sm:$0xff]  ;;  %v6362_v49 = vld [vmem:[#allocation47_spill] sm:$0xff] }
 0x24d   :  { %v6366_v50 = vld [vmem:[#allocation54_spill] sm:$0xff] }
 0x24e   :  { %v1696_v41 = vmul.f32 0.00125, %v1695_v39  ;;  %v1697_v51 = vmul.f32 %v4443_v3, %v4443_v3  ;;  %v6371_v39 = vld [vmem:[#allocation59_spill] sm:$0xff]  ;;  %v6378_v19 = vsub.f32 %v6319_v2, %v4443_v3  ;;  %v6380_v44 = vsub.f32 %v6320_v1, %v4443_v3 }
 0x24f   :  { %v6382_v53 = vsub.f32 %v6321_v13, %v4443_v3  ;;  %v6384_v29 = vsub.f32 %v6322_v8, %v4443_v3 }
 0x250   :  { %v1698_v28 = vsub.f32 %v1696_v41, %v1697_v51  ;;  %v6363_v41 = vld [vmem:[#allocation49_spill] sm:$0xff] }
 0x251   :  { %v6373_v51 = vld [vmem:[#allocation61_spill] sm:$0xff] }
 0x252   :  { %v1799_v52 = vadd.f32 1e-05, %v1698_v28 }
 0x254   :  { %3022 = vrsqrt.f32 %v1799_v52 }
 0x25e   :  { %v4639_v15 = vpop.eup %3022 }
 0x25f   :  { %v4653_v52 = vmul.f32 %v4639_v15, %v6378_v19  ;;  %v4659_v28 = vmul.f32 %v4639_v15, %v6380_v44  ;;  %v4665_v4 = vmul.f32 %v4639_v15, %v6382_v53  ;;  %v4671_v2 = vmul.f32 %v4639_v15, %v6384_v29  ;;  %v6392_v29 = vld [vmem:[#allocation9_spill] sm:$0xff] }
 0x260   :  { %v6386_v19 = vsub.f32 %v6323_v16, %v4443_v3  ;;  %v6388_v44 = vsub.f32 %v6324_v45, %v4443_v3  ;;  %v6390_v53 = vsub.f32 %v6325_v27, %v4443_v3 }
 0x261   :  { %6379 = vst [vmem:[#allocation3_spill] sm:$0xff] %v4653_v52  ;;  %6381 = vst [vmem:[#allocation2_spill] sm:$0xff] %v4659_v28 }
 0x262   :  { %6383 = vst [vmem:[#allocation4_spill] sm:$0xff] %v4665_v4  ;;  %6385 = vst [vmem:[#allocation5_spill] sm:$0xff] %v4671_v2  ;;  %v4677_v1 = vmul.f32 %v4639_v15, %v6386_v19  ;;  %v4683_v13 = vmul.f32 %v4639_v15, %v6388_v44  ;;  %v4689_v8 = vmul.f32 %v4639_v15, %v6390_v53  ;;  %v6395_v19 = vld [vmem:[#allocation10_spill] sm:$0xff]  ;;  %v6398_v44 = vld [vmem:[#allocation11_spill] sm:$0xff] }
 0x263   :  { %v6393_v2 = vsub.f32 %v6392_v29, %v4443_v3  ;;  %v6401_v53 = vld [vmem:[#allocation12_spill] sm:$0xff] }
 0x264   :  { %6387 = vst [vmem:[#allocation6_spill] sm:$0xff] %v4677_v1  ;;  %6389 = vst [vmem:[#allocation7_spill] sm:$0xff] %v4683_v13  ;;  %v6396_v1 = vsub.f32 %v6395_v19, %v4443_v3  ;;  %v6399_v13 = vsub.f32 %v6398_v44, %v4443_v3 }
 0x265   :  { %6391 = vst [vmem:[#allocation8_spill] sm:$0xff] %v4689_v8  ;;  %v4695_v16 = vmul.f32 %v4639_v15, %v6393_v2  ;;  %v6402_v8 = vsub.f32 %v6401_v53, %v4443_v3  ;;  %v6404_v2 = vld [vmem:[#allocation13_spill] sm:$0xff] }
 0x266   :  { %v4701_v45 = vmul.f32 %v4639_v15, %v6396_v1  ;;  %v4707_v27 = vmul.f32 %v4639_v15, %v6399_v13  ;;  %v6407_v1 = vld [vmem:[#allocation14_spill] sm:$0xff]  ;;  %v6410_v13 = vld [vmem:[#allocation15_spill] sm:$0xff] }
 0x267   :  { %6394 = vst [vmem:[#allocation42_spill] sm:$0xff] %v4695_v16  ;;  %v4713_v29 = vmul.f32 %v4639_v15, %v6402_v8  ;;  %v6405_v16 = vsub.f32 %v6404_v2, %v4443_v3  ;;  %v6413_v8 = vld [vmem:[#allocation16_spill] sm:$0xff] }
 0x268   :  { %6397 = vst [vmem:[#allocation43_spill] sm:$0xff] %v4701_v45  ;;  %6400 = vst [vmem:[#allocation45_spill] sm:$0xff] %v4707_v27  ;;  %v6408_v45 = vsub.f32 %v6407_v1, %v4443_v3  ;;  %v6411_v27 = vsub.f32 %v6410_v13, %v4443_v3 }
 0x269   :  { %6403 = vst [vmem:[#allocation47_spill] sm:$0xff] %v4713_v29  ;;  %v4719_v19 = vmul.f32 %v4639_v15, %v6405_v16  ;;  %v6414_v29 = vsub.f32 %v6413_v8, %v4443_v3  ;;  %v6416_v16 = vld [vmem:[#allocation17_spill] sm:$0xff] }
 0x26a   :  { %v4725_v44 = vmul.f32 %v4639_v15, %v6408_v45  ;;  %v4731_v53 = vmul.f32 %v4639_v15, %v6411_v27  ;;  %v6419_v45 = vld [vmem:[#allocation18_spill] sm:$0xff]  ;;  %v6422_v27 = vld [vmem:[#allocation19_spill] sm:$0xff] }
 0x26b   :  { %6406 = vst [vmem:[#allocation49_spill] sm:$0xff] %v4719_v19  ;;  %v4737_v2 = vmul.f32 %v4639_v15, %v6414_v29  ;;  %v6417_v19 = vsub.f32 %v6416_v16, %v4443_v3  ;;  %v6425_v29 = vld [vmem:[#allocation20_spill] sm:$0xff] }
 0x26c   :  { %6409 = vst [vmem:[#allocation54_spill] sm:$0xff] %v4725_v44  ;;  %6412 = vst [vmem:[#allocation53_spill] sm:$0xff] %v4731_v53  ;;  %v6420_v44 = vsub.f32 %v6419_v45, %v4443_v3  ;;  %v6423_v53 = vsub.f32 %v6422_v27, %v4443_v3 }
 0x26d   :  { %6415 = vst [vmem:[#allocation59_spill] sm:$0xff] %v4737_v2  ;;  %v4743_v1 = vmul.f32 %v4639_v15, %v6417_v19  ;;  %v6426_v2 = vsub.f32 %v6425_v29, %v4443_v3  ;;  %v6428_v19 = vld [vmem:[#allocation21_spill] sm:$0xff] }
 0x26e   :  { %v4749_v13 = vmul.f32 %v4639_v15, %v6420_v44  ;;  %v4755_v8 = vmul.f32 %v4639_v15, %v6423_v53  ;;  %v6431_v44 = vld [vmem:[#allocation22_spill] sm:$0xff]  ;;  %v6434_v53 = vld [vmem:[#allocation23_spill] sm:$0xff] }
 0x26f   :  { %6418 = vst [vmem:[#allocation61_spill] sm:$0xff] %v4743_v1  ;;  %v4761_v16 = vmul.f32 %v4639_v15, %v6426_v2  ;;  %v6429_v1 = vsub.f32 %v6428_v19, %v4443_v3  ;;  %v6437_v2 = vld [vmem:[#allocation24_spill] sm:$0xff] }
 0x270   :  { %6421 = vst [vmem:[#allocation62_spill] sm:$0xff] %v4749_v13  ;;  %6424 = vst [vmem:[#allocation44_spill] sm:$0xff] %v4755_v8  ;;  %v6432_v13 = vsub.f32 %v6431_v44, %v4443_v3  ;;  %v6435_v8 = vsub.f32 %v6434_v53, %v4443_v3 }
 0x271   :  { %6427 = vst [vmem:[#allocation46_spill] sm:$0xff] %v4761_v16  ;;  %v4767_v45 = vmul.f32 %v4639_v15, %v6429_v1  ;;  %v6438_v16 = vsub.f32 %v6437_v2, %v4443_v3  ;;  %v6440_v1 = vld [vmem:[#allocation25_spill] sm:$0xff] }
 0x272   :  { %v4773_v27 = vmul.f32 %v4639_v15, %v6432_v13  ;;  %v4779_v29 = vmul.f32 %v4639_v15, %v6435_v8  ;;  %v6443_v13 = vld [vmem:[#allocation26_spill] sm:$0xff]  ;;  %v6446_v8 = vld [vmem:[#allocation27_spill] sm:$0xff] }
 0x273   :  { %6430 = vst [vmem:[#allocation48_spill] sm:$0xff] %v4767_v45  ;;  %v4785_v19 = vmul.f32 %v4639_v15, %v6438_v16  ;;  %v6441_v45 = vsub.f32 %v6440_v1, %v4443_v3  ;;  %v6449_v16 = vld [vmem:[#allocation28_spill] sm:$0xff] }
 0x274   :  { %6433 = vst [vmem:[#allocation9_spill] sm:$0xff] %v4773_v27  ;;  %6436 = vst [vmem:[#allocation10_spill] sm:$0xff] %v4779_v29  ;;  %v6444_v27 = vsub.f32 %v6443_v13, %v4443_v3  ;;  %v6447_v29 = vsub.f32 %v6446_v8, %v4443_v3 }
 0x275   :  { %6439 = vst [vmem:[#allocation11_spill] sm:$0xff] %v4785_v19  ;;  %v4791_v44 = vmul.f32 %v4639_v15, %v6441_v45  ;;  %v6450_v19 = vsub.f32 %v6449_v16, %v4443_v3  ;;  %v6452_v45 = vld [vmem:[#allocation29_spill] sm:$0xff] }
 0x276   :  { %v4797_v53 = vmul.f32 %v4639_v15, %v6444_v27  ;;  %v4803_v2 = vmul.f32 %v4639_v15, %v6447_v29  ;;  %v6455_v27 = vld [vmem:[#allocation30_spill] sm:$0xff]  ;;  %v6458_v29 = vld [vmem:[#allocation31_spill] sm:$0xff] }
 0x277   :  { %6442 = vst [vmem:[#allocation12_spill] sm:$0xff] %v4791_v44  ;;  %v4809_v1 = vmul.f32 %v4639_v15, %v6450_v19  ;;  %v6453_v44 = vsub.f32 %v6452_v45, %v4443_v3  ;;  %v6461_v19 = vld [vmem:[#allocation32_spill] sm:$0xff] }
 0x278   :  { %6445 = vst [vmem:[#allocation13_spill] sm:$0xff] %v4797_v53  ;;  %6448 = vst [vmem:[#allocation14_spill] sm:$0xff] %v4803_v2  ;;  %v6456_v53 = vsub.f32 %v6455_v27, %v4443_v3  ;;  %v6459_v2 = vsub.f32 %v6458_v29, %v4443_v3 }
 0x279   :  { %6451 = vst [vmem:[#allocation15_spill] sm:$0xff] %v4809_v1  ;;  %v4815_v13 = vmul.f32 %v4639_v15, %v6453_v44  ;;  %v6462_v1 = vsub.f32 %v6461_v19, %v4443_v3  ;;  %v6464_v44 = vld [vmem:[#allocation33_spill] sm:$0xff] }
 0x27a   :  { %v4821_v8 = vmul.f32 %v4639_v15, %v6456_v53  ;;  %v4827_v16 = vmul.f32 %v4639_v15, %v6459_v2  ;;  %v6467_v53 = vld [vmem:[#allocation34_spill] sm:$0xff]  ;;  %v6470_v2 = vld [vmem:[#allocation35_spill] sm:$0xff] }
 0x27b   :  { %6454 = vst [vmem:[#allocation16_spill] sm:$0xff] %v4815_v13  ;;  %v4833_v45 = vmul.f32 %v4639_v15, %v6462_v1  ;;  %v6465_v13 = vsub.f32 %v6464_v44, %v4443_v3  ;;  %v6473_v1 = vld [vmem:[#allocation36_spill] sm:$0xff] }
 0x27c   :  { %6457 = vst [vmem:[#allocation17_spill] sm:$0xff] %v4821_v8  ;;  %6460 = vst [vmem:[#allocation18_spill] sm:$0xff] %v4827_v16  ;;  %v6468_v8 = vsub.f32 %v6467_v53, %v4443_v3  ;;  %v6471_v16 = vsub.f32 %v6470_v2, %v4443_v3 }
 0x27d   :  { %6463 = vst [vmem:[#allocation19_spill] sm:$0xff] %v4833_v45  ;;  %v4839_v27 = vmul.f32 %v4639_v15, %v6465_v13  ;;  %v6474_v45 = vsub.f32 %v6473_v1, %v4443_v3  ;;  %v6476_v13 = vld [vmem:[#allocation37_spill] sm:$0xff] }
 0x27e   :  { %v4845_v29 = vmul.f32 %v4639_v15, %v6468_v8  ;;  %v4851_v19 = vmul.f32 %v4639_v15, %v6471_v16  ;;  %v6479_v8 = vld [vmem:[#allocation38_spill] sm:$0xff]  ;;  %v6481_v16 = vld [vmem:[#allocation39_spill] sm:$0xff] }
 0x27f   :  { %6466 = vst [vmem:[#allocation20_spill] sm:$0xff] %v4839_v27  ;;  %v4857_v44 = vmul.f32 %v4639_v15, %v6474_v45  ;;  %v6477_v27 = vsub.f32 %v6476_v13, %v4443_v3  ;;  %v6483_v45 = vld [vmem:[#allocation40_spill] sm:$0xff] }
 0x280   :  { %6469 = vst [vmem:[#allocation21_spill] sm:$0xff] %v4845_v29  ;;  %6472 = vst [vmem:[#allocation22_spill] sm:$0xff] %v4851_v19  ;;  %v6480_v29 = vsub.f32 %v6479_v8, %v4443_v3  ;;  %v6482_v19 = vsub.f32 %v6481_v16, %v4443_v3 }
 0x281   :  { %6475 = vst [vmem:[#allocation23_spill] sm:$0xff] %v4857_v44  ;;  %v4863_v53 = vmul.f32 %v4639_v15, %v6477_v27  ;;  %v6484_v44 = vsub.f32 %v6483_v45, %v4443_v3  ;;  %v6485_v27 = vld [vmem:[#allocation41_spill] sm:$0xff] }
 0x282   :  { %v4869_v2 = vmul.f32 %v4639_v15, %v6480_v29  ;;  %v4875_v1 = vmul.f32 %v4639_v15, %v6482_v19  ;;  %v6487_v29 = vsub.f32 %v6359_v43, %v4443_v3  ;;  %v6488_v19 = vsub.f32 %v6360_v55, %v4443_v3 }
 0x283   :  { %6478 = vst [vmem:[#allocation24_spill] sm:$0xff] %v4863_v53  ;;  %v4881_v13 = vmul.f32 %v4639_v15, %v6484_v44  ;;  %v6486_v53 = vsub.f32 %v6485_v27, %v4443_v3  ;;  %v6490_v44 = vsub.f32 %v6361_v20, %v4443_v3 }
 0x284   :  { %v4893_v16 = vmul.f32 %v4639_v15, %v6487_v29  ;;  %v4899_v45 = vmul.f32 %v4639_v15, %v6488_v19  ;;  %v6493_v29 = vsub.f32 %v6363_v41, %v4443_v3  ;;  %v6494_v19 = vld [vmem:[#allocation51_spill] sm:$0xff] }
 0x285   :  { %v4887_v8 = vmul.f32 %v4639_v15, %v6486_v53  ;;  %v4905_v27 = vmul.f32 %v4639_v15, %v6490_v44  ;;  %v6492_v53 = vsub.f32 %v6362_v49, %v4443_v3  ;;  %v6496_v44 = vld [vmem:[#allocation52_spill] sm:$0xff] }
 0x286   :  { %6489 = vst [vmem:[#allocation25_spill] sm:$0xff] %v4899_v45  ;;  %v4917_v55 = vmul.f32 %v4639_v15, %v6493_v29  ;;  %v6495_v45 = vsub.f32 %v6494_v19, %v4443_v3  ;;  %v6499_v29 = vsub.f32 %v6366_v50, %v4443_v3 }
 0x287   :  { %6491 = vst [vmem:[#allocation26_spill] sm:$0xff] %v4905_v27  ;;  %v4911_v43 = vmul.f32 %v4639_v15, %v6492_v53  ;;  %v6497_v27 = vsub.f32 %v6496_v44, %v4443_v3  ;;  %v6498_v53 = vsub.f32 %v3960_v42, %v4443_v3  ;;  %v6622_v52 = vld [vmem:[#allocation22_spill] sm:$0xff] }
 0x288   :  { %v4923_v20 = vmul.f32 %v4639_v15, %v6495_v45  ;;  %v4941_v19 = vmul.f32 %v4639_v15, %v6499_v29  ;;  %v6500_v45 = vsub.f32 %v3988_v38, %v4443_v3  ;;  %v6503_v29 = vsub.f32 %v3994_v58, %v4443_v3  ;;  %v6623_v28 = vld [vmem:[#allocation23_spill] sm:$0xff] }
 0x289   :  { %v4929_v49 = vmul.f32 %v4639_v15, %v6497_v27  ;;  %v4935_v41 = vmul.f32 %v4639_v15, %v6498_v53  ;;  %v6501_v27 = vsub.f32 %v6367_v60, %v4443_v3  ;;  %v6502_v53 = vsub.f32 %v3981_v12, %v4443_v3 }
 0x28a   :  { %v4947_v44 = vmul.f32 %v4639_v15, %v6500_v45  ;;  %v4965_v38 = vmul.f32 %v4639_v15, %v6503_v29  ;;  %v6504_v45 = vsub.f32 %v4007_v62, %v4443_v3  ;;  %v6507_v29 = vsub.f32 %v4035_v7, %v4443_v3  ;;  %v6624_v4 = vld [vmem:[#allocation24_spill] sm:$0xff] }
 0x28b   :  { %v4953_v42 = vmul.f32 %v4639_v15, %v6501_v27  ;;  %v4959_v50 = vmul.f32 %v4639_v15, %v6502_v53  ;;  %v6505_v27 = vsub.f32 %v4017_v0, %v4443_v3  ;;  %v6506_v53 = vsub.f32 %v4026_v17, %v4443_v3 }
 0x28c   :  { %v4971_v60 = vmul.f32 %v4639_v15, %v6504_v45  ;;  %v4989_v62 = vmul.f32 %v4639_v15, %v6507_v29  ;;  %v6508_v45 = vsub.f32 %v4044_v31, %v4443_v3  ;;  %v6511_v29 = vsub.f32 %v4071_v48, %v4443_v3 }
 0x28d   :  { %v4977_v12 = vmul.f32 %v4639_v15, %v6505_v27  ;;  %v4983_v58 = vmul.f32 %v4639_v15, %v6506_v53  ;;  %v6509_v27 = vsub.f32 %v4053_v36, %v4443_v3  ;;  %v6510_v53 = vsub.f32 %v4062_v54, %v4443_v3 }
 0x28e   :  { %v4995_v0 = vmul.f32 %v4639_v15, %v6508_v45  ;;  %v5013_v31 = vmul.f32 %v4639_v15, %v6511_v29  ;;  %v6512_v45 = vsub.f32 %v4080_v23, %v4443_v3  ;;  %v6515_v29 = vsub.f32 %v4112_v59, %v4443_v3 }
 0x28f   :  { %v5001_v17 = vmul.f32 %v4639_v15, %v6509_v27  ;;  %v5007_v7 = vmul.f32 %v4639_v15, %v6510_v53  ;;  %v6513_v27 = vsub.f32 %v4089_v21, %v4443_v3  ;;  %v6514_v53 = vsub.f32 %v4103_v61, %v4443_v3 }
 0x290   :  { %v5019_v36 = vmul.f32 %v4639_v15, %v6512_v45  ;;  %v5037_v23 = vmul.f32 %v4639_v15, %v6515_v29  ;;  %v6516_v45 = vsub.f32 %v4121_v32, %v4443_v3  ;;  %v6519_v29 = vsub.f32 %v4148_v10, %v4443_v3 }
 0x291   :  { %v5025_v54 = vmul.f32 %v4639_v15, %v6513_v27  ;;  %v5031_v48 = vmul.f32 %v4639_v15, %v6514_v53  ;;  %v6517_v27 = vsub.f32 %v4130_v37, %v4443_v3  ;;  %v6518_v53 = vsub.f32 %v4139_v6, %v4443_v3 }
 0x292   :  { %v5043_v21 = vmul.f32 %v4639_v15, %v6516_v45  ;;  %v5061_v32 = vmul.f32 %v4639_v15, %v6519_v29  ;;  %v6521_v45 = vsub.f32 %v4157_v40, %v4443_v3  ;;  %v6526_v29 = vsub.f32 %v4184_v14, %v4443_v3 }
 0x293   :  { %v5049_v61 = vmul.f32 %v4639_v15, %v6517_v27  ;;  %v5055_v59 = vmul.f32 %v4639_v15, %v6518_v53  ;;  %v6522_v27 = vsub.f32 %v4166_v18, %v4443_v3  ;;  %v6524_v53 = vsub.f32 %v4175_v22, %v4443_v3 }
 0x294   :  { %6520 = vst [vmem:[#allocation27_spill] sm:$0xff] %v5061_v32  ;;  %v5067_v37 = vmul.f32 %v4639_v15, %v6521_v45  ;;  %v5085_v40 = vmul.f32 %v4639_v15, %v6526_v29  ;;  %v6528_v45 = vsub.f32 %v4193_v30, %v4443_v3  ;;  %v6534_v29 = vsub.f32 %v4220_v46, %v4443_v3  ;;  %v6666_v32 = vld [vmem:[#allocation47_spill] sm:$0xff] }
 0x295   :  { %v5073_v6 = vmul.f32 %v4639_v15, %v6522_v27  ;;  %v5079_v10 = vmul.f32 %v4639_v15, %v6524_v53  ;;  %v6530_v27 = vsub.f32 %v4202_v34, %v4443_v3  ;;  %v6532_v53 = vsub.f32 %v4211_v26, %v4443_v3 }
 0x296   :  { %6527 = vst [vmem:[#allocation30_spill] sm:$0xff] %v5085_v40  ;;  %v5091_v18 = vmul.f32 %v4639_v15, %v6528_v45  ;;  %v5109_v30 = vmul.f32 %v4639_v15, %v6534_v29  ;;  %v6536_v45 = vsub.f32 %v4229_v63, %v4443_v3  ;;  %v6542_v29 = vsub.f32 %v4256_v56, %v4443_v3  ;;  %v6662_v40 = vld [vmem:[#allocation43_spill] sm:$0xff] }
 0x297   :  { %6523 = vst [vmem:[#allocation28_spill] sm:$0xff] %v5073_v6  ;;  %6525 = vst [vmem:[#allocation29_spill] sm:$0xff] %v5079_v10  ;;  %v5097_v22 = vmul.f32 %v4639_v15, %v6530_v27  ;;  %v5103_v14 = vmul.f32 %v4639_v15, %v6532_v53  ;;  %v6538_v27 = vsub.f32 %v4238_v5, %v4443_v3  ;;  %v6650_v10 = vld [vmem:[#allocation4_spill] sm:$0xff]  ;;  %v6664_v6 = vld [vmem:[#allocation45_spill] sm:$0xff] }
 0x298   :  { %6529 = vst [vmem:[#allocation31_spill] sm:$0xff] %v5091_v18  ;;  %6535 = vst [vmem:[#allocation34_spill] sm:$0xff] %v5109_v30  ;;  %v5115_v34 = vmul.f32 %v4639_v15, %v6536_v45  ;;  %v6540_v53 = vsub.f32 %v4247_v47, %v4443_v3  ;;  %v5133_v63 = vmul.f32 %v4639_v15, %v6542_v29  ;;  %v6658_v30 = vld [vmem:[#allocation8_spill] sm:$0xff]  ;;  %v6668_v18 = vld [vmem:[#allocation49_spill] sm:$0xff] }
 0x299   :  { %6531 = vst [vmem:[#allocation32_spill] sm:$0xff] %v5097_v22  ;;  %6533 = vst [vmem:[#allocation33_spill] sm:$0xff] %v5103_v14  ;;  %v5121_v26 = vmul.f32 %v4639_v15, %v6538_v27  ;;  %v6544_v45 = vsub.f32 %v4265_v24, %v4443_v3  ;;  %v6546_v27 = vsub.f32 %v4274_v25, %v4443_v3  ;;  %v6654_v14 = vld [vmem:[#allocation6_spill] sm:$0xff] }
 0x29a   :  { %6537 = vst [vmem:[#allocation35_spill] sm:$0xff] %v5115_v34  ;;  %v5127_v46 = vmul.f32 %v4639_v15, %v6540_v53  ;;  %6543 = vst [vmem:[#allocation38_spill] sm:$0xff] %v5133_v63  ;;  %v6548_v53 = vld [vmem:[#allocation55_spill] sm:$0xff]  ;;  %v6551_v29 = vsub.f32 %v4292_v9, %v4443_v3  ;;  %v6648_v63 = vld [vmem:[#allocation2_spill] sm:$0xff] }
 0x29b   :  { %6539 = vst [vmem:[#allocation36_spill] sm:$0xff] %v5121_v26  ;;  %v5139_v5 = vmul.f32 %v4639_v15, %v6544_v45  ;;  %v5145_v47 = vmul.f32 %v4639_v15, %v6546_v27  ;;  %v6553_v45 = vld [vmem:[#allocation56_spill] sm:$0xff]  ;;  %v6556_v27 = vld [vmem:[#allocation57_spill] sm:$0xff]  ;;  %v6646_v26 = vld [vmem:[#allocation3_spill] sm:$0xff] }
 0x29c   :  { %6541 = vst [vmem:[#allocation37_spill] sm:$0xff] %v5127_v46  ;;  %v6549_v46 = vsub.f32 %v6548_v53, %v4443_v3  ;;  %v5157_v24 = vmul.f32 %v4639_v15, %v6551_v29  ;;  %v6562_v29 = vsub.f32 %v6371_v39, %v4443_v3  ;;  %v6656_v34 = vld [vmem:[#allocation7_spill] sm:$0xff]  ;;  %v6660_v22 = vld [vmem:[#allocation42_spill] sm:$0xff] }
 0x29d   :  { %6545 = vst [vmem:[#allocation39_spill] sm:$0xff] %v5139_v5  ;;  %6547 = vst [vmem:[#allocation40_spill] sm:$0xff] %v5145_v47  ;;  %v6554_v5 = vsub.f32 %v6553_v45, %v4443_v3  ;;  %v6557_v47 = vsub.f32 %v6556_v27, %v4443_v3 }
 0x29e   :  { %v5151_v56 = vmul.f32 %v4639_v15, %v6549_v46  ;;  %6552 = vst [vmem:[#allocation51_spill] sm:$0xff] %v5157_v24  ;;  %v6559_v46 = vld [vmem:[#allocation58_spill] sm:$0xff]  ;;  %v5181_v45 = vmul.f32 %v4639_v15, %v6562_v29  ;;  %v6571_v29 = vsub.f32 %v6375_v57, %v4443_v3  ;;  %v6652_v24 = vld [vmem:[#allocation5_spill] sm:$0xff] }
 0x29f   :  { %v5163_v25 = vmul.f32 %v4639_v15, %v6554_v5  ;;  %v5169_v53 = vmul.f32 %v4639_v15, %v6557_v47  ;;  %v6564_v5 = vld [vmem:[#allocation60_spill] sm:$0xff]  ;;  %v6567_v47 = vsub.f32 %v6373_v51, %v4443_v3 }
 0x2a0   :  { %6550 = vst [vmem:[#allocation41_spill] sm:$0xff] %v5151_v56  ;;  %v6560_v56 = vsub.f32 %v6559_v46, %v4443_v3  ;;  %6563 = vst [vmem:[#allocation57_spill] sm:$0xff] %v5181_v45 }
 0x2a1   :  { %6555 = vst [vmem:[#allocation52_spill] sm:$0xff] %v5163_v25  ;;  %6558 = vst [vmem:[#allocation55_spill] sm:$0xff] %v5169_v53  ;;  %v6565_v25 = vsub.f32 %v6564_v5, %v4443_v3  ;;  %v5193_v46 = vmul.f32 %v4639_v15, %v6567_v47  ;;  %v5205_v5 = vmul.f32 %v4639_v15, %v6571_v29  ;;  %v6580_v29 = vld [vmem:[#allocation63_spill] sm:$0xff] }
 0x2a2   :  { %v5175_v9 = vmul.f32 %v4639_v15, %v6560_v56  ;;  %v6569_v56 = vsub.f32 %v6374_v35, %v4443_v3  ;;  %v6575_v47 = vsub.f32 %v6377_v33, %v4443_v3 }
 0x2a3   :  { %v5187_v27 = vmul.f32 %v4639_v15, %v6565_v25  ;;  %6568 = vst [vmem:[#allocation60_spill] sm:$0xff] %v5193_v46  ;;  %6572 = vst [vmem:[#allocation68_spill] sm:$0xff] %v5205_v5  ;;  %v6573_v25 = vsub.f32 %v6376_v11, %v4443_v3  ;;  %v6581_v5 = vsub.f32 %v6580_v29, %v4443_v3  ;;  %v6615_v46 = vld [vmem:[#allocation15_spill] sm:$0xff] }
 0x2a4   :  { %6561 = vst [vmem:[#allocation56_spill] sm:$0xff] %v5175_v9  ;;  %v5199_v39 = vmul.f32 %v4639_v15, %v6569_v56  ;;  %v5217_v35 = vmul.f32 %v4639_v15, %v6575_v47  ;;  %v6577_v56 = vld [vmem:[#allocation50_spill] sm:$0xff]  ;;  %v6586_v47 = vld [vmem:[#allocation65_spill] sm:$0xff] }
 0x2a5   :  { %6566 = vst [vmem:[#allocation58_spill] sm:$0xff] %v5187_v27  ;;  %v5211_v51 = vmul.f32 %v4639_v15, %v6573_v25  ;;  %v5229_v11 = vmul.f32 %v4639_v15, %v6581_v5  ;;  %v6583_v25 = vld [vmem:[#allocation64_spill] sm:$0xff]  ;;  %v6618_v9 = vld [vmem:[#allocation18_spill] sm:$0xff]  ;;  %v6647_v5 = vmax.f32 %v6646_v26, 0.0  ;;  %v6651_v27 = vmax.f32 %v6650_v10, 0.0 }
 0x2a6   :  { %6570 = vst [vmem:[#allocation67_spill] sm:$0xff] %v5199_v39  ;;  %6576 = vst [vmem:[#allocation70_spill] sm:$0xff] %v5217_v35  ;;  %v6578_v39 = vsub.f32 %v6577_v56, %v4443_v3  ;;  %v6587_v35 = vsub.f32 %v6586_v47, %v4443_v3  ;;  %v6616_v47 = vld [vmem:[#allocation16_spill] sm:$0xff]  ;;  %v6657_v26 = vmax.f32 %v6656_v34, 0.0  ;;  %v6661_v10 = vmax.f32 %v6660_v22, 0.0 }
 0x2a7   :  { %6574 = vst [vmem:[#allocation69_spill] sm:$0xff] %v5211_v51  ;;  %6582 = vst [vmem:[#allocation63_spill] sm:$0xff] %v5229_v11  ;;  %v6584_v51 = vsub.f32 %v6583_v25, %v4443_v3  ;;  %v2723_v11 = vpack.c.bf16 %v6647_v5, %v6647_v5  ;;  %v6649_v25 = vmax.f32 %v6648_v63, 0.0  ;;  %v2725_v45 = vpack.c.bf16 %v6651_v27, %v6651_v27 }
 0x2a8   :  { %v5223_v57 = vmul.f32 %v4639_v15, %v6578_v39  ;;  %v5241_v56 = vmul.f32 %v4639_v15, %v6587_v35  ;;  %v6589_v39 = vld [vmem:[#allocation66_spill] sm:$0xff]  ;;  %v6617_v35 = vld [vmem:[#allocation17_spill] sm:$0xff]  ;;  %v2728_v5 = vpack.c.bf16 %v6657_v26, %v6657_v26  ;;  %v6659_v63 = vmax.f32 %v6658_v30, 0.0 }
 0x2a9   :  { %v5235_v33 = vmul.f32 %v4639_v15, %v6584_v51  ;;  %v6614_v51 = vld [vmem:[#allocation14_spill] sm:$0xff]  ;;  %v2730_v27 = vpack.c.bf16 %v6661_v10, %v6661_v10  ;;  %v6667_v34 = vmax.f32 %v6666_v32, 0.0  ;;  %v6669_v30 = vmax.f32 %v6668_v18, 0.0  ;;  %2402 = vst.msk [vmem:[%s6052_s3] sm:$0xf] %vm2401_vm1, %v2723_v11  ;;  %v6672_v18 = vld [vmem:[#allocation53_spill] sm:$0xff] }
 0x2aa   :  { %6579 = vst [vmem:[#allocation50_spill] sm:$0xff] %v5223_v57  ;;  %6588 = vst [vmem:[#allocation65_spill] sm:$0xff] %v5241_v56  ;;  %v6590_v57 = vsub.f32 %v6589_v39, %v4443_v3  ;;  %v6625_v3 = vld [vmem:[#allocation25_spill] sm:$0xff]  ;;  %v6653_v56 = vmax.f32 %v6652_v24, 0.0  ;;  %v6655_v39 = vmax.f32 %v6654_v14, 0.0  ;;  %v6663_v24 = vmax.f32 %v6662_v40, 0.0 }
 0x2ab   :  { %6585 = vst [vmem:[#allocation64_spill] sm:$0xff] %v5235_v33  ;;  %v2724_v33 = vpack.c.bf16 %v6649_v25, %v6649_v25  ;;  %v2729_v25 = vpack.c.bf16 %v6659_v63, %v6659_v63  ;;  %v6665_v14 = vmax.f32 %v6664_v6, 0.0  ;;  %v2733_v26 = vpack.c.bf16 %v6667_v34, %v6667_v34  ;;  %2404 = vst.msk [vmem:[%s6052_s3 + $0x8] sm:$0xf] %vm2401_vm1, %v2725_v45  ;;  %v6670_v32 = vld [vmem:[#allocation54_spill] sm:$0xff]  ;;  %v6674_v10 = vld [vmem:[#allocation59_spill] sm:$0xff] }
 0x2ac   :  { %v5247_v29 = vmul.f32 %v4639_v15, %v6590_v57  ;;  %v6626_v15 = vld [vmem:[#allocation26_spill] sm:$0xff]  ;;  %v2726_v53 = vpack.c.bf16 %v6653_v56, %v6653_v56  ;;  %v2727_v57 = vpack.c.bf16 %v6655_v39, %v6655_v39  ;;  %v2731_v56 = vpack.c.bf16 %v6663_v24, %v6663_v24  ;;  %2407 = vst.msk [vmem:[%s6052_s3 + $0x14] sm:$0xf] %vm2401_vm1, %v2728_v5 }
 0x2ad   :  { %v2732_v39 = vpack.c.bf16 %v6665_v14, %v6665_v14  ;;  %v2734_v63 = vpack.c.bf16 %v6669_v30, %v6669_v30  ;;  %2403 = vst.msk [vmem:[%s6052_s3 + $0x4] sm:$0xf] %vm2401_vm1, %v2724_v33  ;;  %v6671_v6 = vmax.f32 %v6670_v32, 0.0  ;;  %v6673_v22 = vmax.f32 %v6672_v18, 0.0  ;;  %v6676_v14 = vld [vmem:[#allocation61_spill] sm:$0xff] }
 0x2ae   :  { %6591 = vst [vmem:[#allocation66_spill] sm:$0xff] %v5247_v29  ;;  %v6621_v29 = vld [vmem:[#allocation21_spill] sm:$0xff]  ;;  %2405 = vst.msk [vmem:[%s6052_s3 + $0xc] sm:$0xf] %vm2401_vm1, %v2726_v53  ;;  %v6675_v33 = vmax.f32 %v6674_v10, 0.0  ;;  %v6677_v34 = vmax.f32 %v6676_v14, 0.0 }
 0x2af   :  { %v2735_v40 = vpack.c.bf16 %v6671_v6, %v6671_v6  ;;  %v2736_v11 = vpack.c.bf16 %v6673_v22, %v6673_v22  ;;  %2406 = vst.msk [vmem:[%s6052_s3 + $0x10] sm:$0xf] %vm2401_vm1, %v2727_v57  ;;  %2408 = vst.msk [vmem:[%s6052_s3 + $0x18] sm:$0xf] %vm2401_vm1, %v2729_v25  ;;  %v6678_v53 = vld [vmem:[#allocation62_spill] sm:$0xff]  ;;  %v6680_v57 = vld [vmem:[#allocation44_spill] sm:$0xff] }
 0x2b0   :  { %v2737_v24 = vpack.c.bf16 %v6675_v33, %v6675_v33  ;;  %v2738_v45 = vpack.c.bf16 %v6677_v34, %v6677_v34  ;;  %2409 = vst.msk [vmem:[%s6052_s3 + $0x1c] sm:$0xf] %vm2401_vm1, %v2730_v27  ;;  %v6679_v30 = vmax.f32 %v6678_v53, 0.0  ;;  %v6681_v6 = vmax.f32 %v6680_v57, 0.0  ;;  %v6682_v22 = vld [vmem:[#allocation46_spill] sm:$0xff]  ;;  %v6684_v33 = vld [vmem:[#allocation48_spill] sm:$0xff] }
 0x2b1   :  { %v6683_v5 = vmax.f32 %v6682_v22, 0.0  ;;  %v6685_v14 = vmax.f32 %v6684_v33, 0.0  ;;  %2410 = vst.msk [vmem:[%s6052_s3 + $0x20] sm:$0xf] %vm2401_vm1, %v2731_v56  ;;  %2411 = vst.msk [vmem:[%s6052_s3 + $0x24] sm:$0xf] %vm2401_vm1, %v2732_v39 }
 0x2b2   :  { %v2739_v32 = vpack.c.bf16 %v6679_v30, %v6679_v30  ;;  %v2740_v18 = vpack.c.bf16 %v6681_v6, %v6681_v6  ;;  %2412 = vst.msk [vmem:[%s6052_s3 + $0x28] sm:$0xf] %vm2401_vm1, %v2733_v26  ;;  %2413 = vst.msk [vmem:[%s6052_s3 + $0x2c] sm:$0xf] %vm2401_vm1, %v2734_v63  ;;  %v6686_v27 = vld [vmem:[#allocation9_spill] sm:$0xff]  ;;  %v6688_v56 = vld [vmem:[#allocation10_spill] sm:$0xff] }
 0x2b3   :  { %v2741_v10 = vpack.c.bf16 %v6683_v5, %v6683_v5  ;;  %v2742_v25 = vpack.c.bf16 %v6685_v14, %v6685_v14  ;;  %v6687_v34 = vmax.f32 %v6686_v27, 0.0  ;;  %v6689_v30 = vmax.f32 %v6688_v56, 0.0  ;;  %v6690_v6 = vld [vmem:[#allocation11_spill] sm:$0xff]  ;;  %v6692_v5 = vld [vmem:[#allocation12_spill] sm:$0xff]  ;;  %2414 = vst.msk [vmem:[%s6052_s3 + $0x30] sm:$0xf] %vm2401_vm1, %v2735_v40 }
 0x2b4   :  { %v6691_v39 = vmax.f32 %v6690_v6, 0.0  ;;  %v6693_v33 = vmax.f32 %v6692_v5, 0.0  ;;  %2415 = vst.msk [vmem:[%s6052_s3 + $0x34] sm:$0xf] %vm2401_vm1, %v2736_v11  ;;  %2416 = vst.msk [vmem:[%s6052_s3 + $0x38] sm:$0xf] %vm2401_vm1, %v2737_v24 }
 0x2b5   :  { %v2743_v53 = vpack.c.bf16 %v6687_v34, %v6687_v34  ;;  %v2744_v57 = vpack.c.bf16 %v6689_v30, %v6689_v30  ;;  %2417 = vst.msk [vmem:[%s6052_s3 + $0x3c] sm:$0xf] %vm2401_vm1, %v2738_v45  ;;  %v6694_v63 = vld [vmem:[#allocation13_spill] sm:$0xff]  ;;  %v6696_v40 = vmax.f32 %v6614_v51, 0.0  ;;  %v6697_v11 = vmax.f32 %v6615_v46, 0.0 }
 0x2b6   :  { %v2745_v22 = vpack.c.bf16 %v6691_v39, %v6691_v39  ;;  %v2746_v26 = vpack.c.bf16 %v6693_v33, %v6693_v33  ;;  %v6695_v14 = vmax.f32 %v6694_v63, 0.0  ;;  %v6698_v30 = vmax.f32 %v6616_v47, 0.0  ;;  %2418 = vst.msk [vmem:[%s6052_s3 + $0x40] sm:$0xf] %vm2401_vm1, %v2739_v32  ;;  %2419 = vst.msk [vmem:[%s6052_s3 + $0x44] sm:$0xf] %vm2401_vm1, %v2740_v18 }
 0x2b7   :  { %v2748_v34 = vpack.c.bf16 %v6696_v40, %v6696_v40  ;;  %v2749_v56 = vpack.c.bf16 %v6697_v11, %v6697_v11  ;;  %2420 = vst.msk [vmem:[%s6052_s3 + $0x48] sm:$0xf] %vm2401_vm1, %v2741_v10  ;;  %2421 = vst.msk [vmem:[%s6052_s3 + $0x4c] sm:$0xf] %vm2401_vm1, %v2742_v25  ;;  %v6699_v46 = vmax.f32 %v6617_v35, 0.0  ;;  %v6700_v47 = vmax.f32 %v6618_v9, 0.0 }
 0x2b8   :  { %v2747_v27 = vpack.c.bf16 %v6695_v14, %v6695_v14  ;;  %v2750_v24 = vpack.c.bf16 %v6698_v30, %v6698_v30  ;;  %v6701_v32 = vld [vmem:[#allocation19_spill] sm:$0xff]  ;;  %v6703_v39 = vld [vmem:[#allocation20_spill] sm:$0xff]  ;;  %2422 = vst.msk [vmem:[%s6052_s3 + $0x50] sm:$0xf] %vm2401_vm1, %v2743_v53  ;;  %2423 = vst.msk [vmem:[%s6052_s3 + $0x54] sm:$0xf] %vm2401_vm1, %v2744_v57 }
 0x2b9   :  { %v2751_v51 = vpack.c.bf16 %v6699_v46, %v6699_v46  ;;  %v2752_v45 = vpack.c.bf16 %v6700_v47, %v6700_v47  ;;  %v6702_v18 = vmax.f32 %v6701_v32, 0.0  ;;  %v6704_v5 = vmax.f32 %v6703_v39, 0.0  ;;  %2424 = vst.msk [vmem:[%s6052_s3 + $0x58] sm:$0xf] %vm2401_vm1, %v2745_v22  ;;  %2425 = vst.msk [vmem:[%s6052_s3 + $0x5c] sm:$0xf] %vm2401_vm1, %v2746_v26 }
 0x2ba   :  { %v6705_v9 = vmax.f32 %v6621_v29, 0.0  ;;  %v6706_v25 = vmax.f32 %v6622_v52, 0.0  ;;  %v6707_v57 = vmax.f32 %v6623_v28, 0.0  ;;  %v6708_v63 = vmax.f32 %v6624_v4, 0.0  ;;  %2426 = vst.msk [vmem:[%s6052_s3 + $0x60] sm:$0xf] %vm2401_vm1, %v2747_v27 }
 0x2bb   :  { %v2753_v6 = vpack.c.bf16 %v6702_v18, %v6702_v18  ;;  %v2754_v10 = vpack.c.bf16 %v6704_v5, %v6704_v5  ;;  %2427 = vst.msk [vmem:[%s6052_s3 + $0x64] sm:$0xf] %vm2401_vm1, %v2748_v34  ;;  %2428 = vst.msk [vmem:[%s6052_s3 + $0x68] sm:$0xf] %vm2401_vm1, %v2749_v56  ;;  %v6709_v4 = vmax.f32 %v4869_v2, 0.0  ;;  %v6710_v52 = vmax.f32 %v4875_v1, 0.0 }
 0x2bc   :  { %v2755_v35 = vpack.c.bf16 %v6705_v9, %v6705_v9  ;;  %v2756_v53 = vpack.c.bf16 %v6706_v25, %v6706_v25  ;;  %v2757_v33 = vpack.c.bf16 %v6707_v57, %v6707_v57  ;;  %v2758_v22 = vpack.c.bf16 %v6708_v63, %v6708_v63  ;;  %2429 = vst.msk [vmem:[%s6052_s3 + $0x6c] sm:$0xf] %vm2401_vm1, %v2750_v24 }
 0x2bd   :  { %v2759_v28 = vpack.c.bf16 %v6709_v4, %v6709_v4  ;;  %v2760_v29 = vpack.c.bf16 %v6710_v52, %v6710_v52  ;;  %v6711_v26 = vmax.f32 %v4881_v13, 0.0  ;;  %v6712_v27 = vmax.f32 %v4887_v8, 0.0  ;;  %2430 = vst.msk [vmem:[%s6052_s3 + $0x70] sm:$0xf] %vm2401_vm1, %v2751_v51  ;;  %2431 = vst.msk [vmem:[%s6052_s3 + $0x74] sm:$0xf] %vm2401_vm1, %v2752_v45 }
 0x2be   :  { %2432 = vst.msk [vmem:[%s6052_s3 + $0x78] sm:$0xf] %vm2401_vm1, %v2753_v6  ;;  %2433 = vst.msk [vmem:[%s6052_s3 + $0x7c] sm:$0xf] %vm2401_vm1, %v2754_v10  ;;  %v6713_v2 = vmax.f32 %v4893_v16, 0.0  ;;  %v6714_v13 = vmax.f32 %v6625_v3, 0.0 }
 0x2bf   :  { %v2761_v14 = vpack.c.bf16 %v6711_v26, %v6711_v26  ;;  %v2762_v40 = vpack.c.bf16 %v6712_v27, %v6712_v27  ;;  %v6715_v34 = vmax.f32 %v6626_v15, 0.0  ;;  %v6716_v56 = vmax.f32 %v4911_v43, 0.0  ;;  %2434 = vst.msk [vmem:[%s6052_s3 + $0x80] sm:$0xf] %vm2401_vm1, %v2755_v35  ;;  %2435 = vst.msk [vmem:[%s6052_s3 + $0x84] sm:$0xf] %vm2401_vm1, %v2756_v53 }
 0x2c0   :  { %v2763_v1 = vpack.c.bf16 %v6713_v2, %v6713_v2  ;;  %v2764_v8 = vpack.c.bf16 %v6714_v13, %v6714_v13  ;;  %2436 = vst.msk [vmem:[%s6052_s3 + $0x88] sm:$0xf] %vm2401_vm1, %v2757_v33  ;;  %2437 = vst.msk [vmem:[%s6052_s3 + $0x8c] sm:$0xf] %vm2401_vm1, %v2758_v22  ;;  %v6717_v16 = vmax.f32 %v4917_v55, 0.0  ;;  %v6718_v3 = vmax.f32 %v4923_v20, 0.0 }
 0x2c1   :  { %v2765_v11 = vpack.c.bf16 %v6715_v34, %v6715_v34  ;;  %v2766_v30 = vpack.c.bf16 %v6716_v56, %v6716_v56  ;;  %v6719_v24 = vmax.f32 %v4929_v49, 0.0  ;;  %v6720_v51 = vmax.f32 %v4935_v41, 0.0  ;;  %2438 = vst.msk [vmem:[%s6052_s3 + $0x90] sm:$0xf] %vm2401_vm1, %v2759_v28  ;;  %2439 = vst.msk [vmem:[%s6052_s3 + $0x94] sm:$0xf] %vm2401_vm1, %v2760_v29 }
 0x2c2   :  { %v2767_v43 = vpack.c.bf16 %v6717_v16, %v6717_v16  ;;  %v2768_v15 = vpack.c.bf16 %v6718_v3, %v6718_v3  ;;  %2440 = vst.msk [vmem:[%s6052_s3 + $0x98] sm:$0xf] %vm2401_vm1, %v2761_v14  ;;  %2441 = vst.msk [vmem:[%s6052_s3 + $0x9c] sm:$0xf] %vm2401_vm1, %v2762_v40  ;;  %v6721_v55 = vmax.f32 %v4941_v19, 0.0  ;;  %v6722_v49 = vmax.f32 %v4947_v44, 0.0 }
 0x2c3   :  { %v2769_v46 = vpack.c.bf16 %v6719_v24, %v6719_v24  ;;  %v2770_v47 = vpack.c.bf16 %v6720_v51, %v6720_v51  ;;  %v6723_v45 = vmax.f32 %v4953_v42, 0.0  ;;  %v6724_v18 = vmax.f32 %v4959_v50, 0.0  ;;  %2442 = vst.msk [vmem:[%s6052_s3 + $0xa0] sm:$0xf] %vm2401_vm1, %v2763_v1  ;;  %2443 = vst.msk [vmem:[%s6052_s3 + $0xa4] sm:$0xf] %vm2401_vm1, %v2764_v8 }
 0x2c4   :  { %v2771_v20 = vpack.c.bf16 %v6721_v55, %v6721_v55  ;;  %v2772_v41 = vpack.c.bf16 %v6722_v49, %v6722_v49  ;;  %2444 = vst.msk [vmem:[%s6052_s3 + $0xa8] sm:$0xf] %vm2401_vm1, %v2765_v11  ;;  %2445 = vst.msk [vmem:[%s6052_s3 + $0xac] sm:$0xf] %vm2401_vm1, %v2766_v30  ;;  %v6725_v19 = vmax.f32 %v4965_v38, 0.0  ;;  %v6726_v42 = vmax.f32 %v4971_v60, 0.0 }
 0x2c5   :  { %v2773_v32 = vpack.c.bf16 %v6723_v45, %v6723_v45  ;;  %v2774_v6 = vpack.c.bf16 %v6724_v18, %v6724_v18  ;;  %v6727_v39 = vmax.f32 %v4977_v12, 0.0  ;;  %v6728_v10 = vmax.f32 %v4983_v58, 0.0  ;;  %2446 = vst.msk [vmem:[%s6052_s3 + $0xb0] sm:$0xf] %vm2401_vm1, %v2767_v43  ;;  %2447 = vst.msk [vmem:[%s6052_s3 + $0xb4] sm:$0xf] %vm2401_vm1, %v2768_v15 }
 0x2c6   :  { %v2775_v44 = vpack.c.bf16 %v6725_v19, %v6725_v19  ;;  %v2776_v50 = vpack.c.bf16 %v6726_v42, %v6726_v42  ;;  %2448 = vst.msk [vmem:[%s6052_s3 + $0xb8] sm:$0xf] %vm2401_vm1, %v2769_v46  ;;  %2449 = vst.msk [vmem:[%s6052_s3 + $0xbc] sm:$0xf] %vm2401_vm1, %v2770_v47  ;;  %v6729_v38 = vmax.f32 %v4989_v62, 0.0  ;;  %v6730_v12 = vmax.f32 %v4995_v0, 0.0 }
 0x2c7   :  { %v2777_v5 = vpack.c.bf16 %v6727_v39, %v6727_v39  ;;  %v2778_v9 = vpack.c.bf16 %v6728_v10, %v6728_v10  ;;  %v6731_v35 = vmax.f32 %v5001_v17, 0.0  ;;  %v6732_v53 = vmax.f32 %v5007_v7, 0.0  ;;  %2450 = vst.msk [vmem:[%s6052_s3 + $0xc0] sm:$0xf] %vm2401_vm1, %v2771_v20  ;;  %2451 = vst.msk [vmem:[%s6052_s3 + $0xc4] sm:$0xf] %vm2401_vm1, %v2772_v41 }
 0x2c8   :  { %v2779_v60 = vpack.c.bf16 %v6729_v38, %v6729_v38  ;;  %v2780_v58 = vpack.c.bf16 %v6730_v12, %v6730_v12  ;;  %2452 = vst.msk [vmem:[%s6052_s3 + $0xc8] sm:$0xf] %vm2401_vm1, %v2773_v32  ;;  %2453 = vst.msk [vmem:[%s6052_s3 + $0xcc] sm:$0xf] %vm2401_vm1, %v2774_v6  ;;  %v6733_v62 = vmax.f32 %v5013_v31, 0.0  ;;  %v6734_v17 = vmax.f32 %v5019_v36, 0.0 }
 0x2c9   :  { %v2781_v25 = vpack.c.bf16 %v6731_v35, %v6731_v35  ;;  %v2782_v57 = vpack.c.bf16 %v6732_v53, %v6732_v53  ;;  %v6735_v33 = vmax.f32 %v5025_v54, 0.0  ;;  %v6736_v22 = vmax.f32 %v5031_v48, 0.0  ;;  %2454 = vst.msk [vmem:[%s6052_s3 + $0xd0] sm:$0xf] %vm2401_vm1, %v2775_v44  ;;  %2455 = vst.msk [vmem:[%s6052_s3 + $0xd4] sm:$0xf] %vm2401_vm1, %v2776_v50 }
 0x2ca   :  { %v2783_v0 = vpack.c.bf16 %v6733_v62, %v6733_v62  ;;  %v2784_v7 = vpack.c.bf16 %v6734_v17, %v6734_v17  ;;  %2456 = vst.msk [vmem:[%s6052_s3 + $0xd8] sm:$0xf] %vm2401_vm1, %v2777_v5  ;;  %2457 = vst.msk [vmem:[%s6052_s3 + $0xdc] sm:$0xf] %vm2401_vm1, %v2778_v9  ;;  %v6737_v31 = vmax.f32 %v5037_v23, 0.0  ;;  %v6738_v54 = vmax.f32 %v5043_v21, 0.0 }
 0x2cb   :  { %v2785_v63 = vpack.c.bf16 %v6735_v33, %v6735_v33  ;;  %v2786_v4 = vpack.c.bf16 %v6736_v22, %v6736_v22  ;;  %v6739_v28 = vmax.f32 %v5049_v61, 0.0  ;;  %v6740_v29 = vmax.f32 %v5055_v59, 0.0  ;;  %2458 = vst.msk [vmem:[%s6052_s3 + $0xe0] sm:$0xf] %vm2401_vm1, %v2779_v60  ;;  %2459 = vst.msk [vmem:[%s6052_s3 + $0xe4] sm:$0xf] %vm2401_vm1, %v2780_v58 }
 0x2cc   :  { %v2787_v36 = vpack.c.bf16 %v6737_v31, %v6737_v31  ;;  %v2788_v48 = vpack.c.bf16 %v6738_v54, %v6738_v54  ;;  %2460 = vst.msk [vmem:[%s6052_s3 + $0xe8] sm:$0xf] %vm2401_vm1, %v2781_v25  ;;  %2461 = vst.msk [vmem:[%s6052_s3 + $0xec] sm:$0xf] %vm2401_vm1, %v2782_v57  ;;  %v6741_v23 = vld [vmem:[#allocation27_spill] sm:$0xff]  ;;  %v6743_v59 = vmax.f32 %v5067_v37, 0.0 }
 0x2cd   :  { %v2789_v52 = vpack.c.bf16 %v6739_v28, %v6739_v28  ;;  %v2790_v26 = vpack.c.bf16 %v6740_v29, %v6740_v29  ;;  %v6742_v21 = vmax.f32 %v6741_v23, 0.0  ;;  %v6744_v27 = vld [vmem:[#allocation28_spill] sm:$0xff]  ;;  %v6746_v1 = vld [vmem:[#allocation29_spill] sm:$0xff]  ;;  %2462 = vst.msk [vmem:[%s6052_s3 + $0xf0] sm:$0xf] %vm2401_vm1, %v2783_v0  ;;  %v6748_v37 = vld [vmem:[#allocation30_spill] sm:$0xff] }
 0x2ce   :  { %v2792_v14 = vpack.c.bf16 %v6743_v59, %v6743_v59  ;;  %v6745_v40 = vmax.f32 %v6744_v27, 0.0  ;;  %v6747_v13 = vmax.f32 %v6746_v1, 0.0  ;;  %2463 = vst.msk [vmem:[%s6052_s3 + $0xf4] sm:$0xf] %vm2401_vm1, %v2784_v7  ;;  %2464 = vst.msk [vmem:[%s6052_s3 + $0xf8] sm:$0xf] %vm2401_vm1, %v2785_v63 }
 0x2cf   :  { %v2791_v61 = vpack.c.bf16 %v6742_v21, %v6742_v21  ;;  %2465 = vst.msk [vmem:[%s6052_s3 + $0xfc] sm:$0xf] %vm2401_vm1, %v2786_v4  ;;  %v6749_v34 = vmax.f32 %v6748_v37, 0.0  ;;  %v6750_v56 = vld [vmem:[#allocation31_spill] sm:$0xff]  ;;  %v6752_v43 = vld [vmem:[#allocation32_spill] sm:$0xff]  ;;  %v6754_v24 = vld [vmem:[#allocation33_spill] sm:$0xff] }
 0x2d0   :  { %v2793_v2 = vpack.c.bf16 %v6745_v40, %v6745_v40  ;;  %v2794_v8 = vpack.c.bf16 %v6747_v13, %v6747_v13  ;;  %v6751_v30 = vmax.f32 %v6750_v56, 0.0  ;;  %v6753_v3 = vmax.f32 %v6752_v43, 0.0  ;;  %2466 = vst.msk [vmem:[%s6052_s3 + $0x100] sm:$0xf] %vm2401_vm1, %v2787_v36  ;;  %2467 = vst.msk [vmem:[%s6052_s3 + $0x104] sm:$0xf] %vm2401_vm1, %v2788_v48 }
 0x2d1   :  { %v2795_v11 = vpack.c.bf16 %v6749_v34, %v6749_v34  ;;  %v6755_v46 = vmax.f32 %v6754_v24, 0.0  ;;  %2468 = vst.msk [vmem:[%s6052_s3 + $0x108] sm:$0xf] %vm2401_vm1, %v2789_v52  ;;  %2469 = vst.msk [vmem:[%s6052_s3 + $0x10c] sm:$0xf] %vm2401_vm1, %v2790_v26  ;;  %v6756_v47 = vld [vmem:[#allocation34_spill] sm:$0xff] }
 0x2d2   :  { %v2796_v16 = vpack.c.bf16 %v6751_v30, %v6751_v30  ;;  %v2797_v15 = vpack.c.bf16 %v6753_v3, %v6753_v3  ;;  %v6757_v55 = vmax.f32 %v6756_v47, 0.0  ;;  %v6758_v49 = vld [vmem:[#allocation35_spill] sm:$0xff]  ;;  %v6760_v32 = vld [vmem:[#allocation36_spill] sm:$0xff]  ;;  %v6762_v19 = vld [vmem:[#allocation37_spill] sm:$0xff]  ;;  %2470 = vst.msk [vmem:[%s6052_s3 + $0x110] sm:$0xf] %vm2401_vm1, %v2791_v61 }
 0x2d3   :  { %v2798_v51 = vpack.c.bf16 %v6755_v46, %v6755_v46  ;;  %v6759_v41 = vmax.f32 %v6758_v49, 0.0  ;;  %v6761_v18 = vmax.f32 %v6760_v32, 0.0  ;;  %v6763_v44 = vmax.f32 %v6762_v19, 0.0  ;;  %2471 = vst.msk [vmem:[%s6052_s3 + $0x114] sm:$0xf] %vm2401_vm1, %v2792_v14  ;;  %v6764_v50 = vld [vmem:[#allocation38_spill] sm:$0xff] }
 0x2d4   :  { %v2799_v20 = vpack.c.bf16 %v6757_v55, %v6757_v55  ;;  %2472 = vst.msk [vmem:[%s6052_s3 + $0x118] sm:$0xf] %vm2401_vm1, %v2793_v2  ;;  %2473 = vst.msk [vmem:[%s6052_s3 + $0x11c] sm:$0xf] %vm2401_vm1, %v2794_v8  ;;  %v6765_v39 = vmax.f32 %v6764_v50, 0.0  ;;  %v6766_v10 = vld [vmem:[#allocation39_spill] sm:$0xff] }
 0x2d5   :  { %v2800_v45 = vpack.c.bf16 %v6759_v41, %v6759_v41  ;;  %v2801_v6 = vpack.c.bf16 %v6761_v18, %v6761_v18  ;;  %v2802_v42 = vpack.c.bf16 %v6763_v44, %v6763_v44  ;;  %v6767_v9 = vmax.f32 %v6766_v10, 0.0  ;;  %v6768_v60 = vld [vmem:[#allocation40_spill] sm:$0xff]  ;;  %v6770_v35 = vld [vmem:[#allocation41_spill] sm:$0xff]  ;;  %2474 = vst.msk [vmem:[%s6052_s3 + $0x120] sm:$0xf] %vm2401_vm1, %v2795_v11  ;;  %v6772_v57 = vld [vmem:[#allocation51_spill] sm:$0xff] }
 0x2d6   :  { %v2803_v5 = vpack.c.bf16 %v6765_v39, %v6765_v39  ;;  %v6769_v12 = vmax.f32 %v6768_v60, 0.0  ;;  %v6771_v25 = vmax.f32 %v6770_v35, 0.0  ;;  %2475 = vst.msk [vmem:[%s6052_s3 + $0x124] sm:$0xf] %vm2401_vm1, %v2796_v16  ;;  %2476 = vst.msk [vmem:[%s6052_s3 + $0x128] sm:$0xf] %vm2401_vm1, %v2797_v15 }
 0x2d7   :  { %v2804_v38 = vpack.c.bf16 %v6767_v9, %v6767_v9  ;;  %2477 = vst.msk [vmem:[%s6052_s3 + $0x12c] sm:$0xf] %vm2401_vm1, %v2798_v51  ;;  %v6773_v62 = vmax.f32 %v6772_v57, 0.0  ;;  %v6774_v17 = vld [vmem:[#allocation52_spill] sm:$0xff]  ;;  %v6776_v63 = vld [vmem:[#allocation55_spill] sm:$0xff]  ;;  %v6780_v48 = vld [vmem:[#allocation57_spill] sm:$0xff] }
 0x2d8   :  { %v2805_v58 = vpack.c.bf16 %v6769_v12, %v6769_v12  ;;  %v2806_v53 = vpack.c.bf16 %v6771_v25, %v6771_v25  ;;  %v6775_v7 = vmax.f32 %v6774_v17, 0.0  ;;  %v6777_v22 = vmax.f32 %v6776_v63, 0.0  ;;  %v6778_v31 = vld [vmem:[#allocation56_spill] sm:$0xff]  ;;  %2478 = vst.msk [vmem:[%s6052_s3 + $0x130] sm:$0xf] %vm2401_vm1, %v2799_v20  ;;  %v6782_v29 = vld [vmem:[#allocation58_spill] sm:$0xff] }
 0x2d9   :  { %v2807_v0 = vpack.c.bf16 %v6773_v62, %v6773_v62  ;;  %v6779_v36 = vmax.f32 %v6778_v31, 0.0  ;;  %2479 = vst.msk [vmem:[%s6052_s3 + $0x134] sm:$0xf] %vm2401_vm1, %v2800_v45  ;;  %2480 = vst.msk [vmem:[%s6052_s3 + $0x138] sm:$0xf] %vm2401_vm1, %v2801_v6  ;;  %v6781_v28 = vmax.f32 %v6780_v48, 0.0 }
 0x2da   :  { %v2808_v33 = vpack.c.bf16 %v6775_v7, %v6775_v7  ;;  %v2809_v4 = vpack.c.bf16 %v6777_v22, %v6777_v22  ;;  %2481 = vst.msk [vmem:[%s6052_s3 + $0x13c] sm:$0xf] %vm2401_vm1, %v2802_v42  ;;  %v6783_v26 = vmax.f32 %v6782_v29, 0.0  ;;  %v6784_v21 = vld [vmem:[#allocation60_spill] sm:$0xff]  ;;  %v6786_v14 = vld [vmem:[#allocation67_spill] sm:$0xff]  ;;  %v6790_v8 = vld [vmem:[#allocation69_spill] sm:$0xff] }
 0x2db   :  { %v2810_v54 = vpack.c.bf16 %v6779_v36, %v6779_v36  ;;  %v2811_v52 = vpack.c.bf16 %v6781_v28, %v6781_v28  ;;  %v6785_v61 = vmax.f32 %v6784_v21, 0.0  ;;  %v6787_v27 = vmax.f32 %v6786_v14, 0.0  ;;  %2482 = vst.msk [vmem:[%s6052_s3 + $0x140] sm:$0xf] %vm2401_vm1, %v2803_v5  ;;  %2483 = vst.msk [vmem:[%s6052_s3 + $0x144] sm:$0xf] %vm2401_vm1, %v2804_v38 }
 0x2dc   :  { %v2812_v23 = vpack.c.bf16 %v6783_v26, %v6783_v26  ;;  %2484 = vst.msk [vmem:[%s6052_s3 + $0x148] sm:$0xf] %vm2401_vm1, %v2805_v58  ;;  %2485 = vst.msk [vmem:[%s6052_s3 + $0x14c] sm:$0xf] %vm2401_vm1, %v2806_v53  ;;  %v6788_v2 = vld [vmem:[#allocation68_spill] sm:$0xff]  ;;  %v6791_v37 = vmax.f32 %v6790_v8, 0.0 }
 0x2dd   :  { %v2813_v59 = vpack.c.bf16 %v6785_v61, %v6785_v61  ;;  %v2814_v40 = vpack.c.bf16 %v6787_v27, %v6787_v27  ;;  %v6789_v1 = vmax.f32 %v6788_v2, 0.0  ;;  %v6792_v11 = vld [vmem:[#allocation70_spill] sm:$0xff]  ;;  %2486 = vst.msk [vmem:[%s6052_s3 + $0x150] sm:$0xf] %vm2401_vm1, %v2807_v0  ;;  %2487 = vst.msk [vmem:[%s6052_s3 + $0x154] sm:$0xf] %vm2401_vm1, %v2808_v33 }
 0x2de   :  { %v2816_v34 = vpack.c.bf16 %v6791_v37, %v6791_v37  ;;  %v6793_v56 = vmax.f32 %v6792_v11, 0.0  ;;  %v6794_v16 = vld [vmem:[#allocation50_spill] sm:$0xff]  ;;  %2488 = vst.msk [vmem:[%s6052_s3 + $0x158] sm:$0xf] %vm2401_vm1, %v2809_v4  ;;  %2489 = vst.msk [vmem:[%s6052_s3 + $0x15c] sm:$0xf] %vm2401_vm1, %v2810_v54 }
 0x2df   :  { %v2815_v13 = vpack.c.bf16 %v6789_v1, %v6789_v1  ;;  %v6795_v43 = vmax.f32 %v6794_v16, 0.0  ;;  %v6796_v15 = vld [vmem:[#allocation63_spill] sm:$0xff]  ;;  %v6798_v51 = vld [vmem:[#allocation64_spill] sm:$0xff]  ;;  %v6800_v20 = vld [vmem:[#allocation65_spill] sm:$0xff]  ;;  %2490 = vst.msk [vmem:[%s6052_s3 + $0x160] sm:$0xf] %vm2401_vm1, %v2811_v52 }
 0x2e0   :  { %v2817_v30 = vpack.c.bf16 %v6793_v56, %v6793_v56  ;;  %v6797_v24 = vmax.f32 %v6796_v15, 0.0  ;;  %v6799_v47 = vmax.f32 %v6798_v51, 0.0  ;;  %v6801_v49 = vmax.f32 %v6800_v20, 0.0  ;;  %v6802_v45 = vld [vmem:[#allocation66_spill] sm:$0xff]  ;;  %2491 = vst.msk [vmem:[%s6052_s3 + $0x164] sm:$0xf] %vm2401_vm1, %v2812_v23 }
 0x2e1   :  { %v2818_v3 = vpack.c.bf16 %v6795_v43, %v6795_v43  ;;  %v6803_v32 = vmax.f32 %v6802_v45, 0.0  ;;  %2492 = vst.msk [vmem:[%s6052_s3 + $0x168] sm:$0xf] %vm2401_vm1, %v2813_v59  ;;  %2493 = vst.msk [vmem:[%s6052_s3 + $0x16c] sm:$0xf] %vm2401_vm1, %v2814_v40 }
 0x2e2   :  { %v2819_v46 = vpack.c.bf16 %v6797_v24, %v6797_v24  ;;  %v2820_v55 = vpack.c.bf16 %v6799_v47, %v6799_v47  ;;  %v2821_v41 = vpack.c.bf16 %v6801_v49, %v6801_v49  ;;  %2494 = vst.msk [vmem:[%s6052_s3 + $0x170] sm:$0xf] %vm2401_vm1, %v2815_v13  ;;  %2495 = vst.msk [vmem:[%s6052_s3 + $0x174] sm:$0xf] %vm2401_vm1, %v2816_v34 }
 0x2e3   :  { %v2822_v18 = vpack.c.bf16 %v6803_v32, %v6803_v32  ;;  %2496 = vst.msk [vmem:[%s6052_s3 + $0x178] sm:$0xf] %vm2401_vm1, %v2817_v30  ;;  %2497 = vst.msk [vmem:[%s6052_s3 + $0x17c] sm:$0xf] %vm2401_vm1, %v2818_v3 }
 0x2e4   :  { %2498 = vst.msk [vmem:[%s6052_s3 + $0x180] sm:$0xf] %vm2401_vm1, %v2819_v46  ;;  %2499 = vst.msk [vmem:[%s6052_s3 + $0x184] sm:$0xf] %vm2401_vm1, %v2820_v55 }
 0x2e5   :  { %2500 = vst.msk [vmem:[%s6052_s3 + $0x188] sm:$0xf] %vm2401_vm1, %v2821_v41  ;;  %2501 = vst.msk [vmem:[%s6052_s3 + $0x18c] sm:$0xf] %vm2401_vm1, %v2822_v18 }

// kernel: squeeze.4
= control target key start
LH: loop header
LB: loop body
LE: loop exit
PB: predicated region body
PF: predicated region fallthrough
CT: control target
= control target key end

     0   :  { %vm402_vm0 = vcmask 523264   ;;  %s1285_s0 = inlined_call_operand.vmem [shape: bf16[1,200,64], index: 0, kind: input, shape index: {}]   ;;  %s1286_s1 = inlined_call_operand.vmem [shape: bf16[2,10,10,64], index: 1, kind: output, shape index: {}]  }
   0x1   :  { %v895_v0 = vld [vmem:[%s1285_s0 + $0x60] sm:$0xf]  ;;  %v1106_v1 = vld [vmem:[%s1285_s0 + $0x58] sm:$0xff]   ;;  %v1107_v2 = vld [vmem:[%s1285_s0 + $0x50] sm:$0xff]  }
   0x2   :  { %v17_v3 = vunpack.c.l.bf16 %v895_v0  ;;  %v960_v4 = vunpack.c.l.bf16 %v1106_v1  ;;  %v961_v5 = vunpack.c.h.bf16 %v1106_v1  ;;  %v964_v6 = vunpack.c.l.bf16 %v1107_v2  ;;  %v1108_v7 = vld [vmem:[%s1285_s0 + $0x48] sm:$0xff]   ;;  %v1109_v8 = vld [vmem:[%s1285_s0 + $0x40] sm:$0xff]   ;;  %v1110_v9 = vld [vmem:[%s1285_s0 + $0x38] sm:$0xff]  }
   0x3   :  { %v965_v10 = vunpack.c.h.bf16 %v1107_v2  ;;  %v968_v11 = vunpack.c.l.bf16 %v1108_v7  ;;  %v969_v12 = vunpack.c.h.bf16 %v1108_v7  ;;  %v972_v13 = vunpack.c.l.bf16 %v1109_v8  ;;  %v1111_v14 = vld [vmem:[%s1285_s0 + $0x30] sm:$0xff]   ;;  %v1112_v15 = vld [vmem:[%s1285_s0 + $0x28] sm:$0xff]   ;;  %v1113_v16 = vld [vmem:[%s1285_s0 + $0x20] sm:$0xff]  }
   0x4   :  { %v973_v17 = vunpack.c.h.bf16 %v1109_v8  ;;  %v976_v18 = vunpack.c.l.bf16 %v1110_v9  ;;  %v977_v19 = vunpack.c.h.bf16 %v1110_v9  ;;  %v980_v20 = vunpack.c.l.bf16 %v1111_v14  ;;  %v1114_v21 = vld [vmem:[%s1285_s0 + $0x18] sm:$0xff]   ;;  %v1115_v22 = vld [vmem:[%s1285_s0 + $0x10] sm:$0xff]   ;;  %v1116_v23 = vld [vmem:[%s1285_s0 + $0x8] sm:$0xff]   ;;  %527 = vst.msk [vmem:[#allocation0 + $0x100] sm:$0xff] %vm402_vm0, %v964_v6  }
   0x5   :  { %539 = vst.msk [vmem:[#allocation0 + $0x116] sm:$0xf] %vm402_vm0, %v960_v4   ;;  %541 = vst.msk [vmem:[#allocation0 + $0x11c] sm:$0xf0] %vm402_vm0, %v960_v4   ;;  %v981_v24 = vunpack.c.h.bf16 %v1111_v14  ;;  %v984_v25 = vunpack.c.l.bf16 %v1112_v15  ;;  %v985_v26 = vunpack.c.h.bf16 %v1112_v15  ;;  %v988_v27 = vunpack.c.l.bf16 %v1113_v16  ;;  %v1003_v28 = vld [vmem:[%s1285_s0] sm:$0xff]  }
   0x6   :  { %546 = vst.msk [vmem:[#allocation0 + $0x124] sm:$0x3f] %vm402_vm0, %v961_v5   ;;  %548 = vst.msk [vmem:[#allocation0 + $0x12a] sm:$0xc0] %vm402_vm0, %v961_v5   ;;  %v989_v29 = vunpack.c.h.bf16 %v1113_v16  ;;  %v992_v30 = vunpack.c.l.bf16 %v1114_v21  ;;  %v993_v31 = vunpack.c.h.bf16 %v1114_v21  ;;  %v996_v32 = vunpack.c.l.bf16 %v1115_v22 }
   0x7   :  { %553 = vst.msk [vmem:[#allocation0 + $0x132] sm:$0xff] %vm402_vm0, %v17_v3   ;;  %501 = vst.msk [vmem:[#allocation0 + $0xc8] sm:$0x3] %vm402_vm0, %v972_v13   ;;  %v997_v33 = vunpack.c.h.bf16 %v1115_v22  ;;  %v1000_v34 = vunpack.c.l.bf16 %v1116_v23  ;;  %v1001_v35 = vunpack.c.h.bf16 %v1116_v23  ;;  %v1004_v36 = vunpack.c.l.bf16 %v1003_v28 }
   0x8   :  { %503 = vst.msk [vmem:[#allocation0 + $0xce] sm:$0xfc] %vm402_vm0, %v972_v13   ;;  %515 = vst.msk [vmem:[#allocation0 + $0xe4] sm:$0x3f] %vm402_vm0, %v968_v11   ;;  %v1005_v37 = vunpack.c.h.bf16 %v1003_v28 }
   0x9   :  { %517 = vst.msk [vmem:[#allocation0 + $0xea] sm:$0xc0] %vm402_vm0, %v968_v11   ;;  %522 = vst.msk [vmem:[#allocation0 + $0xf2] sm:$0xff] %vm402_vm0, %v969_v12  }
   0xa   :  { %532 = vst.msk [vmem:[#allocation0 + $0x108] sm:$0x3] %vm402_vm0, %v965_v10   ;;  %534 = vst.msk [vmem:[#allocation0 + $0x10e] sm:$0xfc] %vm402_vm0, %v965_v10  }
   0xb   :  { %477 = vst.msk [vmem:[#allocation0 + $0x96] sm:$0xf] %vm402_vm0, %v980_v20   ;;  %479 = vst.msk [vmem:[#allocation0 + $0x9c] sm:$0xf0] %vm402_vm0, %v980_v20   ;;  %v779_v0 = vld [vmem:[#allocation0 + $0x100] sm:$0xff] }
   0xc   :  { %491 = vst.msk [vmem:[#allocation0 + $0xb2] sm:$0xff] %vm402_vm0, %v976_v18   ;;  %496 = vst.msk [vmem:[#allocation0 + $0xc0] sm:$0xff] %vm402_vm0, %v977_v19   ;;  %v800_v7 = vld [vmem:[#allocation0 + $0x118] sm:$0xff] }
   0xd   :  { %508 = vst.msk [vmem:[#allocation0 + $0xd6] sm:$0xf] %vm402_vm0, %v973_v17   ;;  %510 = vst.msk [vmem:[#allocation0 + $0xdc] sm:$0xf0] %vm402_vm0, %v973_v17   ;;  %v807_v8 = vld [vmem:[#allocation0 + $0x120] sm:$0xff]  ;;  %v814_v28 = vld [vmem:[#allocation0 + $0x128] sm:$0xff] }
   0xe   :  { %453 = vst.msk [vmem:[#allocation0 + $0x64] sm:$0x3f] %vm402_vm0, %v988_v27   ;;  %455 = vst.msk [vmem:[#allocation0 + $0x6a] sm:$0xc0] %vm402_vm0, %v988_v27   ;;  %v730_v38 = vld [vmem:[#allocation0 + $0xc8] sm:$0xff] }
   0xf   :  { %465 = vst.msk [vmem:[#allocation0 + $0x80] sm:$0xff] %vm402_vm0, %v984_v25   ;;  %470 = vst.msk [vmem:[#allocation0 + $0x88] sm:$0x3] %vm402_vm0, %v985_v26   ;;  %v758_v62 = vld [vmem:[#allocation0 + $0xe8] sm:$0xff] }
  0x10   :  { %472 = vst.msk [vmem:[#allocation0 + $0x8e] sm:$0xfc] %vm402_vm0, %v985_v26   ;;  %484 = vst.msk [vmem:[#allocation0 + $0xa4] sm:$0x3f] %vm402_vm0, %v981_v24   ;;  %v765_v63 = vld [vmem:[#allocation0 + $0xf0] sm:$0xff]  ;;  %v772_v22 = vld [vmem:[#allocation0 + $0xf8] sm:$0xff] }
  0x11   :  { %486 = vst.msk [vmem:[#allocation0 + $0xaa] sm:$0xc0] %vm402_vm0, %v981_v24   ;;  %429 = vst.msk [vmem:[#allocation0 + $0x32] sm:$0xff] %vm402_vm0, %v996_v32   ;;  %v786_v23 = vld [vmem:[#allocation0 + $0x108] sm:$0xff]  ;;  %v1084_v25 = vpack.c.bf16 %v772_v22, %v765_v63  ;;  %v793_v27 = vld [vmem:[#allocation0 + $0x110] sm:$0xff] }
  0x12   :  { %439 = vst.msk [vmem:[#allocation0 + $0x48] sm:$0x3] %vm402_vm0, %v992_v30   ;;  %441 = vst.msk [vmem:[#allocation0 + $0x4e] sm:$0xfc] %vm402_vm0, %v992_v30   ;;  %v688_v51 = vld [vmem:[#allocation0 + $0x98] sm:$0xff]  ;;  %v1089_v26 = vpack.c.bf16 %v786_v23, %v779_v0  ;;  %v1094_v30 = vpack.c.bf16 %v800_v7, %v793_v27 }
  0x13   :  { %446 = vst.msk [vmem:[#allocation0 + $0x56] sm:$0xf] %vm402_vm0, %v993_v31   ;;  %448 = vst.msk [vmem:[#allocation0 + $0x5c] sm:$0xf0] %vm402_vm0, %v993_v31   ;;  %v723_v39 = vld [vmem:[#allocation0 + $0xc0] sm:$0xff]  ;;  %v716_v55 = vld [vmem:[#allocation0 + $0xb8] sm:$0xff]  ;;  %v1099_v31 = vpack.c.bf16 %v814_v28, %v807_v8 }
  0x14   :  { %460 = vst.msk [vmem:[#allocation0 + $0x72] sm:$0xff] %vm402_vm0, %v989_v29   ;;  %403 = vst.msk [vmem:[#allocation0] sm:$0xff] %vm402_vm0, %v1004_v36   ;;  %v1069_v42 = vpack.c.bf16 %v730_v38, %v723_v39  ;;  %v737_v17 = vld [vmem:[#allocation0 + $0xd0] sm:$0xff]  ;;  %v744_v18 = vld [vmem:[#allocation0 + $0xd8] sm:$0xff] }
  0x15   :  { %415 = vst.msk [vmem:[#allocation0 + $0x16] sm:$0xf] %vm402_vm0, %v1000_v34   ;;  %417 = vst.msk [vmem:[#allocation0 + $0x1c] sm:$0xf0] %vm402_vm0, %v1000_v34   ;;  %v646_v46 = vld [vmem:[#allocation0 + $0x68] sm:$0xff]  ;;  %v1074_v20 = vpack.c.bf16 %v744_v18, %v737_v17  ;;  %v751_v21 = vld [vmem:[#allocation0 + $0xe0] sm:$0xff] }
  0x16   :  { %422 = vst.msk [vmem:[#allocation0 + $0x24] sm:$0x3f] %vm402_vm0, %v1001_v35   ;;  %424 = vst.msk [vmem:[#allocation0 + $0x2a] sm:$0xc0] %vm402_vm0, %v1001_v35   ;;  %v667_v40 = vld [vmem:[#allocation0 + $0x80] sm:$0xff]  ;;  %v674_v41 = vld [vmem:[#allocation0 + $0x88] sm:$0xff]  ;;  %v1079_v24 = vpack.c.bf16 %v758_v62, %v751_v21 }
  0x17   :  { %434 = vst.msk [vmem:[#allocation0 + $0x40] sm:$0xff] %vm402_vm0, %v997_v33   ;;  %408 = vst.msk [vmem:[#allocation0 + $0x8] sm:$0x3] %vm402_vm0, %v1005_v37   ;;  %v1049_v47 = vpack.c.bf16 %v674_v41, %v667_v40  ;;  %v681_v11 = vld [vmem:[#allocation0 + $0x90] sm:$0xff]  ;;  %v695_v12 = vld [vmem:[#allocation0 + $0xa0] sm:$0xff] }
  0x18   :  { %410 = vst.msk [vmem:[#allocation0 + $0xe] sm:$0xfc] %vm402_vm0, %v1005_v37   ;;  %v604_v43 = vld [vmem:[#allocation0 + $0x38] sm:$0xff]  ;;  %1128 = vst [vmem:[%s1286_s1 + $0x60] sm:$0xff] %v1069_v42   ;;  %v702_v13 = vld [vmem:[#allocation0 + $0xa8] sm:$0xff]  ;;  %v1054_v14 = vpack.c.bf16 %v688_v51, %v681_v11 }
  0x19   :  { %v618_v44 = vld [vmem:[#allocation0 + $0x48] sm:$0xff]  ;;  %1124 = vst [vmem:[%s1286_s1 + $0x40] sm:$0xff] %v1049_v47   ;;  %v1059_v15 = vpack.c.bf16 %v702_v13, %v695_v12  ;;  %v709_v16 = vld [vmem:[#allocation0 + $0xb0] sm:$0xff]  ;;  %1129 = vst [vmem:[%s1286_s1 + $0x68] sm:$0xff] %v1074_v20  }
  0x1a   :  { %v625_v45 = vld [vmem:[#allocation0 + $0x50] sm:$0xff]  ;;  %v632_v61 = vld [vmem:[#allocation0 + $0x58] sm:$0xff]  ;;  %v639_v4 = vld [vmem:[#allocation0 + $0x60] sm:$0xff]  ;;  %v1064_v19 = vpack.c.bf16 %v716_v55, %v709_v16  ;;  %1125 = vst [vmem:[%s1286_s1 + $0x48] sm:$0xff] %v1054_v14  }
  0x1b   :  { %v558_v48 = vld [vmem:[#allocation0] sm:$0xff]  ;;  %v1034_v3 = vpack.c.bf16 %v632_v61, %v625_v45  ;;  %v653_v5 = vld [vmem:[#allocation0 + $0x70] sm:$0xff]  ;;  %v660_v6 = vld [vmem:[#allocation0 + $0x78] sm:$0xff]  ;;  %v1039_v9 = vpack.c.bf16 %v646_v46, %v639_v4  ;;  %1126 = vst [vmem:[%s1286_s1 + $0x50] sm:$0xff] %v1059_v15  }
  0x1c   :  { %v576_v49 = vld [vmem:[#allocation0 + $0x18] sm:$0xff]  ;;  %v1044_v10 = vpack.c.bf16 %v660_v6, %v653_v5  ;;  %v821_v29 = vld [vmem:[#allocation0 + $0x130] sm:$0xff]  ;;  %1127 = vst [vmem:[%s1286_s1 + $0x58] sm:$0xff] %v1064_v19   ;;  %1130 = vst [vmem:[%s1286_s1 + $0x70] sm:$0xff] %v1079_v24  }
  0x1d   :  { %v583_v50 = vld [vmem:[#allocation0 + $0x20] sm:$0xff]  ;;  %v590_v54 = vld [vmem:[#allocation0 + $0x28] sm:$0xff]  ;;  %v597_v59 = vld [vmem:[#allocation0 + $0x30] sm:$0xff]  ;;  %1121 = vst [vmem:[%s1286_s1 + $0x28] sm:$0xff] %v1034_v3  }
  0x1e   :  { %v563_v52 = vld [vmem:[#allocation0 + $0x8] sm:$0xff]  ;;  %v1019_v58 = vpack.c.bf16 %v590_v54, %v583_v50  ;;  %v611_v60 = vld [vmem:[#allocation0 + $0x40] sm:$0xff]  ;;  %v1024_v1 = vpack.c.bf16 %v604_v43, %v597_v59  ;;  %1122 = vst [vmem:[%s1286_s1 + $0x30] sm:$0xff] %v1039_v9   ;;  %1123 = vst [vmem:[%s1286_s1 + $0x38] sm:$0xff] %v1044_v10  }
  0x1f   :  { %v569_v53 = vld [vmem:[#allocation0 + $0x10] sm:$0xff]  ;;  %v1009_v56 = vpack.c.bf16 %v563_v52, %v558_v48  ;;  %v1029_v2 = vpack.c.bf16 %v618_v44, %v611_v60  ;;  %v828_v32 = vld [vmem:[#allocation0 + $0x138] sm:$0xff]  ;;  %1131 = vst [vmem:[%s1286_s1 + $0x78] sm:$0xff] %v1084_v25   ;;  %1132 = vst [vmem:[%s1286_s1 + $0x80] sm:$0xff] %v1089_v26  }
  0x20   :  { %v1014_v57 = vpack.c.bf16 %v576_v49, %v569_v53  ;;  %1118 = vst [vmem:[%s1286_s1 + $0x10] sm:$0xff] %v1019_v58   ;;  %1119 = vst [vmem:[%s1286_s1 + $0x18] sm:$0xff] %v1024_v1   ;;  %v1104_v33 = vpack.c.bf16 %v828_v32, %v821_v29 }
  0x21   :  { %1010 = vst [vmem:[%s1286_s1] sm:$0xff] %v1009_v56   ;;  %1120 = vst [vmem:[%s1286_s1 + $0x20] sm:$0xff] %v1029_v2  }
  0x22   :  { %1117 = vst [vmem:[%s1286_s1 + $0x8] sm:$0xff] %v1014_v57   ;;  %1133 = vst [vmem:[%s1286_s1 + $0x88] sm:$0xff] %v1094_v30  }
  0x23   :  { %1134 = vst [vmem:[%s1286_s1 + $0x90] sm:$0xff] %v1099_v31   ;;  %1135 = vst [vmem:[%s1286_s1 + $0x98] sm:$0xff] %v1104_v33  }

// kernel: rnd_forward.5
= control target key start
LH: loop header
LB: loop body
LE: loop exit
PB: predicated region body
PF: predicated region fallthrough
CT: control target
= control target key end

     0   :  { %s1949_s12 = smov 0   ;;  %s2364_s0 = inlined_call_operand.vmem [shape: bf16[2,200,512], index: 0, kind: input, shape index: {}]   ;;  %s2365_s1 = inlined_call_operand.vmem [shape: bf16[2,512,64], index: 1, kind: input, shape index: {}]   ;;  %s2366_s2 = inlined_call_operand.vmem [shape: f32[2,1,64], index: 2, kind: input, shape index: {}]   ;;  %s2367_s3 = inlined_call_operand.vmem [shape: bf16[2,200,64], index: 3, kind: output, shape index: {}]  }
   0x1 LB: > { %s1466_s13 = sadd.s32 4294967295, %s1927_s12   ;;  %p1470_p0 = scmp.ge.s32.totalorder %s1927_s12, 1  ;;  %s1927_s12 = sphi %s1949_s12, %s13_s12  }
   0x2   : > { %p155_p1 = scmp.lt.s32.totalorder %s1927_s12, 3 }
   0x4   : > { %p156_p2 = pnand %p1470_p0, %p155_p1 }
   0x5   : > { %p187_p3 = scmp.lt.s32.totalorder (!%p156_p2), %s1466_s13, 1  ;;  %vm1045_vm0 = vcmask (!%p156_p2), 523264   ;;  %vm1364_vm1 = vcmask (!%p156_p2), 519168  }
   0x6   : > { %159 = sbr.rel (%p156_p2) target bundleno = 427 (0x1ab), region = 32 }
   0xd   : > { %s2369_s13 = smov (!%p187_p3, %s1466_s13), 1 }
   0xe   : > { %s1587_s14 = sshll.u32 %s2369_s13, 8  ;;  %s1801_s18 = smul.u32 400, %s2369_s13 }
   0xf   : > { %s1963_s17 = scalar_lea.vmem %s2365_s1, %s1587_s14  ;;  %s199_s24 = scalar_lea.vmem %s2366_s2, %s2369_s13 }
  0x10   : > { %v1811_v0 = vld [vmem:[%s1963_s17 + $0x40] sm:$0xff]   ;;  %v1815_v4 = vld [vmem:[%s1963_s17 + $0x48] sm:$0xff]   ;;  %v1819_v8 = vld [vmem:[%s1963_s17 + $0x50] sm:$0xff]   ;;  %s1999_s21 = scalar_lea.vmem %s2364_s0, %s1801_s18  ;;  %s1802_s25 = smul.u32 100, %s2369_s13 }
  0x11   : > { %v1812_v1 = vld [vmem:[%s1963_s17 + $0xc0] sm:$0xff]   ;;  %1613 = vmatprep.subr.bf16.mxu0 %v1811_v0  ;;  %v1816_v5 = vld [vmem:[%s1963_s17 + $0xc8] sm:$0xff]   ;;  %v1820_v9 = vld [vmem:[%s1963_s17 + $0xd0] sm:$0xff]  }
  0x12   : > { %v1813_v2 = vld [vmem:[%s1963_s17] sm:$0xff]   ;;  %1707 = vmatprep.subr.bf16.mxu1 %v1812_v1  ;;  %v1817_v6 = vld [vmem:[%s1963_s17 + $0x8] sm:$0xff]   ;;  %v1821_v10 = vld [vmem:[%s1963_s17 + $0x10] sm:$0xff]   ;;  %s2303_s28 = scalar_lea.vmem %s2367_s3, %s1802_s25 }
  0x13   : > { %v1814_v3 = vld [vmem:[%s1963_s17 + $0x80] sm:$0xff]   ;;  %1614 = vmatpush3.bf16.msra.mxu0 %v1813_v2  ;;  %v1818_v7 = vld [vmem:[%s1963_s17 + $0x88] sm:$0xff]   ;;  %v1822_v11 = vld [vmem:[%s1963_s17 + $0x90] sm:$0xff]  }
  0x14   : > { %1708 = vmatpush3.bf16.msra.mxu1 %v1814_v3  ;;  %1615 = vmatprep.subr.bf16.mxu0 %v1815_v4  ;;  %v1823_v12 = vld [vmem:[%s1963_s17 + $0x58] sm:$0xff]   ;;  %v1827_v16 = vld [vmem:[%s1963_s17 + $0x60] sm:$0xff]   ;;  %v1831_v20 = vld [vmem:[%s1963_s17 + $0x68] sm:$0xff]  }
  0x15   : > { %1709 = vmatprep.subr.bf16.mxu1 %v1816_v5  ;;  %v1824_v13 = vld [vmem:[%s1963_s17 + $0xd8] sm:$0xff]   ;;  %v1828_v17 = vld [vmem:[%s1963_s17 + $0xe0] sm:$0xff]   ;;  %v1832_v21 = vld [vmem:[%s1963_s17 + $0xe8] sm:$0xff]  }
  0x16   : > { %v1825_v14 = vld [vmem:[%s1963_s17 + $0x18] sm:$0xff]   ;;  %v1829_v18 = vld [vmem:[%s1963_s17 + $0x20] sm:$0xff]   ;;  %v1833_v22 = vld [vmem:[%s1963_s17 + $0x28] sm:$0xff]  }
  0x17   : > { %1616 = vmatpush3.bf16.msra.mxu0 %v1817_v6  ;;  %v1826_v15 = vld [vmem:[%s1963_s17 + $0x98] sm:$0xff]   ;;  %v1830_v19 = vld [vmem:[%s1963_s17 + $0xa0] sm:$0xff]   ;;  %v1834_v23 = vld [vmem:[%s1963_s17 + $0xa8] sm:$0xff]  }
  0x18   : > { %1710 = vmatpush3.bf16.msra.mxu1 %v1818_v7  ;;  %1617 = vmatprep.subr.bf16.mxu0 %v1819_v8  ;;  %v1835_v24 = vld [vmem:[%s1963_s17 + $0x70] sm:$0xff]   ;;  %v1839_v28 = vld [vmem:[%s1963_s17 + $0x78] sm:$0xff]  }
  0x19   : > { %1711 = vmatprep.subr.bf16.mxu1 %v1820_v9  ;;  %v1836_v25 = vld [vmem:[%s1963_s17 + $0xf0] sm:$0xff]   ;;  %v1840_v29 = vld [vmem:[%s1963_s17 + $0xf8] sm:$0xff]  }
  0x1a   : > { %v1837_v26 = vld [vmem:[%s1963_s17 + $0x30] sm:$0xff]   ;;  %v1841_v30 = vld [vmem:[%s1963_s17 + $0x38] sm:$0xff]  }
  0x1b   : > { %1618 = vmatpush3.bf16.msra.mxu0 %v1821_v10  ;;  %v1838_v27 = vld [vmem:[%s1963_s17 + $0xb0] sm:$0xff]   ;;  %v1842_v31 = vld [vmem:[%s1963_s17 + $0xb8] sm:$0xff]  }
  0x1c   : > { %1712 = vmatpush3.bf16.msra.mxu1 %v1822_v11  ;;  %1619 = vmatprep.subr.bf16.mxu0 %v1823_v12  ;;  %v1843_v32 = vld [vmem:[%s1999_s21] ss:$16 sps:$4 sm:$0xff]   ;;  %v1845_v33 = vld [vmem:[%s1999_s21 + $0x4] ss:$16 sps:$4 sm:$0xff]   ;;  %v1846_v34 = vld [vmem:[%s1999_s21 + $0x8] ss:$16 sps:$4 sm:$0xff]  }
  0x1d   : > { %1713 = vmatprep.subr.bf16.mxu1 %v1824_v13  ;;  %v1848_v35 = vld [vmem:[%s1999_s21 + $0xc] ss:$16 sps:$4 sm:$0xff]   ;;  %805 = vmatprep.mubr.bf16.mxu0 %v1845_v33  ;;  %v1849_v36 = vld [vmem:[%s1999_s21 + $0x24] ss:$16 sps:$4 sm:$0xff]   ;;  %v1853_v38 = vld [vmem:[%s1999_s21 + $0x20] ss:$16 sps:$4 sm:$0xff]  }
  0x1e   : > { %941 = vmatprep.mubr.bf16.mxu1 %v1848_v35  ;;  %v1851_v37 = vld [vmem:[%s1999_s21 + $0x2c] ss:$16 sps:$4 sm:$0xff]   ;;  %v1854_v39 = vld [vmem:[%s1999_s21 + $0x28] ss:$16 sps:$4 sm:$0xff]   ;;  %v1855_v40 = vld [vmem:[%s1999_s21 + $0x44] ss:$16 sps:$4 sm:$0xff]  }
  0x1f   : > { %1620 = vmatpush3.bf16.msra.mxu0 %v1825_v14  ;;  %v1857_v41 = vld [vmem:[%s1999_s21 + $0x4c] ss:$16 sps:$4 sm:$0xff]   ;;  %v1859_v42 = vld [vmem:[%s1999_s21 + $0x40] ss:$16 sps:$4 sm:$0xff]   ;;  %v1860_v43 = vld [vmem:[%s1999_s21 + $0x48] ss:$16 sps:$4 sm:$0xff]  }
  0x20   : > { %1714 = vmatpush3.bf16.msra.mxu1 %v1826_v15  ;;  %1621 = vmatprep.subr.bf16.mxu0 %v1827_v16  ;;  %v1861_v44 = vld [vmem:[%s1999_s21 + $0x64] ss:$16 sps:$4 sm:$0xff]   ;;  %v1863_v45 = vld [vmem:[%s1999_s21 + $0x6c] ss:$16 sps:$4 sm:$0xff]   ;;  %v1865_v46 = vld [vmem:[%s1999_s21 + $0x60] ss:$16 sps:$4 sm:$0xff]  }
  0x21   : > { %1715 = vmatprep.subr.bf16.mxu1 %v1828_v17  ;;  %v1866_v47 = vld [vmem:[%s1999_s21 + $0x68] ss:$16 sps:$4 sm:$0xff]   ;;  %v1867_v48 = vld [vmem:[%s1999_s21 + $0x84] ss:$16 sps:$4 sm:$0xff]   ;;  %v1869_v49 = vld [vmem:[%s1999_s21 + $0x8c] ss:$16 sps:$4 sm:$0xff]  }
  0x22   : > { %v1871_v50 = vld [vmem:[%s1999_s21 + $0x80] ss:$16 sps:$4 sm:$0xff]   ;;  %v1872_v51 = vld [vmem:[%s1999_s21 + $0x88] ss:$16 sps:$4 sm:$0xff]   ;;  %v1873_v52 = vld [vmem:[%s1999_s21 + $0xa4] ss:$16 sps:$4 sm:$0xff]  }
  0x23   : > { %1622 = vmatpush3.bf16.msra.mxu0 %v1829_v18  ;;  %v1875_v53 = vld [vmem:[%s1999_s21 + $0xac] ss:$16 sps:$4 sm:$0xff]   ;;  %v1877_v54 = vld [vmem:[%s1999_s21 + $0xa0] ss:$16 sps:$4 sm:$0xff]   ;;  %v1878_v55 = vld [vmem:[%s1999_s21 + $0xa8] ss:$16 sps:$4 sm:$0xff]  }
  0x24   : > { %1716 = vmatpush3.bf16.msra.mxu1 %v1830_v19  ;;  %1623 = vmatprep.subr.bf16.mxu0 %v1831_v20  ;;  %v1879_v56 = vld [vmem:[%s1999_s21 + $0xc4] ss:$16 sps:$4 sm:$0xff]   ;;  %v1881_v57 = vld [vmem:[%s1999_s21 + $0xcc] ss:$16 sps:$4 sm:$0xff]   ;;  %v1883_v58 = vld [vmem:[%s1999_s21 + $0xc0] ss:$16 sps:$4 sm:$0xff]  }
  0x25   : > { %1717 = vmatprep.subr.bf16.mxu1 %v1832_v21  ;;  %v1884_v59 = vld [vmem:[%s1999_s21 + $0xc8] ss:$16 sps:$4 sm:$0xff]   ;;  %v1885_v60 = vld [vmem:[%s1999_s21 + $0xe4] ss:$16 sps:$4 sm:$0xff]   ;;  %v1887_v61 = vld [vmem:[%s1999_s21 + $0xec] ss:$16 sps:$4 sm:$0xff]  }
  0x26   : > { %v1889_v62 = vld [vmem:[%s1999_s21 + $0xe0] ss:$16 sps:$4 sm:$0xff]   ;;  %v1890_v63 = vld [vmem:[%s1999_s21 + $0xe8] ss:$16 sps:$4 sm:$0xff]   ;;  %v1891_v0 = vld [vmem:[%s1999_s21 + $0x104] ss:$16 sps:$4 sm:$0xff]  }
  0x27   : > { %1624 = vmatpush3.bf16.msra.mxu0 %v1833_v22  ;;  %v1893_v1 = vld [vmem:[%s1999_s21 + $0x10c] ss:$16 sps:$4 sm:$0xff]   ;;  %v1895_v2 = vld [vmem:[%s1999_s21 + $0x100] ss:$16 sps:$4 sm:$0xff]   ;;  %v1896_v3 = vld [vmem:[%s1999_s21 + $0x108] ss:$16 sps:$4 sm:$0xff]  }
  0x28   : > { %1718 = vmatpush3.bf16.msra.mxu1 %v1834_v23  ;;  %1625 = vmatprep.subr.bf16.mxu0 %v1835_v24  ;;  %v1897_v4 = vld [vmem:[%s1999_s21 + $0x124] ss:$16 sps:$4 sm:$0xff]   ;;  %v1899_v5 = vld [vmem:[%s1999_s21 + $0x12c] ss:$16 sps:$4 sm:$0xff]   ;;  %v1901_v6 = vld [vmem:[%s1999_s21 + $0x120] ss:$16 sps:$4 sm:$0xff]  }
  0x29   : > { %1719 = vmatprep.subr.bf16.mxu1 %v1836_v25  ;;  %v1902_v7 = vld [vmem:[%s1999_s21 + $0x128] ss:$16 sps:$4 sm:$0xff]   ;;  %v1903_v8 = vld [vmem:[%s1999_s21 + $0x144] ss:$16 sps:$4 sm:$0xff]   ;;  %v1905_v9 = vld [vmem:[%s1999_s21 + $0x14c] ss:$16 sps:$4 sm:$0xff]  }
  0x2a   : > { %v1907_v10 = vld [vmem:[%s1999_s21 + $0x140] ss:$16 sps:$4 sm:$0xff]   ;;  %v1908_v11 = vld [vmem:[%s1999_s21 + $0x148] ss:$16 sps:$4 sm:$0xff]   ;;  %v1909_v12 = vld [vmem:[%s1999_s21 + $0x164] ss:$16 sps:$4 sm:$0xff]  }
  0x2b   : > { %1626 = vmatpush3.bf16.msra.mxu0 %v1837_v26  ;;  %v1911_v13 = vld [vmem:[%s1999_s21 + $0x16c] ss:$16 sps:$4 sm:$0xff]   ;;  %v254_v14 = vld [vmem:[%s1999_s21 + $0x180] sm:$0xff]  ;;  %v1914_v17 = vld [vmem:[%s1999_s21 + $0x168] ss:$16 sps:$4 sm:$0xff]  }
  0x2c   : > { %1720 = vmatpush3.bf16.msra.mxu1 %v1838_v27  ;;  %1627 = vmatprep.subr.bf16.mxu0 %v1839_v28  ;;  %v255_v15 = vld [vmem:[%s1999_s21 + $0x188] sm:$0xff]  ;;  %v1913_v16 = vld [vmem:[%s1999_s21 + $0x160] ss:$16 sps:$4 sm:$0xff]   ;;  %v1525_v18 = vcombine.high %v254_v14, %v254_v14  ;;  %v1524_v20 = vcombine.low %v254_v14, %v254_v14 }
  0x2d   : > { %1721 = vmatprep.subr.bf16.mxu1 %v1840_v29  ;;  %v1527_v19 = vcombine.high %v255_v15, %v255_v15  ;;  %v1526_v21 = vcombine.low %v255_v15, %v255_v15  ;;  %v2057_v24 = vld [vmem:[%s199_s24] ss:$0 sm:$0xff] }
  0x2f   : > { %1628 = vmatpush3.bf16.msra.mxu0 %v1841_v30 }
  0x30   : > { %1722 = vmatpush3.bf16.msra.mxu1 %v1842_v31 }
  0x32   : > { %806 = vmatmul.mubr.bf16.vlgmr.msra.gmra.mrb[0].mxu0 %v1843_v32 }
  0x33   : > { %942 = vmatmul.mubr.bf16.vlgmr.msra.gmra.mrb[0].mxu1 %v1846_v34  ;;  %813 = vmatprep.mubr.bf16.mxu0 %v1849_v36 }
  0x34   : > { %949 = vmatprep.mubr.bf16.mxu1 %v1851_v37 }
  0x3a   : > { %814 = vmatmul.mubr.bf16.gmra.mrb[4].mxu0 %v1853_v38 }
  0x3b   : > { %950 = vmatmul.mubr.bf16.gmra.mrb[4].mxu1 %v1854_v39  ;;  %821 = vmatprep.mubr.bf16.mxu0 %v1855_v40 }
  0x3c   : > { %957 = vmatprep.mubr.bf16.mxu1 %v1857_v41 }
  0x42   : > { %822 = vmatmul.mubr.bf16.gmra.mrb[8].mxu0 %v1859_v42 }
  0x43   : > { %958 = vmatmul.mubr.bf16.gmra.mrb[8].mxu1 %v1860_v43  ;;  %829 = vmatprep.mubr.bf16.mxu0 %v1861_v44 }
  0x44   : > { %965 = vmatprep.mubr.bf16.mxu1 %v1863_v45 }
  0x4a   : > { %830 = vmatmul.mubr.bf16.gmra.mrb[12].mxu0 %v1865_v46 }
  0x4b   : > { %966 = vmatmul.mubr.bf16.gmra.mrb[12].mxu1 %v1866_v47  ;;  %837 = vmatprep.mubr.bf16.mxu0 %v1867_v48 }
  0x4c   : > { %973 = vmatprep.mubr.bf16.mxu1 %v1869_v49 }
  0x52   : > { %838 = vmatmul.mubr.bf16.gmra.mrb[16].mxu0 %v1871_v50 }
  0x53   : > { %974 = vmatmul.mubr.bf16.gmra.mrb[16].mxu1 %v1872_v51  ;;  %845 = vmatprep.mubr.bf16.mxu0 %v1873_v52 }
  0x54   : > { %981 = vmatprep.mubr.bf16.mxu1 %v1875_v53 }
  0x5a   : > { %846 = vmatmul.mubr.bf16.gmra.mrb[20].mxu0 %v1877_v54 }
  0x5b   : > { %982 = vmatmul.mubr.bf16.gmra.mrb[20].mxu1 %v1878_v55  ;;  %853 = vmatprep.mubr.bf16.mxu0 %v1879_v56 }
  0x5c   : > { %989 = vmatprep.mubr.bf16.mxu1 %v1881_v57 }
  0x62   : > { %854 = vmatmul.mubr.bf16.gmra.mrb[24].mxu0 %v1883_v58 }
  0x63   : > { %990 = vmatmul.mubr.bf16.gmra.mrb[24].mxu1 %v1884_v59  ;;  %861 = vmatprep.mubr.bf16.mxu0 %v1885_v60 }
  0x64   : > { %997 = vmatprep.mubr.bf16.mxu1 %v1887_v61 }
  0x6a   : > { %862 = vmatmul.mubr.bf16.gmra.mrb[28].mxu0 %v1889_v62 }
  0x6b   : > { %998 = vmatmul.mubr.bf16.gmra.mrb[28].mxu1 %v1890_v63  ;;  %869 = vmatprep.mubr.bf16.mxu0 %v1891_v0 }
  0x6c   : > { %1005 = vmatprep.mubr.bf16.mxu1 %v1893_v1 }
  0x72   : > { %870 = vmatmul.mubr.bf16.gmra.mrb[32].mxu0 %v1895_v2 }
  0x73   : > { %1006 = vmatmul.mubr.bf16.gmra.mrb[32].mxu1 %v1896_v3  ;;  %877 = vmatprep.mubr.bf16.mxu0 %v1897_v4 }
  0x74   : > { %1013 = vmatprep.mubr.bf16.mxu1 %v1899_v5 }
  0x7a   : > { %878 = vmatmul.mubr.bf16.gmra.mrb[36].mxu0 %v1901_v6 }
  0x7b   : > { %1014 = vmatmul.mubr.bf16.gmra.mrb[36].mxu1 %v1902_v7  ;;  %885 = vmatprep.mubr.bf16.mxu0 %v1903_v8 }
  0x7c   : > { %1021 = vmatprep.mubr.bf16.mxu1 %v1905_v9 }
  0x82   : > { %886 = vmatmul.mubr.bf16.gmra.mrb[40].mxu0 %v1907_v10 }
  0x83   : > { %1022 = vmatmul.mubr.bf16.gmra.mrb[40].mxu1 %v1908_v11  ;;  %893 = vmatprep.mubr.bf16.mxu0 %v1909_v12 }
  0x84   : > { %1029 = vmatprep.mubr.bf16.mxu1 %v1911_v13 }
  0x8a   : > { %894 = vmatmul.mubr.bf16.gmra.mrb[44].mxu0 %v1913_v16 }
  0x8b   : > { %1030 = vmatmul.mubr.bf16.gmra.mrb[44].mxu1 %v1914_v17  ;;  %901 = vmatprep.mubr.bf16.mxu0 %v1525_v18 }
  0x8c   : > { %1037 = vmatprep.mubr.bf16.mxu1 %v1527_v19 }
  0x92   : > { %902 = vmatmul.mubr.bf16.gmra.mrb[48].mxu0 %v1524_v20 }
  0x93   : > { %1038 = vmatmul.mubr.bf16.gmra.mrb[48].mxu1 %v1526_v21 }
 0x105   : > { %v1629_v22 = vpop.f32.mrb[0].mxu0 }
 0x106   : > { %v1723_v23 = vpop.f32.mrb[0].mxu1  ;;  %v1630_v25 = vpop.f32.mrb[1].mxu0 }
 0x107   : > { %v1631_v26 = vadd.f32 %v1630_v25, %v1629_v22  ;;  %v1724_v27 = vpop.f32.mrb[1].mxu1  ;;  %v1632_v28 = vpop.f32.mrb[2].mxu0 }
 0x108   : > { %v1725_v29 = vadd.f32 %v1724_v27, %v1723_v23  ;;  %v1726_v30 = vpop.f32.mrb[2].mxu1  ;;  %v1633_v31 = vpop.f32.mrb[3].mxu0 }
 0x109   : > { %v808_v32 = vadd.f32 %v1631_v26, %v2057_v24  ;;  %v1634_v33 = vadd.f32 %v1633_v31, %v1632_v28  ;;  %v1727_v34 = vpop.f32.mrb[3].mxu1 }
 0x10a   : > { %v1728_v35 = vadd.f32 %v1727_v34, %v1726_v30 }
 0x10b   : > { %v2060_v36 = vadd.f32 %v1725_v29, %v808_v32  ;;  %v811_v37 = vadd.f32 %v1634_v33, %v2057_v24 }
 0x10d   : > { %v2063_v38 = vadd.f32 %v1728_v35, %v811_v37  ;;  %v1635_v39 = vpop.f32.mrb[4].mxu0  ;;  %v1103_v62 = vmul.f32 %v2060_v36, %v2060_v36  ;;  %v1046_v7 = vsel %vm1045_vm0, %v2060_v36, 0.0 }
 0x10e   : > { %v1729_v40 = vpop.f32.mrb[4].mxu1  ;;  %v1636_v41 = vpop.f32.mrb[5].mxu0 }
 0x10f   : > { %v1637_v42 = vadd.f32 %v1636_v41, %v1635_v39  ;;  %v1730_v43 = vpop.f32.mrb[5].mxu1  ;;  %v1638_v44 = vpop.f32.mrb[6].mxu0  ;;  %v1104_v58 = vmul.f32 %v2063_v38, %v2063_v38  ;;  %v1047_v2 = vsel %vm1045_vm0, %v2063_v38, 0.0  ;;  %v1128_v14 = vsel %vm1045_vm0, %v1103_v62, 0.0 }
 0x110   : > { %v1731_v45 = vadd.f32 %v1730_v43, %v1729_v40  ;;  %v1732_v46 = vpop.f32.mrb[6].mxu1  ;;  %v1639_v47 = vpop.f32.mrb[7].mxu0  ;;  %v1048_v13 = vadd.f32 %v1047_v2, %v1046_v7 }
 0x111   : > { %v816_v48 = vadd.f32 %v1637_v42, %v2057_v24  ;;  %v1640_v49 = vadd.f32 %v1639_v47, %v1638_v44  ;;  %v1733_v50 = vpop.f32.mrb[7].mxu1  ;;  %v1129_v9 = vsel %vm1045_vm0, %v1104_v58, 0.0 }
 0x112   : > { %v1734_v51 = vadd.f32 %v1733_v50, %v1732_v46  ;;  %v1130_v19 = vadd.f32 %v1129_v9, %v1128_v14 }
 0x113   : > { %v2066_v52 = vadd.f32 %v1731_v45, %v816_v48  ;;  %v819_v53 = vadd.f32 %v1640_v49, %v2057_v24 }
 0x115   : > { %v2069_v54 = vadd.f32 %v1734_v51, %v819_v53  ;;  %v1641_v55 = vpop.f32.mrb[8].mxu0  ;;  %v1105_v3 = vmul.f32 %v2066_v52, %v2066_v52  ;;  %v1049_v10 = vsel %vm1045_vm0, %v2066_v52, 0.0 }
 0x116   : > { %v1735_v56 = vpop.f32.mrb[8].mxu1  ;;  %v1642_v57 = vpop.f32.mrb[9].mxu0  ;;  %v1050_v20 = vadd.f32 %v1049_v10, %v1048_v13 }
 0x117   : > { %v1643_v59 = vadd.f32 %v1642_v57, %v1641_v55  ;;  %v1736_v60 = vpop.f32.mrb[9].mxu1  ;;  %v1644_v61 = vpop.f32.mrb[10].mxu0  ;;  %v1131_v15 = vsel %vm1045_vm0, %v1105_v3, 0.0  ;;  %v1106_v16 = vmul.f32 %v2069_v54, %v2069_v54  ;;  %v1051_v23 = vsel %vm1045_vm0, %v2069_v54, 0.0 }
 0x118   : > { %v1737_v63 = vadd.f32 %v1736_v60, %v1735_v56  ;;  %v1738_v0 = vpop.f32.mrb[10].mxu1  ;;  %v1645_v1 = vpop.f32.mrb[11].mxu0  ;;  %v1132_v29 = vadd.f32 %v1131_v15, %v1130_v19  ;;  %v1052_v40 = vadd.f32 %v1051_v23, %v1050_v20 }
 0x119   : > { %v824_v4 = vadd.f32 %v1643_v59, %v2057_v24  ;;  %v1646_v5 = vadd.f32 %v1645_v1, %v1644_v61  ;;  %v1739_v6 = vpop.f32.mrb[11].mxu1  ;;  %v1133_v33 = vsel %vm1045_vm0, %v1106_v16, 0.0 }
 0x11a   : > { %v1740_v8 = vadd.f32 %v1739_v6, %v1738_v0  ;;  %v1134_v46 = vadd.f32 %v1133_v33, %v1132_v29 }
 0x11b   : > { %v2085_v11 = vadd.f32 %v1737_v63, %v824_v4  ;;  %v827_v12 = vadd.f32 %v1646_v5, %v2057_v24 }
 0x11d   : > { %v2092_v17 = vadd.f32 %v1740_v8, %v827_v12  ;;  %v1647_v18 = vpop.f32.mrb[12].mxu0  ;;  %v1107_v25 = vmul.f32 %v2085_v11, %v2085_v11  ;;  %v1053_v34 = vsel %vm1045_vm0, %v2085_v11, 0.0 }
 0x11e   : > { %v1741_v21 = vpop.f32.mrb[12].mxu1  ;;  %v1648_v22 = vpop.f32.mrb[13].mxu0  ;;  %v1054_v47 = vadd.f32 %v1053_v34, %v1052_v40 }
 0x11f   : > { %v1649_v26 = vadd.f32 %v1648_v22, %v1647_v18  ;;  %v1742_v27 = vpop.f32.mrb[13].mxu1  ;;  %v1650_v28 = vpop.f32.mrb[14].mxu0  ;;  %v1135_v42 = vsel %vm1045_vm0, %v1107_v25, 0.0  ;;  %v1108_v43 = vmul.f32 %v2092_v17, %v2092_v17  ;;  %v1055_v48 = vsel %vm1045_vm0, %v2092_v17, 0.0 }
 0x120   : > { %v1743_v30 = vadd.f32 %v1742_v27, %v1741_v21  ;;  %v1744_v31 = vpop.f32.mrb[14].mxu1  ;;  %v1651_v32 = vpop.f32.mrb[15].mxu0  ;;  %v1136_v53 = vadd.f32 %v1135_v42, %v1134_v46  ;;  %v1056_v62 = vadd.f32 %v1055_v48, %v1054_v47 }
 0x121   : > { %v832_v35 = vadd.f32 %v1649_v26, %v2057_v24  ;;  %v1652_v37 = vadd.f32 %v1651_v32, %v1650_v28  ;;  %v1745_v39 = vpop.f32.mrb[15].mxu1  ;;  %v1137_v57 = vsel %vm1045_vm0, %v1108_v43, 0.0 }
 0x122   : > { %v1746_v41 = vadd.f32 %v1745_v39, %v1744_v31  ;;  %v1138_v7 = vadd.f32 %v1137_v57, %v1136_v53 }
 0x123   : > { %v2105_v44 = vadd.f32 %v1743_v30, %v832_v35  ;;  %v835_v45 = vadd.f32 %v1652_v37, %v2057_v24 }
 0x125   : > { %v1109_v49 = vmul.f32 %v2105_v44, %v2105_v44  ;;  %v2112_v50 = vadd.f32 %v1746_v41, %v835_v45  ;;  %v1653_v51 = vpop.f32.mrb[16].mxu0  ;;  %v1057_v58 = vsel %vm1045_vm0, %v2105_v44, 0.0 }
 0x126   : > { %v1747_v55 = vpop.f32.mrb[16].mxu1  ;;  %v1654_v56 = vpop.f32.mrb[17].mxu0  ;;  %v1058_v8 = vadd.f32 %v1057_v58, %v1056_v62 }
 0x127   : > { %v1655_v59 = vadd.f32 %v1654_v56, %v1653_v51  ;;  %v1748_v60 = vpop.f32.mrb[17].mxu1  ;;  %v1656_v61 = vpop.f32.mrb[18].mxu0  ;;  %v1139_v2 = vsel %vm1045_vm0, %v1109_v49, 0.0  ;;  %v1110_v3 = vmul.f32 %v2112_v50, %v2112_v50  ;;  %v1059_v10 = vsel %vm1045_vm0, %v2112_v50, 0.0 }
 0x128   : > { %v1749_v63 = vadd.f32 %v1748_v60, %v1747_v55  ;;  %v1750_v0 = vpop.f32.mrb[18].mxu1  ;;  %v1657_v1 = vpop.f32.mrb[19].mxu0  ;;  %v1140_v14 = vadd.f32 %v1139_v2, %v1138_v7  ;;  %v1060_v21 = vadd.f32 %v1059_v10, %v1058_v8 }
 0x129   : > { %v840_v4 = vadd.f32 %v1655_v59, %v2057_v24  ;;  %v1658_v5 = vadd.f32 %v1657_v1, %v1656_v61  ;;  %v1751_v6 = vpop.f32.mrb[19].mxu1  ;;  %v1141_v15 = vsel %vm1045_vm0, %v1110_v3, 0.0 }
 0x12a   : > { %v1752_v9 = vadd.f32 %v1751_v6, %v1750_v0  ;;  %v1142_v30 = vadd.f32 %v1141_v15, %v1140_v14 }
 0x12b   : > { %v2123_v12 = vadd.f32 %v1749_v63, %v840_v4  ;;  %v843_v13 = vadd.f32 %v1658_v5, %v2057_v24 }
 0x12d   : > { %v1061_v16 = vsel %vm1045_vm0, %v2123_v12, 0.0  ;;  %v1111_v18 = vmul.f32 %v2123_v12, %v2123_v12  ;;  %v2131_v19 = vadd.f32 %v1752_v9, %v843_v13  ;;  %v1659_v20 = vpop.f32.mrb[20].mxu0 }
 0x12e   : > { %v1753_v22 = vpop.f32.mrb[20].mxu1  ;;  %v1660_v23 = vpop.f32.mrb[21].mxu0  ;;  %v1062_v31 = vadd.f32 %v1061_v16, %v1060_v21 }
 0x12f   : > { %v1143_v25 = vsel %vm1045_vm0, %v1111_v18, 0.0  ;;  %v1112_v26 = vmul.f32 %v2131_v19, %v2131_v19  ;;  %v1661_v27 = vadd.f32 %v1660_v23, %v1659_v20  ;;  %v1754_v28 = vpop.f32.mrb[21].mxu1  ;;  %v1662_v29 = vpop.f32.mrb[22].mxu0  ;;  %v1063_v35 = vsel %vm1045_vm0, %v2131_v19, 0.0 }
 0x130   : > { %v1755_v32 = vadd.f32 %v1754_v28, %v1753_v22  ;;  %v1756_v33 = vpop.f32.mrb[22].mxu1  ;;  %v1663_v34 = vpop.f32.mrb[23].mxu0  ;;  %v1144_v41 = vadd.f32 %v1143_v25, %v1142_v30  ;;  %v1064_v47 = vadd.f32 %v1063_v35, %v1062_v31 }
 0x131   : > { %v848_v37 = vadd.f32 %v1661_v27, %v2057_v24  ;;  %v1664_v39 = vadd.f32 %v1663_v34, %v1662_v29  ;;  %v1757_v40 = vpop.f32.mrb[23].mxu1  ;;  %v1145_v43 = vsel %vm1045_vm0, %v1112_v26, 0.0 }
 0x132   : > { %v1758_v42 = vadd.f32 %v1757_v40, %v1756_v33  ;;  %v1146_v55 = vadd.f32 %v1145_v43, %v1144_v41 }
 0x133   : > { %v2140_v45 = vadd.f32 %v1755_v32, %v848_v37  ;;  %v851_v46 = vadd.f32 %v1664_v39, %v2057_v24 }
 0x135   : > { %v1065_v48 = vsel %vm1045_vm0, %v2140_v45, 0.0  ;;  %v1113_v49 = vmul.f32 %v2140_v45, %v2140_v45  ;;  %v2147_v51 = vadd.f32 %v1758_v42, %v851_v46  ;;  %v1665_v53 = vpop.f32.mrb[24].mxu0 }
 0x136   : > { %v1066_v56 = vadd.f32 %v1065_v48, %v1064_v47  ;;  %v1759_v57 = vpop.f32.mrb[24].mxu1  ;;  %v1666_v58 = vpop.f32.mrb[25].mxu0 }
 0x137   : > { %v1147_v59 = vsel %vm1045_vm0, %v1113_v49, 0.0  ;;  %v1067_v60 = vsel %vm1045_vm0, %v2147_v51, 0.0  ;;  %v1114_v61 = vmul.f32 %v2147_v51, %v2147_v51  ;;  %v1667_v62 = vadd.f32 %v1666_v58, %v1665_v53  ;;  %v1760_v63 = vpop.f32.mrb[25].mxu1  ;;  %v1668_v0 = vpop.f32.mrb[26].mxu0 }
 0x138   : > { %v1148_v1 = vadd.f32 %v1147_v59, %v1146_v55  ;;  %v1068_v2 = vadd.f32 %v1067_v60, %v1066_v56  ;;  %v1761_v3 = vadd.f32 %v1760_v63, %v1759_v57  ;;  %v1762_v4 = vpop.f32.mrb[26].mxu1  ;;  %v1669_v5 = vpop.f32.mrb[27].mxu0 }
 0x139   : > { %v1149_v6 = vsel %vm1045_vm0, %v1114_v61, 0.0  ;;  %v856_v7 = vadd.f32 %v1667_v62, %v2057_v24  ;;  %v1670_v8 = vadd.f32 %v1669_v5, %v1668_v0  ;;  %v1763_v9 = vpop.f32.mrb[27].mxu1 }
 0x13a   : > { %v1150_v10 = vadd.f32 %v1149_v6, %v1148_v1  ;;  %v1764_v13 = vadd.f32 %v1763_v9, %v1762_v4 }
 0x13b   : > { %v2156_v14 = vadd.f32 %v1761_v3, %v856_v7  ;;  %v859_v15 = vadd.f32 %v1670_v8, %v2057_v24 }
 0x13d   : > { %v1069_v16 = vsel %vm1045_vm0, %v2156_v14, 0.0  ;;  %v1115_v18 = vmul.f32 %v2156_v14, %v2156_v14  ;;  %v2163_v20 = vadd.f32 %v1764_v13, %v859_v15  ;;  %v1671_v21 = vpop.f32.mrb[28].mxu0 }
 0x13e   : > { %v1070_v22 = vadd.f32 %v1069_v16, %v1068_v2  ;;  %v1765_v23 = vpop.f32.mrb[28].mxu1  ;;  %v1672_v25 = vpop.f32.mrb[29].mxu0 }
 0x13f   : > { %v1151_v26 = vsel %vm1045_vm0, %v1115_v18, 0.0  ;;  %v1071_v27 = vsel %vm1045_vm0, %v2163_v20, 0.0  ;;  %v1116_v28 = vmul.f32 %v2163_v20, %v2163_v20  ;;  %v1673_v29 = vadd.f32 %v1672_v25, %v1671_v21  ;;  %v1766_v30 = vpop.f32.mrb[29].mxu1  ;;  %v1674_v31 = vpop.f32.mrb[30].mxu0 }
 0x140   : > { %v1152_v32 = vadd.f32 %v1151_v26, %v1150_v10  ;;  %v1072_v33 = vadd.f32 %v1071_v27, %v1070_v22  ;;  %v1767_v34 = vadd.f32 %v1766_v30, %v1765_v23  ;;  %v1768_v35 = vpop.f32.mrb[30].mxu1  ;;  %v1675_v37 = vpop.f32.mrb[31].mxu0 }
 0x141   : > { %v1153_v39 = vsel %vm1045_vm0, %v1116_v28, 0.0  ;;  %v864_v40 = vadd.f32 %v1673_v29, %v2057_v24  ;;  %v1676_v41 = vadd.f32 %v1675_v37, %v1674_v31  ;;  %v1769_v42 = vpop.f32.mrb[31].mxu1 }
 0x142   : > { %v1154_v43 = vadd.f32 %v1153_v39, %v1152_v32  ;;  %v1770_v46 = vadd.f32 %v1769_v42, %v1768_v35 }
 0x143   : > { %v2172_v47 = vadd.f32 %v1767_v34, %v864_v40  ;;  %v867_v48 = vadd.f32 %v1676_v41, %v2057_v24 }
 0x145   : > { %v1073_v49 = vsel %vm1045_vm0, %v2172_v47, 0.0  ;;  %v1117_v53 = vmul.f32 %v2172_v47, %v2172_v47  ;;  %v2179_v55 = vadd.f32 %v1770_v46, %v867_v48  ;;  %v1677_v56 = vpop.f32.mrb[32].mxu0 }
 0x146   : > { %v1074_v57 = vadd.f32 %v1073_v49, %v1072_v33  ;;  %v1771_v58 = vpop.f32.mrb[32].mxu1  ;;  %v1678_v59 = vpop.f32.mrb[33].mxu0 }
 0x147   : > { %v1155_v60 = vsel %vm1045_vm0, %v1117_v53, 0.0  ;;  %v1075_v61 = vsel %vm1045_vm0, %v2179_v55, 0.0  ;;  %v1118_v62 = vmul.f32 %v2179_v55, %v2179_v55  ;;  %v1679_v63 = vadd.f32 %v1678_v59, %v1677_v56  ;;  %v1772_v0 = vpop.f32.mrb[33].mxu1  ;;  %v1680_v1 = vpop.f32.mrb[34].mxu0 }
 0x148   : > { %v1156_v2 = vadd.f32 %v1155_v60, %v1154_v43  ;;  %v1076_v3 = vadd.f32 %v1075_v61, %v1074_v57  ;;  %v1773_v4 = vadd.f32 %v1772_v0, %v1771_v58  ;;  %v1774_v5 = vpop.f32.mrb[34].mxu1  ;;  %v1681_v6 = vpop.f32.mrb[35].mxu0 }
 0x149   : > { %v1157_v7 = vsel %vm1045_vm0, %v1118_v62, 0.0  ;;  %v872_v8 = vadd.f32 %v1679_v63, %v2057_v24  ;;  %v1682_v9 = vadd.f32 %v1681_v6, %v1680_v1  ;;  %v1775_v10 = vpop.f32.mrb[35].mxu1 }
 0x14a   : > { %v1158_v13 = vadd.f32 %v1157_v7, %v1156_v2  ;;  %v1776_v15 = vadd.f32 %v1775_v10, %v1774_v5 }
 0x14b   : > { %v2188_v16 = vadd.f32 %v1773_v4, %v872_v8  ;;  %v875_v18 = vadd.f32 %v1682_v9, %v2057_v24 }
 0x14d   : > { %v1077_v21 = vsel %vm1045_vm0, %v2188_v16, 0.0  ;;  %v1119_v22 = vmul.f32 %v2188_v16, %v2188_v16  ;;  %v2195_v23 = vadd.f32 %v1776_v15, %v875_v18  ;;  %v1683_v25 = vpop.f32.mrb[36].mxu0 }
 0x14e   : > { %v1078_v26 = vadd.f32 %v1077_v21, %v1076_v3  ;;  %v1777_v27 = vpop.f32.mrb[36].mxu1  ;;  %v1684_v28 = vpop.f32.mrb[37].mxu0 }
 0x14f   : > { %v1159_v29 = vsel %vm1045_vm0, %v1119_v22, 0.0  ;;  %v1079_v30 = vsel %vm1045_vm0, %v2195_v23, 0.0  ;;  %v1120_v31 = vmul.f32 %v2195_v23, %v2195_v23  ;;  %v1685_v32 = vadd.f32 %v1684_v28, %v1683_v25  ;;  %v1778_v33 = vpop.f32.mrb[37].mxu1  ;;  %v1686_v34 = vpop.f32.mrb[38].mxu0 }
 0x150   : > { %v1160_v35 = vadd.f32 %v1159_v29, %v1158_v13  ;;  %v1080_v37 = vadd.f32 %v1079_v30, %v1078_v26  ;;  %v1779_v39 = vadd.f32 %v1778_v33, %v1777_v27  ;;  %v1780_v40 = vpop.f32.mrb[38].mxu1  ;;  %v1687_v41 = vpop.f32.mrb[39].mxu0 }
 0x151   : > { %v1161_v42 = vsel %vm1045_vm0, %v1120_v31, 0.0  ;;  %v880_v43 = vadd.f32 %v1685_v32, %v2057_v24  ;;  %v1688_v46 = vadd.f32 %v1687_v41, %v1686_v34  ;;  %v1781_v48 = vpop.f32.mrb[39].mxu1 }
 0x152   : > { %v1162_v49 = vadd.f32 %v1161_v42, %v1160_v35  ;;  %v1782_v53 = vadd.f32 %v1781_v48, %v1780_v40 }
 0x153   : > { %v2204_v56 = vadd.f32 %v1779_v39, %v880_v43  ;;  %v883_v57 = vadd.f32 %v1688_v46, %v2057_v24 }
 0x155   : > { %v1081_v58 = vsel %vm1045_vm0, %v2204_v56, 0.0  ;;  %v1121_v59 = vmul.f32 %v2204_v56, %v2204_v56  ;;  %v2211_v60 = vadd.f32 %v1782_v53, %v883_v57  ;;  %v1689_v61 = vpop.f32.mrb[40].mxu0 }
 0x156   : > { %v1082_v62 = vadd.f32 %v1081_v58, %v1080_v37  ;;  %v1783_v63 = vpop.f32.mrb[40].mxu1  ;;  %v1690_v0 = vpop.f32.mrb[41].mxu0 }
 0x157   : > { %v1163_v1 = vsel %vm1045_vm0, %v1121_v59, 0.0  ;;  %v1083_v2 = vsel %vm1045_vm0, %v2211_v60, 0.0  ;;  %v1122_v3 = vmul.f32 %v2211_v60, %v2211_v60  ;;  %v1691_v4 = vadd.f32 %v1690_v0, %v1689_v61  ;;  %v1784_v5 = vpop.f32.mrb[41].mxu1  ;;  %v1692_v6 = vpop.f32.mrb[42].mxu0 }
 0x158   : > { %v1164_v7 = vadd.f32 %v1163_v1, %v1162_v49  ;;  %v1084_v8 = vadd.f32 %v1083_v2, %v1082_v62  ;;  %v1785_v9 = vadd.f32 %v1784_v5, %v1783_v63  ;;  %v1786_v10 = vpop.f32.mrb[42].mxu1  ;;  %v1693_v13 = vpop.f32.mrb[43].mxu0 }
 0x159   : > { %v1165_v15 = vsel %vm1045_vm0, %v1122_v3, 0.0  ;;  %v888_v18 = vadd.f32 %v1691_v4, %v2057_v24  ;;  %v1694_v21 = vadd.f32 %v1693_v13, %v1692_v6  ;;  %v1787_v22 = vpop.f32.mrb[43].mxu1 }
 0x15a   : > { %v1166_v25 = vadd.f32 %v1165_v15, %v1164_v7  ;;  %v1788_v26 = vadd.f32 %v1787_v22, %v1786_v10 }
 0x15b   : > { %v2220_v27 = vadd.f32 %v1785_v9, %v888_v18  ;;  %v891_v28 = vadd.f32 %v1694_v21, %v2057_v24 }
 0x15d   : > { %v1085_v29 = vsel %vm1045_vm0, %v2220_v27, 0.0  ;;  %v1123_v30 = vmul.f32 %v2220_v27, %v2220_v27  ;;  %v2227_v31 = vadd.f32 %v1788_v26, %v891_v28  ;;  %v1695_v32 = vpop.f32.mrb[44].mxu0 }
 0x15e   : > { %v1086_v33 = vadd.f32 %v1085_v29, %v1084_v8  ;;  %v1789_v34 = vpop.f32.mrb[44].mxu1  ;;  %v1696_v35 = vpop.f32.mrb[45].mxu0 }
 0x15f   : > { %v1167_v37 = vsel %vm1045_vm0, %v1123_v30, 0.0  ;;  %v1087_v39 = vsel %vm1045_vm0, %v2227_v31, 0.0  ;;  %v1124_v40 = vmul.f32 %v2227_v31, %v2227_v31  ;;  %v1697_v41 = vadd.f32 %v1696_v35, %v1695_v32  ;;  %v1790_v42 = vpop.f32.mrb[45].mxu1  ;;  %v1698_v43 = vpop.f32.mrb[46].mxu0 }
 0x160   : > { %v1168_v46 = vadd.f32 %v1167_v37, %v1166_v25  ;;  %v1088_v48 = vadd.f32 %v1087_v39, %v1086_v33  ;;  %v1791_v49 = vadd.f32 %v1790_v42, %v1789_v34  ;;  %v1792_v53 = vpop.f32.mrb[46].mxu1  ;;  %v1699_v57 = vpop.f32.mrb[47].mxu0 }
 0x161   : > { %v1169_v58 = vsel %vm1045_vm0, %v1124_v40, 0.0  ;;  %v896_v59 = vadd.f32 %v1697_v41, %v2057_v24  ;;  %v1700_v61 = vadd.f32 %v1699_v57, %v1698_v43  ;;  %v1793_v62 = vpop.f32.mrb[47].mxu1 }
 0x162   : > { %v1170_v63 = vadd.f32 %v1169_v58, %v1168_v46  ;;  %v1794_v0 = vadd.f32 %v1793_v62, %v1792_v53 }
 0x163   : > { %v2236_v1 = vadd.f32 %v1791_v49, %v896_v59  ;;  %v899_v2 = vadd.f32 %v1700_v61, %v2057_v24 }
 0x165   : > { %v1089_v3 = vsel %vm1045_vm0, %v2236_v1, 0.0  ;;  %v1125_v4 = vmul.f32 %v2236_v1, %v2236_v1  ;;  %v2243_v5 = vadd.f32 %v1794_v0, %v899_v2  ;;  %v1701_v6 = vpop.f32.mrb[48].mxu0 }
 0x166   : > { %v1090_v7 = vadd.f32 %v1089_v3, %v1088_v48  ;;  %v1795_v8 = vpop.f32.mrb[48].mxu1  ;;  %v1702_v9 = vpop.f32.mrb[49].mxu0 }
 0x167   : > { %v1171_v10 = vsel %vm1045_vm0, %v1125_v4, 0.0  ;;  %v1091_v13 = vsel %vm1045_vm0, %v2243_v5, 0.0  ;;  %v1126_v15 = vmul.f32 %v2243_v5, %v2243_v5  ;;  %v1703_v18 = vadd.f32 %v1702_v9, %v1701_v6  ;;  %v1796_v21 = vpop.f32.mrb[49].mxu1  ;;  %v1704_v22 = vpop.f32.mrb[50].mxu0 }
 0x168   : > { %v1172_v25 = vadd.f32 %v1171_v10, %v1170_v63  ;;  %v1092_v26 = vadd.f32 %v1091_v13, %v1090_v7  ;;  %v1797_v28 = vadd.f32 %v1796_v21, %v1795_v8  ;;  %v1798_v29 = vpop.f32.mrb[50].mxu1  ;;  %v1705_v30 = vpop.f32.mrb[51].mxu0 }
 0x169   : > { %v1173_v32 = vsel %vm1045_vm0, %v1126_v15, 0.0  ;;  %v904_v33 = vadd.f32 %v1703_v18, %v2057_v24  ;;  %v1799_v34 = vpop.f32.mrb[51].mxu1 }
 0x16a   : > { %v1174_v35 = vadd.f32 %v1173_v32, %v1172_v25 }
 0x16b   : > { %v2252_v37 = vadd.f32 %v1797_v28, %v904_v33 }
 0x16d   : > { %v1093_v39 = vsel %vm1045_vm0, %v2252_v37, 0.0  ;;  %v1127_v40 = vmul.f32 %v2252_v37, %v2252_v37 }
 0x16e   : > { %v1094_v41 = vadd.f32 %v1093_v39, %v1092_v26 }
 0x16f   : > { %v1175_v42 = vsel %vm1045_vm0, %v1127_v40, 0.0 }
 0x170   : > { %v1095_v43 = vrot.slane %v1094_v41, 4  ;;  %v1176_v46 = vadd.f32 %v1175_v42, %v1174_v35 }
 0x172   : > { %v1096_v48 = vadd.f32 %v1095_v43, %v1094_v41  ;;  %v1177_v49 = vrot.slane %v1176_v46, 4 }
 0x174   : > { %v1097_v53 = vrot.slane %v1096_v48, 2  ;;  %v1178_v57 = vadd.f32 %v1177_v49, %v1176_v46 }
 0x176   : > { %v1098_v24 = vadd.f32 %v1097_v53, %v1096_v48  ;;  %v1179_v58 = vrot.slane %v1178_v57, 2 }
 0x178   : > { %v1099_v59 = vrot.slane %v1098_v24, 1  ;;  %v1180_v61 = vadd.f32 %v1179_v58, %v1178_v57 }
 0x17a   : > { %v1100_v62 = vadd.f32 %v1099_v59, %v1098_v24  ;;  %v1181_v63 = vrot.slane %v1180_v61, 1 }
 0x17c   : > { %v1102_v0 = vmul.f32 0.005, %v1100_v62  ;;  %v1182_v2 = vadd.f32 %v1181_v63, %v1180_v61 }
 0x17e   : > { %v1183_v3 = vmul.f32 0.005, %v1182_v2  ;;  %v1184_v4 = vmul.f32 %v1102_v0, %v1102_v0  ;;  %v1195_v7 = vsub.f32 %v2131_v19, %v1102_v0  ;;  %v1196_v8 = vsub.f32 %v2140_v45, %v1102_v0 }
 0x17f   : > { %v1197_v9 = vsub.f32 %v2147_v51, %v1102_v0  ;;  %v1198_v10 = vsub.f32 %v2156_v14, %v1102_v0  ;;  %v1199_v13 = vsub.f32 %v2163_v20, %v1102_v0  ;;  %v1200_v15 = vsub.f32 %v2172_v47, %v1102_v0 }
 0x180   : > { %v1185_v6 = vsub.f32 %v1183_v3, %v1184_v4  ;;  %v1201_v18 = vsub.f32 %v2179_v55, %v1102_v0  ;;  %v1202_v21 = vsub.f32 %v2188_v16, %v1102_v0  ;;  %v1203_v22 = vsub.f32 %v2195_v23, %v1102_v0 }
 0x181   : > { %v1204_v25 = vsub.f32 %v2204_v56, %v1102_v0  ;;  %v1205_v19 = vsub.f32 %v2211_v60, %v1102_v0  ;;  %v1206_v45 = vsub.f32 %v2220_v27, %v1102_v0  ;;  %v1207_v51 = vsub.f32 %v2227_v31, %v1102_v0 }
 0x182   : > { %v1208_v14 = vsub.f32 %v2236_v1, %v1102_v0  ;;  %v1209_v20 = vsub.f32 %v2243_v5, %v1102_v0  ;;  %v1210_v47 = vsub.f32 %v2252_v37, %v1102_v0  ;;  %v1211_v26 = vadd.f32 1e-05, %v1185_v6 }
 0x183   : > { %v1186_v55 = vsub.f32 %v2060_v36, %v1102_v0  ;;  %v1187_v16 = vsub.f32 %v2063_v38, %v1102_v0  ;;  %v1188_v23 = vsub.f32 %v2066_v52, %v1102_v0  ;;  %v1189_v56 = vsub.f32 %v2069_v54, %v1102_v0 }
 0x184   : > { %1919 = vrsqrt.f32 %v1211_v26  ;;  %v1190_v60 = vsub.f32 %v2085_v11, %v1102_v0  ;;  %v1191_v31 = vsub.f32 %v2092_v17, %v1102_v0  ;;  %v1192_v1 = vsub.f32 %v2105_v44, %v1102_v0 }
 0x185   : > { %v1193_v5 = vsub.f32 %v2112_v50, %v1102_v0  ;;  %v1194_v28 = vsub.f32 %v2123_v12, %v1102_v0 }
 0x18e   : > { %v1920_v27 = vpop.eup %1919 }
 0x18f   : > { %v1213_v29 = vmul.f32 %v1920_v27, %v1186_v55  ;;  %v1214_v30 = vmul.f32 %v1920_v27, %v1187_v16  ;;  %v1215_v36 = vmul.f32 %v1920_v27, %v1188_v23  ;;  %v1216_v32 = vmul.f32 %v1920_v27, %v1189_v56 }
 0x190   : > { %v1217_v38 = vmul.f32 %v1920_v27, %v1190_v60  ;;  %v1218_v33 = vmul.f32 %v1920_v27, %v1191_v31  ;;  %v1219_v52 = vmul.f32 %v1920_v27, %v1192_v1  ;;  %v1220_v34 = vmul.f32 %v1920_v27, %v1193_v5 }
 0x191   : > { %v1221_v54 = vmul.f32 %v1920_v27, %v1194_v28  ;;  %v1222_v35 = vmul.f32 %v1920_v27, %v1195_v7  ;;  %v1223_v11 = vmul.f32 %v1920_v27, %v1196_v8  ;;  %v1224_v37 = vmul.f32 %v1920_v27, %v1197_v9 }
 0x192   : > { %v1225_v39 = vmul.f32 %v1920_v27, %v1198_v10  ;;  %v1226_v17 = vmul.f32 %v1920_v27, %v1199_v13  ;;  %v1227_v44 = vmul.f32 %v1920_v27, %v1200_v15  ;;  %v1228_v40 = vmul.f32 %v1920_v27, %v1201_v18 }
 0x193   : > { %v1229_v50 = vmul.f32 %v1920_v27, %v1202_v21  ;;  %v1230_v12 = vmul.f32 %v1920_v27, %v1203_v22  ;;  %v2284_v41 = vmul.f32 %v1920_v27, %v1204_v25  ;;  %v2286_v42 = vmul.f32 %v1920_v27, %v1205_v19 }
 0x194   : > { %v2288_v43 = vmul.f32 %v1920_v27, %v1206_v45  ;;  %v2290_v46 = vmul.f32 %v1920_v27, %v1207_v51  ;;  %v2292_v48 = vmul.f32 %v1920_v27, %v1208_v14  ;;  %v2294_v49 = vmul.f32 %v1920_v27, %v1209_v20 }
 0x195   : > { %v2296_v53 = vmul.f32 %v1920_v27, %v1210_v47  ;;  %v1238_v57 = vmax.f32 %v1213_v29, 0.0  ;;  %v1239_v24 = vmax.f32 %v1214_v30, 0.0  ;;  %v1240_v58 = vmax.f32 %v1215_v36, 0.0 }
 0x196   : > { %v1241_v59 = vmax.f32 %v1216_v32, 0.0  ;;  %v1242_v61 = vmax.f32 %v1217_v38, 0.0  ;;  %v1243_v62 = vmax.f32 %v1218_v33, 0.0  ;;  %v1244_v63 = vmax.f32 %v1219_v52, 0.0 }
 0x197   : > { %v1245_v0 = vmax.f32 %v1220_v34, 0.0  ;;  %v1246_v2 = vmax.f32 %v1221_v54, 0.0  ;;  %v1247_v3 = vmax.f32 %v1222_v35, 0.0  ;;  %v1248_v4 = vmax.f32 %v1223_v11, 0.0 }
 0x198   : > { %v1249_v6 = vmax.f32 %v1224_v37, 0.0  ;;  %v1250_v7 = vmax.f32 %v1225_v39, 0.0  ;;  %v1251_v8 = vmax.f32 %v1226_v17, 0.0  ;;  %v1252_v9 = vmax.f32 %v1227_v44, 0.0 }
 0x199   : > { %v1253_v10 = vmax.f32 %v1228_v40, 0.0  ;;  %v1254_v13 = vmax.f32 %v1229_v50, 0.0  ;;  %v1255_v15 = vmax.f32 %v1230_v12, 0.0  ;;  %v1256_v18 = vmax.f32 %v2284_v41, 0.0 }
 0x19a   : > { %v1257_v21 = vmax.f32 %v2286_v42, 0.0  ;;  %v1258_v22 = vmax.f32 %v2288_v43, 0.0  ;;  %v1259_v25 = vmax.f32 %v2290_v46, 0.0  ;;  %v1260_v19 = vmax.f32 %v2292_v48, 0.0 }
 0x19b   : > { %v1261_v45 = vmax.f32 %v2294_v49, 0.0  ;;  %v1262_v51 = vmax.f32 %v2296_v53, 0.0  ;;  %v1588_v14 = vpack.c.bf16 %v1238_v57, %v1238_v57  ;;  %v1589_v20 = vpack.c.bf16 %v1239_v24, %v1239_v24 }
 0x19c   : > { %v1590_v47 = vpack.c.bf16 %v1240_v58, %v1240_v58  ;;  %v1591_v26 = vpack.c.bf16 %v1241_v59, %v1241_v59  ;;  %v1592_v55 = vpack.c.bf16 %v1242_v61, %v1242_v61  ;;  %v1593_v16 = vpack.c.bf16 %v1243_v62, %v1243_v62 }
 0x19d   : > { %v1594_v23 = vpack.c.bf16 %v1244_v63, %v1244_v63  ;;  %v1595_v56 = vpack.c.bf16 %v1245_v0, %v1245_v0  ;;  %v1596_v60 = vpack.c.bf16 %v1246_v2, %v1246_v2  ;;  %v1597_v27 = vpack.c.bf16 %v1247_v3, %v1247_v3  ;;  %1365 = vst.msk [vmem:[%s2303_s28] sm:$0xf] %vm1364_vm1, %v1588_v14 }
 0x19e   : > { %1366 = vst.msk [vmem:[%s2303_s28 + $0x4] sm:$0xf] %vm1364_vm1, %v1589_v20  ;;  %v1598_v31 = vpack.c.bf16 %v1248_v4, %v1248_v4  ;;  %v1599_v1 = vpack.c.bf16 %v1249_v6, %v1249_v6  ;;  %v1600_v5 = vpack.c.bf16 %v1250_v7, %v1250_v7  ;;  %v1601_v28 = vpack.c.bf16 %v1251_v8, %v1251_v8 }
 0x19f   : > { %1367 = vst.msk [vmem:[%s2303_s28 + $0x8] sm:$0xf] %vm1364_vm1, %v1590_v47  ;;  %1368 = vst.msk [vmem:[%s2303_s28 + $0xc] sm:$0xf] %vm1364_vm1, %v1591_v26  ;;  %v1602_v29 = vpack.c.bf16 %v1252_v9, %v1252_v9  ;;  %v1603_v30 = vpack.c.bf16 %v1253_v10, %v1253_v10  ;;  %v1604_v36 = vpack.c.bf16 %v1254_v13, %v1254_v13 }
 0x1a0   : > { %1369 = vst.msk [vmem:[%s2303_s28 + $0x10] sm:$0xf] %vm1364_vm1, %v1592_v55  ;;  %1370 = vst.msk [vmem:[%s2303_s28 + $0x14] sm:$0xf] %vm1364_vm1, %v1593_v16  ;;  %v1605_v32 = vpack.c.bf16 %v1255_v15, %v1255_v15  ;;  %v1606_v38 = vpack.c.bf16 %v1256_v18, %v1256_v18  ;;  %v1607_v33 = vpack.c.bf16 %v1257_v21, %v1257_v21 }
 0x1a1   : > { %1371 = vst.msk [vmem:[%s2303_s28 + $0x18] sm:$0xf] %vm1364_vm1, %v1594_v23  ;;  %1372 = vst.msk [vmem:[%s2303_s28 + $0x1c] sm:$0xf] %vm1364_vm1, %v1595_v56  ;;  %v1608_v52 = vpack.c.bf16 %v1258_v22, %v1258_v22  ;;  %v1609_v34 = vpack.c.bf16 %v1259_v25, %v1259_v25  ;;  %v1610_v54 = vpack.c.bf16 %v1260_v19, %v1260_v19 }
 0x1a2   : > { %1373 = vst.msk [vmem:[%s2303_s28 + $0x20] sm:$0xf] %vm1364_vm1, %v1596_v60  ;;  %1374 = vst.msk [vmem:[%s2303_s28 + $0x24] sm:$0xf] %vm1364_vm1, %v1597_v27  ;;  %v1611_v35 = vpack.c.bf16 %v1261_v45, %v1261_v45  ;;  %v1612_v11 = vpack.c.bf16 %v1262_v51, %v1262_v51 }
 0x1a3   : > { %1375 = vst.msk [vmem:[%s2303_s28 + $0x28] sm:$0xf] %vm1364_vm1, %v1598_v31  ;;  %1376 = vst.msk [vmem:[%s2303_s28 + $0x2c] sm:$0xf] %vm1364_vm1, %v1599_v1 }
 0x1a4   : > { %1377 = vst.msk [vmem:[%s2303_s28 + $0x30] sm:$0xf] %vm1364_vm1, %v1600_v5  ;;  %1378 = vst.msk [vmem:[%s2303_s28 + $0x34] sm:$0xf] %vm1364_vm1, %v1601_v28 }
 0x1a5   : > { %1379 = vst.msk [vmem:[%s2303_s28 + $0x38] sm:$0xf] %vm1364_vm1, %v1602_v29  ;;  %1380 = vst.msk [vmem:[%s2303_s28 + $0x3c] sm:$0xf] %vm1364_vm1, %v1603_v30 }
 0x1a6   : > { %1381 = vst.msk [vmem:[%s2303_s28 + $0x40] sm:$0xf] %vm1364_vm1, %v1604_v36  ;;  %1382 = vst.msk [vmem:[%s2303_s28 + $0x44] sm:$0xf] %vm1364_vm1, %v1605_v32 }
 0x1a7   : > { %1383 = vst.msk [vmem:[%s2303_s28 + $0x48] sm:$0xf] %vm1364_vm1, %v1606_v38  ;;  %1384 = vst.msk [vmem:[%s2303_s28 + $0x4c] sm:$0xf] %vm1364_vm1, %v1607_v33 }
 0x1a8   : > { %1385 = vst.msk [vmem:[%s2303_s28 + $0x50] sm:$0xf] %vm1364_vm1, %v1608_v52  ;;  %1386 = vst.msk [vmem:[%s2303_s28 + $0x54] sm:$0xf] %vm1364_vm1, %v1609_v34 }
 0x1a9   : > { %1387 = vst.msk [vmem:[%s2303_s28 + $0x58] sm:$0xf] %vm1364_vm1, %v1610_v54  ;;  %1388 = vst.msk [vmem:[%s2303_s28 + $0x5c] sm:$0xf] %vm1364_vm1, %v1611_v35 }
 0x1aa   : > { %1389 = vst.msk [vmem:[%s2303_s28 + $0x60] sm:$0xf] %vm1364_vm1, %v1612_v11 }
 0x1ab PF: > { %s13_s12 = sadd.s32 1, %s1927_s12  }
 0x1ac   : > { %p10_p4 = scmp.ge.s32.totalorder %s13_s12, 4  }
 0x1ae   :  { %12 = sbr.rel (!%p10_p4) target bundleno = 1 (0x1), region = 68 }

// kernel: rnd_forward.6
= control target key start
LH: loop header
LB: loop body
LE: loop exit
PB: predicated region body
PF: predicated region fallthrough
CT: control target
= control target key end

     0   :  { %s2387_s12 = smov 0   ;;  %s2937_s0 = inlined_call_operand.vmem [shape: bf16[2,200,576], index: 0, kind: input, shape index: {}]   ;;  %s2938_s1 = inlined_call_operand.vmem [shape: bf16[2,576,64], index: 1, kind: input, shape index: {}]   ;;  %s2939_s2 = inlined_call_operand.vmem [shape: f32[2,1,64], index: 2, kind: input, shape index: {}]   ;;  %s2940_s3 = inlined_call_operand.vmem [shape: bf16[2,200,64], index: 3, kind: output, shape index: {}]  }
   0x1 LB: > { %s1761_s13 = sadd.s32 4294967295, %s2363_s12   ;;  %p1765_p0 = scmp.ge.s32.totalorder %s2363_s12, 1  ;;  %s2363_s12 = sphi %s2387_s12, %s13_s12  }
   0x2   : > { %p155_p1 = scmp.lt.s32.totalorder %s2363_s12, 3 }
   0x4   : > { %p156_p2 = pnand %p1765_p0, %p155_p1 }
   0x5   : > { %p187_p3 = scmp.lt.s32.totalorder (!%p156_p2), %s1761_s13, 1  ;;  %v2365_v24 = vmov (!%p156_p2), 0.0   ;;  %vm2366_vm0 = vmmov (!%p156_p2), 0   ;;  %vm893_vm1 = vcmask (!%p156_p2), 523264   ;;  %vm1659_vm2 = vcmask (!%p156_p2), 519168  }
   0x6   : > { %159 = sbr.rel (%p156_p2) target bundleno = 478 (0x1de), region = 32 }
   0xd   : > { %s2942_s13 = smov (!%p187_p3, %s1761_s13), 1 }
   0xe   : > { %s2218_s14 = smul.u32 288, %s2942_s13  ;;  %s199_s24 = scalar_lea.vmem %s2939_s2, %s2942_s13 }
   0xf   : > { %s2217_s18 = smul.u32 500, %s2942_s13 }
  0x10   : > { %s2401_s17 = scalar_lea.vmem %s2938_s1, %s2218_s14  ;;  %s2219_s25 = smul.u32 100, %s2942_s13 }
  0x11   : > { %v2230_v0 = vld [vmem:[%s2401_s17 + $0x40] sm:$0xff]   ;;  %v2232_v2 = vld [vmem:[%s2401_s17 + $0x48] sm:$0xff]   ;;  %v2234_v4 = vld [vmem:[%s2401_s17 + $0x50] sm:$0xff]   ;;  %s2416_s21 = scalar_lea.vmem %s2937_s0, %s2217_s18 }
  0x12   : > { %v2231_v1 = vld [vmem:[%s2401_s17] sm:$0xff]   ;;  %1936 = vmatprep.subr.bf16.mxu0 %v2230_v0  ;;  %2201 = vmatprep.subr.bf16.mxu1 %v2230_v0  ;;  %v2233_v3 = vld [vmem:[%s2401_s17 + $0x8] sm:$0xff]   ;;  %v2235_v5 = vld [vmem:[%s2401_s17 + $0x10] sm:$0xff]   ;;  %s2876_s28 = scalar_lea.vmem %s2940_s3, %s2219_s25 }
  0x13   : > { %1937 = vmatpush3.bf16.msra.mxu0 %v2231_v1  ;;  %2209 = vmatpush3.bf16.msra.mxu1 %v2231_v1  ;;  %v2236_v6 = vld [vmem:[%s2401_s17 + $0x58] sm:$0xff]   ;;  %v2238_v8 = vld [vmem:[%s2401_s17 + $0x60] sm:$0xff]   ;;  %v2240_v10 = vld [vmem:[%s2401_s17 + $0x68] sm:$0xff]  }
  0x14   : > { %1938 = vmatprep.subr.bf16.mxu0 %v2232_v2  ;;  %2202 = vmatprep.subr.bf16.mxu1 %v2232_v2  ;;  %v2237_v7 = vld [vmem:[%s2401_s17 + $0x18] sm:$0xff]   ;;  %v2239_v9 = vld [vmem:[%s2401_s17 + $0x20] sm:$0xff]   ;;  %v2241_v13 = vld [vmem:[%s2401_s17 + $0x28] sm:$0xff]  }
  0x15   : > { %v2248_v11 = vld [vmem:[%s2416_s21 + $0x4] ss:$20 sps:$4 sm:$0xff]   ;;  %v2251_v12 = vld [vmem:[%s2416_s21 + $0x11c] ss:$20 sps:$4 sm:$0xff]   ;;  %v2246_v19 = vld [vmem:[%s2416_s21] ss:$20 sps:$4 sm:$0xff]  }
  0x16   : > { %v2242_v14 = vld [vmem:[%s2401_s17 + $0x70] sm:$0xff]   ;;  %965 = vmatprep.mubr.bf16.mxu0 %v2248_v11  ;;  %1021 = vmatprep.mubr.bf16.mxu1 %v2251_v12  ;;  %v2244_v16 = vld [vmem:[%s2401_s17 + $0x78] sm:$0xff]   ;;  %v2253_v18 = vld [vmem:[%s2401_s17 + $0xc0] sm:$0xff]  }
  0x17   : > { %1939 = vmatpush3.bf16.msra.mxu0 %v2233_v3  ;;  %2210 = vmatpush3.bf16.msra.mxu1 %v2233_v3  ;;  %v2243_v15 = vld [vmem:[%s2401_s17 + $0x30] sm:$0xff]   ;;  %v2245_v17 = vld [vmem:[%s2401_s17 + $0x38] sm:$0xff]   ;;  %v2252_v21 = vld [vmem:[%s2401_s17 + $0x100] sm:$0xff]  }
  0x18   : > { %1940 = vmatprep.subr.bf16.mxu0 %v2234_v4  ;;  %2203 = vmatprep.subr.bf16.mxu1 %v2234_v4  ;;  %v2249_v20 = vld [vmem:[%s2416_s21 + $0x118] ss:$20 sps:$4 sm:$0xff]   ;;  %v2254_v22 = vld [vmem:[%s2401_s17 + $0x80] sm:$0xff]   ;;  %v2259_v29 = vld [vmem:[%s2416_s21 + $0x28] ss:$20 sps:$4 sm:$0xff]  }
  0x19   : > { %v2255_v23 = vld [vmem:[%s2416_s21 + $0x2c] ss:$20 sps:$4 sm:$0xff]   ;;  %v2257_v25 = vld [vmem:[%s2416_s21 + $0x144] ss:$20 sps:$4 sm:$0xff]   ;;  %v2267_v31 = vld [vmem:[%s2401_s17 + $0xd0] sm:$0xff]  }
  0x1a   : > { %v2261_v26 = vld [vmem:[%s2401_s17 + $0xc8] sm:$0xff]   ;;  %v2260_v30 = vld [vmem:[%s2416_s21 + $0x140] ss:$20 sps:$4 sm:$0xff]   ;;  %v2272_v36 = vld [vmem:[%s2401_s17 + $0xd8] sm:$0xff]  }
  0x1b   : > { %1941 = vmatpush3.bf16.msra.mxu0 %v2235_v5  ;;  %2211 = vmatpush3.bf16.msra.mxu1 %v2235_v5  ;;  %v2262_v27 = vld [vmem:[%s2401_s17 + $0x88] sm:$0xff]   ;;  %v2271_v34 = vld [vmem:[%s2401_s17 + $0x90] sm:$0xff]   ;;  %v2273_v38 = vld [vmem:[%s2401_s17 + $0x98] sm:$0xff]  }
  0x1c   : > { %1942 = vmatprep.subr.bf16.mxu0 %v2236_v6  ;;  %2204 = vmatprep.subr.bf16.mxu1 %v2236_v6  ;;  %v2268_v28 = vld [vmem:[%s2401_s17 + $0x108] sm:$0xff]   ;;  %v2282_v35 = vld [vmem:[%s2401_s17 + $0x110] sm:$0xff]   ;;  %v2280_v40 = vld [vmem:[%s2401_s17 + $0xe0] sm:$0xff]  }
  0x1d   : > { %v2263_v32 = vld [vmem:[%s2416_s21 + $0x54] ss:$20 sps:$4 sm:$0xff]   ;;  %v2265_v33 = vld [vmem:[%s2416_s21 + $0x16c] ss:$20 sps:$4 sm:$0xff]   ;;  %v2269_v37 = vld [vmem:[%s2416_s21 + $0x50] ss:$20 sps:$4 sm:$0xff]  }
  0x1e   : > { %v2270_v39 = vld [vmem:[%s2416_s21 + $0x168] ss:$20 sps:$4 sm:$0xff]   ;;  %v2281_v43 = vld [vmem:[%s2401_s17 + $0xa0] sm:$0xff]   ;;  %v2278_v47 = vld [vmem:[%s2416_s21 + $0x78] ss:$20 sps:$4 sm:$0xff]  }
  0x1f   : > { %1943 = vmatpush3.bf16.msra.mxu0 %v2237_v7  ;;  %2212 = vmatpush3.bf16.msra.mxu1 %v2237_v7  ;;  %v2274_v41 = vld [vmem:[%s2416_s21 + $0x7c] ss:$20 sps:$4 sm:$0xff]   ;;  %v2276_v42 = vld [vmem:[%s2416_s21 + $0x194] ss:$20 sps:$4 sm:$0xff]   ;;  %v2283_v50 = vld [vmem:[%s2416_s21 + $0xa4] ss:$20 sps:$4 sm:$0xff]  }
  0x20   : > { %1944 = vmatprep.subr.bf16.mxu0 %v2238_v8  ;;  %2205 = vmatprep.subr.bf16.mxu1 %v2238_v8  ;;  %v2298_v44 = vld [vmem:[%s2401_s17 + $0x118] sm:$0xff]   ;;  %v2289_v45 = vld [vmem:[%s2401_s17 + $0xe8] sm:$0xff]   ;;  %v2294_v48 = vld [vmem:[%s2401_s17 + $0xf0] sm:$0xff]  }
  0x21   : > { %v2290_v46 = vld [vmem:[%s2401_s17 + $0xa8] sm:$0xff]   ;;  %v2279_v49 = vld [vmem:[%s2416_s21 + $0x190] ss:$20 sps:$4 sm:$0xff]   ;;  %v2299_v53 = vld [vmem:[%s2401_s17 + $0xf8] sm:$0xff]  }
  0x22   : > { %v2285_v51 = vld [vmem:[%s2416_s21 + $0x1bc] ss:$20 sps:$4 sm:$0xff]   ;;  %v278_v54 = vld [vmem:[%s2416_s21 + $0x1e0] sm:$0xff]  ;;  %v2288_v57 = vld [vmem:[%s2416_s21 + $0x1b8] ss:$20 sps:$4 sm:$0xff]  }
  0x23   : > { %1945 = vmatpush3.bf16.msra.mxu0 %v2239_v9  ;;  %2213 = vmatpush3.bf16.msra.mxu1 %v2239_v9  ;;  %v2297_v52 = vld [vmem:[%s2401_s17 + $0xb0] sm:$0xff]   ;;  %v2300_v55 = vld [vmem:[%s2401_s17 + $0xb8] sm:$0xff]   ;;  %v2291_v58 = vld [vmem:[%s2416_s21 + $0xcc] ss:$20 sps:$4 sm:$0xff]   ;;  %v1831_v59 = vcombine.high %v278_v54, %v278_v54  ;;  %v1830_v61 = vcombine.low %v278_v54, %v278_v54 }
  0x24   : > { %1946 = vmatprep.subr.bf16.mxu0 %v2240_v10  ;;  %2206 = vmatprep.subr.bf16.mxu1 %v2240_v10  ;;  %v2287_v56 = vld [vmem:[%s2416_s21 + $0xa0] ss:$20 sps:$4 sm:$0xff]   ;;  %v2295_v60 = vld [vmem:[%s2416_s21 + $0xc8] ss:$20 sps:$4 sm:$0xff]   ;;  %v2306_v1 = vld [vmem:[%s2416_s21 + $0xf0] ss:$20 sps:$4 sm:$0xff]  }
  0x25   : > { %v2301_v62 = vld [vmem:[%s2416_s21 + $0xf4] ss:$20 sps:$4 sm:$0xff]   ;;  %v2305_v63 = vld [vmem:[%s2416_s21 + $0xc] ss:$20 sps:$4 sm:$0xff]   ;;  %v2309_v3 = vld [vmem:[%s2416_s21 + $0x30] ss:$20 sps:$4 sm:$0xff]  }
  0x26   : > { %v2303_v0 = vld [vmem:[%s2416_s21 + $0x8] ss:$20 sps:$4 sm:$0xff]   ;;  %v2310_v4 = vld [vmem:[%s2416_s21 + $0x10] ss:$20 sps:$4 sm:$0xff]   ;;  %v2313_v6 = vld [vmem:[%s2416_s21 + $0x58] ss:$20 sps:$4 sm:$0xff]  }
  0x27   : > { %1947 = vmatpush3.bf16.msra.mxu0 %v2241_v13  ;;  %2214 = vmatpush3.bf16.msra.mxu1 %v2241_v13  ;;  %v2307_v2 = vld [vmem:[%s2416_s21 + $0x34] ss:$20 sps:$4 sm:$0xff]   ;;  %v2311_v5 = vld [vmem:[%s2416_s21 + $0x5c] ss:$20 sps:$4 sm:$0xff]   ;;  %v2314_v7 = vld [vmem:[%s2416_s21 + $0x38] ss:$20 sps:$4 sm:$0xff]  }
  0x28   : > { %1948 = vmatprep.subr.bf16.mxu0 %v2242_v14  ;;  %2207 = vmatprep.subr.bf16.mxu1 %v2242_v14  ;;  %v2315_v8 = vld [vmem:[%s2416_s21 + $0x84] ss:$20 sps:$4 sm:$0xff]   ;;  %v2317_v9 = vld [vmem:[%s2416_s21 + $0x80] ss:$20 sps:$4 sm:$0xff]   ;;  %v2321_v12 = vld [vmem:[%s2416_s21 + $0xa8] ss:$20 sps:$4 sm:$0xff]  }
  0x29   : > { %v2318_v10 = vld [vmem:[%s2416_s21 + $0x60] ss:$20 sps:$4 sm:$0xff]   ;;  %v2322_v13 = vld [vmem:[%s2416_s21 + $0x88] ss:$20 sps:$4 sm:$0xff]  }
  0x2a   : > { %v2319_v11 = vld [vmem:[%s2416_s21 + $0xac] ss:$20 sps:$4 sm:$0xff]   ;;  %v2323_v14 = vld [vmem:[%s2416_s21 + $0xd4] ss:$20 sps:$4 sm:$0xff]  }
  0x2b   : > { %1949 = vmatpush3.bf16.msra.mxu0 %v2243_v15  ;;  %2215 = vmatpush3.bf16.msra.mxu1 %v2243_v15  ;;  %v2325_v15 = vld [vmem:[%s2416_s21 + $0xd0] ss:$20 sps:$4 sm:$0xff]  }
  0x2c   : > { %1950 = vmatprep.subr.bf16.mxu0 %v2244_v16  ;;  %2208 = vmatprep.subr.bf16.mxu1 %v2244_v16  ;;  %v2326_v16 = vld [vmem:[%s2416_s21 + $0xb0] ss:$20 sps:$4 sm:$0xff]  }
  0x2f   : > { %1951 = vmatpush3.bf16.msra.mxu0 %v2245_v17  ;;  %2216 = vmatpush3.bf16.msra.mxu1 %v2245_v17  ;;  %v2327_v17 = vld [vmem:[%s2416_s21 + $0xfc] ss:$20 sps:$4 sm:$0xff]  }
  0x30   : > { %2141 = vmatprep.subr.bf16.mxu0 %v2365_v24  ;;  %2030 = vmatprep.subr.bf16.mxu1 %v2253_v18  ;;  %v2329_v18 = vld [vmem:[%s2416_s21 + $0xf8] ss:$20 sps:$4 sm:$0xff]  }
  0x32   : > { %966 = vmatmul.mubr.bf16.vlgmr.msra.gmra.mrb[0].mxu0 %v2246_v19  ;;  %1022 = vmatmul.mubr.bf16.vlgmr.msra.gmra.mrb[0].mxu1 %v2249_v20  ;;  %v2330_v19 = vld [vmem:[%s2416_s21 + $0xd8] ss:$20 sps:$4 sm:$0xff]  }
  0x33   : > { %2142 = vmatpush3.bf16.msra.mxu0 %v2252_v21  ;;  %2031 = vmatpush3.bf16.msra.mxu1 %v2254_v22  ;;  %v2331_v20 = vld [vmem:[%s2416_s21 + $0x124] ss:$20 sps:$4 sm:$0xff]   ;;  %v2333_v21 = vld [vmem:[%s2416_s21 + $0x120] ss:$20 sps:$4 sm:$0xff]  }
  0x34   : > { %973 = vmatprep.mubr.bf16.mxu0 %v2255_v23  ;;  %1029 = vmatprep.mubr.bf16.mxu1 %v2257_v25  ;;  %v2334_v22 = vld [vmem:[%s2416_s21 + $0x100] ss:$20 sps:$4 sm:$0xff]   ;;  %v2337_v25 = vld [vmem:[%s2416_s21 + $0x148] ss:$20 sps:$4 sm:$0xff]  }
  0x35   : > { %2032 = vmatprep.subr.bf16.mxu1 %v2261_v26  ;;  %2143 = vmatprep.subr.bf16.mxu0 %v2365_v24  ;;  %v2335_v23 = vld [vmem:[%s2416_s21 + $0x14c] ss:$20 sps:$4 sm:$0xff]   ;;  %v2338_v26 = vld [vmem:[%s2416_s21 + $0x128] ss:$20 sps:$4 sm:$0xff]  }
  0x37   : > { %2033 = vmatpush3.bf16.msra.mxu1 %v2262_v27  ;;  %2144 = vmatpush3.bf16.msra.mxu0 %v2268_v28  ;;  %v2339_v27 = vld [vmem:[%s2416_s21 + $0x174] ss:$20 sps:$4 sm:$0xff]   ;;  %v2341_v28 = vld [vmem:[%s2416_s21 + $0x170] ss:$20 sps:$4 sm:$0xff]  }
  0x38   : > { %2034 = vmatprep.subr.bf16.mxu1 %v2267_v31  ;;  %2145 = vmatprep.subr.bf16.mxu0 %v2365_v24  ;;  %v2345_v31 = vld [vmem:[%s2416_s21 + $0x198] ss:$20 sps:$4 sm:$0xff]  }
  0x3a   : > { %974 = vmatmul.mubr.bf16.gmra.mrb[4].mxu0 %v2259_v29  ;;  %1030 = vmatmul.mubr.bf16.gmra.mrb[4].mxu1 %v2260_v30  ;;  %v2342_v29 = vld [vmem:[%s2416_s21 + $0x150] ss:$20 sps:$4 sm:$0xff]  }
  0x3b   : > { %981 = vmatprep.mubr.bf16.mxu0 %v2263_v32  ;;  %1037 = vmatprep.mubr.bf16.mxu1 %v2265_v33  ;;  %v2343_v30 = vld [vmem:[%s2416_s21 + $0x19c] ss:$20 sps:$4 sm:$0xff]   ;;  %v2346_v32 = vld [vmem:[%s2416_s21 + $0x178] ss:$20 sps:$4 sm:$0xff]  }
  0x3c   : > { %2035 = vmatpush3.bf16.msra.mxu1 %v2271_v34  ;;  %2146 = vmatpush3.bf16.msra.mxu0 %v2282_v35  ;;  %v2347_v33 = vld [vmem:[%s2416_s21 + $0x1c4] ss:$20 sps:$4 sm:$0xff]   ;;  %v279_v34 = vld [vmem:[%s2416_s21 + $0x1e8] sm:$0xff]  ;;  %v2349_v35 = vld [vmem:[%s2416_s21 + $0x1c0] ss:$20 sps:$4 sm:$0xff]  }
  0x3d   : > { %2036 = vmatprep.subr.bf16.mxu1 %v2272_v36  ;;  %2147 = vmatprep.subr.bf16.mxu0 %v2365_v24  ;;  %v2350_v36 = vld [vmem:[%s2416_s21 + $0x1a0] ss:$20 sps:$4 sm:$0xff]  }
  0x40   : > { %2037 = vmatpush3.bf16.msra.mxu1 %v2273_v38  ;;  %2148 = vmatpush3.bf16.msra.mxu0 %v2298_v44  ;;  %v1832_v38 = vcombine.low %v279_v34, %v279_v34 }
  0x41   : > { %2038 = vmatprep.subr.bf16.mxu1 %v2280_v40  ;;  %v2354_v40 = vld [vmem:[%s2416_s21 + $0x1f0] ss:$0 sps:$4 sm:$0xff]  }
  0x42   : > { %982 = vmatmul.mubr.bf16.gmra.mrb[8].mxu0 %v2269_v37  ;;  %1038 = vmatmul.mubr.bf16.gmra.mrb[8].mxu1 %v2270_v39  ;;  %v1833_v37 = vcombine.high %v279_v34, %v279_v34  ;;  %v2353_v39 = vld [vmem:[%s2416_s21 + $0x1c8] ss:$20 sps:$4 sm:$0xff]  }
  0x43   : > { %989 = vmatprep.mubr.bf16.mxu0 %v2274_v41  ;;  %1045 = vmatprep.mubr.bf16.mxu1 %v2276_v42 }
  0x44   : > { %2039 = vmatpush3.bf16.msra.mxu1 %v2281_v43 }
  0x45   : > { %2040 = vmatprep.subr.bf16.mxu1 %v2289_v45 }
  0x48   : > { %2041 = vmatpush3.bf16.msra.mxu1 %v2290_v46 }
  0x49   : > { %2042 = vmatprep.subr.bf16.mxu1 %v2294_v48 }
  0x4a   : > { %990 = vmatmul.mubr.bf16.gmra.mrb[12].mxu0 %v2278_v47  ;;  %1046 = vmatmul.mubr.bf16.gmra.mrb[12].mxu1 %v2279_v49 }
  0x4b   : > { %997 = vmatprep.mubr.bf16.mxu0 %v2283_v50  ;;  %1053 = vmatprep.mubr.bf16.mxu1 %v2285_v51 }
  0x4c   : > { %2043 = vmatpush3.bf16.msra.mxu1 %v2297_v52 }
  0x4d   : > { %2044 = vmatprep.subr.bf16.mxu1 %v2299_v53 }
  0x50   : > { %2045 = vmatpush3.bf16.msra.mxu1 %v2300_v55 }
  0x52   : > { %998 = vmatmul.mubr.bf16.gmra.mrb[16].mxu0 %v2287_v56  ;;  %1054 = vmatmul.mubr.bf16.gmra.mrb[16].mxu1 %v2288_v57 }
  0x53   : > { %1005 = vmatprep.mubr.bf16.mxu0 %v2291_v58  ;;  %1061 = vmatprep.mubr.bf16.mxu1 %v1831_v59 }
  0x5a   : > { %1006 = vmatmul.mubr.bf16.gmra.mrb[20].mxu0 %v2295_v60  ;;  %1062 = vmatmul.mubr.bf16.gmra.mrb[20].mxu1 %v1830_v61 }
  0x5b   : > { %1013 = vmatprep.mubr.bf16.mxu0 %v2301_v62  ;;  %1101 = vmatprep.mubr.bf16.mxu1 %v2305_v63 }
  0x62   : > { %1014 = vmatmul.mubr.bf16.gmra.mrb[24].mxu0 %v2306_v1  ;;  %1102 = vmatmul.mubr.bf16.vlgmr.msra.gmra.mrb[24].mxu1 %v2303_v0 }
  0x63   : > { %1109 = vmatprep.mubr.bf16.mxu1 %v2307_v2  ;;  %2149 = vmatprep.mubr.msk.bf16.mxu0 %vm2366_vm0, %v2365_v24 }
  0x6a   : > { %1110 = vmatmul.mubr.bf16.gmra.mrb[28].mxu1 %v2309_v3  ;;  %2150 = vmatmul.mubr.msk.bf16.vlgmr.msra.gmra.mrb[28].mxu0 %vm893_vm1, %v2310_v4 }
  0x6b   : > { %1117 = vmatprep.mubr.bf16.mxu1 %v2311_v5  ;;  %2153 = vmatprep.mubr.msk.bf16.mxu0 %vm2366_vm0, %v2365_v24 }
  0x72   : > { %1118 = vmatmul.mubr.bf16.gmra.mrb[32].mxu1 %v2313_v6  ;;  %2154 = vmatmul.mubr.msk.bf16.gmra.mrb[32].mxu0 %vm893_vm1, %v2314_v7 }
  0x73   : > { %1125 = vmatprep.mubr.bf16.mxu1 %v2315_v8  ;;  %2157 = vmatprep.mubr.msk.bf16.mxu0 %vm2366_vm0, %v2365_v24 }
  0x7a   : > { %1126 = vmatmul.mubr.bf16.gmra.mrb[36].mxu1 %v2317_v9  ;;  %2158 = vmatmul.mubr.msk.bf16.gmra.mrb[36].mxu0 %vm893_vm1, %v2318_v10 }
  0x7b   : > { %1133 = vmatprep.mubr.bf16.mxu1 %v2319_v11  ;;  %2161 = vmatprep.mubr.msk.bf16.mxu0 %vm2366_vm0, %v2365_v24 }
  0x82   : > { %1134 = vmatmul.mubr.bf16.gmra.mrb[40].mxu1 %v2321_v12  ;;  %2162 = vmatmul.mubr.msk.bf16.gmra.mrb[40].mxu0 %vm893_vm1, %v2322_v13 }
  0x83   : > { %1141 = vmatprep.mubr.bf16.mxu1 %v2323_v14  ;;  %2165 = vmatprep.mubr.msk.bf16.mxu0 %vm2366_vm0, %v2365_v24 }
  0x8a   : > { %1142 = vmatmul.mubr.bf16.gmra.mrb[44].mxu1 %v2325_v15  ;;  %2166 = vmatmul.mubr.msk.bf16.gmra.mrb[44].mxu0 %vm893_vm1, %v2326_v16 }
  0x8b   : > { %1149 = vmatprep.mubr.bf16.mxu1 %v2327_v17  ;;  %2169 = vmatprep.mubr.msk.bf16.mxu0 %vm2366_vm0, %v2365_v24 }
  0x92   : > { %1150 = vmatmul.mubr.bf16.gmra.mrb[48].mxu1 %v2329_v18  ;;  %2170 = vmatmul.mubr.msk.bf16.gmra.mrb[48].mxu0 %vm893_vm1, %v2330_v19 }
  0x93   : > { %1157 = vmatprep.mubr.bf16.mxu1 %v2331_v20  ;;  %2173 = vmatprep.mubr.msk.bf16.mxu0 %vm2366_vm0, %v2365_v24 }
  0x9a   : > { %1158 = vmatmul.mubr.bf16.gmra.mrb[52].mxu1 %v2333_v21  ;;  %2174 = vmatmul.mubr.msk.bf16.gmra.mrb[52].mxu0 %vm893_vm1, %v2334_v22 }
  0x9b   : > { %1165 = vmatprep.mubr.bf16.mxu1 %v2335_v23  ;;  %2177 = vmatprep.mubr.msk.bf16.mxu0 %vm2366_vm0, %v2365_v24 }
  0xa2   : > { %1166 = vmatmul.mubr.bf16.gmra.mrb[56].mxu1 %v2337_v25  ;;  %2178 = vmatmul.mubr.msk.bf16.gmra.mrb[56].mxu0 %vm893_vm1, %v2338_v26 }
  0xa3   : > { %1173 = vmatprep.mubr.bf16.mxu1 %v2339_v27  ;;  %2181 = vmatprep.mubr.msk.bf16.mxu0 %vm2366_vm0, %v2365_v24 }
  0xaa   : > { %1174 = vmatmul.mubr.bf16.gmra.mrb[60].mxu1 %v2341_v28  ;;  %2182 = vmatmul.mubr.msk.bf16.gmra.mrb[60].mxu0 %vm893_vm1, %v2342_v29 }
  0xab   : > { %1181 = vmatprep.mubr.bf16.mxu1 %v2343_v30  ;;  %2185 = vmatprep.mubr.msk.bf16.mxu0 %vm2366_vm0, %v2365_v24 }
  0xb2   : > { %1182 = vmatmul.mubr.bf16.gmra.mrb[64].mxu1 %v2345_v31  ;;  %2186 = vmatmul.mubr.msk.bf16.gmra.mrb[64].mxu0 %vm893_vm1, %v2346_v32 }
  0xb3   : > { %1189 = vmatprep.mubr.bf16.mxu1 %v2347_v33  ;;  %2189 = vmatprep.mubr.msk.bf16.mxu0 %vm2366_vm0, %v2365_v24 }
  0xba   : > { %1190 = vmatmul.mubr.bf16.gmra.mrb[68].mxu1 %v2349_v35  ;;  %2190 = vmatmul.mubr.msk.bf16.gmra.mrb[68].mxu0 %vm893_vm1, %v2350_v36 }
  0xbb   : > { %1197 = vmatprep.mubr.bf16.mxu1 %v1833_v37  ;;  %2193 = vmatprep.mubr.msk.bf16.mxu0 %vm2366_vm0, %v2365_v24 }
  0xc2   : > { %1198 = vmatmul.mubr.bf16.gmra.mrb[72].mxu1 %v1832_v38  ;;  %2194 = vmatmul.mubr.msk.bf16.gmra.mrb[72].mxu0 %vm893_vm1, %v2353_v39 }
  0xc3   : > { %2197 = vmatprep.mubr.msk.bf16.mxu0 %vm2366_vm0, %v2365_v24 }
  0xca   : > { %2198 = vmatmul.mubr.msk.bf16.gmra.mrb[76].mxu0 %vm893_vm1, %v2354_v40 }
 0x105   : > { %v1952_v41 = vpop.f32.mrb[0].mxu0  ;;  %v1994_v42 = vpop.f32.mrb[0].mxu1 }
 0x106   : > { %v1953_v43 = vpop.f32.mrb[1].mxu0  ;;  %v1995_v44 = vpop.f32.mrb[1].mxu1 }
 0x107   : > { %v2551_v45 = vadd.f32 %v1953_v43, %v1952_v41  ;;  %v1955_v46 = vpop.f32.mrb[2].mxu0  ;;  %v2553_v47 = vadd.f32 %v1995_v44, %v1994_v42  ;;  %v1997_v48 = vpop.f32.mrb[2].mxu1 }
 0x108   : > { %v1956_v49 = vpop.f32.mrb[3].mxu0  ;;  %v1998_v50 = vpop.f32.mrb[3].mxu1 }
 0x109   : > { %v2555_v51 = vadd.f32 %v1956_v49, %v1955_v46  ;;  %v2557_v52 = vadd.f32 %v1998_v50, %v1997_v48  ;;  %v2601_v50 = vld [vmem:[%s199_s24] ss:$0 sm:$0xff] }
 0x10d   : > { %v1958_v24 = vpop.f32.mrb[4].mxu0  ;;  %v2000_v53 = vpop.f32.mrb[4].mxu1 }
 0x10e   : > { %v1959_v54 = vpop.f32.mrb[5].mxu0  ;;  %v2001_v55 = vpop.f32.mrb[5].mxu1 }
 0x10f   : > { %v2559_v56 = vadd.f32 %v1959_v54, %v1958_v24  ;;  %v1961_v57 = vpop.f32.mrb[6].mxu0  ;;  %v2561_v58 = vadd.f32 %v2001_v55, %v2000_v53  ;;  %v2003_v59 = vpop.f32.mrb[6].mxu1 }
 0x110   : > { %v1962_v60 = vpop.f32.mrb[7].mxu0  ;;  %v2004_v61 = vpop.f32.mrb[7].mxu1 }
 0x111   : > { %v2563_v62 = vadd.f32 %v1962_v60, %v1961_v57  ;;  %v2565_v63 = vadd.f32 %v2004_v61, %v2003_v59  ;;  %v968_v57 = vadd.f32 %v2551_v45, %v2601_v50 }
 0x115   : > { %v1964_v0 = vpop.f32.mrb[8].mxu0  ;;  %v2006_v1 = vpop.f32.mrb[8].mxu1 }
 0x116   : > { %v1965_v2 = vpop.f32.mrb[9].mxu0  ;;  %v2007_v3 = vpop.f32.mrb[9].mxu1 }
 0x117   : > { %v2567_v4 = vadd.f32 %v1965_v2, %v1964_v0  ;;  %v1967_v5 = vpop.f32.mrb[10].mxu0  ;;  %v2569_v6 = vadd.f32 %v2007_v3, %v2006_v1  ;;  %v2009_v7 = vpop.f32.mrb[10].mxu1  ;;  %v971_v3 = vadd.f32 %v2555_v51, %v2601_v50 }
 0x118   : > { %v1968_v8 = vpop.f32.mrb[11].mxu0  ;;  %v2010_v9 = vpop.f32.mrb[11].mxu1 }
 0x119   : > { %v2571_v10 = vadd.f32 %v1968_v8, %v1967_v5  ;;  %v2573_v11 = vadd.f32 %v2010_v9, %v2009_v7 }
 0x11d   : > { %v1970_v12 = vpop.f32.mrb[12].mxu0  ;;  %v2012_v13 = vpop.f32.mrb[12].mxu1 }
 0x11e   : > { %v1971_v14 = vpop.f32.mrb[13].mxu0  ;;  %v2013_v15 = vpop.f32.mrb[13].mxu1 }
 0x11f   : > { %v2575_v16 = vadd.f32 %v1971_v14, %v1970_v12  ;;  %v1973_v17 = vpop.f32.mrb[14].mxu0  ;;  %v2577_v18 = vadd.f32 %v2013_v15, %v2012_v13  ;;  %v2015_v19 = vpop.f32.mrb[14].mxu1 }
 0x120   : > { %v1974_v20 = vpop.f32.mrb[15].mxu0  ;;  %v2016_v21 = vpop.f32.mrb[15].mxu1 }
 0x121   : > { %v2579_v22 = vadd.f32 %v1974_v20, %v1973_v17  ;;  %v2581_v23 = vadd.f32 %v2016_v21, %v2015_v19  ;;  %v976_v17 = vadd.f32 %v2559_v56, %v2601_v50  ;;  %v984_v56 = vadd.f32 %v2567_v4, %v2601_v50 }
 0x125   : > { %v1976_v25 = vpop.f32.mrb[16].mxu0  ;;  %v2018_v26 = vpop.f32.mrb[16].mxu1 }
 0x126   : > { %v1977_v27 = vpop.f32.mrb[17].mxu0  ;;  %v2019_v28 = vpop.f32.mrb[17].mxu1 }
 0x127   : > { %v2583_v29 = vadd.f32 %v1977_v27, %v1976_v25  ;;  %v1979_v30 = vpop.f32.mrb[18].mxu0  ;;  %v2585_v31 = vadd.f32 %v2019_v28, %v2018_v26  ;;  %v2021_v32 = vpop.f32.mrb[18].mxu1  ;;  %v979_v27 = vadd.f32 %v2563_v62, %v2601_v50  ;;  %v987_v62 = vadd.f32 %v2571_v10, %v2601_v50 }
 0x128   : > { %v1980_v33 = vpop.f32.mrb[19].mxu0  ;;  %v2022_v34 = vpop.f32.mrb[19].mxu1 }
 0x129   : > { %v2587_v35 = vadd.f32 %v1980_v33, %v1979_v30  ;;  %v2589_v36 = vadd.f32 %v2022_v34, %v2021_v32 }
 0x12d   : > { %v1982_v37 = vpop.f32.mrb[20].mxu0  ;;  %v2024_v38 = vpop.f32.mrb[20].mxu1 }
 0x12e   : > { %v1983_v39 = vpop.f32.mrb[21].mxu0  ;;  %v2025_v40 = vpop.f32.mrb[21].mxu1 }
 0x12f   : > { %v2591_v41 = vadd.f32 %v1983_v39, %v1982_v37  ;;  %v1985_v42 = vpop.f32.mrb[22].mxu0  ;;  %v2593_v43 = vadd.f32 %v2025_v40, %v2024_v38  ;;  %v2027_v44 = vpop.f32.mrb[22].mxu1 }
 0x130   : > { %v1986_v46 = vpop.f32.mrb[23].mxu0  ;;  %v2028_v48 = vpop.f32.mrb[23].mxu1 }
 0x131   : > { %v2599_v49 = vadd.f32 %v1986_v46, %v1985_v42 }
 0x135   : > { %v1988_v24 = vpop.f32.mrb[24].mxu0  ;;  %v2046_v53 = vpop.f32.mrb[24].mxu1 }
 0x136   : > { %v1989_v54 = vpop.f32.mrb[25].mxu0  ;;  %v2047_v55 = vpop.f32.mrb[25].mxu1 }
 0x137   : > { %v2605_v59 = vadd.f32 %v1989_v54, %v1988_v24  ;;  %v2048_v60 = vadd.f32 %v2047_v55, %v2046_v53  ;;  %v1991_v61 = vpop.f32.mrb[26].mxu0  ;;  %v2049_v0 = vpop.f32.mrb[26].mxu1 }
 0x138   : > { %v1992_v1 = vpop.f32.mrb[27].mxu0  ;;  %v2050_v2 = vpop.f32.mrb[27].mxu1 }
 0x139   : > { %v2609_v5 = vadd.f32 %v1992_v1, %v1991_v61  ;;  %v2051_v7 = vadd.f32 %v2050_v2, %v2049_v0  ;;  %v1104_v8 = vadd.f32 %v2048_v60, %v968_v57 }
 0x13b   : > { %v1107_v9 = vadd.f32 %v2051_v7, %v971_v3 }
 0x13d   : > { %v2052_v12 = vpop.f32.mrb[28].mxu1  ;;  %v1239_v13 = vpop.f32.mrb[28].mxu0 }
 0x13e   : > { %v2611_v14 = vadd.f32 %v1239_v13, %v1104_v8  ;;  %v2053_v45 = vpop.f32.mrb[29].mxu1  ;;  %v2151_v15 = vpop.f32.mrb[29].mxu0  ;;  %v995_v13 = vadd.f32 %v2579_v22, %v2601_v50 }
 0x13f   : > { %v2054_v19 = vadd.f32 %v2053_v45, %v2052_v12  ;;  %v2055_v20 = vpop.f32.mrb[30].mxu1  ;;  %v1242_v21 = vpop.f32.mrb[30].mxu0  ;;  %v992_v12 = vadd.f32 %v2575_v16, %v2601_v50 }
 0x140   : > { %v2615_v25 = vadd.f32 %v1242_v21, %v1107_v9  ;;  %v2056_v51 = vpop.f32.mrb[31].mxu1  ;;  %v2152_v26 = vpop.f32.mrb[31].mxu0  ;;  %v1398_v60 = vmul.f32 %v2611_v14, %v2611_v14  ;;  %v1341_v10 = vsel %vm893_vm1, %v2611_v14, 0.0 }
 0x141   : > { %v2057_v28 = vadd.f32 %v2056_v51, %v2055_v20  ;;  %v1112_v30 = vadd.f32 %v2054_v19, %v976_v17 }
 0x142   : > { %v1399_v55 = vmul.f32 %v2615_v25, %v2615_v25  ;;  %v1342_v4 = vsel %vm893_vm1, %v2615_v25, 0.0  ;;  %v1423_v20 = vsel %vm893_vm1, %v1398_v60, 0.0 }
 0x143   : > { %v1115_v32 = vadd.f32 %v2057_v28, %v979_v27  ;;  %v1343_v45 = vadd.f32 %v1342_v4, %v1341_v10 }
 0x144   : > { %v1424_v2 = vsel %vm893_vm1, %v1399_v55, 0.0 }
 0x145   : > { %v2058_v33 = vpop.f32.mrb[32].mxu1  ;;  %v1247_v34 = vpop.f32.mrb[32].mxu0 }
 0x146   : > { %v2619_v37 = vadd.f32 %v1247_v34, %v1112_v30  ;;  %v2059_v38 = vpop.f32.mrb[33].mxu1  ;;  %v2155_v39 = vpop.f32.mrb[33].mxu0  ;;  %v1425_v30 = vadd.f32 %v1424_v2, %v1423_v20 }
 0x147   : > { %v2060_v40 = vadd.f32 %v2059_v38, %v2058_v33  ;;  %v2061_v42 = vpop.f32.mrb[34].mxu1  ;;  %v1250_v44 = vpop.f32.mrb[34].mxu0 }
 0x148   : > { %v2623_v46 = vadd.f32 %v1250_v44, %v1115_v32  ;;  %v2062_v48 = vpop.f32.mrb[35].mxu1  ;;  %v2156_v24 = vpop.f32.mrb[35].mxu0  ;;  %v1400_v61 = vmul.f32 %v2619_v37, %v2619_v37  ;;  %v1344_v3 = vsel %vm893_vm1, %v2619_v37, 0.0 }
 0x149   : > { %v2063_v53 = vadd.f32 %v2062_v48, %v2061_v42  ;;  %v1120_v54 = vadd.f32 %v2060_v40, %v984_v56  ;;  %v1345_v16 = vadd.f32 %v1344_v3, %v1343_v45 }
 0x14a   : > { %v1426_v21 = vsel %vm893_vm1, %v1400_v61, 0.0  ;;  %v1401_v51 = vmul.f32 %v2623_v46, %v2623_v46  ;;  %v1346_v22 = vsel %vm893_vm1, %v2623_v46, 0.0 }
 0x14b   : > { %v1123_v57 = vadd.f32 %v2063_v53, %v987_v62  ;;  %v1427_v38 = vadd.f32 %v1426_v21, %v1425_v30  ;;  %v1347_v42 = vadd.f32 %v1346_v22, %v1345_v16 }
 0x14c   : > { %v1428_v56 = vsel %vm893_vm1, %v1401_v51, 0.0 }
 0x14d   : > { %v2064_v0 = vpop.f32.mrb[36].mxu1  ;;  %v1255_v1 = vpop.f32.mrb[36].mxu0  ;;  %v1429_v60 = vadd.f32 %v1428_v56, %v1427_v38 }
 0x14e   : > { %v2640_v7 = vadd.f32 %v1255_v1, %v1120_v54  ;;  %v2065_v8 = vpop.f32.mrb[37].mxu1  ;;  %v2159_v9 = vpop.f32.mrb[37].mxu0 }
 0x14f   : > { %v2066_v15 = vadd.f32 %v2065_v8, %v2064_v0  ;;  %v2067_v17 = vpop.f32.mrb[38].mxu1  ;;  %v1258_v19 = vpop.f32.mrb[38].mxu0 }
 0x150   : > { %v2650_v26 = vadd.f32 %v1258_v19, %v1123_v57  ;;  %v2068_v27 = vpop.f32.mrb[39].mxu1  ;;  %v2160_v28 = vpop.f32.mrb[39].mxu0  ;;  %v1402_v34 = vmul.f32 %v2640_v7, %v2640_v7  ;;  %v1348_v40 = vsel %vm893_vm1, %v2640_v7, 0.0  ;;  %v1000_v57 = vadd.f32 %v2583_v29, %v2601_v50 }
 0x151   : > { %v2069_v32 = vadd.f32 %v2068_v27, %v2067_v17  ;;  %v1128_v33 = vadd.f32 %v2066_v15, %v992_v12  ;;  %v1349_v4 = vadd.f32 %v1348_v40, %v1347_v42  ;;  %v1003_v12 = vadd.f32 %v2587_v35, %v2601_v50 }
 0x152   : > { %v1430_v24 = vsel %vm893_vm1, %v1402_v34, 0.0  ;;  %v1403_v62 = vmul.f32 %v2650_v26, %v2650_v26  ;;  %v1350_v10 = vsel %vm893_vm1, %v2650_v26, 0.0  ;;  %v1008_v34 = vadd.f32 %v2591_v41, %v2601_v50 }
 0x153   : > { %v1131_v39 = vadd.f32 %v2069_v32, %v995_v13  ;;  %v1431_v13 = vadd.f32 %v1430_v24, %v1429_v60  ;;  %v1351_v19 = vadd.f32 %v1350_v10, %v1349_v4 }
 0x154   : > { %v1432_v15 = vsel %vm893_vm1, %v1403_v62, 0.0 }
 0x155   : > { %v2070_v44 = vpop.f32.mrb[40].mxu1  ;;  %v1263_v48 = vpop.f32.mrb[40].mxu0  ;;  %v1433_v27 = vadd.f32 %v1432_v15, %v1431_v13  ;;  %v1016_v15 = vadd.f32 %v2605_v59, %v2601_v50 }
 0x156   : > { %v2662_v53 = vadd.f32 %v1263_v48, %v1128_v33  ;;  %v2071_v54 = vpop.f32.mrb[41].mxu1  ;;  %v2163_v55 = vpop.f32.mrb[41].mxu0 }
 0x157   : > { %v2072_v61 = vadd.f32 %v2071_v54, %v2070_v44  ;;  %v2073_v0 = vpop.f32.mrb[42].mxu1  ;;  %v1266_v1 = vpop.f32.mrb[42].mxu0  ;;  %v1011_v55 = vadd.f32 %v2599_v49, %v2601_v50 }
 0x158   : > { %v1404_v2 = vmul.f32 %v2662_v53, %v2662_v53  ;;  %v2670_v3 = vadd.f32 %v1266_v1, %v1131_v39  ;;  %v2074_v8 = vpop.f32.mrb[43].mxu1  ;;  %v2164_v9 = vpop.f32.mrb[43].mxu0  ;;  %v1352_v17 = vsel %vm893_vm1, %v2662_v53, 0.0 }
 0x159   : > { %v2075_v29 = vadd.f32 %v2074_v8, %v2073_v0  ;;  %v1136_v45 = vadd.f32 %v2072_v61, %v1000_v57  ;;  %v1353_v28 = vadd.f32 %v1352_v17, %v1351_v19 }
 0x15a   : > { %v1434_v21 = vsel %vm893_vm1, %v1404_v2, 0.0  ;;  %v1405_v51 = vmul.f32 %v2670_v3, %v2670_v3  ;;  %v1354_v35 = vsel %vm893_vm1, %v2670_v3, 0.0 }
 0x15b   : > { %v1139_v20 = vadd.f32 %v2075_v29, %v1003_v12  ;;  %v1435_v38 = vadd.f32 %v1434_v21, %v1433_v27  ;;  %v1355_v41 = vadd.f32 %v1354_v35, %v1353_v28 }
 0x15c   : > { %v1436_v42 = vsel %vm893_vm1, %v1405_v51, 0.0  ;;  %v1019_v51 = vadd.f32 %v2609_v5, %v2601_v50 }
 0x15d   : > { %v2076_v30 = vpop.f32.mrb[44].mxu1  ;;  %v1271_v16 = vpop.f32.mrb[44].mxu0  ;;  %v1437_v0 = vadd.f32 %v1436_v42, %v1435_v38 }
 0x15e   : > { %v2682_v32 = vadd.f32 %v1271_v16, %v1136_v45  ;;  %v2077_v33 = vpop.f32.mrb[45].mxu1  ;;  %v2167_v22 = vpop.f32.mrb[45].mxu0 }
 0x15f   : > { %v2078_v39 = vadd.f32 %v2077_v33, %v2076_v30  ;;  %v2079_v56 = vpop.f32.mrb[46].mxu1  ;;  %v1274_v40 = vpop.f32.mrb[46].mxu0 }
 0x160   : > { %v1356_v44 = vsel %vm893_vm1, %v2682_v32, 0.0  ;;  %v1406_v48 = vmul.f32 %v2682_v32, %v2682_v32  ;;  %v2691_v24 = vadd.f32 %v1274_v40, %v1139_v20  ;;  %v2080_v62 = vpop.f32.mrb[47].mxu1  ;;  %v2168_v54 = vpop.f32.mrb[47].mxu0 }
 0x161   : > { %v2081_v57 = vadd.f32 %v2080_v62, %v2079_v56  ;;  %v1144_v60 = vadd.f32 %v2078_v39, %v1008_v34  ;;  %v1357_v1 = vadd.f32 %v1356_v44, %v1355_v41 }
 0x162   : > { %v1438_v4 = vsel %vm893_vm1, %v1406_v48, 0.0  ;;  %v1407_v61 = vmul.f32 %v2691_v24, %v2691_v24  ;;  %v1358_v2 = vsel %vm893_vm1, %v2691_v24, 0.0 }
 0x163   : > { %v1147_v10 = vadd.f32 %v2081_v57, %v1011_v55  ;;  %v1439_v8 = vadd.f32 %v1438_v4, %v1437_v0  ;;  %v1359_v17 = vadd.f32 %v1358_v2, %v1357_v1 }
 0x164   : > { %v1440_v13 = vsel %vm893_vm1, %v1407_v61, 0.0 }
 0x165   : > { %v2082_v9 = vpop.f32.mrb[48].mxu1  ;;  %v1279_v12 = vpop.f32.mrb[48].mxu0  ;;  %v1441_v33 = vadd.f32 %v1440_v13, %v1439_v8 }
 0x166   : > { %v2701_v49 = vadd.f32 %v1279_v12, %v1144_v60  ;;  %v2083_v29 = vpop.f32.mrb[49].mxu1  ;;  %v2171_v45 = vpop.f32.mrb[49].mxu0  ;;  %v1024_v60 = vadd.f32 %v2553_v47, %v2601_v50  ;;  %v1027_v12 = vadd.f32 %v2557_v52, %v2601_v50 }
 0x167   : > { %v2084_v19 = vadd.f32 %v2083_v29, %v2082_v9  ;;  %v2085_v20 = vpop.f32.mrb[50].mxu1  ;;  %v1282_v21 = vpop.f32.mrb[50].mxu0 }
 0x168   : > { %v1360_v27 = vsel %vm893_vm1, %v2701_v49, 0.0  ;;  %v1408_v28 = vmul.f32 %v2701_v49, %v2701_v49  ;;  %v2711_v30 = vadd.f32 %v1282_v21, %v1147_v10  ;;  %v2086_v16 = vpop.f32.mrb[51].mxu1  ;;  %v2172_v35 = vpop.f32.mrb[51].mxu0 }
 0x169   : > { %v1361_v22 = vadd.f32 %v1360_v27, %v1359_v17  ;;  %v2087_v59 = vadd.f32 %v2086_v16, %v2085_v20  ;;  %v1152_v34 = vadd.f32 %v2084_v19, %v1016_v15 }
 0x16a   : > { %v1442_v38 = vsel %vm893_vm1, %v1408_v28, 0.0  ;;  %v1362_v39 = vsel %vm893_vm1, %v2711_v30, 0.0  ;;  %v1409_v5 = vmul.f32 %v2711_v30, %v2711_v30 }
 0x16b   : > { %v1443_v56 = vadd.f32 %v1442_v38, %v1441_v33  ;;  %v1363_v40 = vadd.f32 %v1362_v39, %v1361_v22  ;;  %v1155_v42 = vadd.f32 %v2087_v59, %v1019_v51  ;;  %v1032_v22 = vadd.f32 %v2561_v58, %v2601_v50 }
 0x16c   : > { %v1444_v44 = vsel %vm893_vm1, %v1409_v5, 0.0 }
 0x16d   : > { %v1445_v48 = vadd.f32 %v1444_v44, %v1443_v56  ;;  %v2088_v62 = vpop.f32.mrb[52].mxu1  ;;  %v1287_v54 = vpop.f32.mrb[52].mxu0  ;;  %v1035_v44 = vadd.f32 %v2565_v63, %v2601_v50 }
 0x16e   : > { %v2719_v55 = vadd.f32 %v1287_v54, %v1152_v34  ;;  %v2089_v41 = vpop.f32.mrb[53].mxu1  ;;  %v2175_v57 = vpop.f32.mrb[53].mxu0 }
 0x16f   : > { %v2090_v4 = vadd.f32 %v2089_v41, %v2088_v62  ;;  %v2091_v61 = vpop.f32.mrb[54].mxu1  ;;  %v1290_v0 = vpop.f32.mrb[54].mxu0 }
 0x170   : > { %v1364_v1 = vsel %vm893_vm1, %v2719_v55, 0.0  ;;  %v1410_v10 = vmul.f32 %v2719_v55, %v2719_v55  ;;  %v2727_v2 = vadd.f32 %v1290_v0, %v1155_v42  ;;  %v2092_v8 = vpop.f32.mrb[55].mxu1  ;;  %v2176_v9 = vpop.f32.mrb[55].mxu0 }
 0x171   : > { %v1365_v13 = vadd.f32 %v1364_v1, %v1363_v40  ;;  %v2093_v29 = vadd.f32 %v2092_v8, %v2091_v61  ;;  %v1160_v45 = vadd.f32 %v2090_v4, %v1024_v60 }
 0x172   : > { %v1446_v47 = vsel %vm893_vm1, %v1410_v10, 0.0  ;;  %v1366_v15 = vsel %vm893_vm1, %v2727_v2, 0.0  ;;  %v1411_v17 = vmul.f32 %v2727_v2, %v2727_v2 }
 0x173   : > { %v1447_v19 = vadd.f32 %v1446_v47, %v1445_v48  ;;  %v1367_v20 = vadd.f32 %v1366_v15, %v1365_v13  ;;  %v1163_v21 = vadd.f32 %v2093_v29, %v1027_v12  ;;  %v1040_v13 = vadd.f32 %v2569_v6, %v2601_v50 }
 0x174   : > { %v1448_v51 = vsel %vm893_vm1, %v1411_v17, 0.0 }
 0x175   : > { %v1449_v27 = vadd.f32 %v1448_v51, %v1447_v19  ;;  %v2094_v28 = vpop.f32.mrb[56].mxu1  ;;  %v1295_v16 = vpop.f32.mrb[56].mxu0  ;;  %v1043_v51 = vadd.f32 %v2573_v11, %v2601_v50 }
 0x176   : > { %v2737_v52 = vadd.f32 %v1295_v16, %v1160_v45  ;;  %v2095_v35 = vpop.f32.mrb[57].mxu1  ;;  %v2179_v33 = vpop.f32.mrb[57].mxu0 }
 0x177   : > { %v2096_v59 = vadd.f32 %v2095_v35, %v2094_v28  ;;  %v2097_v34 = vpop.f32.mrb[58].mxu1  ;;  %v1298_v38 = vpop.f32.mrb[58].mxu0 }
 0x178   : > { %v1368_v39 = vsel %vm893_vm1, %v2737_v52, 0.0  ;;  %v1412_v5 = vmul.f32 %v2737_v52, %v2737_v52  ;;  %v2745_v56 = vadd.f32 %v1298_v38, %v1163_v21  ;;  %v2098_v40 = vpop.f32.mrb[59].mxu1  ;;  %v2180_v42 = vpop.f32.mrb[59].mxu0 }
 0x179   : > { %v1369_v48 = vadd.f32 %v1368_v39, %v1367_v20  ;;  %v2099_v62 = vadd.f32 %v2098_v40, %v2097_v34  ;;  %v1168_v54 = vadd.f32 %v2096_v59, %v1032_v22 }
 0x17a   : > { %v1450_v58 = vsel %vm893_vm1, %v1412_v5, 0.0  ;;  %v1370_v41 = vsel %vm893_vm1, %v2745_v56, 0.0  ;;  %v1413_v57 = vmul.f32 %v2745_v56, %v2745_v56 }
 0x17b   : > { %v1451_v60 = vadd.f32 %v1450_v58, %v1449_v27  ;;  %v1371_v4 = vadd.f32 %v1370_v41, %v1369_v48  ;;  %v1171_v61 = vadd.f32 %v2099_v62, %v1035_v44  ;;  %v1048_v48 = vadd.f32 %v2577_v18, %v2601_v50 }
 0x17c   : > { %v1452_v0 = vsel %vm893_vm1, %v1413_v57, 0.0 }
 0x17d   : > { %v1453_v1 = vadd.f32 %v1452_v0, %v1451_v60  ;;  %v2100_v10 = vpop.f32.mrb[60].mxu1  ;;  %v1303_v8 = vpop.f32.mrb[60].mxu0  ;;  %v1051_v0 = vadd.f32 %v2581_v23, %v2601_v50 }
 0x17e   : > { %v2755_v63 = vadd.f32 %v1303_v8, %v1168_v54  ;;  %v2101_v9 = vpop.f32.mrb[61].mxu1  ;;  %v2183_v12 = vpop.f32.mrb[61].mxu0 }
 0x17f   : > { %v2102_v29 = vadd.f32 %v2101_v9, %v2100_v10  ;;  %v2103_v45 = vpop.f32.mrb[62].mxu1  ;;  %v1306_v47 = vpop.f32.mrb[62].mxu0 }
 0x180   : > { %v1372_v15 = vsel %vm893_vm1, %v2755_v63, 0.0  ;;  %v1414_v17 = vmul.f32 %v2755_v63, %v2755_v63  ;;  %v2763_v19 = vadd.f32 %v1306_v47, %v1171_v61  ;;  %v2104_v20 = vpop.f32.mrb[63].mxu1  ;;  %v2184_v21 = vpop.f32.mrb[63].mxu0 }
 0x181   : > { %v1373_v27 = vadd.f32 %v1372_v15, %v1371_v4  ;;  %v2105_v28 = vadd.f32 %v2104_v20, %v2103_v45  ;;  %v1176_v16 = vadd.f32 %v2102_v29, %v1040_v13 }
 0x182   : > { %v1454_v6 = vsel %vm893_vm1, %v1414_v17, 0.0  ;;  %v1374_v35 = vsel %vm893_vm1, %v2763_v19, 0.0  ;;  %v1415_v33 = vmul.f32 %v2763_v19, %v2763_v19 }
 0x183   : > { %v1455_v22 = vadd.f32 %v1454_v6, %v1453_v1  ;;  %v1375_v59 = vadd.f32 %v1374_v35, %v1373_v27  ;;  %v1179_v34 = vadd.f32 %v2105_v28, %v1043_v51  ;;  %v1056_v27 = vadd.f32 %v2585_v31, %v2601_v50 }
 0x184   : > { %v1456_v38 = vsel %vm893_vm1, %v1415_v33, 0.0 }
 0x185   : > { %v1457_v39 = vadd.f32 %v1456_v38, %v1455_v22  ;;  %v2106_v5 = vpop.f32.mrb[64].mxu1  ;;  %v1311_v40 = vpop.f32.mrb[64].mxu0  ;;  %v1059_v38 = vadd.f32 %v2589_v36, %v2601_v50 }
 0x186   : > { %v2773_v11 = vadd.f32 %v1311_v40, %v1176_v16  ;;  %v2107_v42 = vpop.f32.mrb[65].mxu1  ;;  %v2187_v44 = vpop.f32.mrb[65].mxu0 }
 0x187   : > { %v2108_v62 = vadd.f32 %v2107_v42, %v2106_v5  ;;  %v2109_v54 = vpop.f32.mrb[66].mxu1  ;;  %v1314_v58 = vpop.f32.mrb[66].mxu0 }
 0x188   : > { %v1376_v41 = vsel %vm893_vm1, %v2773_v11, 0.0  ;;  %v1416_v57 = vmul.f32 %v2773_v11, %v2773_v11  ;;  %v2781_v60 = vadd.f32 %v1314_v58, %v1179_v34  ;;  %v2110_v4 = vpop.f32.mrb[67].mxu1  ;;  %v2188_v61 = vpop.f32.mrb[67].mxu0 }
 0x189   : > { %v1377_v1 = vadd.f32 %v1376_v41, %v1375_v59  ;;  %v2111_v10 = vadd.f32 %v2110_v4, %v2109_v54  ;;  %v1184_v8 = vadd.f32 %v2108_v62, %v1048_v48 }
 0x18a   : > { %v1458_v18 = vsel %vm893_vm1, %v1416_v57, 0.0  ;;  %v1378_v9 = vsel %vm893_vm1, %v2781_v60, 0.0  ;;  %v1417_v12 = vmul.f32 %v2781_v60, %v2781_v60 }
 0x18b   : > { %v1459_v13 = vadd.f32 %v1458_v18, %v1457_v39  ;;  %v1379_v29 = vadd.f32 %v1378_v9, %v1377_v1  ;;  %v1187_v45 = vadd.f32 %v2111_v10, %v1051_v0  ;;  %v1064_v1 = vadd.f32 %v2593_v43, %v2601_v50 }
 0x18c   : > { %v1460_v47 = vsel %vm893_vm1, %v1417_v12, 0.0 }
 0x18d   : > { %v1461_v15 = vadd.f32 %v1460_v47, %v1459_v13  ;;  %v2112_v17 = vpop.f32.mrb[68].mxu1  ;;  %v1319_v20 = vpop.f32.mrb[68].mxu0 }
 0x18e   : > { %v2791_v23 = vadd.f32 %v1319_v20, %v1184_v8  ;;  %v2113_v21 = vpop.f32.mrb[69].mxu1  ;;  %v2191_v51 = vpop.f32.mrb[69].mxu0 }
 0x18f   : > { %v2114_v28 = vadd.f32 %v2113_v21, %v2112_v17  ;;  %v2115_v16 = vpop.f32.mrb[70].mxu1  ;;  %v1322_v6 = vpop.f32.mrb[70].mxu0 }
 0x190   : > { %v1380_v35 = vsel %vm893_vm1, %v2791_v23, 0.0  ;;  %v1418_v33 = vmul.f32 %v2791_v23, %v2791_v23  ;;  %v2799_v22 = vadd.f32 %v1322_v6, %v1187_v45  ;;  %v2116_v59 = vpop.f32.mrb[71].mxu1  ;;  %v2192_v34 = vpop.f32.mrb[71].mxu0 }
 0x191   : > { %v1381_v39 = vadd.f32 %v1380_v35, %v1379_v29  ;;  %v2117_v5 = vadd.f32 %v2116_v59, %v2115_v16  ;;  %v1192_v40 = vadd.f32 %v2114_v28, %v1056_v27 }
 0x192   : > { %v1462_v31 = vsel %vm893_vm1, %v1418_v33, 0.0  ;;  %v1382_v42 = vsel %vm893_vm1, %v2799_v22, 0.0  ;;  %v1419_v44 = vmul.f32 %v2799_v22, %v2799_v22 }
 0x193   : > { %v1463_v48 = vadd.f32 %v1462_v31, %v1461_v15  ;;  %v1383_v62 = vadd.f32 %v1382_v42, %v1381_v39  ;;  %v1195_v54 = vadd.f32 %v2117_v5, %v1059_v38 }
 0x194   : > { %v1464_v58 = vsel %vm893_vm1, %v1419_v44, 0.0 }
 0x195   : > { %v1465_v41 = vadd.f32 %v1464_v58, %v1463_v48  ;;  %v2118_v57 = vpop.f32.mrb[72].mxu1  ;;  %v1327_v4 = vpop.f32.mrb[72].mxu0 }
 0x196   : > { %v2809_v36 = vadd.f32 %v1327_v4, %v1192_v40  ;;  %v2119_v61 = vpop.f32.mrb[73].mxu1  ;;  %v2195_v0 = vpop.f32.mrb[73].mxu0 }
 0x197   : > { %v2120_v10 = vadd.f32 %v2119_v61, %v2118_v57  ;;  %v1330_v8 = vpop.f32.mrb[74].mxu0  ;;  %v2121_v18 = vpop.f32.mrb[74].mxu1 }
 0x198   : > { %v1384_v9 = vsel %vm893_vm1, %v2809_v36, 0.0  ;;  %v1420_v12 = vmul.f32 %v2809_v36, %v2809_v36  ;;  %v2817_v13 = vadd.f32 %v1330_v8, %v1195_v54  ;;  %v2196_v29 = vpop.f32.mrb[75].mxu0  ;;  %v2122_v45 = vpop.f32.mrb[75].mxu1 }
 0x199   : > { %v1385_v47 = vadd.f32 %v1384_v9, %v1383_v62  ;;  %v1200_v15 = vadd.f32 %v2120_v10, %v1064_v1 }
 0x19a   : > { %v1466_v17 = vsel %vm893_vm1, %v1420_v12, 0.0  ;;  %v1386_v43 = vsel %vm893_vm1, %v2817_v13, 0.0  ;;  %v1421_v50 = vmul.f32 %v2817_v13, %v2817_v13 }
 0x19b   : > { %v1467_v20 = vadd.f32 %v1466_v17, %v1465_v41  ;;  %v1387_v21 = vadd.f32 %v1386_v43, %v1385_v47 }
 0x19c   : > { %v1468_v51 = vsel %vm893_vm1, %v1421_v50, 0.0 }
 0x19d   : > { %v1469_v27 = vadd.f32 %v1468_v51, %v1467_v20  ;;  %v1335_v28 = vpop.f32.mrb[76].mxu0 }
 0x19e   : > { %v2825_v16 = vadd.f32 %v1335_v28, %v1200_v15  ;;  %v2199_v6 = vpop.f32.mrb[77].mxu0 }
 0x19f   : > { %v1338_v35 = vpop.f32.mrb[78].mxu0 }
 0x1a0   : > { %v1388_v33 = vsel %vm893_vm1, %v2825_v16, 0.0  ;;  %v1422_v59 = vmul.f32 %v2825_v16, %v2825_v16  ;;  %v2200_v34 = vpop.f32.mrb[79].mxu0 }
 0x1a1   : > { %v1389_v38 = vadd.f32 %v1388_v33, %v1387_v21 }
 0x1a2   : > { %v1470_v39 = vsel %vm893_vm1, %v1422_v59, 0.0 }
 0x1a3   : > { %v1390_v5 = vrot.slane %v1389_v38, 4  ;;  %v1471_v40 = vadd.f32 %v1470_v39, %v1469_v27 }
 0x1a5   : > { %v1391_v31 = vadd.f32 %v1390_v5, %v1389_v38  ;;  %v1472_v42 = vrot.slane %v1471_v40, 4 }
 0x1a7   : > { %v1392_v44 = vrot.slane %v1391_v31, 2  ;;  %v1473_v48 = vadd.f32 %v1472_v42, %v1471_v40 }
 0x1a9   : > { %v1393_v62 = vadd.f32 %v1392_v44, %v1391_v31  ;;  %v1474_v54 = vrot.slane %v1473_v48, 2 }
 0x1ab   : > { %v1394_v58 = vrot.slane %v1393_v62, 1  ;;  %v1475_v41 = vadd.f32 %v1474_v54, %v1473_v48 }
 0x1ad   : > { %v1395_v57 = vadd.f32 %v1394_v58, %v1393_v62  ;;  %v1476_v4 = vrot.slane %v1475_v41, 1 }
 0x1af   : > { %v1397_v61 = vmul.f32 0.005, %v1395_v57  ;;  %v1477_v0 = vadd.f32 %v1476_v4, %v1475_v41 }
 0x1b1   : > { %v1478_v1 = vmul.f32 0.005, %v1477_v0  ;;  %v1479_v10 = vmul.f32 %v1397_v61, %v1397_v61  ;;  %v1490_v18 = vsub.f32 %v2691_v24, %v1397_v61  ;;  %v1491_v9 = vsub.f32 %v2701_v49, %v1397_v61 }
 0x1b2   : > { %v1492_v12 = vsub.f32 %v2711_v30, %v1397_v61  ;;  %v1493_v29 = vsub.f32 %v2719_v55, %v1397_v61  ;;  %v1494_v45 = vsub.f32 %v2727_v2, %v1397_v61  ;;  %v1495_v47 = vsub.f32 %v2737_v52, %v1397_v61 }
 0x1b3   : > { %v1480_v8 = vsub.f32 %v1478_v1, %v1479_v10  ;;  %v1496_v15 = vsub.f32 %v2745_v56, %v1397_v61  ;;  %v1497_v17 = vsub.f32 %v2755_v63, %v1397_v61  ;;  %v1498_v43 = vsub.f32 %v2763_v19, %v1397_v61 }
 0x1b4   : > { %v1499_v50 = vsub.f32 %v2773_v11, %v1397_v61  ;;  %v1500_v24 = vsub.f32 %v2781_v60, %v1397_v61  ;;  %v1501_v49 = vsub.f32 %v2791_v23, %v1397_v61  ;;  %v1502_v30 = vsub.f32 %v2799_v22, %v1397_v61 }
 0x1b5   : > { %v1503_v55 = vsub.f32 %v2809_v36, %v1397_v61  ;;  %v1504_v2 = vsub.f32 %v2817_v13, %v1397_v61  ;;  %v1505_v52 = vsub.f32 %v2825_v16, %v1397_v61  ;;  %v1506_v20 = vadd.f32 1e-05, %v1480_v8 }
 0x1b6   : > { %v1481_v56 = vsub.f32 %v2611_v14, %v1397_v61  ;;  %v1482_v63 = vsub.f32 %v2615_v25, %v1397_v61  ;;  %v1483_v19 = vsub.f32 %v2619_v37, %v1397_v61  ;;  %v1484_v11 = vsub.f32 %v2623_v46, %v1397_v61 }
 0x1b7   : > { %2355 = vrsqrt.f32 %v1506_v20  ;;  %v1485_v60 = vsub.f32 %v2640_v7, %v1397_v61  ;;  %v1486_v22 = vsub.f32 %v2650_v26, %v1397_v61  ;;  %v1487_v36 = vsub.f32 %v2662_v53, %v1397_v61 }
 0x1b8   : > { %v1488_v13 = vsub.f32 %v2670_v3, %v1397_v61  ;;  %v1489_v21 = vsub.f32 %v2682_v32, %v1397_v61 }
 0x1c1   : > { %v2356_v23 = vpop.eup %2355 }
 0x1c2   : > { %v1508_v51 = vmul.f32 %v2356_v23, %v1481_v56  ;;  %v1509_v27 = vmul.f32 %v2356_v23, %v1482_v63  ;;  %v1510_v14 = vmul.f32 %v2356_v23, %v1483_v19  ;;  %v1511_v28 = vmul.f32 %v2356_v23, %v1484_v11 }
 0x1c3   : > { %v1512_v25 = vmul.f32 %v2356_v23, %v1485_v60  ;;  %v1513_v16 = vmul.f32 %v2356_v23, %v1486_v22  ;;  %v1514_v37 = vmul.f32 %v2356_v23, %v1487_v36  ;;  %v1515_v6 = vmul.f32 %v2356_v23, %v1488_v13 }
 0x1c4   : > { %v1516_v46 = vmul.f32 %v2356_v23, %v1489_v21  ;;  %v1517_v35 = vmul.f32 %v2356_v23, %v1490_v18  ;;  %v1518_v7 = vmul.f32 %v2356_v23, %v1491_v9  ;;  %v1519_v33 = vmul.f32 %v2356_v23, %v1492_v12 }
 0x1c5   : > { %v1520_v59 = vmul.f32 %v2356_v23, %v1493_v29  ;;  %v1521_v26 = vmul.f32 %v2356_v23, %v1494_v45  ;;  %v1522_v53 = vmul.f32 %v2356_v23, %v1495_v47  ;;  %v1523_v34 = vmul.f32 %v2356_v23, %v1496_v15 }
 0x1c6   : > { %v1524_v3 = vmul.f32 %v2356_v23, %v1497_v17  ;;  %v1525_v32 = vmul.f32 %v2356_v23, %v1498_v43  ;;  %v2857_v38 = vmul.f32 %v2356_v23, %v1499_v50  ;;  %v2859_v39 = vmul.f32 %v2356_v23, %v1500_v24 }
 0x1c7   : > { %v2861_v5 = vmul.f32 %v2356_v23, %v1501_v49  ;;  %v2863_v40 = vmul.f32 %v2356_v23, %v1502_v30  ;;  %v2865_v31 = vmul.f32 %v2356_v23, %v1503_v55  ;;  %v2867_v42 = vmul.f32 %v2356_v23, %v1504_v2 }
 0x1c8   : > { %v2869_v44 = vmul.f32 %v2356_v23, %v1505_v52  ;;  %v1533_v48 = vmax.f32 %v1508_v51, 0.0  ;;  %v1534_v62 = vmax.f32 %v1509_v27, 0.0  ;;  %v1535_v54 = vmax.f32 %v1510_v14, 0.0 }
 0x1c9   : > { %v1536_v58 = vmax.f32 %v1511_v28, 0.0  ;;  %v1537_v41 = vmax.f32 %v1512_v25, 0.0  ;;  %v1538_v57 = vmax.f32 %v1513_v16, 0.0  ;;  %v1539_v4 = vmax.f32 %v1514_v37, 0.0 }
 0x1ca   : > { %v1540_v61 = vmax.f32 %v1515_v6, 0.0  ;;  %v1541_v0 = vmax.f32 %v1516_v46, 0.0  ;;  %v1542_v1 = vmax.f32 %v1517_v35, 0.0  ;;  %v1543_v10 = vmax.f32 %v1518_v7, 0.0 }
 0x1cb   : > { %v1544_v8 = vmax.f32 %v1519_v33, 0.0  ;;  %v1545_v18 = vmax.f32 %v1520_v59, 0.0  ;;  %v1546_v9 = vmax.f32 %v1521_v26, 0.0  ;;  %v1547_v12 = vmax.f32 %v1522_v53, 0.0 }
 0x1cc   : > { %v1548_v29 = vmax.f32 %v1523_v34, 0.0  ;;  %v1549_v45 = vmax.f32 %v1524_v3, 0.0  ;;  %v1550_v47 = vmax.f32 %v1525_v32, 0.0  ;;  %v1551_v15 = vmax.f32 %v2857_v38, 0.0 }
 0x1cd   : > { %v1552_v17 = vmax.f32 %v2859_v39, 0.0  ;;  %v1553_v43 = vmax.f32 %v2861_v5, 0.0  ;;  %v1554_v50 = vmax.f32 %v2863_v40, 0.0  ;;  %v1555_v24 = vmax.f32 %v2865_v31, 0.0 }
 0x1ce   : > { %v1556_v49 = vmax.f32 %v2867_v42, 0.0  ;;  %v1557_v30 = vmax.f32 %v2869_v44, 0.0  ;;  %v1911_v55 = vpack.c.bf16 %v1533_v48, %v1533_v48  ;;  %v1912_v2 = vpack.c.bf16 %v1534_v62, %v1534_v62 }
 0x1cf   : > { %v1913_v52 = vpack.c.bf16 %v1535_v54, %v1535_v54  ;;  %v1914_v20 = vpack.c.bf16 %v1536_v58, %v1536_v58  ;;  %v1915_v56 = vpack.c.bf16 %v1537_v41, %v1537_v41  ;;  %v1916_v63 = vpack.c.bf16 %v1538_v57, %v1538_v57 }
 0x1d0   : > { %v1917_v19 = vpack.c.bf16 %v1539_v4, %v1539_v4  ;;  %v1918_v11 = vpack.c.bf16 %v1540_v61, %v1540_v61  ;;  %v1919_v60 = vpack.c.bf16 %v1541_v0, %v1541_v0  ;;  %v1920_v23 = vpack.c.bf16 %v1542_v1, %v1542_v1  ;;  %1660 = vst.msk [vmem:[%s2876_s28] sm:$0xf] %vm1659_vm2, %v1911_v55 }
 0x1d1   : > { %1661 = vst.msk [vmem:[%s2876_s28 + $0x4] sm:$0xf] %vm1659_vm2, %v1912_v2  ;;  %v1921_v22 = vpack.c.bf16 %v1543_v10, %v1543_v10  ;;  %v1922_v36 = vpack.c.bf16 %v1544_v8, %v1544_v8  ;;  %v1923_v13 = vpack.c.bf16 %v1545_v18, %v1545_v18  ;;  %v1924_v21 = vpack.c.bf16 %v1546_v9, %v1546_v9 }
 0x1d2   : > { %1662 = vst.msk [vmem:[%s2876_s28 + $0x8] sm:$0xf] %vm1659_vm2, %v1913_v52  ;;  %1663 = vst.msk [vmem:[%s2876_s28 + $0xc] sm:$0xf] %vm1659_vm2, %v1914_v20  ;;  %v1925_v51 = vpack.c.bf16 %v1547_v12, %v1547_v12  ;;  %v1926_v27 = vpack.c.bf16 %v1548_v29, %v1548_v29  ;;  %v1927_v14 = vpack.c.bf16 %v1549_v45, %v1549_v45 }
 0x1d3   : > { %1664 = vst.msk [vmem:[%s2876_s28 + $0x10] sm:$0xf] %vm1659_vm2, %v1915_v56  ;;  %1665 = vst.msk [vmem:[%s2876_s28 + $0x14] sm:$0xf] %vm1659_vm2, %v1916_v63  ;;  %v1928_v28 = vpack.c.bf16 %v1550_v47, %v1550_v47  ;;  %v1929_v25 = vpack.c.bf16 %v1551_v15, %v1551_v15  ;;  %v1930_v16 = vpack.c.bf16 %v1552_v17, %v1552_v17 }
 0x1d4   : > { %1666 = vst.msk [vmem:[%s2876_s28 + $0x18] sm:$0xf] %vm1659_vm2, %v1917_v19  ;;  %1667 = vst.msk [vmem:[%s2876_s28 + $0x1c] sm:$0xf] %vm1659_vm2, %v1918_v11  ;;  %v1931_v37 = vpack.c.bf16 %v1553_v43, %v1553_v43  ;;  %v1932_v6 = vpack.c.bf16 %v1554_v50, %v1554_v50  ;;  %v1933_v46 = vpack.c.bf16 %v1555_v24, %v1555_v24 }
 0x1d5   : > { %1668 = vst.msk [vmem:[%s2876_s28 + $0x20] sm:$0xf] %vm1659_vm2, %v1919_v60  ;;  %1669 = vst.msk [vmem:[%s2876_s28 + $0x24] sm:$0xf] %vm1659_vm2, %v1920_v23  ;;  %v1934_v35 = vpack.c.bf16 %v1556_v49, %v1556_v49  ;;  %v1935_v7 = vpack.c.bf16 %v1557_v30, %v1557_v30 }
 0x1d6   : > { %1670 = vst.msk [vmem:[%s2876_s28 + $0x28] sm:$0xf] %vm1659_vm2, %v1921_v22  ;;  %1671 = vst.msk [vmem:[%s2876_s28 + $0x2c] sm:$0xf] %vm1659_vm2, %v1922_v36 }
 0x1d7   : > { %1672 = vst.msk [vmem:[%s2876_s28 + $0x30] sm:$0xf] %vm1659_vm2, %v1923_v13  ;;  %1673 = vst.msk [vmem:[%s2876_s28 + $0x34] sm:$0xf] %vm1659_vm2, %v1924_v21 }
 0x1d8   : > { %1674 = vst.msk [vmem:[%s2876_s28 + $0x38] sm:$0xf] %vm1659_vm2, %v1925_v51  ;;  %1675 = vst.msk [vmem:[%s2876_s28 + $0x3c] sm:$0xf] %vm1659_vm2, %v1926_v27 }
 0x1d9   : > { %1676 = vst.msk [vmem:[%s2876_s28 + $0x40] sm:$0xf] %vm1659_vm2, %v1927_v14  ;;  %1677 = vst.msk [vmem:[%s2876_s28 + $0x44] sm:$0xf] %vm1659_vm2, %v1928_v28 }
 0x1da   : > { %1678 = vst.msk [vmem:[%s2876_s28 + $0x48] sm:$0xf] %vm1659_vm2, %v1929_v25  ;;  %1679 = vst.msk [vmem:[%s2876_s28 + $0x4c] sm:$0xf] %vm1659_vm2, %v1930_v16 }
 0x1db   : > { %1680 = vst.msk [vmem:[%s2876_s28 + $0x50] sm:$0xf] %vm1659_vm2, %v1931_v37  ;;  %1681 = vst.msk [vmem:[%s2876_s28 + $0x54] sm:$0xf] %vm1659_vm2, %v1932_v6 }
 0x1dc   : > { %1682 = vst.msk [vmem:[%s2876_s28 + $0x58] sm:$0xf] %vm1659_vm2, %v1933_v46  ;;  %1683 = vst.msk [vmem:[%s2876_s28 + $0x5c] sm:$0xf] %vm1659_vm2, %v1934_v35 }
 0x1dd   : > { %1684 = vst.msk [vmem:[%s2876_s28 + $0x60] sm:$0xf] %vm1659_vm2, %v1935_v7 }
 0x1de PF: > { %s13_s12 = sadd.s32 1, %s2363_s12  }
 0x1df   : > { %p10_p4 = scmp.ge.s32.totalorder %s13_s12, 4  }
 0x1e1   :  { %12 = sbr.rel (!%p10_p4) target bundleno = 1 (0x1), region = 68 }

// kernel: rnd_forward.7
= control target key start
LH: loop header
LB: loop body
LE: loop exit
PB: predicated region body
PF: predicated region fallthrough
CT: control target
= control target key end

     0   :  { %s6601_s24 = smov 0   ;;  %s6603_s25 = smov 0   ;;  %s7890_s0 = inlined_call_operand.vmem [shape: bf16[2,2,6400], index: 0, kind: input, shape index: {}]   ;;  %s7891_s1 = inlined_call_operand.vmem [shape: bf16[2,6400,512], index: 1, kind: input, shape index: {}]   ;;  %s7892_s2 = inlined_call_operand.vmem [shape: f32[2,1,512], index: 2, kind: input, shape index: {}]   ;;  %s7893_s3 = inlined_call_operand.vmem [shape: bf16[512,512], index: 3, kind: input, shape index: {}]   ;;  %s7894_s4 = inlined_call_operand.vmem [shape: f32[1,512], index: 4, kind: input, shape index: {}]   ;;  %s7895_s5 = inlined_call_operand.vmem [shape: bf16[512,512], index: 5, kind: input, shape index: {}]   ;;  %s7896_s6 = inlined_call_operand.vmem [shape: f32[1,512], index: 6, kind: input, shape index: {}]   ;;  %s7897_s7 = inlined_call_operand.vmem [shape: f32[2,2,512], index: 7, kind: output, shape index: {}]  }
   0x1   :  { %s6605_s26 = smov 0   ;;  %s6607_s27 = smov 0  }
   0x2   :  { %s6609_s28 = smov 0  }
   0x3 LB: > { %7900 = sst [smem:[#allocation3_spill]] %s6548_s26  ;;  %s26_s29 = sadd.s32 1, %s6548_s26  ;;  %s6556_s28 = sphi %s6609_s28, %s17_s28   ;;  %s6552_s27 = sphi %s6607_s27, %s7908_s27   ;;  %s6548_s26 = sphi %s6605_s26, %s7907_s26   ;;  %s6544_s25 = sphi %s6603_s25, %s7906_s25   ;;  %s6540_s24 = sphi %s6601_s24, %s7905_s24  }
   0x4   : > { %7901 = sst [smem:[#allocation4_spill]] %s6552_s27  ;;  %s29_s30 = sadd.s32 1, %s6552_s27 }
   0x5   : > { %p27_p0 = scmp.ge.s32.totalorder %s26_s29, 5  ;;  %p4965_p1 = scmp.ge.s32.totalorder %s6556_s28, 1 }
   0x6   : > { %p282_p2 = scmp.lt.s32.totalorder %s6556_s28, 11 }
   0x7   : > { %s7910_s29 = smov (%p27_p0, %s26_s29), 0  ;;  %s7912_s30 = smov (!%p27_p0, %s29_s30), %s6552_s27 }
   0x8   : > { %7902 = sst [smem:[#allocation5_spill]] %s7910_s29  ;;  %p283_p3 = pnand %p4965_p1, %p282_p2 }
   0x9   : > { %p31_p4 = scmp.ge.s32.totalorder %s7912_s30, 2  ;;  %s331_s8 = smul.u32 (!%p283_p3), 10, %s6540_s24 }
   0xa   : > { %286 = sbr.rel (%p283_p3) target bundleno = 1179 (0x49b), region = 48  ;;  %p332_p5 = scmp.lt.s32.totalorder (!%p283_p3), %s6544_s25, 1 }
   0xb   : > { %s7914_s30 = smov (%p31_p4, %s7912_s30), 0  ;;  %s340_s9 = smul.u32 (!%p283_p3), 160, %s6540_s24 }
   0xc   : > { %7903 = sst [smem:[#allocation6_spill]] %s7914_s30  ;;  %p334_p6 = scmp.lt.s32.totalorder (!%p283_p3), %s331_s8, 49 }
   0xd   : > { %p343_p7 = scmp.lt.s32.totalorder (!%p283_p3), %s340_s9, 799  ;;  %p4971_p8 = scmp.ne.s32.totalorder (!%p283_p3), %s6540_s24, 0 }
  0x11   : > { %s333_s10 = scalar_select %p332_p5, %s6544_s25, 1 }
  0x12   : > { %s7916_s8 = smov (!%p334_p6, %s331_s8), 49  ;;  %s7918_s9 = smov (!%p343_p7, %s340_s9), 799 }
  0x13   : > { %s5608_s11 = smul.u32 50, %s333_s10  ;;  %s4968_s12 = sshll.u32 %s333_s10, 2  ;;  %v6558_v0 = vmov (!%p4971_p8), 0.0  }
  0x14   : > { %s5609_s14 = smul.u32 3200, %s333_s10  ;;  %s4966_s18 = sshll.u32 %s7918_s9, 2  ;;  %364 = vst [vmem:[#allocation2] sm:$0xff] (!%p4971_p8), %v6558_v0 }
  0x15   : > { %s337_s13 = sadd.s32 %s5608_s11, %s7916_s8  ;;  %s6647_s22 = scalar_lea.vmem %s7892_s2, %s4968_s12 }
  0x16   : > { %s6642_s17 = scalar_lea.vmem %s7890_s0, %s337_s13  ;;  %s347_s19 = sadd.s32 %s5609_s14, %s4966_s18 }
  0x17   : > { %s4967_s23 = sshll.u32 %s347_s19, 2  ;;  %s5551_s30 = sshll.u32 %s333_s10, 3 }
  0x18   : > { %s6652_s26 = scalar_lea.vmem %s7891_s1, %s4967_s23  ;;  %s6657_s15 = scalar_lea.vmem %s7897_s7, %s5551_s30 }
  0x19   : > { %363 = sbr.rel (%p4971_p8) target bundleno = 32 (0x20), region = 52 }
  0x20 PF: > { %v5653_v1 = vld [vmem:[%s6652_s26 + $0x4] ss:$16 sps:$4 sm:$0xff]   ;;  %v5655_v2 = vld [vmem:[%s6652_s26 + $0xc] ss:$16 sps:$4 sm:$0xff]   ;;  %v5657_v3 = vld [vmem:[%s6652_s26] ss:$16 sps:$4 sm:$0xff]   ;;  %v694_v39 = vlaneseq }
  0x21   : > { %2371 = vmatprep.subr.bf16.mxu0 %v5653_v1  ;;  %v5658_v4 = vld [vmem:[%s6652_s26 + $0x8] ss:$16 sps:$4 sm:$0xff]   ;;  %2576 = vmatprep.subr.bf16.mxu1 %v5655_v2  ;;  %v5659_v5 = vld [vmem:[%s6652_s26 + $0x24] ss:$16 sps:$4 sm:$0xff]   ;;  %v5661_v6 = vld [vmem:[%s6652_s26 + $0x2c] ss:$16 sps:$4 sm:$0xff]  }
  0x22   : > { %2372 = vmatpush1.bf16.msra.mxu0 %v5657_v3  ;;  %2577 = vmatpush1.bf16.msra.mxu1 %v5658_v4  ;;  %v5663_v7 = vld [vmem:[%s6652_s26 + $0x20] ss:$16 sps:$4 sm:$0xff]   ;;  %v5664_v8 = vld [vmem:[%s6652_s26 + $0x28] ss:$16 sps:$4 sm:$0xff]   ;;  %v5665_v9 = vld [vmem:[%s6652_s26 + $0x44] ss:$16 sps:$4 sm:$0xff]  }
  0x23   : > { %2373 = vmatprep.subr.bf16.mxu0 %v5659_v5  ;;  %2578 = vmatprep.subr.bf16.mxu1 %v5661_v6  ;;  %v5667_v10 = vld [vmem:[%s6652_s26 + $0x4c] ss:$16 sps:$4 sm:$0xff]   ;;  %v5669_v11 = vld [vmem:[%s6652_s26 + $0x40] ss:$16 sps:$4 sm:$0xff]   ;;  %v5670_v12 = vld [vmem:[%s6652_s26 + $0x48] ss:$16 sps:$4 sm:$0xff]  }
  0x24   : > { %v5671_v13 = vld [vmem:[%s6652_s26 + $0x64] ss:$16 sps:$4 sm:$0xff]   ;;  %v5673_v14 = vld [vmem:[%s6652_s26 + $0x6c] ss:$16 sps:$4 sm:$0xff]   ;;  %v5675_v15 = vld [vmem:[%s6652_s26 + $0x60] ss:$16 sps:$4 sm:$0xff]  }
  0x25   : > { %v5676_v16 = vld [vmem:[%s6652_s26 + $0x68] ss:$16 sps:$4 sm:$0xff]   ;;  %v5677_v17 = vld [vmem:[%s6652_s26 + $0x84] ss:$16 sps:$4 sm:$0xff]   ;;  %v5679_v18 = vld [vmem:[%s6652_s26 + $0x8c] ss:$16 sps:$4 sm:$0xff]  }
  0x26   : > { %2374 = vmatpush1.bf16.msra.mxu0 %v5663_v7  ;;  %2579 = vmatpush1.bf16.msra.mxu1 %v5664_v8  ;;  %v5681_v19 = vld [vmem:[%s6652_s26 + $0x80] ss:$16 sps:$4 sm:$0xff]   ;;  %v5682_v20 = vld [vmem:[%s6652_s26 + $0x88] ss:$16 sps:$4 sm:$0xff]   ;;  %v5683_v21 = vld [vmem:[%s6652_s26 + $0xa4] ss:$16 sps:$4 sm:$0xff]  }
  0x27   : > { %2375 = vmatprep.subr.bf16.mxu0 %v5665_v9  ;;  %2580 = vmatprep.subr.bf16.mxu1 %v5667_v10  ;;  %v5685_v22 = vld [vmem:[%s6652_s26 + $0xac] ss:$16 sps:$4 sm:$0xff]   ;;  %v5687_v23 = vld [vmem:[%s6652_s26 + $0xa0] ss:$16 sps:$4 sm:$0xff]   ;;  %v5688_v24 = vld [vmem:[%s6652_s26 + $0xa8] ss:$16 sps:$4 sm:$0xff]  }
  0x28   : > { %v5689_v25 = vld [vmem:[%s6652_s26 + $0xc4] ss:$16 sps:$4 sm:$0xff]   ;;  %v5691_v26 = vld [vmem:[%s6652_s26 + $0xcc] ss:$16 sps:$4 sm:$0xff]   ;;  %v5693_v27 = vld [vmem:[%s6652_s26 + $0xc0] ss:$16 sps:$4 sm:$0xff]  }
  0x29   : > { %v5694_v28 = vld [vmem:[%s6652_s26 + $0xc8] ss:$16 sps:$4 sm:$0xff]   ;;  %v5695_v29 = vld [vmem:[%s6652_s26 + $0xe4] ss:$16 sps:$4 sm:$0xff]   ;;  %v5697_v30 = vld [vmem:[%s6652_s26 + $0xec] ss:$16 sps:$4 sm:$0xff]  }
  0x2a   : > { %2376 = vmatpush1.bf16.msra.mxu0 %v5669_v11  ;;  %2581 = vmatpush1.bf16.msra.mxu1 %v5670_v12  ;;  %v5699_v31 = vld [vmem:[%s6652_s26 + $0xe0] ss:$16 sps:$4 sm:$0xff]   ;;  %v5700_v32 = vld [vmem:[%s6652_s26 + $0xe8] ss:$16 sps:$4 sm:$0xff]   ;;  %v5701_v33 = vld [vmem:[%s6652_s26 + $0x104] ss:$16 sps:$4 sm:$0xff]  }
  0x2b   : > { %2377 = vmatprep.subr.bf16.mxu0 %v5671_v13  ;;  %2582 = vmatprep.subr.bf16.mxu1 %v5673_v14  ;;  %v5703_v34 = vld [vmem:[%s6652_s26 + $0x10c] ss:$16 sps:$4 sm:$0xff]   ;;  %v5705_v35 = vld [vmem:[%s6652_s26 + $0x100] ss:$16 sps:$4 sm:$0xff]   ;;  %v5706_v36 = vld [vmem:[%s6652_s26 + $0x108] ss:$16 sps:$4 sm:$0xff]  }
  0x2c   : > { %v6559_v37 = vmov 1966171168   ;;  %v5707_v40 = vld [vmem:[%s6652_s26 + $0x124] ss:$16 sps:$4 sm:$0xff]   ;;  %v5709_v41 = vld [vmem:[%s6652_s26 + $0x12c] ss:$16 sps:$4 sm:$0xff]  }
  0x2d   : > { %v692_v38 = vunpack.c.l.s4 %v6559_v37  ;;  %v5711_v42 = vld [vmem:[%s6652_s26 + $0x120] ss:$16 sps:$4 sm:$0xff]   ;;  %v6699_v44 = vshrl.u32 %v694_v39, 7  ;;  %v5712_v45 = vld [vmem:[%s6652_s26 + $0x128] ss:$16 sps:$4 sm:$0xff]   ;;  %p2805_p9 = scmp.eq.s32.totalorder %s6540_s24, 4 }
  0x2e   : > { %2378 = vmatpush1.bf16.msra.mxu0 %v5675_v15  ;;  %2583 = vmatpush1.bf16.msra.mxu1 %v5676_v16  ;;  %v5713_v46 = vld [vmem:[%s6652_s26 + $0x144] ss:$16 sps:$4 sm:$0xff]   ;;  %v5715_v47 = vld [vmem:[%s6652_s26 + $0x14c] ss:$16 sps:$4 sm:$0xff]   ;;  %v5717_v48 = vld [vmem:[%s6652_s26 + $0x140] ss:$16 sps:$4 sm:$0xff]  }
  0x2f   : > { %2379 = vmatprep.subr.bf16.mxu0 %v5677_v17  ;;  %2584 = vmatprep.subr.bf16.mxu1 %v5679_v18  ;;  %v693_v43 = vunpack.c.0.s8 %v692_v38  ;;  %v5718_v49 = vld [vmem:[%s6652_s26 + $0x148] ss:$16 sps:$4 sm:$0xff]   ;;  %v5719_v51 = vld [vmem:[%s6652_s26 + $0x164] ss:$16 sps:$4 sm:$0xff]   ;;  %v5721_v52 = vld [vmem:[%s6652_s26 + $0x16c] ss:$16 sps:$4 sm:$0xff]  }
  0x30   : > { %v6712_v53 = vld [vmem:[%s6642_s17] sm:$0xff]  ;;  %v5724_v56 = vld [vmem:[%s6652_s26 + $0x168] ss:$16 sps:$4 sm:$0xff]   ;;  %v5727_v58 = vld [vmem:[%s6652_s26 + $0x18c] ss:$16 sps:$4 sm:$0xff]   ;;  %p2806_p10 = scmp.eq.s32.totalorder %s6544_s25, 0 }
  0x31   : > { %v6707_v50 = vsub.s32 %v693_v43, %v6699_v44  ;;  %v5723_v54 = vld [vmem:[%s6652_s26 + $0x160] ss:$16 sps:$4 sm:$0xff]   ;;  %v5725_v57 = vld [vmem:[%s6652_s26 + $0x184] ss:$16 sps:$4 sm:$0xff]   ;;  %v5730_v62 = vld [vmem:[%s6652_s26 + $0x188] ss:$16 sps:$4 sm:$0xff]  }
  0x32   : > { %2380 = vmatpush1.bf16.msra.mxu0 %v5681_v19  ;;  %2585 = vmatpush1.bf16.msra.mxu1 %v5682_v20  ;;  %v5729_v60 = vld [vmem:[%s6652_s26 + $0x180] ss:$16 sps:$4 sm:$0xff]   ;;  %v5731_v63 = vld [vmem:[%s6652_s26 + $0x1a4] ss:$16 sps:$4 sm:$0xff]   ;;  %v5733_v0 = vld [vmem:[%s6652_s26 + $0x1ac] ss:$16 sps:$4 sm:$0xff]   ;;  %p7032_p11 = pnand %p2806_p10, %p2805_p9 }
  0x33   : > { %2381 = vmatprep.subr.bf16.mxu0 %v5683_v21  ;;  %2586 = vmatprep.subr.bf16.mxu1 %v5685_v22  ;;  %v697_v55 = vrot.slane %v6712_v53, %v6707_v50  ;;  %v5735_v1 = vld [vmem:[%s6652_s26 + $0x1a0] ss:$16 sps:$4 sm:$0xff]   ;;  %v5736_v2 = vld [vmem:[%s6652_s26 + $0x1a8] ss:$16 sps:$4 sm:$0xff]   ;;  %v5737_v3 = vld [vmem:[%s6652_s26 + $0x1c4] ss:$16 sps:$4 sm:$0xff]  }
  0x34   : > { %v5739_v4 = vld [vmem:[%s6652_s26 + $0x1cc] ss:$16 sps:$4 sm:$0xff]   ;;  %v5741_v5 = vld [vmem:[%s6652_s26 + $0x1c0] ss:$16 sps:$4 sm:$0xff]   ;;  %v5742_v6 = vld [vmem:[%s6652_s26 + $0x1c8] ss:$16 sps:$4 sm:$0xff]  }
  0x35   : > { %v705_v59 = vcombine.high %v697_v55, %v697_v55  ;;  %v5743_v7 = vld [vmem:[%s6652_s26 + $0x1e4] ss:$16 sps:$4 sm:$0xff]   ;;  %v5745_v8 = vld [vmem:[%s6652_s26 + $0x1ec] ss:$16 sps:$4 sm:$0xff]   ;;  %v5747_v9 = vld [vmem:[%s6652_s26 + $0x1e0] ss:$16 sps:$4 sm:$0xff]   ;;  %v6739_v14 = vrot.slane %v697_v55, %v6707_v50 }
  0x36   : > { %2382 = vmatpush1.bf16.msra.mxu0 %v5687_v23  ;;  %2587 = vmatpush1.bf16.msra.mxu1 %v5688_v24  ;;  %v5748_v10 = vld [vmem:[%s6652_s26 + $0x1e8] ss:$16 sps:$4 sm:$0xff]   ;;  %v5751_v11 = vld [vmem:[%s6652_s26 + $0x204] ss:$16 sps:$4 sm:$0xff]   ;;  %v5754_v12 = vld [vmem:[%s6652_s26 + $0x20c] ss:$16 sps:$4 sm:$0xff]  }
  0x37   : > { %2383 = vmatprep.subr.bf16.mxu0 %v5689_v25  ;;  %2588 = vmatprep.subr.bf16.mxu1 %v5691_v26  ;;  %v727_v61 = vrot.slane %v705_v59, %v6707_v50  ;;  %v5749_v13 = vld [vmem:[%s6652_s26 + $0x200] ss:$16 sps:$4 sm:$0xff]   ;;  %v5752_v15 = vld [vmem:[%s6652_s26 + $0x208] ss:$16 sps:$4 sm:$0xff]   ;;  %v5757_v16 = vld [vmem:[%s6652_s26 + $0x224] ss:$16 sps:$4 sm:$0xff]  }
  0x38   : > { %v5760_v17 = vld [vmem:[%s6652_s26 + $0x22c] ss:$16 sps:$4 sm:$0xff]   ;;  %v5755_v19 = vld [vmem:[%s6652_s26 + $0x220] ss:$16 sps:$4 sm:$0xff]   ;;  %v5758_v20 = vld [vmem:[%s6652_s26 + $0x228] ss:$16 sps:$4 sm:$0xff]  }
  0x39   : > { %2403 = vmatprep.mubr.bf16.mxu0 %v727_v61  ;;  %2608 = vmatprep.mubr.bf16.mxu1 %v727_v61  ;;  %v737_v18 = vcombine.high %v727_v61, %v727_v61  ;;  %v5763_v21 = vld [vmem:[%s6652_s26 + $0x244] ss:$16 sps:$4 sm:$0xff]   ;;  %v5766_v22 = vld [vmem:[%s6652_s26 + $0x24c] ss:$16 sps:$4 sm:$0xff]   ;;  %v5761_v23 = vld [vmem:[%s6652_s26 + $0x240] ss:$16 sps:$4 sm:$0xff]  }
  0x3a   : > { %2384 = vmatpush1.bf16.msra.mxu0 %v5693_v27  ;;  %2589 = vmatpush1.bf16.msra.mxu1 %v5694_v28  ;;  %v5764_v24 = vld [vmem:[%s6652_s26 + $0x248] ss:$16 sps:$4 sm:$0xff]   ;;  %v5769_v25 = vld [vmem:[%s6652_s26 + $0x264] ss:$16 sps:$4 sm:$0xff]   ;;  %v5772_v26 = vld [vmem:[%s6652_s26 + $0x26c] ss:$16 sps:$4 sm:$0xff]  }
  0x3b   : > { %2385 = vmatprep.subr.bf16.mxu0 %v5695_v29  ;;  %2590 = vmatprep.subr.bf16.mxu1 %v5697_v30  ;;  %v5767_v27 = vld [vmem:[%s6652_s26 + $0x260] ss:$16 sps:$4 sm:$0xff]   ;;  %v5770_v28 = vld [vmem:[%s6652_s26 + $0x268] ss:$16 sps:$4 sm:$0xff]   ;;  %v5775_v29 = vld [vmem:[%s6652_s26 + $0x284] ss:$16 sps:$4 sm:$0xff]  }
  0x3c   : > { %v5778_v30 = vld [vmem:[%s6652_s26 + $0x28c] ss:$16 sps:$4 sm:$0xff]   ;;  %v5787_v37 = vld [vmem:[%s6652_s26 + $0x2c4] ss:$16 sps:$4 sm:$0xff]   ;;  %v5785_v39 = vld [vmem:[%s6652_s26 + $0x2c0] ss:$16 sps:$4 sm:$0xff]  }
  0x3d   : > { %v5790_v38 = vld [vmem:[%s6652_s26 + $0x2cc] ss:$16 sps:$4 sm:$0xff]   ;;  %v5791_v43 = vld [vmem:[%s6652_s26 + $0x2e0] ss:$16 sps:$4 sm:$0xff]   ;;  %v5806_v55 = vld [vmem:[%s6652_s26 + $0x328] ss:$16 sps:$4 sm:$0xff]  }
  0x3e   : > { %2386 = vmatpush1.bf16.msra.mxu0 %v5699_v31  ;;  %2591 = vmatpush1.bf16.msra.mxu1 %v5700_v32  ;;  %v5773_v31 = vld [vmem:[%s6652_s26 + $0x280] ss:$16 sps:$4 sm:$0xff]   ;;  %v5776_v32 = vld [vmem:[%s6652_s26 + $0x288] ss:$16 sps:$4 sm:$0xff]   ;;  %v5820_v61 = vld [vmem:[%s6652_s26 + $0x36c] ss:$16 sps:$4 sm:$0xff]  }
  0x3f   : > { %2387 = vmatprep.subr.bf16.mxu0 %v5701_v33  ;;  %2592 = vmatprep.subr.bf16.mxu1 %v5703_v34  ;;  %v5781_v33 = vld [vmem:[%s6652_s26 + $0x2a4] ss:$16 sps:$4 sm:$0xff]   ;;  %v5784_v34 = vld [vmem:[%s6652_s26 + $0x2ac] ss:$16 sps:$4 sm:$0xff]   ;;  %v5812_v59 = vld [vmem:[%s6652_s26 + $0x348] ss:$16 sps:$4 sm:$0xff]  }
  0x42   : > { %2388 = vmatpush1.bf16.msra.mxu0 %v5705_v35  ;;  %2593 = vmatpush1.bf16.msra.mxu1 %v5706_v36  ;;  %v5779_v35 = vld [vmem:[%s6652_s26 + $0x2a0] ss:$16 sps:$4 sm:$0xff]   ;;  %v5782_v36 = vld [vmem:[%s6652_s26 + $0x2a8] ss:$16 sps:$4 sm:$0xff]  }
  0x43   : > { %2389 = vmatprep.subr.bf16.mxu0 %v5707_v40  ;;  %2594 = vmatprep.subr.bf16.mxu1 %v5709_v41  ;;  %v5788_v40 = vld [vmem:[%s6652_s26 + $0x2c8] ss:$16 sps:$4 sm:$0xff]   ;;  %v5793_v41 = vld [vmem:[%s6652_s26 + $0x2e4] ss:$16 sps:$4 sm:$0xff]  }
  0x46   : > { %2390 = vmatpush1.bf16.msra.mxu0 %v5711_v42  ;;  %2595 = vmatpush1.bf16.msra.mxu1 %v5712_v45  ;;  %v5796_v42 = vld [vmem:[%s6652_s26 + $0x2ec] ss:$16 sps:$4 sm:$0xff]   ;;  %v5794_v45 = vld [vmem:[%s6652_s26 + $0x2e8] ss:$16 sps:$4 sm:$0xff]  }
  0x47   : > { %2391 = vmatprep.subr.bf16.mxu0 %v5713_v46  ;;  %2596 = vmatprep.subr.bf16.mxu1 %v5715_v47  ;;  %v5799_v46 = vld [vmem:[%s6652_s26 + $0x304] ss:$16 sps:$4 sm:$0xff]   ;;  %v5802_v47 = vld [vmem:[%s6652_s26 + $0x30c] ss:$16 sps:$4 sm:$0xff]  }
  0x4a   : > { %2392 = vmatpush1.bf16.msra.mxu0 %v5717_v48  ;;  %2597 = vmatpush1.bf16.msra.mxu1 %v5718_v49  ;;  %v5797_v48 = vld [vmem:[%s6652_s26 + $0x300] ss:$16 sps:$4 sm:$0xff]   ;;  %v5800_v49 = vld [vmem:[%s6652_s26 + $0x308] ss:$16 sps:$4 sm:$0xff]  }
  0x4b   : > { %2393 = vmatprep.subr.bf16.mxu0 %v5719_v51  ;;  %2598 = vmatprep.subr.bf16.mxu1 %v5721_v52  ;;  %v5805_v51 = vld [vmem:[%s6652_s26 + $0x324] ss:$16 sps:$4 sm:$0xff]   ;;  %v5808_v52 = vld [vmem:[%s6652_s26 + $0x32c] ss:$16 sps:$4 sm:$0xff]  }
  0x4e   : > { %2394 = vmatpush1.bf16.msra.mxu0 %v5723_v54  ;;  %2599 = vmatpush1.bf16.msra.mxu1 %v5724_v56  ;;  %v5803_v54 = vld [vmem:[%s6652_s26 + $0x320] ss:$16 sps:$4 sm:$0xff]   ;;  %v5811_v56 = vld [vmem:[%s6652_s26 + $0x344] ss:$16 sps:$4 sm:$0xff]  }
  0x4f   : > { %2395 = vmatprep.subr.bf16.mxu0 %v5725_v57  ;;  %2600 = vmatprep.subr.bf16.mxu1 %v5727_v58  ;;  %v5814_v57 = vld [vmem:[%s6652_s26 + $0x34c] ss:$16 sps:$4 sm:$0xff]   ;;  %v5809_v58 = vld [vmem:[%s6652_s26 + $0x340] ss:$16 sps:$4 sm:$0xff]  }
  0x52   : > { %2396 = vmatpush1.bf16.msra.mxu0 %v5729_v60  ;;  %2601 = vmatpush1.bf16.msra.mxu1 %v5730_v62  ;;  %v5817_v60 = vld [vmem:[%s6652_s26 + $0x364] ss:$16 sps:$4 sm:$0xff]   ;;  %v5815_v62 = vld [vmem:[%s6652_s26 + $0x360] ss:$16 sps:$4 sm:$0xff]  }
  0x53   : > { %2397 = vmatprep.subr.bf16.mxu0 %v5731_v63  ;;  %2602 = vmatprep.subr.bf16.mxu1 %v5733_v0  ;;  %v5818_v63 = vld [vmem:[%s6652_s26 + $0x368] ss:$16 sps:$4 sm:$0xff]   ;;  %v5823_v0 = vld [vmem:[%s6652_s26 + $0x384] ss:$16 sps:$4 sm:$0xff]  }
  0x56   : > { %2398 = vmatpush1.bf16.msra.mxu0 %v5735_v1  ;;  %2603 = vmatpush1.bf16.msra.mxu1 %v5736_v2  ;;  %v5826_v1 = vld [vmem:[%s6652_s26 + $0x38c] ss:$16 sps:$4 sm:$0xff]   ;;  %v5821_v2 = vld [vmem:[%s6652_s26 + $0x380] ss:$16 sps:$4 sm:$0xff]  }
  0x57   : > { %2399 = vmatprep.subr.bf16.mxu0 %v5737_v3  ;;  %2604 = vmatprep.subr.bf16.mxu1 %v5739_v4  ;;  %v5824_v3 = vld [vmem:[%s6652_s26 + $0x388] ss:$16 sps:$4 sm:$0xff]   ;;  %v5829_v4 = vld [vmem:[%s6652_s26 + $0x3a4] ss:$16 sps:$4 sm:$0xff]  }
  0x5a   : > { %2400 = vmatpush1.bf16.msra.mxu0 %v5741_v5  ;;  %2605 = vmatpush1.bf16.msra.mxu1 %v5742_v6  ;;  %v5832_v5 = vld [vmem:[%s6652_s26 + $0x3ac] ss:$16 sps:$4 sm:$0xff]   ;;  %v5827_v6 = vld [vmem:[%s6652_s26 + $0x3a0] ss:$16 sps:$4 sm:$0xff]  }
  0x5b   : > { %2401 = vmatprep.subr.bf16.mxu0 %v5743_v7  ;;  %2606 = vmatprep.subr.bf16.mxu1 %v5745_v8  ;;  %v5830_v7 = vld [vmem:[%s6652_s26 + $0x3a8] ss:$16 sps:$4 sm:$0xff]   ;;  %v5835_v8 = vld [vmem:[%s6652_s26 + $0x3c4] ss:$16 sps:$4 sm:$0xff]  }
  0x5e   : > { %2402 = vmatpush1.bf16.msra.mxu0 %v5747_v9  ;;  %2607 = vmatpush1.bf16.msra.mxu1 %v5748_v10  ;;  %v5838_v9 = vld [vmem:[%s6652_s26 + $0x3cc] ss:$16 sps:$4 sm:$0xff]   ;;  %v690_v10 = vcombine.high %v6712_v53, %v6712_v53  ;;  %v5842_v53 = vld [vmem:[%s6652_s26 + $0x3e8] ss:$16 sps:$4 sm:$0xff]  }
  0x5f   : > { %2412 = vmatprep.subr.bf16.mxu0 %v5751_v11  ;;  %2617 = vmatprep.subr.bf16.mxu1 %v5754_v12  ;;  %v5833_v11 = vld [vmem:[%s6652_s26 + $0x3c0] ss:$16 sps:$4 sm:$0xff]   ;;  %v5836_v12 = vld [vmem:[%s6652_s26 + $0x3c8] ss:$16 sps:$4 sm:$0xff]  }
  0x61   : > { %2404 = vmatmul.mubr.bf16.vlgmr.msra.gmra.mrb[0].mxu0 %v6739_v14  ;;  %2609 = vmatmul.mubr.bf16.vlgmr.msra.gmra.mrb[0].mxu1 %v6739_v14 }
  0x62   : > { %2413 = vmatpush1.bf16.msra.mxu0 %v5749_v13  ;;  %2618 = vmatpush1.bf16.msra.mxu1 %v5752_v15  ;;  %v5841_v13 = vld [vmem:[%s6652_s26 + $0x3e4] ss:$16 sps:$4 sm:$0xff]   ;;  %v5844_v15 = vld [vmem:[%s6652_s26 + $0x3ec] ss:$16 sps:$4 sm:$0xff]  }
  0x63   : > { %2414 = vmatprep.subr.bf16.mxu0 %v5757_v16  ;;  %2619 = vmatprep.subr.bf16.mxu1 %v5760_v17  ;;  %v6805_v16 = vrot.slane %v690_v10, %v6707_v50  ;;  %v5839_v17 = vld [vmem:[%s6652_s26 + $0x3e0] ss:$16 sps:$4 sm:$0xff]   ;;  %v5920_v10 = vld [vmem:[%s6652_s26 + $0x588] ss:$16 sps:$4 sm:$0xff]  }
  0x64   : > { %2444 = vmatprep.mubr.bf16.mxu0 %v737_v18  ;;  %2649 = vmatprep.mubr.bf16.mxu1 %v737_v18  ;;  %v5847_v18 = vld [vmem:[%s6652_s26 + $0x404] ss:$16 sps:$4 sm:$0xff]  }
  0x66   : > { %2415 = vmatpush1.bf16.msra.mxu0 %v5755_v19  ;;  %2620 = vmatpush1.bf16.msra.mxu1 %v5758_v20  ;;  %v5850_v19 = vld [vmem:[%s6652_s26 + $0x40c] ss:$16 sps:$4 sm:$0xff]   ;;  %v706_v20 = vcombine.high %v6805_v16, %v6805_v16 }
  0x67   : > { %2416 = vmatprep.subr.bf16.mxu0 %v5763_v21  ;;  %2621 = vmatprep.subr.bf16.mxu1 %v5766_v22  ;;  %v5845_v21 = vld [vmem:[%s6652_s26 + $0x400] ss:$16 sps:$4 sm:$0xff]   ;;  %v735_v22 = vcombine.high %v6739_v14, %v6739_v14  ;;  %v5854_v14 = vld [vmem:[%s6652_s26 + $0x428] ss:$16 sps:$4 sm:$0xff]  }
  0x6a   : > { %2417 = vmatpush1.bf16.msra.mxu0 %v5761_v23  ;;  %2622 = vmatpush1.bf16.msra.mxu1 %v5764_v24  ;;  %v5848_v23 = vld [vmem:[%s6652_s26 + $0x408] ss:$16 sps:$4 sm:$0xff]   ;;  %v5853_v24 = vld [vmem:[%s6652_s26 + $0x424] ss:$16 sps:$4 sm:$0xff]  }
  0x6b   : > { %2418 = vmatprep.subr.bf16.mxu0 %v5769_v25  ;;  %2623 = vmatprep.subr.bf16.mxu1 %v5772_v26  ;;  %v5856_v25 = vld [vmem:[%s6652_s26 + $0x42c] ss:$16 sps:$4 sm:$0xff]   ;;  %v6820_v26 = vrot.slane %v706_v20, %v6707_v50  ;;  %v5937_v20 = vld [vmem:[%s6652_s26 + $0x5e4] ss:$16 sps:$4 sm:$0xff]  }
  0x6e   : > { %2419 = vmatpush1.bf16.msra.mxu0 %v5767_v27  ;;  %2624 = vmatpush1.bf16.msra.mxu1 %v5770_v28  ;;  %v5851_v27 = vld [vmem:[%s6652_s26 + $0x420] ss:$16 sps:$4 sm:$0xff]   ;;  %v5859_v28 = vld [vmem:[%s6652_s26 + $0x444] ss:$16 sps:$4 sm:$0xff]  }
  0x6f   : > { %2420 = vmatprep.subr.bf16.mxu0 %v5775_v29  ;;  %2625 = vmatprep.subr.bf16.mxu1 %v5778_v30  ;;  %v5862_v29 = vld [vmem:[%s6652_s26 + $0x44c] ss:$16 sps:$4 sm:$0xff]   ;;  %v5857_v30 = vld [vmem:[%s6652_s26 + $0x440] ss:$16 sps:$4 sm:$0xff]  }
  0x72   : > { %2421 = vmatpush1.bf16.msra.mxu0 %v5773_v31  ;;  %2626 = vmatpush1.bf16.msra.mxu1 %v5776_v32  ;;  %v5860_v31 = vld [vmem:[%s6652_s26 + $0x448] ss:$16 sps:$4 sm:$0xff]   ;;  %v5865_v32 = vld [vmem:[%s6652_s26 + $0x464] ss:$16 sps:$4 sm:$0xff]  }
  0x73   : > { %2422 = vmatprep.subr.bf16.mxu0 %v5781_v33  ;;  %2627 = vmatprep.subr.bf16.mxu1 %v5784_v34  ;;  %v5868_v33 = vld [vmem:[%s6652_s26 + $0x46c] ss:$16 sps:$4 sm:$0xff]   ;;  %v5863_v34 = vld [vmem:[%s6652_s26 + $0x460] ss:$16 sps:$4 sm:$0xff]  }
  0x76   : > { %2423 = vmatpush1.bf16.msra.mxu0 %v5779_v35  ;;  %2628 = vmatpush1.bf16.msra.mxu1 %v5782_v36  ;;  %v5866_v35 = vld [vmem:[%s6652_s26 + $0x468] ss:$16 sps:$4 sm:$0xff]   ;;  %v5871_v36 = vld [vmem:[%s6652_s26 + $0x484] ss:$16 sps:$4 sm:$0xff]  }
  0x77   : > { %2424 = vmatprep.subr.bf16.mxu0 %v5787_v37  ;;  %2629 = vmatprep.subr.bf16.mxu1 %v5790_v38  ;;  %v5874_v37 = vld [vmem:[%s6652_s26 + $0x48c] ss:$16 sps:$4 sm:$0xff]   ;;  %v5869_v38 = vld [vmem:[%s6652_s26 + $0x480] ss:$16 sps:$4 sm:$0xff]  }
  0x7a   : > { %2425 = vmatpush1.bf16.msra.mxu0 %v5785_v39  ;;  %2630 = vmatpush1.bf16.msra.mxu1 %v5788_v40  ;;  %v5872_v39 = vld [vmem:[%s6652_s26 + $0x488] ss:$16 sps:$4 sm:$0xff]   ;;  %v5877_v40 = vld [vmem:[%s6652_s26 + $0x4a4] ss:$16 sps:$4 sm:$0xff]  }
  0x7b   : > { %2426 = vmatprep.subr.bf16.mxu0 %v5793_v41  ;;  %2631 = vmatprep.subr.bf16.mxu1 %v5796_v42  ;;  %v5880_v41 = vld [vmem:[%s6652_s26 + $0x4ac] ss:$16 sps:$4 sm:$0xff]   ;;  %v5875_v42 = vld [vmem:[%s6652_s26 + $0x4a0] ss:$16 sps:$4 sm:$0xff]  }
  0x7e   : > { %2427 = vmatpush1.bf16.msra.mxu0 %v5791_v43  ;;  %2632 = vmatpush1.bf16.msra.mxu1 %v5794_v45  ;;  %v5878_v43 = vld [vmem:[%s6652_s26 + $0x4a8] ss:$16 sps:$4 sm:$0xff]   ;;  %v5883_v45 = vld [vmem:[%s6652_s26 + $0x4c4] ss:$16 sps:$4 sm:$0xff]  }
  0x7f   : > { %2428 = vmatprep.subr.bf16.mxu0 %v5799_v46  ;;  %2633 = vmatprep.subr.bf16.mxu1 %v5802_v47  ;;  %v5886_v46 = vld [vmem:[%s6652_s26 + $0x4cc] ss:$16 sps:$4 sm:$0xff]   ;;  %v5881_v47 = vld [vmem:[%s6652_s26 + $0x4c0] ss:$16 sps:$4 sm:$0xff]  }
  0x82   : > { %2429 = vmatpush1.bf16.msra.mxu0 %v5797_v48  ;;  %2634 = vmatpush1.bf16.msra.mxu1 %v5800_v49  ;;  %v5884_v48 = vld [vmem:[%s6652_s26 + $0x4c8] ss:$16 sps:$4 sm:$0xff]   ;;  %v5889_v49 = vld [vmem:[%s6652_s26 + $0x4e4] ss:$16 sps:$4 sm:$0xff]  }
  0x83   : > { %2430 = vmatprep.subr.bf16.mxu0 %v5805_v51  ;;  %2635 = vmatprep.subr.bf16.mxu1 %v5808_v52  ;;  %v5892_v51 = vld [vmem:[%s6652_s26 + $0x4ec] ss:$16 sps:$4 sm:$0xff]   ;;  %v5887_v52 = vld [vmem:[%s6652_s26 + $0x4e0] ss:$16 sps:$4 sm:$0xff]  }
  0x86   : > { %2431 = vmatpush1.bf16.msra.mxu0 %v5803_v54  ;;  %2636 = vmatpush1.bf16.msra.mxu1 %v5806_v55  ;;  %v5890_v54 = vld [vmem:[%s6652_s26 + $0x4e8] ss:$16 sps:$4 sm:$0xff]   ;;  %v5895_v55 = vld [vmem:[%s6652_s26 + $0x504] ss:$16 sps:$4 sm:$0xff]  }
  0x87   : > { %2432 = vmatprep.subr.bf16.mxu0 %v5811_v56  ;;  %2637 = vmatprep.subr.bf16.mxu1 %v5814_v57  ;;  %v5898_v56 = vld [vmem:[%s6652_s26 + $0x50c] ss:$16 sps:$4 sm:$0xff]   ;;  %v5893_v57 = vld [vmem:[%s6652_s26 + $0x500] ss:$16 sps:$4 sm:$0xff]  }
  0x8a   : > { %2433 = vmatpush1.bf16.msra.mxu0 %v5809_v58  ;;  %2638 = vmatpush1.bf16.msra.mxu1 %v5812_v59  ;;  %v5896_v58 = vld [vmem:[%s6652_s26 + $0x508] ss:$16 sps:$4 sm:$0xff]   ;;  %v5901_v59 = vld [vmem:[%s6652_s26 + $0x524] ss:$16 sps:$4 sm:$0xff]  }
  0x8b   : > { %2434 = vmatprep.subr.bf16.mxu0 %v5817_v60  ;;  %2639 = vmatprep.subr.bf16.mxu1 %v5820_v61  ;;  %v5904_v60 = vld [vmem:[%s6652_s26 + $0x52c] ss:$16 sps:$4 sm:$0xff]   ;;  %v5899_v61 = vld [vmem:[%s6652_s26 + $0x520] ss:$16 sps:$4 sm:$0xff]  }
  0x8e   : > { %2435 = vmatpush1.bf16.msra.mxu0 %v5815_v62  ;;  %2640 = vmatpush1.bf16.msra.mxu1 %v5818_v63  ;;  %v5902_v62 = vld [vmem:[%s6652_s26 + $0x528] ss:$16 sps:$4 sm:$0xff]   ;;  %v5907_v63 = vld [vmem:[%s6652_s26 + $0x544] ss:$16 sps:$4 sm:$0xff]  }
  0x8f   : > { %2436 = vmatprep.subr.bf16.mxu0 %v5823_v0  ;;  %2641 = vmatprep.subr.bf16.mxu1 %v5826_v1  ;;  %v5910_v0 = vld [vmem:[%s6652_s26 + $0x54c] ss:$16 sps:$4 sm:$0xff]   ;;  %v5905_v1 = vld [vmem:[%s6652_s26 + $0x540] ss:$16 sps:$4 sm:$0xff]  }
  0x92   : > { %2437 = vmatpush1.bf16.msra.mxu0 %v5821_v2  ;;  %2642 = vmatpush1.bf16.msra.mxu1 %v5824_v3  ;;  %v5908_v2 = vld [vmem:[%s6652_s26 + $0x548] ss:$16 sps:$4 sm:$0xff]   ;;  %v5913_v3 = vld [vmem:[%s6652_s26 + $0x564] ss:$16 sps:$4 sm:$0xff]  }
  0x93   : > { %2438 = vmatprep.subr.bf16.mxu0 %v5829_v4  ;;  %2643 = vmatprep.subr.bf16.mxu1 %v5832_v5  ;;  %v5916_v4 = vld [vmem:[%s6652_s26 + $0x56c] ss:$16 sps:$4 sm:$0xff]   ;;  %v5911_v5 = vld [vmem:[%s6652_s26 + $0x560] ss:$16 sps:$4 sm:$0xff]  }
  0x96   : > { %2439 = vmatpush1.bf16.msra.mxu0 %v5827_v6  ;;  %2644 = vmatpush1.bf16.msra.mxu1 %v5830_v7  ;;  %v5914_v6 = vld [vmem:[%s6652_s26 + $0x568] ss:$16 sps:$4 sm:$0xff]   ;;  %v5919_v7 = vld [vmem:[%s6652_s26 + $0x584] ss:$16 sps:$4 sm:$0xff]  }
  0x97   : > { %2440 = vmatprep.subr.bf16.mxu0 %v5835_v8  ;;  %2645 = vmatprep.subr.bf16.mxu1 %v5838_v9  ;;  %v5922_v8 = vld [vmem:[%s6652_s26 + $0x58c] ss:$16 sps:$4 sm:$0xff]   ;;  %v5917_v9 = vld [vmem:[%s6652_s26 + $0x580] ss:$16 sps:$4 sm:$0xff]  }
  0x9a   : > { %2441 = vmatpush1.bf16.msra.mxu0 %v5833_v11  ;;  %2646 = vmatpush1.bf16.msra.mxu1 %v5836_v12  ;;  %v5925_v11 = vld [vmem:[%s6652_s26 + $0x5a4] ss:$16 sps:$4 sm:$0xff]   ;;  %v5928_v12 = vld [vmem:[%s6652_s26 + $0x5ac] ss:$16 sps:$4 sm:$0xff]  }
  0x9b   : > { %2442 = vmatprep.subr.bf16.mxu0 %v5841_v13  ;;  %2647 = vmatprep.subr.bf16.mxu1 %v5844_v15  ;;  %v5923_v13 = vld [vmem:[%s6652_s26 + $0x5a0] ss:$16 sps:$4 sm:$0xff]   ;;  %v5926_v15 = vld [vmem:[%s6652_s26 + $0x5a8] ss:$16 sps:$4 sm:$0xff]  }
  0x9e   : > { %2443 = vmatpush1.bf16.msra.mxu0 %v5839_v17  ;;  %2648 = vmatpush1.bf16.msra.mxu1 %v5842_v53  ;;  %v5931_v17 = vld [vmem:[%s6652_s26 + $0x5c4] ss:$16 sps:$4 sm:$0xff]   ;;  %v5934_v53 = vld [vmem:[%s6652_s26 + $0x5cc] ss:$16 sps:$4 sm:$0xff]  }
  0x9f   : > { %2453 = vmatprep.subr.bf16.mxu0 %v5847_v18  ;;  %2658 = vmatprep.subr.bf16.mxu1 %v5850_v19  ;;  %v5929_v18 = vld [vmem:[%s6652_s26 + $0x5c0] ss:$16 sps:$4 sm:$0xff]   ;;  %v5932_v19 = vld [vmem:[%s6652_s26 + $0x5c8] ss:$16 sps:$4 sm:$0xff]  }
  0xa1   : > { %2445 = vmatmul.mubr.bf16.vlgmr.msra.gmra.mrb[0].mxu0 %v735_v22  ;;  %2650 = vmatmul.mubr.bf16.vlgmr.msra.gmra.mrb[0].mxu1 %v735_v22  ;;  %v5935_v22 = vld [vmem:[%s6652_s26 + $0x5e0] ss:$16 sps:$4 sm:$0xff]  }
  0xa2   : > { %2454 = vmatpush1.bf16.msra.mxu0 %v5845_v21  ;;  %2659 = vmatpush1.bf16.msra.mxu1 %v5848_v23  ;;  %v5940_v21 = vld [vmem:[%s6652_s26 + $0x5ec] ss:$16 sps:$4 sm:$0xff]   ;;  %v5938_v23 = vld [vmem:[%s6652_s26 + $0x5e8] ss:$16 sps:$4 sm:$0xff]  }
  0xa3   : > { %2455 = vmatprep.subr.bf16.mxu0 %v5853_v24  ;;  %2660 = vmatprep.subr.bf16.mxu1 %v5856_v25  ;;  %v5944_v24 = vld [vmem:[%s6652_s26 + $0x604] ss:$16 sps:$4 sm:$0xff]   ;;  %v5947_v25 = vld [vmem:[%s6652_s26 + $0x60c] ss:$16 sps:$4 sm:$0xff]  }
  0xa4   : > { %2485 = vmatprep.mubr.bf16.mxu0 %v6820_v26  ;;  %2690 = vmatprep.mubr.bf16.mxu1 %v6820_v26 }
  0xa6   : > { %2456 = vmatpush1.bf16.msra.mxu0 %v5851_v27  ;;  %2661 = vmatpush1.bf16.msra.mxu1 %v5854_v14  ;;  %v5942_v27 = vld [vmem:[%s6652_s26 + $0x600] ss:$16 sps:$4 sm:$0xff]   ;;  %v6887_v14 = vrot.slane %v6805_v16, %v6707_v50 }
  0xa7   : > { %2457 = vmatprep.subr.bf16.mxu0 %v5859_v28  ;;  %2662 = vmatprep.subr.bf16.mxu1 %v5862_v29  ;;  %v5945_v28 = vld [vmem:[%s6652_s26 + $0x608] ss:$16 sps:$4 sm:$0xff]   ;;  %v5950_v29 = vld [vmem:[%s6652_s26 + $0x624] ss:$16 sps:$4 sm:$0xff]   ;;  %v5948_v16 = vld [vmem:[%s6652_s26 + $0x620] ss:$16 sps:$4 sm:$0xff]  }
  0xaa   : > { %2458 = vmatpush1.bf16.msra.mxu0 %v5857_v30  ;;  %2663 = vmatpush1.bf16.msra.mxu1 %v5860_v31  ;;  %v5953_v30 = vld [vmem:[%s6652_s26 + $0x62c] ss:$16 sps:$4 sm:$0xff]   ;;  %v738_v31 = vcombine.high %v6820_v26, %v6820_v26  ;;  %v5954_v26 = vld [vmem:[%s6652_s26 + $0x640] ss:$16 sps:$4 sm:$0xff]  }
  0xab   : > { %2459 = vmatprep.subr.bf16.mxu0 %v5865_v32  ;;  %2664 = vmatprep.subr.bf16.mxu1 %v5868_v33  ;;  %v5951_v32 = vld [vmem:[%s6652_s26 + $0x628] ss:$16 sps:$4 sm:$0xff]   ;;  %v5956_v33 = vld [vmem:[%s6652_s26 + $0x644] ss:$16 sps:$4 sm:$0xff]  }
  0xae   : > { %2460 = vmatpush1.bf16.msra.mxu0 %v5863_v34  ;;  %2665 = vmatpush1.bf16.msra.mxu1 %v5866_v35  ;;  %v5959_v34 = vld [vmem:[%s6652_s26 + $0x64c] ss:$16 sps:$4 sm:$0xff]   ;;  %v5957_v35 = vld [vmem:[%s6652_s26 + $0x648] ss:$16 sps:$4 sm:$0xff]  }
  0xaf   : > { %2461 = vmatprep.subr.bf16.mxu0 %v5871_v36  ;;  %2666 = vmatprep.subr.bf16.mxu1 %v5874_v37  ;;  %v5962_v36 = vld [vmem:[%s6652_s26 + $0x664] ss:$16 sps:$4 sm:$0xff]   ;;  %v5965_v37 = vld [vmem:[%s6652_s26 + $0x66c] ss:$16 sps:$4 sm:$0xff]  }
  0xb2   : > { %2462 = vmatpush1.bf16.msra.mxu0 %v5869_v38  ;;  %2667 = vmatpush1.bf16.msra.mxu1 %v5872_v39  ;;  %v5960_v38 = vld [vmem:[%s6652_s26 + $0x660] ss:$16 sps:$4 sm:$0xff]   ;;  %v5963_v39 = vld [vmem:[%s6652_s26 + $0x668] ss:$16 sps:$4 sm:$0xff]  }
  0xb3   : > { %2463 = vmatprep.subr.bf16.mxu0 %v5877_v40  ;;  %2668 = vmatprep.subr.bf16.mxu1 %v5880_v41  ;;  %v5968_v40 = vld [vmem:[%s6652_s26 + $0x684] ss:$16 sps:$4 sm:$0xff]   ;;  %v5971_v41 = vld [vmem:[%s6652_s26 + $0x68c] ss:$16 sps:$4 sm:$0xff]  }
  0xb6   : > { %2464 = vmatpush1.bf16.msra.mxu0 %v5875_v42  ;;  %2669 = vmatpush1.bf16.msra.mxu1 %v5878_v43  ;;  %v5966_v42 = vld [vmem:[%s6652_s26 + $0x680] ss:$16 sps:$4 sm:$0xff]   ;;  %v5969_v43 = vld [vmem:[%s6652_s26 + $0x688] ss:$16 sps:$4 sm:$0xff]  }
  0xb7   : > { %2465 = vmatprep.subr.bf16.mxu0 %v5883_v45  ;;  %2670 = vmatprep.subr.bf16.mxu1 %v5886_v46  ;;  %v5974_v45 = vld [vmem:[%s6652_s26 + $0x6a4] ss:$16 sps:$4 sm:$0xff]   ;;  %v5977_v46 = vld [vmem:[%s6652_s26 + $0x6ac] ss:$16 sps:$4 sm:$0xff]  }
  0xba   : > { %2466 = vmatpush1.bf16.msra.mxu0 %v5881_v47  ;;  %2671 = vmatpush1.bf16.msra.mxu1 %v5884_v48  ;;  %v5972_v47 = vld [vmem:[%s6652_s26 + $0x6a0] ss:$16 sps:$4 sm:$0xff]   ;;  %v5975_v48 = vld [vmem:[%s6652_s26 + $0x6a8] ss:$16 sps:$4 sm:$0xff]  }
  0xbb   : > { %2467 = vmatprep.subr.bf16.mxu0 %v5889_v49  ;;  %2672 = vmatprep.subr.bf16.mxu1 %v5892_v51  ;;  %v5980_v49 = vld [vmem:[%s6652_s26 + $0x6c4] ss:$16 sps:$4 sm:$0xff]   ;;  %v5983_v51 = vld [vmem:[%s6652_s26 + $0x6cc] ss:$16 sps:$4 sm:$0xff]  }
  0xbe   : > { %2468 = vmatpush1.bf16.msra.mxu0 %v5887_v52  ;;  %2673 = vmatpush1.bf16.msra.mxu1 %v5890_v54  ;;  %v5978_v52 = vld [vmem:[%s6652_s26 + $0x6c0] ss:$16 sps:$4 sm:$0xff]   ;;  %v5981_v54 = vld [vmem:[%s6652_s26 + $0x6c8] ss:$16 sps:$4 sm:$0xff]  }
  0xbf   : > { %2469 = vmatprep.subr.bf16.mxu0 %v5895_v55  ;;  %2674 = vmatprep.subr.bf16.mxu1 %v5898_v56  ;;  %v5986_v55 = vld [vmem:[%s6652_s26 + $0x6e4] ss:$16 sps:$4 sm:$0xff]   ;;  %v5989_v56 = vld [vmem:[%s6652_s26 + $0x6ec] ss:$16 sps:$4 sm:$0xff]  }
  0xc2   : > { %2470 = vmatpush1.bf16.msra.mxu0 %v5893_v57  ;;  %2675 = vmatpush1.bf16.msra.mxu1 %v5896_v58  ;;  %v5984_v57 = vld [vmem:[%s6652_s26 + $0x6e0] ss:$16 sps:$4 sm:$0xff]   ;;  %v5987_v58 = vld [vmem:[%s6652_s26 + $0x6e8] ss:$16 sps:$4 sm:$0xff]  }
  0xc3   : > { %2471 = vmatprep.subr.bf16.mxu0 %v5901_v59  ;;  %2676 = vmatprep.subr.bf16.mxu1 %v5904_v60  ;;  %v5992_v59 = vld [vmem:[%s6652_s26 + $0x704] ss:$16 sps:$4 sm:$0xff]   ;;  %v5995_v60 = vld [vmem:[%s6652_s26 + $0x70c] ss:$16 sps:$4 sm:$0xff]  }
  0xc6   : > { %2472 = vmatpush1.bf16.msra.mxu0 %v5899_v61  ;;  %2677 = vmatpush1.bf16.msra.mxu1 %v5902_v62  ;;  %v5990_v61 = vld [vmem:[%s6652_s26 + $0x700] ss:$16 sps:$4 sm:$0xff]   ;;  %v5993_v62 = vld [vmem:[%s6652_s26 + $0x708] ss:$16 sps:$4 sm:$0xff]  }
  0xc7   : > { %2473 = vmatprep.subr.bf16.mxu0 %v5907_v63  ;;  %2678 = vmatprep.subr.bf16.mxu1 %v5910_v0  ;;  %v5998_v63 = vld [vmem:[%s6652_s26 + $0x724] ss:$16 sps:$4 sm:$0xff]   ;;  %v6001_v0 = vld [vmem:[%s6652_s26 + $0x72c] ss:$16 sps:$4 sm:$0xff]  }
  0xca   : > { %2474 = vmatpush1.bf16.msra.mxu0 %v5905_v1  ;;  %2679 = vmatpush1.bf16.msra.mxu1 %v5908_v2  ;;  %v5996_v1 = vld [vmem:[%s6652_s26 + $0x720] ss:$16 sps:$4 sm:$0xff]   ;;  %v5999_v2 = vld [vmem:[%s6652_s26 + $0x728] ss:$16 sps:$4 sm:$0xff]  }
  0xcb   : > { %2475 = vmatprep.subr.bf16.mxu0 %v5913_v3  ;;  %2680 = vmatprep.subr.bf16.mxu1 %v5916_v4  ;;  %v6004_v3 = vld [vmem:[%s6652_s26 + $0x744] ss:$16 sps:$4 sm:$0xff]   ;;  %v6007_v4 = vld [vmem:[%s6652_s26 + $0x74c] ss:$16 sps:$4 sm:$0xff]  }
  0xce   : > { %2476 = vmatpush1.bf16.msra.mxu0 %v5911_v5  ;;  %2681 = vmatpush1.bf16.msra.mxu1 %v5914_v6  ;;  %v6002_v5 = vld [vmem:[%s6652_s26 + $0x740] ss:$16 sps:$4 sm:$0xff]   ;;  %v6005_v6 = vld [vmem:[%s6652_s26 + $0x748] ss:$16 sps:$4 sm:$0xff]  }
  0xcf   : > { %2477 = vmatprep.subr.bf16.mxu0 %v5919_v7  ;;  %2682 = vmatprep.subr.bf16.mxu1 %v5922_v8  ;;  %v6010_v7 = vld [vmem:[%s6652_s26 + $0x764] ss:$16 sps:$4 sm:$0xff]   ;;  %v6013_v8 = vld [vmem:[%s6652_s26 + $0x76c] ss:$16 sps:$4 sm:$0xff]  }
  0xd2   : > { %2478 = vmatpush1.bf16.msra.mxu0 %v5917_v9  ;;  %2683 = vmatpush1.bf16.msra.mxu1 %v5920_v10  ;;  %v6008_v9 = vld [vmem:[%s6652_s26 + $0x760] ss:$16 sps:$4 sm:$0xff]   ;;  %v6011_v10 = vld [vmem:[%s6652_s26 + $0x768] ss:$16 sps:$4 sm:$0xff]  }
  0xd3   : > { %2479 = vmatprep.subr.bf16.mxu0 %v5925_v11  ;;  %2684 = vmatprep.subr.bf16.mxu1 %v5928_v12  ;;  %v6016_v11 = vld [vmem:[%s6652_s26 + $0x784] ss:$16 sps:$4 sm:$0xff]   ;;  %v6019_v12 = vld [vmem:[%s6652_s26 + $0x78c] ss:$16 sps:$4 sm:$0xff]  }
  0xd6   : > { %2480 = vmatpush1.bf16.msra.mxu0 %v5923_v13  ;;  %2685 = vmatpush1.bf16.msra.mxu1 %v5926_v15  ;;  %v6014_v13 = vld [vmem:[%s6652_s26 + $0x780] ss:$16 sps:$4 sm:$0xff]   ;;  %v6017_v15 = vld [vmem:[%s6652_s26 + $0x788] ss:$16 sps:$4 sm:$0xff]  }
  0xd7   : > { %2481 = vmatprep.subr.bf16.mxu0 %v5931_v17  ;;  %2686 = vmatprep.subr.bf16.mxu1 %v5934_v53  ;;  %v6022_v17 = vld [vmem:[%s6652_s26 + $0x7a4] ss:$16 sps:$4 sm:$0xff]   ;;  %v6025_v53 = vld [vmem:[%s6652_s26 + $0x7ac] ss:$16 sps:$4 sm:$0xff]  }
  0xda   : > { %2482 = vmatpush1.bf16.msra.mxu0 %v5929_v18  ;;  %2687 = vmatpush1.bf16.msra.mxu1 %v5932_v19  ;;  %v6020_v18 = vld [vmem:[%s6652_s26 + $0x7a0] ss:$16 sps:$4 sm:$0xff]   ;;  %v6023_v19 = vld [vmem:[%s6652_s26 + $0x7a8] ss:$16 sps:$4 sm:$0xff]  }
  0xdb   : > { %2483 = vmatprep.subr.bf16.mxu0 %v5937_v20  ;;  %2688 = vmatprep.subr.bf16.mxu1 %v5940_v21  ;;  %v6028_v20 = vld [vmem:[%s6652_s26 + $0x7c4] ss:$16 sps:$4 sm:$0xff]   ;;  %v6031_v21 = vld [vmem:[%s6652_s26 + $0x7cc] ss:$16 sps:$4 sm:$0xff]  }
  0xde   : > { %2484 = vmatpush1.bf16.msra.mxu0 %v5935_v22  ;;  %2689 = vmatpush1.bf16.msra.mxu1 %v5938_v23  ;;  %v6026_v22 = vld [vmem:[%s6652_s26 + $0x7c0] ss:$16 sps:$4 sm:$0xff]   ;;  %v6029_v23 = vld [vmem:[%s6652_s26 + $0x7c8] ss:$16 sps:$4 sm:$0xff]  }
  0xdf   : > { %2494 = vmatprep.subr.bf16.mxu0 %v5944_v24  ;;  %2699 = vmatprep.subr.bf16.mxu1 %v5947_v25  ;;  %v6034_v24 = vld [vmem:[%s6652_s26 + $0x7e4] ss:$16 sps:$4 sm:$0xff]   ;;  %v6037_v25 = vld [vmem:[%s6652_s26 + $0x7ec] ss:$16 sps:$4 sm:$0xff]  }
  0xe1   : > { %2486 = vmatmul.mubr.bf16.vlgmr.msra.gmra.mrb[0].mxu0 %v6887_v14  ;;  %2691 = vmatmul.mubr.bf16.vlgmr.msra.gmra.mrb[0].mxu1 %v6887_v14 }
  0xe2   : > { %2495 = vmatpush1.bf16.msra.mxu0 %v5942_v27  ;;  %2700 = vmatpush1.bf16.msra.mxu1 %v5945_v28  ;;  %v6953_v27 = vld.sshfl [vmem:[%s6642_s17 + $0x8] sm:$0x11 pattern:$0x75316420]  ;;  %v6032_v28 = vld [vmem:[%s6652_s26 + $0x7e0] ss:$16 sps:$4 sm:$0xff]  }
  0xe3   : > { %2496 = vmatprep.subr.bf16.mxu0 %v5950_v29  ;;  %2701 = vmatprep.subr.bf16.mxu1 %v5953_v30  ;;  %v6035_v29 = vld [vmem:[%s6652_s26 + $0x7e8] ss:$16 sps:$4 sm:$0xff]   ;;  %v6040_v30 = vld [vmem:[%s6652_s26 + $0x804] ss:$16 sps:$4 sm:$0xff]  }
  0xe4   : > { %2526 = vmatprep.mubr.bf16.mxu0 %v738_v31  ;;  %2731 = vmatprep.mubr.bf16.mxu1 %v738_v31  ;;  %v6043_v31 = vld [vmem:[%s6652_s26 + $0x80c] ss:$16 sps:$4 sm:$0xff]  }
  0xe6   : > { %2497 = vmatpush1.bf16.msra.mxu0 %v5948_v16  ;;  %2702 = vmatpush1.bf16.msra.mxu1 %v5951_v32  ;;  %v746_v16 = vcombine.high %v6953_v27, %v6953_v27  ;;  %v736_v32 = vcombine.high %v6887_v14, %v6887_v14  ;;  %v6044_v14 = vld [vmem:[%s6652_s26 + $0x820] ss:$16 sps:$4 sm:$0xff]  }
  0xe7   : > { %2498 = vmatprep.subr.bf16.mxu0 %v5956_v33  ;;  %2703 = vmatprep.subr.bf16.mxu1 %v5959_v34  ;;  %v6038_v33 = vld [vmem:[%s6652_s26 + $0x800] ss:$16 sps:$4 sm:$0xff]   ;;  %v6041_v34 = vld [vmem:[%s6652_s26 + $0x808] ss:$16 sps:$4 sm:$0xff]  }
  0xea   : > { %2499 = vmatpush1.bf16.msra.mxu0 %v5954_v26  ;;  %2704 = vmatpush1.bf16.msra.mxu1 %v5957_v35  ;;  %v6046_v26 = vld [vmem:[%s6652_s26 + $0x824] ss:$16 sps:$4 sm:$0xff]   ;;  %v6049_v35 = vld [vmem:[%s6652_s26 + $0x82c] ss:$16 sps:$4 sm:$0xff]  }
  0xeb   : > { %2500 = vmatprep.subr.bf16.mxu0 %v5962_v36  ;;  %2705 = vmatprep.subr.bf16.mxu1 %v5965_v37  ;;  %v760_v36 = vrot.slane %v746_v16, %v6707_v50  ;;  %v6047_v37 = vld [vmem:[%s6652_s26 + $0x828] ss:$16 sps:$4 sm:$0xff]   ;;  %v6130_v16 = vld [vmem:[%s6652_s26 + $0x9e4] ss:$16 sps:$4 sm:$0xff]  }
  0xee   : > { %2501 = vmatpush1.bf16.msra.mxu0 %v5960_v38  ;;  %2706 = vmatpush1.bf16.msra.mxu1 %v5963_v39  ;;  %v6052_v38 = vld [vmem:[%s6652_s26 + $0x844] ss:$16 sps:$4 sm:$0xff]   ;;  %v6055_v39 = vld [vmem:[%s6652_s26 + $0x84c] ss:$16 sps:$4 sm:$0xff]  }
  0xef   : > { %2502 = vmatprep.subr.bf16.mxu0 %v5968_v40  ;;  %2707 = vmatprep.subr.bf16.mxu1 %v5971_v41  ;;  %v6050_v40 = vld [vmem:[%s6652_s26 + $0x840] ss:$16 sps:$4 sm:$0xff]   ;;  %v6053_v41 = vld [vmem:[%s6652_s26 + $0x848] ss:$16 sps:$4 sm:$0xff]  }
  0xf2   : > { %2503 = vmatpush1.bf16.msra.mxu0 %v5966_v42  ;;  %2708 = vmatpush1.bf16.msra.mxu1 %v5969_v43  ;;  %v6058_v42 = vld [vmem:[%s6652_s26 + $0x864] ss:$16 sps:$4 sm:$0xff]   ;;  %v6061_v43 = vld [vmem:[%s6652_s26 + $0x86c] ss:$16 sps:$4 sm:$0xff]  }
  0xf3   : > { %2504 = vmatprep.subr.bf16.mxu0 %v5974_v45  ;;  %2709 = vmatprep.subr.bf16.mxu1 %v5977_v46  ;;  %v6056_v45 = vld [vmem:[%s6652_s26 + $0x860] ss:$16 sps:$4 sm:$0xff]   ;;  %v6059_v46 = vld [vmem:[%s6652_s26 + $0x868] ss:$16 sps:$4 sm:$0xff]  }
  0xf6   : > { %2505 = vmatpush1.bf16.msra.mxu0 %v5972_v47  ;;  %2710 = vmatpush1.bf16.msra.mxu1 %v5975_v48  ;;  %v6064_v47 = vld [vmem:[%s6652_s26 + $0x884] ss:$16 sps:$4 sm:$0xff]   ;;  %v6067_v48 = vld [vmem:[%s6652_s26 + $0x88c] ss:$16 sps:$4 sm:$0xff]  }
  0xf7   : > { %2506 = vmatprep.subr.bf16.mxu0 %v5980_v49  ;;  %2711 = vmatprep.subr.bf16.mxu1 %v5983_v51  ;;  %v6062_v49 = vld [vmem:[%s6652_s26 + $0x880] ss:$16 sps:$4 sm:$0xff]   ;;  %v6065_v51 = vld [vmem:[%s6652_s26 + $0x888] ss:$16 sps:$4 sm:$0xff]  }
  0xfa   : > { %2507 = vmatpush1.bf16.msra.mxu0 %v5978_v52  ;;  %2712 = vmatpush1.bf16.msra.mxu1 %v5981_v54  ;;  %v6070_v52 = vld [vmem:[%s6652_s26 + $0x8a4] ss:$16 sps:$4 sm:$0xff]   ;;  %v6073_v54 = vld [vmem:[%s6652_s26 + $0x8ac] ss:$16 sps:$4 sm:$0xff]  }
  0xfb   : > { %2508 = vmatprep.subr.bf16.mxu0 %v5986_v55  ;;  %2713 = vmatprep.subr.bf16.mxu1 %v5989_v56  ;;  %v6068_v55 = vld [vmem:[%s6652_s26 + $0x8a0] ss:$16 sps:$4 sm:$0xff]   ;;  %v6071_v56 = vld [vmem:[%s6652_s26 + $0x8a8] ss:$16 sps:$4 sm:$0xff]  }
  0xfe   : > { %2509 = vmatpush1.bf16.msra.mxu0 %v5984_v57  ;;  %2714 = vmatpush1.bf16.msra.mxu1 %v5987_v58  ;;  %v6076_v57 = vld [vmem:[%s6652_s26 + $0x8c4] ss:$16 sps:$4 sm:$0xff]   ;;  %v6079_v58 = vld [vmem:[%s6652_s26 + $0x8cc] ss:$16 sps:$4 sm:$0xff]  }
  0xff   : > { %2510 = vmatprep.subr.bf16.mxu0 %v5992_v59  ;;  %2715 = vmatprep.subr.bf16.mxu1 %v5995_v60  ;;  %v6074_v59 = vld [vmem:[%s6652_s26 + $0x8c0] ss:$16 sps:$4 sm:$0xff]   ;;  %v6077_v60 = vld [vmem:[%s6652_s26 + $0x8c8] ss:$16 sps:$4 sm:$0xff]  }
 0x102   : > { %2511 = vmatpush1.bf16.msra.mxu0 %v5990_v61  ;;  %2716 = vmatpush1.bf16.msra.mxu1 %v5993_v62  ;;  %v6082_v61 = vld [vmem:[%s6652_s26 + $0x8e4] ss:$16 sps:$4 sm:$0xff]   ;;  %v6085_v62 = vld [vmem:[%s6652_s26 + $0x8ec] ss:$16 sps:$4 sm:$0xff]  }
 0x103   : > { %2512 = vmatprep.subr.bf16.mxu0 %v5998_v63  ;;  %2717 = vmatprep.subr.bf16.mxu1 %v6001_v0  ;;  %v6080_v63 = vld [vmem:[%s6652_s26 + $0x8e0] ss:$16 sps:$4 sm:$0xff]   ;;  %v6083_v0 = vld [vmem:[%s6652_s26 + $0x8e8] ss:$16 sps:$4 sm:$0xff]  }
 0x106   : > { %2513 = vmatpush1.bf16.msra.mxu0 %v5996_v1  ;;  %2718 = vmatpush1.bf16.msra.mxu1 %v5999_v2  ;;  %v6088_v1 = vld [vmem:[%s6652_s26 + $0x904] ss:$16 sps:$4 sm:$0xff]   ;;  %v6091_v2 = vld [vmem:[%s6652_s26 + $0x90c] ss:$16 sps:$4 sm:$0xff]  }
 0x107   : > { %2514 = vmatprep.subr.bf16.mxu0 %v6004_v3  ;;  %2719 = vmatprep.subr.bf16.mxu1 %v6007_v4  ;;  %v6086_v3 = vld [vmem:[%s6652_s26 + $0x900] ss:$16 sps:$4 sm:$0xff]   ;;  %v6089_v4 = vld [vmem:[%s6652_s26 + $0x908] ss:$16 sps:$4 sm:$0xff]  }
 0x10a   : > { %2515 = vmatpush1.bf16.msra.mxu0 %v6002_v5  ;;  %2720 = vmatpush1.bf16.msra.mxu1 %v6005_v6  ;;  %v6094_v5 = vld [vmem:[%s6652_s26 + $0x924] ss:$16 sps:$4 sm:$0xff]   ;;  %v6097_v6 = vld [vmem:[%s6652_s26 + $0x92c] ss:$16 sps:$4 sm:$0xff]  }
 0x10b   : > { %2516 = vmatprep.subr.bf16.mxu0 %v6010_v7  ;;  %2721 = vmatprep.subr.bf16.mxu1 %v6013_v8  ;;  %v6092_v7 = vld [vmem:[%s6652_s26 + $0x920] ss:$16 sps:$4 sm:$0xff]   ;;  %v6095_v8 = vld [vmem:[%s6652_s26 + $0x928] ss:$16 sps:$4 sm:$0xff]  }
 0x10e   : > { %2517 = vmatpush1.bf16.msra.mxu0 %v6008_v9  ;;  %2722 = vmatpush1.bf16.msra.mxu1 %v6011_v10  ;;  %v6100_v9 = vld [vmem:[%s6652_s26 + $0x944] ss:$16 sps:$4 sm:$0xff]   ;;  %v6103_v10 = vld [vmem:[%s6652_s26 + $0x94c] ss:$16 sps:$4 sm:$0xff]  }
 0x10f   : > { %2518 = vmatprep.subr.bf16.mxu0 %v6016_v11  ;;  %2723 = vmatprep.subr.bf16.mxu1 %v6019_v12  ;;  %v6098_v11 = vld [vmem:[%s6652_s26 + $0x940] ss:$16 sps:$4 sm:$0xff]   ;;  %v6101_v12 = vld [vmem:[%s6652_s26 + $0x948] ss:$16 sps:$4 sm:$0xff]  }
 0x112   : > { %2519 = vmatpush1.bf16.msra.mxu0 %v6014_v13  ;;  %2724 = vmatpush1.bf16.msra.mxu1 %v6017_v15  ;;  %v6106_v13 = vld [vmem:[%s6652_s26 + $0x964] ss:$16 sps:$4 sm:$0xff]   ;;  %v6109_v15 = vld [vmem:[%s6652_s26 + $0x96c] ss:$16 sps:$4 sm:$0xff]  }
 0x113   : > { %2520 = vmatprep.subr.bf16.mxu0 %v6022_v17  ;;  %2725 = vmatprep.subr.bf16.mxu1 %v6025_v53  ;;  %v6104_v17 = vld [vmem:[%s6652_s26 + $0x960] ss:$16 sps:$4 sm:$0xff]   ;;  %v6107_v53 = vld [vmem:[%s6652_s26 + $0x968] ss:$16 sps:$4 sm:$0xff]  }
 0x116   : > { %2521 = vmatpush1.bf16.msra.mxu0 %v6020_v18  ;;  %2726 = vmatpush1.bf16.msra.mxu1 %v6023_v19  ;;  %v6112_v18 = vld [vmem:[%s6652_s26 + $0x984] ss:$16 sps:$4 sm:$0xff]   ;;  %v6115_v19 = vld [vmem:[%s6652_s26 + $0x98c] ss:$16 sps:$4 sm:$0xff]  }
 0x117   : > { %2522 = vmatprep.subr.bf16.mxu0 %v6028_v20  ;;  %2727 = vmatprep.subr.bf16.mxu1 %v6031_v21  ;;  %v6110_v20 = vld [vmem:[%s6652_s26 + $0x980] ss:$16 sps:$4 sm:$0xff]   ;;  %v6113_v21 = vld [vmem:[%s6652_s26 + $0x988] ss:$16 sps:$4 sm:$0xff]  }
 0x11a   : > { %2523 = vmatpush1.bf16.msra.mxu0 %v6026_v22  ;;  %2728 = vmatpush1.bf16.msra.mxu1 %v6029_v23  ;;  %v6118_v22 = vld [vmem:[%s6652_s26 + $0x9a4] ss:$16 sps:$4 sm:$0xff]   ;;  %v6121_v23 = vld [vmem:[%s6652_s26 + $0x9ac] ss:$16 sps:$4 sm:$0xff]  }
 0x11b   : > { %2524 = vmatprep.subr.bf16.mxu0 %v6034_v24  ;;  %2729 = vmatprep.subr.bf16.mxu1 %v6037_v25  ;;  %v6116_v24 = vld [vmem:[%s6652_s26 + $0x9a0] ss:$16 sps:$4 sm:$0xff]   ;;  %v6119_v25 = vld [vmem:[%s6652_s26 + $0x9a8] ss:$16 sps:$4 sm:$0xff]  }
 0x11e   : > { %2525 = vmatpush1.bf16.msra.mxu0 %v6032_v28  ;;  %2730 = vmatpush1.bf16.msra.mxu1 %v6035_v29  ;;  %v6124_v28 = vld [vmem:[%s6652_s26 + $0x9c4] ss:$16 sps:$4 sm:$0xff]   ;;  %v6127_v29 = vld [vmem:[%s6652_s26 + $0x9cc] ss:$16 sps:$4 sm:$0xff]  }
 0x11f   : > { %2535 = vmatprep.subr.bf16.mxu0 %v6040_v30  ;;  %2740 = vmatprep.subr.bf16.mxu1 %v6043_v31  ;;  %v6122_v30 = vld [vmem:[%s6652_s26 + $0x9c0] ss:$16 sps:$4 sm:$0xff]   ;;  %v6125_v31 = vld [vmem:[%s6652_s26 + $0x9c8] ss:$16 sps:$4 sm:$0xff]  }
 0x121   : > { %2527 = vmatmul.mubr.bf16.vlgmr.msra.gmra.mrb[0].mxu0 %v736_v32  ;;  %2732 = vmatmul.mubr.bf16.vlgmr.msra.gmra.mrb[0].mxu1 %v736_v32  ;;  %v6133_v32 = vld [vmem:[%s6652_s26 + $0x9ec] ss:$16 sps:$4 sm:$0xff]  }
 0x122   : > { %2536 = vmatpush1.bf16.msra.mxu0 %v6038_v33  ;;  %2741 = vmatpush1.bf16.msra.mxu1 %v6041_v34  ;;  %v6128_v33 = vld [vmem:[%s6652_s26 + $0x9e0] ss:$16 sps:$4 sm:$0xff]   ;;  %v6131_v34 = vld [vmem:[%s6652_s26 + $0x9e8] ss:$16 sps:$4 sm:$0xff]  }
 0x123   : > { %2537 = vmatprep.subr.bf16.mxu0 %v6046_v26  ;;  %2742 = vmatprep.subr.bf16.mxu1 %v6049_v35  ;;  %v753_v26 = vrot.slane %v6953_v27, %v6707_v50  ;;  %v6560_v35 = vmov 1983009808  }
 0x124   : > { %2567 = vmatprep.mubr.bf16.mxu0 %v760_v36  ;;  %2772 = vmatprep.mubr.bf16.mxu1 %v760_v36  ;;  %v2788_v36 = vunpack.c.l.s4 %v6560_v35  ;;  %v7176_v35 = vsub.s32 (!%p7032_p11), 0, %v6699_v44 }
 0x126   : > { %2538 = vmatpush1.bf16.msra.mxu0 %v6044_v14  ;;  %2743 = vmatpush1.bf16.msra.mxu1 %v6047_v37  ;;  %v2789_v14 = vunpack.c.0.s8 %v2788_v36  ;;  %v6200_v36 = vld [vmem:[%s7893_s3 + $0x164] ss:$16 sps:$4 sm:$0xff] (!%p7032_p11)  }
 0x127   : > { %2539 = vmatprep.subr.bf16.mxu0 %v6052_v38  ;;  %2744 = vmatprep.subr.bf16.mxu1 %v6055_v39 }
 0x128   : > { %v7037_v39 = vsub.s32 %v2789_v14, %v6699_v44  ;;  %v7182_v14 = vsub.s32 (!%p7032_p11), 1, %v6699_v44 }
 0x12a   : > { %2540 = vmatpush1.bf16.msra.mxu0 %v6050_v40  ;;  %2745 = vmatpush1.bf16.msra.mxu1 %v6053_v41 }
 0x12b   : > { %2541 = vmatprep.subr.bf16.mxu0 %v6058_v42  ;;  %2746 = vmatprep.subr.bf16.mxu1 %v6061_v43 }
 0x12e   : > { %2542 = vmatpush1.bf16.msra.mxu0 %v6056_v45  ;;  %2747 = vmatpush1.bf16.msra.mxu1 %v6059_v46 }
 0x12f   : > { %2543 = vmatprep.subr.bf16.mxu0 %v6064_v47  ;;  %2748 = vmatprep.subr.bf16.mxu1 %v6067_v48 }
 0x132   : > { %2544 = vmatpush1.bf16.msra.mxu0 %v6062_v49  ;;  %2749 = vmatpush1.bf16.msra.mxu1 %v6065_v51  ;;  %v365_v49 = vld [vmem:[#allocation2] sm:$0xff] }
 0x133   : > { %2545 = vmatprep.subr.bf16.mxu0 %v6070_v52  ;;  %2750 = vmatprep.subr.bf16.mxu1 %v6073_v54  ;;  %v6134_v54 = vld [vmem:[%s7893_s3 + $0x4] ss:$16 sps:$4 sm:$0xff] (!%p7032_p11)  }
 0x136   : > { %2546 = vmatpush1.bf16.msra.mxu0 %v6068_v55  ;;  %2751 = vmatpush1.bf16.msra.mxu1 %v6071_v56  ;;  %v6136_v55 = vld [vmem:[%s7893_s3 + $0xc] ss:$16 sps:$4 sm:$0xff] (!%p7032_p11)   ;;  %v6138_v56 = vld [vmem:[%s7893_s3] ss:$16 sps:$4 sm:$0xff] (!%p7032_p11)  }
 0x137   : > { %2547 = vmatprep.subr.bf16.mxu0 %v6076_v57  ;;  %2752 = vmatprep.subr.bf16.mxu1 %v6079_v58  ;;  %v6139_v57 = vld [vmem:[%s7893_s3 + $0x8] ss:$16 sps:$4 sm:$0xff] (!%p7032_p11)   ;;  %v6140_v58 = vld [vmem:[%s7893_s3 + $0x24] ss:$16 sps:$4 sm:$0xff] (!%p7032_p11)  }
 0x13a   : > { %2548 = vmatpush1.bf16.msra.mxu0 %v6074_v59  ;;  %2753 = vmatpush1.bf16.msra.mxu1 %v6077_v60  ;;  %v6142_v59 = vld [vmem:[%s7893_s3 + $0x2c] ss:$16 sps:$4 sm:$0xff] (!%p7032_p11)   ;;  %v6144_v60 = vld [vmem:[%s7893_s3 + $0x20] ss:$16 sps:$4 sm:$0xff] (!%p7032_p11)  }
 0x13b   : > { %2549 = vmatprep.subr.bf16.mxu0 %v6082_v61  ;;  %2754 = vmatprep.subr.bf16.mxu1 %v6085_v62  ;;  %v6145_v61 = vld [vmem:[%s7893_s3 + $0x28] ss:$16 sps:$4 sm:$0xff] (!%p7032_p11)   ;;  %v6146_v62 = vld [vmem:[%s7893_s3 + $0x44] ss:$16 sps:$4 sm:$0xff] (!%p7032_p11)  }
 0x13e   : > { %2550 = vmatpush1.bf16.msra.mxu0 %v6080_v63  ;;  %2755 = vmatpush1.bf16.msra.mxu1 %v6083_v0  ;;  %v6148_v63 = vld [vmem:[%s7893_s3 + $0x4c] ss:$16 sps:$4 sm:$0xff] (!%p7032_p11)   ;;  %v6150_v0 = vld [vmem:[%s7893_s3 + $0x40] ss:$16 sps:$4 sm:$0xff] (!%p7032_p11)  }
 0x13f   : > { %2551 = vmatprep.subr.bf16.mxu0 %v6088_v1  ;;  %2756 = vmatprep.subr.bf16.mxu1 %v6091_v2  ;;  %v6151_v1 = vld [vmem:[%s7893_s3 + $0x48] ss:$16 sps:$4 sm:$0xff] (!%p7032_p11)   ;;  %v6152_v2 = vld [vmem:[%s7893_s3 + $0x64] ss:$16 sps:$4 sm:$0xff] (!%p7032_p11)  }
 0x142   : > { %2552 = vmatpush1.bf16.msra.mxu0 %v6086_v3  ;;  %2757 = vmatpush1.bf16.msra.mxu1 %v6089_v4  ;;  %v6154_v3 = vld [vmem:[%s7893_s3 + $0x6c] ss:$16 sps:$4 sm:$0xff] (!%p7032_p11)   ;;  %v6156_v4 = vld [vmem:[%s7893_s3 + $0x60] ss:$16 sps:$4 sm:$0xff] (!%p7032_p11)  }
 0x143   : > { %2553 = vmatprep.subr.bf16.mxu0 %v6094_v5  ;;  %2758 = vmatprep.subr.bf16.mxu1 %v6097_v6  ;;  %v6157_v5 = vld [vmem:[%s7893_s3 + $0x68] ss:$16 sps:$4 sm:$0xff] (!%p7032_p11)   ;;  %v6158_v6 = vld [vmem:[%s7893_s3 + $0x84] ss:$16 sps:$4 sm:$0xff] (!%p7032_p11)  }
 0x146   : > { %2554 = vmatpush1.bf16.msra.mxu0 %v6092_v7  ;;  %2759 = vmatpush1.bf16.msra.mxu1 %v6095_v8  ;;  %v6160_v7 = vld [vmem:[%s7893_s3 + $0x8c] ss:$16 sps:$4 sm:$0xff] (!%p7032_p11)   ;;  %v6162_v8 = vld [vmem:[%s7893_s3 + $0x80] ss:$16 sps:$4 sm:$0xff] (!%p7032_p11)  }
 0x147   : > { %2555 = vmatprep.subr.bf16.mxu0 %v6100_v9  ;;  %2760 = vmatprep.subr.bf16.mxu1 %v6103_v10  ;;  %v6163_v9 = vld [vmem:[%s7893_s3 + $0x88] ss:$16 sps:$4 sm:$0xff] (!%p7032_p11)   ;;  %v6164_v10 = vld [vmem:[%s7893_s3 + $0xa4] ss:$16 sps:$4 sm:$0xff] (!%p7032_p11)  }
 0x14a   : > { %2556 = vmatpush1.bf16.msra.mxu0 %v6098_v11  ;;  %2761 = vmatpush1.bf16.msra.mxu1 %v6101_v12  ;;  %v6166_v11 = vld [vmem:[%s7893_s3 + $0xac] ss:$16 sps:$4 sm:$0xff] (!%p7032_p11)   ;;  %v6168_v12 = vld [vmem:[%s7893_s3 + $0xa0] ss:$16 sps:$4 sm:$0xff] (!%p7032_p11)  }
 0x14b   : > { %2557 = vmatprep.subr.bf16.mxu0 %v6106_v13  ;;  %2762 = vmatprep.subr.bf16.mxu1 %v6109_v15  ;;  %v6169_v13 = vld [vmem:[%s7893_s3 + $0xa8] ss:$16 sps:$4 sm:$0xff] (!%p7032_p11)   ;;  %v6170_v15 = vld [vmem:[%s7893_s3 + $0xc4] ss:$16 sps:$4 sm:$0xff] (!%p7032_p11)  }
 0x14e   : > { %2558 = vmatpush1.bf16.msra.mxu0 %v6104_v17  ;;  %2763 = vmatpush1.bf16.msra.mxu1 %v6107_v53  ;;  %v6172_v17 = vld [vmem:[%s7893_s3 + $0xcc] ss:$16 sps:$4 sm:$0xff] (!%p7032_p11)   ;;  %v6174_v53 = vld [vmem:[%s7893_s3 + $0xc0] ss:$16 sps:$4 sm:$0xff] (!%p7032_p11)  }
 0x14f   : > { %2559 = vmatprep.subr.bf16.mxu0 %v6112_v18  ;;  %2764 = vmatprep.subr.bf16.mxu1 %v6115_v19  ;;  %v6175_v18 = vld [vmem:[%s7893_s3 + $0xc8] ss:$16 sps:$4 sm:$0xff] (!%p7032_p11)   ;;  %v6176_v19 = vld [vmem:[%s7893_s3 + $0xe4] ss:$16 sps:$4 sm:$0xff] (!%p7032_p11)  }
 0x152   : > { %2560 = vmatpush1.bf16.msra.mxu0 %v6110_v20  ;;  %2765 = vmatpush1.bf16.msra.mxu1 %v6113_v21  ;;  %v6178_v20 = vld [vmem:[%s7893_s3 + $0xec] ss:$16 sps:$4 sm:$0xff] (!%p7032_p11)   ;;  %v6180_v21 = vld [vmem:[%s7893_s3 + $0xe0] ss:$16 sps:$4 sm:$0xff] (!%p7032_p11)  }
 0x153   : > { %2561 = vmatprep.subr.bf16.mxu0 %v6118_v22  ;;  %2766 = vmatprep.subr.bf16.mxu1 %v6121_v23  ;;  %v6181_v22 = vld [vmem:[%s7893_s3 + $0xe8] ss:$16 sps:$4 sm:$0xff] (!%p7032_p11)   ;;  %v6182_v23 = vld [vmem:[%s7893_s3 + $0x104] ss:$16 sps:$4 sm:$0xff] (!%p7032_p11)  }
 0x156   : > { %2562 = vmatpush1.bf16.msra.mxu0 %v6116_v24  ;;  %2767 = vmatpush1.bf16.msra.mxu1 %v6119_v25  ;;  %v6184_v24 = vld [vmem:[%s7893_s3 + $0x10c] ss:$16 sps:$4 sm:$0xff] (!%p7032_p11)   ;;  %v6186_v25 = vld [vmem:[%s7893_s3 + $0x100] ss:$16 sps:$4 sm:$0xff] (!%p7032_p11)  }
 0x157   : > { %2563 = vmatprep.subr.bf16.mxu0 %v6124_v28  ;;  %2768 = vmatprep.subr.bf16.mxu1 %v6127_v29  ;;  %v6187_v28 = vld [vmem:[%s7893_s3 + $0x108] ss:$16 sps:$4 sm:$0xff] (!%p7032_p11)   ;;  %v6188_v29 = vld [vmem:[%s7893_s3 + $0x124] ss:$16 sps:$4 sm:$0xff] (!%p7032_p11)  }
 0x15a   : > { %2564 = vmatpush1.bf16.msra.mxu0 %v6122_v30  ;;  %2769 = vmatpush1.bf16.msra.mxu1 %v6125_v31  ;;  %v6190_v30 = vld [vmem:[%s7893_s3 + $0x12c] ss:$16 sps:$4 sm:$0xff] (!%p7032_p11)   ;;  %v6192_v31 = vld [vmem:[%s7893_s3 + $0x120] ss:$16 sps:$4 sm:$0xff] (!%p7032_p11)  }
 0x15b   : > { %2565 = vmatprep.subr.bf16.mxu0 %v6130_v16  ;;  %2770 = vmatprep.subr.bf16.mxu1 %v6133_v32  ;;  %v6193_v16 = vld [vmem:[%s7893_s3 + $0x128] ss:$16 sps:$4 sm:$0xff] (!%p7032_p11)   ;;  %v6194_v32 = vld [vmem:[%s7893_s3 + $0x144] ss:$16 sps:$4 sm:$0xff] (!%p7032_p11)  }
 0x15e   : > { %2566 = vmatpush1.bf16.msra.mxu0 %v6128_v33  ;;  %2771 = vmatpush1.bf16.msra.mxu1 %v6131_v34  ;;  %v6196_v33 = vld [vmem:[%s7893_s3 + $0x14c] ss:$16 sps:$4 sm:$0xff] (!%p7032_p11)   ;;  %v6198_v34 = vld [vmem:[%s7893_s3 + $0x140] ss:$16 sps:$4 sm:$0xff] (!%p7032_p11)  }
 0x15f   : > { %3666 = vmatprep.subr.bf16.mxu0 (!%p7032_p11), %v6134_v54  ;;  %3748 = vmatprep.subr.bf16.mxu1 (!%p7032_p11), %v6136_v55  ;;  %v6211_v54 = vld [vmem:[%s7893_s3 + $0x188] ss:$16 sps:$4 sm:$0xff] (!%p7032_p11)  }
 0x161   : > { %2568 = vmatmul.mubr.bf16.vlgmr.msra.gmra.mrb[0].mxu0 %v753_v26  ;;  %2773 = vmatmul.mubr.bf16.vlgmr.msra.gmra.mrb[0].mxu1 %v753_v26  ;;  %v6199_v26 = vld [vmem:[%s7893_s3 + $0x148] ss:$16 sps:$4 sm:$0xff] (!%p7032_p11)  }
 0x162   : > { %3667 = vmatpush1.bf16.msra.mxu0 (!%p7032_p11), %v6138_v56  ;;  %3749 = vmatpush1.bf16.msra.mxu1 (!%p7032_p11), %v6139_v57  ;;  %v6212_v56 = vld [vmem:[%s7893_s3 + $0x1a4] ss:$16 sps:$4 sm:$0xff] (!%p7032_p11)   ;;  %v6214_v57 = vld [vmem:[%s7893_s3 + $0x1ac] ss:$16 sps:$4 sm:$0xff] (!%p7032_p11)  }
 0x163   : > { %3668 = vmatprep.subr.bf16.mxu0 (!%p7032_p11), %v6140_v58  ;;  %3750 = vmatprep.subr.bf16.mxu1 (!%p7032_p11), %v6142_v59 }
 0x166   : > { %3669 = vmatpush1.bf16.msra.mxu0 (!%p7032_p11), %v6144_v60  ;;  %3751 = vmatpush1.bf16.msra.mxu1 (!%p7032_p11), %v6145_v61  ;;  %v6216_v61 = vld [vmem:[%s7893_s3 + $0x1a0] ss:$16 sps:$4 sm:$0xff] (!%p7032_p11)  }
 0x167   : > { %3670 = vmatprep.subr.bf16.mxu0 (!%p7032_p11), %v6146_v62  ;;  %3752 = vmatprep.subr.bf16.mxu1 (!%p7032_p11), %v6148_v63  ;;  %v6217_v62 = vld [vmem:[%s7893_s3 + $0x1a8] ss:$16 sps:$4 sm:$0xff] (!%p7032_p11)   ;;  %v6218_v63 = vld [vmem:[%s7893_s3 + $0x1c4] ss:$16 sps:$4 sm:$0xff] (!%p7032_p11)  }
 0x16a   : > { %3671 = vmatpush1.bf16.msra.mxu0 (!%p7032_p11), %v6150_v0  ;;  %3753 = vmatpush1.bf16.msra.mxu1 (!%p7032_p11), %v6151_v1  ;;  %v6220_v0 = vld [vmem:[%s7893_s3 + $0x1cc] ss:$16 sps:$4 sm:$0xff] (!%p7032_p11)  }
 0x16b   : > { %3672 = vmatprep.subr.bf16.mxu0 (!%p7032_p11), %v6152_v2  ;;  %3754 = vmatprep.subr.bf16.mxu1 (!%p7032_p11), %v6154_v3  ;;  %v6222_v3 = vld [vmem:[%s7893_s3 + $0x1c0] ss:$16 sps:$4 sm:$0xff] (!%p7032_p11)  }
 0x16e   : > { %3673 = vmatpush1.bf16.msra.mxu0 (!%p7032_p11), %v6156_v4  ;;  %3755 = vmatpush1.bf16.msra.mxu1 (!%p7032_p11), %v6157_v5  ;;  %v6223_v4 = vld [vmem:[%s7893_s3 + $0x1c8] ss:$16 sps:$4 sm:$0xff] (!%p7032_p11)   ;;  %v6224_v5 = vld [vmem:[%s7893_s3 + $0x1e4] ss:$16 sps:$4 sm:$0xff] (!%p7032_p11)  }
 0x16f   : > { %3674 = vmatprep.subr.bf16.mxu0 (!%p7032_p11), %v6158_v6  ;;  %3756 = vmatprep.subr.bf16.mxu1 (!%p7032_p11), %v6160_v7  ;;  %v6226_v6 = vld [vmem:[%s7893_s3 + $0x1ec] ss:$16 sps:$4 sm:$0xff] (!%p7032_p11)  }
 0x172   : > { %3675 = vmatpush1.bf16.msra.mxu0 (!%p7032_p11), %v6162_v8  ;;  %3757 = vmatpush1.bf16.msra.mxu1 (!%p7032_p11), %v6163_v9 }
 0x173   : > { %3676 = vmatprep.subr.bf16.mxu0 (!%p7032_p11), %v6164_v10  ;;  %3758 = vmatprep.subr.bf16.mxu1 (!%p7032_p11), %v6166_v11  ;;  %v6228_v11 = vld [vmem:[%s7893_s3 + $0x1e0] ss:$16 sps:$4 sm:$0xff] (!%p7032_p11)  }
 0x176   : > { %3677 = vmatpush1.bf16.msra.mxu0 (!%p7032_p11), %v6168_v12  ;;  %3759 = vmatpush1.bf16.msra.mxu1 (!%p7032_p11), %v6169_v13  ;;  %v6229_v12 = vld [vmem:[%s7893_s3 + $0x1e8] ss:$16 sps:$4 sm:$0xff] (!%p7032_p11)  }
 0x177   : > { %3678 = vmatprep.subr.bf16.mxu0 (!%p7032_p11), %v6170_v15  ;;  %3760 = vmatprep.subr.bf16.mxu1 (!%p7032_p11), %v6172_v17  ;;  %v6232_v15 = vld [vmem:[%s7893_s3 + $0x204] ss:$16 sps:$4 sm:$0xff] (!%p7032_p11)   ;;  %v6235_v17 = vld [vmem:[%s7893_s3 + $0x20c] ss:$16 sps:$4 sm:$0xff] (!%p7032_p11)  }
 0x17a   : > { %3679 = vmatpush1.bf16.msra.mxu0 (!%p7032_p11), %v6174_v53  ;;  %3761 = vmatpush1.bf16.msra.mxu1 (!%p7032_p11), %v6175_v18 }
 0x17b   : > { %3680 = vmatprep.subr.bf16.mxu0 (!%p7032_p11), %v6176_v19  ;;  %3762 = vmatprep.subr.bf16.mxu1 (!%p7032_p11), %v6178_v20  ;;  %v6230_v19 = vld [vmem:[%s7893_s3 + $0x200] ss:$16 sps:$4 sm:$0xff] (!%p7032_p11)   ;;  %v6233_v20 = vld [vmem:[%s7893_s3 + $0x208] ss:$16 sps:$4 sm:$0xff] (!%p7032_p11)  }
 0x17e   : > { %3681 = vmatpush1.bf16.msra.mxu0 (!%p7032_p11), %v6180_v21  ;;  %3763 = vmatpush1.bf16.msra.mxu1 (!%p7032_p11), %v6181_v22  ;;  %v6238_v21 = vld [vmem:[%s7893_s3 + $0x224] ss:$16 sps:$4 sm:$0xff] (!%p7032_p11)   ;;  %v6241_v22 = vld [vmem:[%s7893_s3 + $0x22c] ss:$16 sps:$4 sm:$0xff] (!%p7032_p11)  }
 0x17f   : > { %3682 = vmatprep.subr.bf16.mxu0 (!%p7032_p11), %v6182_v23  ;;  %3764 = vmatprep.subr.bf16.mxu1 (!%p7032_p11), %v6184_v24  ;;  %v6236_v24 = vld [vmem:[%s7893_s3 + $0x220] ss:$16 sps:$4 sm:$0xff] (!%p7032_p11)  }
 0x182   : > { %3683 = vmatpush1.bf16.msra.mxu0 (!%p7032_p11), %v6186_v25  ;;  %3765 = vmatpush1.bf16.msra.mxu1 (!%p7032_p11), %v6187_v28  ;;  %v6239_v25 = vld [vmem:[%s7893_s3 + $0x228] ss:$16 sps:$4 sm:$0xff] (!%p7032_p11)   ;;  %v6244_v28 = vld [vmem:[%s7893_s3 + $0x244] ss:$16 sps:$4 sm:$0xff] (!%p7032_p11)  }
 0x183   : > { %3684 = vmatprep.subr.bf16.mxu0 (!%p7032_p11), %v6188_v29  ;;  %3766 = vmatprep.subr.bf16.mxu1 (!%p7032_p11), %v6190_v30  ;;  %v6247_v29 = vld [vmem:[%s7893_s3 + $0x24c] ss:$16 sps:$4 sm:$0xff] (!%p7032_p11)   ;;  %v6242_v30 = vld [vmem:[%s7893_s3 + $0x240] ss:$16 sps:$4 sm:$0xff] (!%p7032_p11)  }
 0x186   : > { %3685 = vmatpush1.bf16.msra.mxu0 (!%p7032_p11), %v6192_v31  ;;  %3767 = vmatpush1.bf16.msra.mxu1 (!%p7032_p11), %v6193_v16  ;;  %v6245_v31 = vld [vmem:[%s7893_s3 + $0x248] ss:$16 sps:$4 sm:$0xff] (!%p7032_p11)   ;;  %v6250_v16 = vld [vmem:[%s7893_s3 + $0x264] ss:$16 sps:$4 sm:$0xff] (!%p7032_p11)  }
 0x187   : > { %3686 = vmatprep.subr.bf16.mxu0 (!%p7032_p11), %v6194_v32  ;;  %3768 = vmatprep.subr.bf16.mxu1 (!%p7032_p11), %v6196_v33  ;;  %v6253_v32 = vld [vmem:[%s7893_s3 + $0x26c] ss:$16 sps:$4 sm:$0xff] (!%p7032_p11)   ;;  %v6248_v33 = vld [vmem:[%s7893_s3 + $0x260] ss:$16 sps:$4 sm:$0xff] (!%p7032_p11)  }
 0x18a   : > { %3687 = vmatpush1.bf16.msra.mxu0 (!%p7032_p11), %v6198_v34  ;;  %3769 = vmatpush1.bf16.msra.mxu1 (!%p7032_p11), %v6199_v26  ;;  %v6251_v34 = vld [vmem:[%s7893_s3 + $0x268] ss:$16 sps:$4 sm:$0xff] (!%p7032_p11)   ;;  %v6256_v26 = vld [vmem:[%s7893_s3 + $0x284] ss:$16 sps:$4 sm:$0xff] (!%p7032_p11)  }
 0x18b   : > { %3688 = vmatprep.subr.bf16.mxu0 (!%p7032_p11), %v6200_v36  ;;  %v6259_v36 = vld [vmem:[%s7893_s3 + $0x28c] ss:$16 sps:$4 sm:$0xff] (!%p7032_p11)  }
 0x234   : > { %v2569_v37 = vpop.f32.mrb[0].mxu0  ;;  %v2774_v38 = vpop.f32.mrb[0].mxu1 }
 0x235   : > { %v2571_v50 = vpop.f32.mrb[1].mxu0  ;;  %v2776_v27 = vpop.f32.mrb[1].mxu1 }
 0x236   : > { %v2785_v40 = vcombine.low %v2569_v37, %v2571_v50  ;;  %v2786_v41 = vcombine.low %v2774_v38, %v2776_v27  ;;  %v2573_v42 = vpop.f32.mrb[2].mxu0  ;;  %v2778_v43 = vpop.f32.mrb[2].mxu1  ;;  %v7185_v37 = vsub.s32 (!%p7032_p11), 2, %v6699_v44  ;;  %v6202_v38 = vld [vmem:[%s7893_s3 + $0x16c] ss:$16 sps:$4 sm:$0xff] (!%p7032_p11)   ;;  %v7191_v50 = vsub.s32 (!%p7032_p11), 3, %v6699_v44 }
 0x237   : > { %v2574_v45 = vpop.f32.mrb[3].mxu0  ;;  %v2779_v46 = vpop.f32.mrb[3].mxu1  ;;  %v2812_v27 = vld [vmem:[%s6647_s22] sm:$0xf] (!%p7032_p11)  ;;  %3770 = vmatprep.subr.bf16.mxu1 (!%p7032_p11), %v6202_v38 }
 0x238   : > { %v2793_v47 = vrot.slane %v2785_v40, %v7037_v39  ;;  %v2800_v48 = vrot.slane %v2786_v41, %v7037_v39  ;;  %2810 = sbr.rel (%p7032_p11) target bundleno = 1163 (0x48b), region = 56  ;;  %v6204_v40 = vld [vmem:[%s7893_s3 + $0x160] ss:$16 sps:$4 sm:$0xff] (!%p7032_p11)   ;;  %v6205_v41 = vld [vmem:[%s7893_s3 + $0x168] ss:$16 sps:$4 sm:$0xff] (!%p7032_p11)   ;;  %v2817_v42 = vrot.slane (!%p7032_p11), %v2812_v27, %v7176_v35  ;;  %v2821_v43 = vrot.slane (!%p7032_p11), %v2812_v27, %v7182_v14 }
 0x239   : > { %v2825_v45 = vrot.slane (!%p7032_p11), %v2812_v27, %v7185_v37  ;;  %v6206_v46 = vld [vmem:[%s7893_s3 + $0x184] ss:$16 sps:$4 sm:$0xff] (!%p7032_p11)   ;;  %3689 = vmatpush1.bf16.msra.mxu0 (!%p7032_p11), %v6204_v40  ;;  %3771 = vmatpush1.bf16.msra.mxu1 (!%p7032_p11), %v6205_v41  ;;  %v6254_v38 = vld [vmem:[%s7893_s3 + $0x280] ss:$16 sps:$4 sm:$0xff] (!%p7032_p11)   ;;  %v6265_v41 = vld [vmem:[%s7893_s3 + $0x2ac] ss:$16 sps:$4 sm:$0xff] (!%p7032_p11)  }
 0x23a   : > { %v2801_v51 = vcombine.low %v2793_v47, %v2800_v48  ;;  %v6208_v47 = vld [vmem:[%s7893_s3 + $0x18c] ss:$16 sps:$4 sm:$0xff] (!%p7032_p11)   ;;  %v2829_v48 = vrot.slane (!%p7032_p11), %v2812_v27, %v7191_v50  ;;  %3690 = vmatprep.subr.bf16.mxu0 (!%p7032_p11), %v6206_v46  ;;  %v6257_v27 = vld [vmem:[%s7893_s3 + $0x288] ss:$16 sps:$4 sm:$0xff] (!%p7032_p11)   ;;  %v6262_v40 = vld [vmem:[%s7893_s3 + $0x2a4] ss:$16 sps:$4 sm:$0xff] (!%p7032_p11)  }
 0x23b   : > { %3772 = vmatprep.subr.bf16.mxu1 (!%p7032_p11), %v6208_v47  ;;  %v6271_v46 = vld [vmem:[%s7893_s3 + $0x2cc] ss:$16 sps:$4 sm:$0xff] (!%p7032_p11)   ;;  %v6266_v47 = vld [vmem:[%s7893_s3 + $0x2c0] ss:$16 sps:$4 sm:$0xff] (!%p7032_p11)  }
 0x23c   : > { %v2803_v52 = vadd.f32 %v2801_v51, %v365_v49  ;;  %v2830_v49 = vcombine.low (!%p7032_p11), %v2817_v42, %v2821_v43  ;;  %v2831_v51 = vcombine.low (!%p7032_p11), %v2825_v45, %v2829_v48  ;;  %v6260_v42 = vld [vmem:[%s7893_s3 + $0x2a0] ss:$16 sps:$4 sm:$0xff] (!%p7032_p11)   ;;  %v6263_v43 = vld [vmem:[%s7893_s3 + $0x2a8] ss:$16 sps:$4 sm:$0xff] (!%p7032_p11)   ;;  %v6268_v45 = vld [vmem:[%s7893_s3 + $0x2c4] ss:$16 sps:$4 sm:$0xff] (!%p7032_p11)  }
 0x23d   : > { %3773 = vmatpush1.bf16.msra.mxu1 (!%p7032_p11), %v6211_v54  ;;  %v6269_v48 = vld [vmem:[%s7893_s3 + $0x2c8] ss:$16 sps:$4 sm:$0xff] (!%p7032_p11)  }
 0x23e   : > { %2804 = vst [vmem:[#allocation2] sm:$0xff] %v2803_v52  ;;  %v6210_v52 = vld [vmem:[%s7893_s3 + $0x180] ss:$16 sps:$4 sm:$0xff] (!%p7032_p11)   ;;  %v2838_v55 = vrot.slane (!%p7032_p11), %v2830_v49, %v7037_v39  ;;  %v2845_v58 = vrot.slane (!%p7032_p11), %v2831_v51, %v7037_v39  ;;  %3774 = vmatprep.subr.bf16.mxu1 (!%p7032_p11), %v6214_v57  ;;  %v6274_v49 = vld [vmem:[%s7893_s3 + $0x2e4] ss:$16 sps:$4 sm:$0xff] (!%p7032_p11)  }
 0x23f   : > { %3691 = vmatpush1.bf16.msra.mxu0 %v6210_v52  ;;  %v6277_v51 = vld [vmem:[%s7893_s3 + $0x2ec] ss:$16 sps:$4 sm:$0xff]   ;;  %v6272_v52 = vld [vmem:[%s7893_s3 + $0x2e0] ss:$16 sps:$4 sm:$0xff]   ;;  %v6275_v54 = vld [vmem:[%s7893_s3 + $0x2e8] ss:$16 sps:$4 sm:$0xff]  }
 0x240   : > { %v2846_v60 = vcombine.low %v2838_v55, %v2845_v58  ;;  %3692 = vmatprep.subr.bf16.mxu0 %v6212_v56  ;;  %v6280_v55 = vld [vmem:[%s7893_s3 + $0x304] ss:$16 sps:$4 sm:$0xff]   ;;  %v6283_v56 = vld [vmem:[%s7893_s3 + $0x30c] ss:$16 sps:$4 sm:$0xff]   ;;  %v6278_v57 = vld [vmem:[%s7893_s3 + $0x300] ss:$16 sps:$4 sm:$0xff]  }
 0x241   : > { %3775 = vmatpush1.bf16.msra.mxu1 %v6217_v62  ;;  %v6281_v58 = vld [vmem:[%s7893_s3 + $0x308] ss:$16 sps:$4 sm:$0xff]  }
 0x242   : > { %3776 = vmatprep.subr.bf16.mxu1 %v6220_v0  ;;  %v6287_v62 = vld [vmem:[%s7893_s3 + $0x328] ss:$16 sps:$4 sm:$0xff]   ;;  %v6295_v0 = vld [vmem:[%s7893_s3 + $0x34c] ss:$16 sps:$4 sm:$0xff]  }
 0x243   : > { %3693 = vmatpush1.bf16.msra.mxu0 %v6216_v61  ;;  %v6284_v61 = vld [vmem:[%s7893_s3 + $0x320] ss:$16 sps:$4 sm:$0xff]  }
 0x244   : > { %3694 = vmatprep.subr.bf16.mxu0 %v6218_v63  ;;  %v6292_v63 = vld [vmem:[%s7893_s3 + $0x344] ss:$16 sps:$4 sm:$0xff]  }
 0x245   : > { %v2811_v59 = vld [vmem:[#allocation2] sm:$0xff]  ;;  %3777 = vmatpush1.bf16.msra.mxu1 %v6223_v4  ;;  %v6301_v4 = vld [vmem:[%s7893_s3 + $0x36c] ss:$16 sps:$4 sm:$0xff]  }
 0x246   : > { %v2848_v1 = vadd.f32 %v2846_v60, %v2811_v59  ;;  %3778 = vmatprep.subr.bf16.mxu1 %v6226_v6  ;;  %v6286_v59 = vld [vmem:[%s7893_s3 + $0x324] ss:$16 sps:$4 sm:$0xff]   ;;  %v6289_v60 = vld [vmem:[%s7893_s3 + $0x32c] ss:$16 sps:$4 sm:$0xff]   ;;  %v6299_v6 = vld [vmem:[%s7893_s3 + $0x368] ss:$16 sps:$4 sm:$0xff]  }
 0x247   : > { %3695 = vmatpush1.bf16.msra.mxu0 %v6222_v3  ;;  %v6298_v3 = vld [vmem:[%s7893_s3 + $0x364] ss:$16 sps:$4 sm:$0xff]  }
 0x248   : > { %v2849_v2 = vmax.f32 %v2848_v1, 0.0  ;;  %3696 = vmatprep.subr.bf16.mxu0 %v6224_v5  ;;  %v6290_v1 = vld [vmem:[%s7893_s3 + $0x340] ss:$16 sps:$4 sm:$0xff]  }
 0x249   : > { %3779 = vmatpush1.bf16.msra.mxu1 %v6229_v12  ;;  %v6296_v5 = vld [vmem:[%s7893_s3 + $0x360] ss:$16 sps:$4 sm:$0xff]   ;;  %v6310_v12 = vld [vmem:[%s7893_s3 + $0x3a4] ss:$16 sps:$4 sm:$0xff]  }
 0x24a   : > { %v2858_v7 = vrot.slane %v2849_v2, %v7037_v39  ;;  %v2851_v8 = vcombine.high %v2849_v2, %v2849_v2  ;;  %3789 = vmatprep.subr.bf16.mxu1 %v6235_v17  ;;  %v6293_v2 = vld [vmem:[%s7893_s3 + $0x348] ss:$16 sps:$4 sm:$0xff]  }
 0x24b   : > { %3697 = vmatpush1.bf16.msra.mxu0 %v6228_v11  ;;  %v6305_v11 = vld [vmem:[%s7893_s3 + $0x388] ss:$16 sps:$4 sm:$0xff]  }
 0x24c   : > { %v2866_v9 = vcombine.high %v2858_v7, %v2858_v7  ;;  %v7250_v10 = vrot.slane %v2851_v8, %v7037_v39  ;;  %v2872_v18 = vpack.c.bf16 %v2858_v7, %v2858_v7  ;;  %3707 = vmatprep.subr.bf16.mxu0 %v6232_v15  ;;  %v6304_v7 = vld [vmem:[%s7893_s3 + $0x384] ss:$16 sps:$4 sm:$0xff]   ;;  %v6307_v8 = vld [vmem:[%s7893_s3 + $0x38c] ss:$16 sps:$4 sm:$0xff]   ;;  %v6308_v15 = vld [vmem:[%s7893_s3 + $0x3a0] ss:$16 sps:$4 sm:$0xff]  }
 0x24d   : > { %v6311_v17 = vld [vmem:[%s7893_s3 + $0x3a8] ss:$16 sps:$4 sm:$0xff]  }
 0x24e   : > { %v2873_v13 = vpack.c.bf16 %v2866_v9, %v2866_v9  ;;  %v2867_v53 = vcombine.high %v7250_v10, %v7250_v10  ;;  %v6302_v9 = vld [vmem:[%s7893_s3 + $0x380] ss:$16 sps:$4 sm:$0xff]  }
 0x250   : > { %3698 = vmatprep.mubr.bf16.mxu0 %v2873_v13  ;;  %3780 = vmatprep.mubr.bf16.mxu1 %v2873_v13  ;;  %v2875_v23 = vpack.c.bf16 %v2867_v53, %v2867_v53  ;;  %v6313_v13 = vld [vmem:[%s7893_s3 + $0x3ac] ss:$16 sps:$4 sm:$0xff]   ;;  %v6316_v53 = vld [vmem:[%s7893_s3 + $0x3c4] ss:$16 sps:$4 sm:$0xff]  }
 0x251   : > { %3699 = vmatmul.mubr.bf16.vlgmr.msra.gmra.mrb[0].mxu0 %v2872_v18  ;;  %3781 = vmatmul.mubr.bf16.vlgmr.msra.gmra.mrb[0].mxu1 %v2872_v18  ;;  %v6319_v18 = vld [vmem:[%s7893_s3 + $0x3cc] ss:$16 sps:$4 sm:$0xff]  }
 0x252   : > { %3708 = vmatpush1.bf16.msra.mxu0 %v6230_v19  ;;  %3790 = vmatpush1.bf16.msra.mxu1 %v6233_v20  ;;  %v6314_v19 = vld [vmem:[%s7893_s3 + $0x3c0] ss:$16 sps:$4 sm:$0xff]   ;;  %v6317_v20 = vld [vmem:[%s7893_s3 + $0x3c8] ss:$16 sps:$4 sm:$0xff]  }
 0x253   : > { %3709 = vmatprep.subr.bf16.mxu0 %v6238_v21  ;;  %3791 = vmatprep.subr.bf16.mxu1 %v6241_v22  ;;  %v6322_v21 = vld [vmem:[%s7893_s3 + $0x3e4] ss:$16 sps:$4 sm:$0xff]   ;;  %v6325_v22 = vld [vmem:[%s7893_s3 + $0x3ec] ss:$16 sps:$4 sm:$0xff]  }
 0x254   : > { %3739 = vmatprep.mubr.bf16.mxu0 %v2875_v23  ;;  %3821 = vmatprep.mubr.bf16.mxu1 %v2875_v23  ;;  %v6320_v23 = vld [vmem:[%s7893_s3 + $0x3e0] ss:$16 sps:$4 sm:$0xff]  }
 0x256   : > { %3710 = vmatpush1.bf16.msra.mxu0 %v6236_v24  ;;  %3792 = vmatpush1.bf16.msra.mxu1 %v6239_v25  ;;  %v6323_v24 = vld [vmem:[%s7893_s3 + $0x3e8] ss:$16 sps:$4 sm:$0xff]   ;;  %v6328_v25 = vld [vmem:[%s7895_s5 + $0x4] ss:$16 sps:$4 sm:$0xff]  }
 0x257   : > { %3711 = vmatprep.subr.bf16.mxu0 %v6244_v28  ;;  %3793 = vmatprep.subr.bf16.mxu1 %v6247_v29  ;;  %v6331_v28 = vld [vmem:[%s7895_s5 + $0xc] ss:$16 sps:$4 sm:$0xff]   ;;  %v6326_v29 = vld [vmem:[%s7895_s5] ss:$16 sps:$4 sm:$0xff]  }
 0x25a   : > { %3712 = vmatpush1.bf16.msra.mxu0 %v6242_v30  ;;  %3794 = vmatpush1.bf16.msra.mxu1 %v6245_v31  ;;  %v6329_v30 = vld [vmem:[%s7895_s5 + $0x8] ss:$16 sps:$4 sm:$0xff]   ;;  %v2874_v31 = vpack.c.bf16 %v7250_v10, %v7250_v10 }
 0x25b   : > { %3713 = vmatprep.subr.bf16.mxu0 %v6250_v16  ;;  %3795 = vmatprep.subr.bf16.mxu1 %v6253_v32  ;;  %v6334_v16 = vld [vmem:[%s7895_s5 + $0x24] ss:$16 sps:$4 sm:$0xff]   ;;  %v6337_v32 = vld [vmem:[%s7895_s5 + $0x2c] ss:$16 sps:$4 sm:$0xff]   ;;  %v6335_v10 = vld [vmem:[%s7895_s5 + $0x28] ss:$16 sps:$4 sm:$0xff]  }
 0x25e   : > { %3714 = vmatpush1.bf16.msra.mxu0 %v6248_v33  ;;  %3796 = vmatpush1.bf16.msra.mxu1 %v6251_v34  ;;  %v6332_v33 = vld [vmem:[%s7895_s5 + $0x20] ss:$16 sps:$4 sm:$0xff]   ;;  %v6340_v34 = vld [vmem:[%s7895_s5 + $0x44] ss:$16 sps:$4 sm:$0xff]  }
 0x25f   : > { %3715 = vmatprep.subr.bf16.mxu0 %v6256_v26  ;;  %3797 = vmatprep.subr.bf16.mxu1 %v6259_v36  ;;  %v6343_v26 = vld [vmem:[%s7895_s5 + $0x4c] ss:$16 sps:$4 sm:$0xff]   ;;  %v6338_v36 = vld [vmem:[%s7895_s5 + $0x40] ss:$16 sps:$4 sm:$0xff]  }
 0x262   : > { %3716 = vmatpush1.bf16.msra.mxu0 %v6254_v38  ;;  %3798 = vmatpush1.bf16.msra.mxu1 %v6257_v27  ;;  %v6341_v38 = vld [vmem:[%s7895_s5 + $0x48] ss:$16 sps:$4 sm:$0xff]   ;;  %v6346_v27 = vld [vmem:[%s7895_s5 + $0x64] ss:$16 sps:$4 sm:$0xff]  }
 0x263   : > { %3717 = vmatprep.subr.bf16.mxu0 %v6262_v40  ;;  %3799 = vmatprep.subr.bf16.mxu1 %v6265_v41  ;;  %v6349_v40 = vld [vmem:[%s7895_s5 + $0x6c] ss:$16 sps:$4 sm:$0xff]   ;;  %v6344_v41 = vld [vmem:[%s7895_s5 + $0x60] ss:$16 sps:$4 sm:$0xff]  }
 0x266   : > { %3718 = vmatpush1.bf16.msra.mxu0 %v6260_v42  ;;  %3800 = vmatpush1.bf16.msra.mxu1 %v6263_v43  ;;  %v6347_v42 = vld [vmem:[%s7895_s5 + $0x68] ss:$16 sps:$4 sm:$0xff]   ;;  %v6352_v43 = vld [vmem:[%s7895_s5 + $0x84] ss:$16 sps:$4 sm:$0xff]  }
 0x267   : > { %3719 = vmatprep.subr.bf16.mxu0 %v6268_v45  ;;  %3801 = vmatprep.subr.bf16.mxu1 %v6271_v46  ;;  %v6355_v45 = vld [vmem:[%s7895_s5 + $0x8c] ss:$16 sps:$4 sm:$0xff]   ;;  %v6350_v46 = vld [vmem:[%s7895_s5 + $0x80] ss:$16 sps:$4 sm:$0xff]  }
 0x26a   : > { %3720 = vmatpush1.bf16.msra.mxu0 %v6266_v47  ;;  %3802 = vmatpush1.bf16.msra.mxu1 %v6269_v48  ;;  %v6353_v47 = vld [vmem:[%s7895_s5 + $0x88] ss:$16 sps:$4 sm:$0xff]   ;;  %v6358_v48 = vld [vmem:[%s7895_s5 + $0xa4] ss:$16 sps:$4 sm:$0xff]  }
 0x26b   : > { %3721 = vmatprep.subr.bf16.mxu0 %v6274_v49  ;;  %3803 = vmatprep.subr.bf16.mxu1 %v6277_v51  ;;  %v6361_v49 = vld [vmem:[%s7895_s5 + $0xac] ss:$16 sps:$4 sm:$0xff]   ;;  %v6356_v51 = vld [vmem:[%s7895_s5 + $0xa0] ss:$16 sps:$4 sm:$0xff]  }
 0x26e   : > { %3722 = vmatpush1.bf16.msra.mxu0 %v6272_v52  ;;  %3804 = vmatpush1.bf16.msra.mxu1 %v6275_v54  ;;  %v6359_v52 = vld [vmem:[%s7895_s5 + $0xa8] ss:$16 sps:$4 sm:$0xff]   ;;  %v6364_v54 = vld [vmem:[%s7895_s5 + $0xc4] ss:$16 sps:$4 sm:$0xff]  }
 0x26f   : > { %3723 = vmatprep.subr.bf16.mxu0 %v6280_v55  ;;  %3805 = vmatprep.subr.bf16.mxu1 %v6283_v56  ;;  %v6367_v55 = vld [vmem:[%s7895_s5 + $0xcc] ss:$16 sps:$4 sm:$0xff]   ;;  %v6362_v56 = vld [vmem:[%s7895_s5 + $0xc0] ss:$16 sps:$4 sm:$0xff]  }
 0x272   : > { %3724 = vmatpush1.bf16.msra.mxu0 %v6278_v57  ;;  %3806 = vmatpush1.bf16.msra.mxu1 %v6281_v58  ;;  %v6365_v57 = vld [vmem:[%s7895_s5 + $0xc8] ss:$16 sps:$4 sm:$0xff]   ;;  %v6370_v58 = vld [vmem:[%s7895_s5 + $0xe4] ss:$16 sps:$4 sm:$0xff]  }
 0x273   : > { %3725 = vmatprep.subr.bf16.mxu0 %v6286_v59  ;;  %3807 = vmatprep.subr.bf16.mxu1 %v6289_v60  ;;  %v6373_v59 = vld [vmem:[%s7895_s5 + $0xec] ss:$16 sps:$4 sm:$0xff]   ;;  %v6368_v60 = vld [vmem:[%s7895_s5 + $0xe0] ss:$16 sps:$4 sm:$0xff]  }
 0x276   : > { %3726 = vmatpush1.bf16.msra.mxu0 %v6284_v61  ;;  %3808 = vmatpush1.bf16.msra.mxu1 %v6287_v62  ;;  %v6371_v61 = vld [vmem:[%s7895_s5 + $0xe8] ss:$16 sps:$4 sm:$0xff]   ;;  %v6376_v62 = vld [vmem:[%s7895_s5 + $0x104] ss:$16 sps:$4 sm:$0xff]  }
 0x277   : > { %3727 = vmatprep.subr.bf16.mxu0 %v6292_v63  ;;  %3809 = vmatprep.subr.bf16.mxu1 %v6295_v0  ;;  %v6379_v63 = vld [vmem:[%s7895_s5 + $0x10c] ss:$16 sps:$4 sm:$0xff]   ;;  %v6374_v0 = vld [vmem:[%s7895_s5 + $0x100] ss:$16 sps:$4 sm:$0xff]  }
 0x27a   : > { %3728 = vmatpush1.bf16.msra.mxu0 %v6290_v1  ;;  %3810 = vmatpush1.bf16.msra.mxu1 %v6293_v2  ;;  %v6377_v1 = vld [vmem:[%s7895_s5 + $0x108] ss:$16 sps:$4 sm:$0xff]   ;;  %v6382_v2 = vld [vmem:[%s7895_s5 + $0x124] ss:$16 sps:$4 sm:$0xff]  }
 0x27b   : > { %3729 = vmatprep.subr.bf16.mxu0 %v6298_v3  ;;  %3811 = vmatprep.subr.bf16.mxu1 %v6301_v4  ;;  %v6385_v3 = vld [vmem:[%s7895_s5 + $0x12c] ss:$16 sps:$4 sm:$0xff]   ;;  %v6380_v4 = vld [vmem:[%s7895_s5 + $0x120] ss:$16 sps:$4 sm:$0xff]  }
 0x27e   : > { %3730 = vmatpush1.bf16.msra.mxu0 %v6296_v5  ;;  %3812 = vmatpush1.bf16.msra.mxu1 %v6299_v6  ;;  %v6383_v5 = vld [vmem:[%s7895_s5 + $0x128] ss:$16 sps:$4 sm:$0xff]   ;;  %v6388_v6 = vld [vmem:[%s7895_s5 + $0x144] ss:$16 sps:$4 sm:$0xff]  }
 0x27f   : > { %3731 = vmatprep.subr.bf16.mxu0 %v6304_v7  ;;  %3813 = vmatprep.subr.bf16.mxu1 %v6307_v8  ;;  %v6391_v7 = vld [vmem:[%s7895_s5 + $0x14c] ss:$16 sps:$4 sm:$0xff]   ;;  %v6386_v8 = vld [vmem:[%s7895_s5 + $0x140] ss:$16 sps:$4 sm:$0xff]  }
 0x282   : > { %3732 = vmatpush1.bf16.msra.mxu0 %v6302_v9  ;;  %3814 = vmatpush1.bf16.msra.mxu1 %v6305_v11  ;;  %v6389_v9 = vld [vmem:[%s7895_s5 + $0x148] ss:$16 sps:$4 sm:$0xff]   ;;  %v6394_v11 = vld [vmem:[%s7895_s5 + $0x164] ss:$16 sps:$4 sm:$0xff]  }
 0x283   : > { %3733 = vmatprep.subr.bf16.mxu0 %v6310_v12  ;;  %3815 = vmatprep.subr.bf16.mxu1 %v6313_v13  ;;  %v6397_v12 = vld [vmem:[%s7895_s5 + $0x16c] ss:$16 sps:$4 sm:$0xff]   ;;  %v6392_v13 = vld [vmem:[%s7895_s5 + $0x160] ss:$16 sps:$4 sm:$0xff]  }
 0x286   : > { %3734 = vmatpush1.bf16.msra.mxu0 %v6308_v15  ;;  %3816 = vmatpush1.bf16.msra.mxu1 %v6311_v17  ;;  %v6395_v15 = vld [vmem:[%s7895_s5 + $0x168] ss:$16 sps:$4 sm:$0xff]   ;;  %v6400_v17 = vld [vmem:[%s7895_s5 + $0x184] ss:$16 sps:$4 sm:$0xff]  }
 0x287   : > { %3735 = vmatprep.subr.bf16.mxu0 %v6316_v53  ;;  %3817 = vmatprep.subr.bf16.mxu1 %v6319_v18  ;;  %v6403_v53 = vld [vmem:[%s7895_s5 + $0x18c] ss:$16 sps:$4 sm:$0xff]   ;;  %v6398_v18 = vld [vmem:[%s7895_s5 + $0x180] ss:$16 sps:$4 sm:$0xff]  }
 0x28a   : > { %3736 = vmatpush1.bf16.msra.mxu0 %v6314_v19  ;;  %3818 = vmatpush1.bf16.msra.mxu1 %v6317_v20  ;;  %v6401_v19 = vld [vmem:[%s7895_s5 + $0x188] ss:$16 sps:$4 sm:$0xff]   ;;  %v6406_v20 = vld [vmem:[%s7895_s5 + $0x1a4] ss:$16 sps:$4 sm:$0xff]  }
 0x28b   : > { %3737 = vmatprep.subr.bf16.mxu0 %v6322_v21  ;;  %3819 = vmatprep.subr.bf16.mxu1 %v6325_v22  ;;  %v6409_v21 = vld [vmem:[%s7895_s5 + $0x1ac] ss:$16 sps:$4 sm:$0xff]   ;;  %v6404_v22 = vld [vmem:[%s7895_s5 + $0x1a0] ss:$16 sps:$4 sm:$0xff]  }
 0x28e   : > { %3738 = vmatpush1.bf16.msra.mxu0 %v6320_v23  ;;  %3820 = vmatpush1.bf16.msra.mxu1 %v6323_v24  ;;  %v6407_v23 = vld [vmem:[%s7895_s5 + $0x1a8] ss:$16 sps:$4 sm:$0xff]   ;;  %v6412_v24 = vld [vmem:[%s7895_s5 + $0x1c4] ss:$16 sps:$4 sm:$0xff]  }
 0x28f   : > { %4628 = vmatprep.subr.bf16.mxu0 %v6328_v25  ;;  %4710 = vmatprep.subr.bf16.mxu1 %v6331_v28  ;;  %v6415_v25 = vld [vmem:[%s7895_s5 + $0x1cc] ss:$16 sps:$4 sm:$0xff]   ;;  %v6410_v28 = vld [vmem:[%s7895_s5 + $0x1c0] ss:$16 sps:$4 sm:$0xff]  }
 0x291   : > { %3740 = vmatmul.mubr.bf16.vlgmr.msra.gmra.mrb[0].mxu0 %v2874_v31  ;;  %3822 = vmatmul.mubr.bf16.vlgmr.msra.gmra.mrb[0].mxu1 %v2874_v31  ;;  %v6421_v31 = vld [vmem:[%s7895_s5 + $0x1ec] ss:$16 sps:$4 sm:$0xff]  }
 0x292   : > { %4629 = vmatpush1.bf16.msra.mxu0 %v6326_v29  ;;  %4711 = vmatpush1.bf16.msra.mxu1 %v6329_v30  ;;  %v6413_v29 = vld [vmem:[%s7895_s5 + $0x1c8] ss:$16 sps:$4 sm:$0xff]   ;;  %v6418_v30 = vld [vmem:[%s7895_s5 + $0x1e4] ss:$16 sps:$4 sm:$0xff]  }
 0x293   : > { %4630 = vmatprep.subr.bf16.mxu0 %v6334_v16  ;;  %4712 = vmatprep.subr.bf16.mxu1 %v6337_v32  ;;  %v6416_v16 = vld [vmem:[%s7895_s5 + $0x1e0] ss:$16 sps:$4 sm:$0xff]   ;;  %v6419_v32 = vld [vmem:[%s7895_s5 + $0x1e8] ss:$16 sps:$4 sm:$0xff]  }
 0x296   : > { %4631 = vmatpush1.bf16.msra.mxu0 %v6332_v33  ;;  %4713 = vmatpush1.bf16.msra.mxu1 %v6335_v10  ;;  %v6424_v33 = vld [vmem:[%s7895_s5 + $0x204] ss:$16 sps:$4 sm:$0xff]   ;;  %v6427_v10 = vld [vmem:[%s7895_s5 + $0x20c] ss:$16 sps:$4 sm:$0xff]  }
 0x297   : > { %4632 = vmatprep.subr.bf16.mxu0 %v6340_v34  ;;  %4714 = vmatprep.subr.bf16.mxu1 %v6343_v26  ;;  %v7655_v34 = vld [vmem:[%s7894_s4] sm:$0xf] }
 0x298   : > { %v3009_v26 = vrot.slane %v7655_v34, %v7176_v35 }
 0x29a   : > { %4633 = vmatpush1.bf16.msra.mxu0 %v6338_v36  ;;  %4715 = vmatpush1.bf16.msra.mxu1 %v6341_v38  ;;  %v3013_v36 = vrot.slane %v7655_v34, %v7182_v14  ;;  %v3021_v38 = vrot.slane %v7655_v34, %v7191_v50 }
 0x29b   : > { %4634 = vmatprep.subr.bf16.mxu0 %v6346_v27  ;;  %4716 = vmatprep.subr.bf16.mxu1 %v6349_v40 }
 0x29e   : > { %4635 = vmatpush1.bf16.msra.mxu0 %v6344_v41  ;;  %4717 = vmatpush1.bf16.msra.mxu1 %v6347_v42 }
 0x29f   : > { %4636 = vmatprep.subr.bf16.mxu0 %v6352_v43  ;;  %4718 = vmatprep.subr.bf16.mxu1 %v6355_v45 }
 0x2a2   : > { %4637 = vmatpush1.bf16.msra.mxu0 %v6350_v46  ;;  %4719 = vmatpush1.bf16.msra.mxu1 %v6353_v47 }
 0x2a3   : > { %4638 = vmatprep.subr.bf16.mxu0 %v6358_v48  ;;  %4720 = vmatprep.subr.bf16.mxu1 %v6361_v49 }
 0x2a6   : > { %4639 = vmatpush1.bf16.msra.mxu0 %v6356_v51  ;;  %4721 = vmatpush1.bf16.msra.mxu1 %v6359_v52 }
 0x2a7   : > { %4640 = vmatprep.subr.bf16.mxu0 %v6364_v54  ;;  %4722 = vmatprep.subr.bf16.mxu1 %v6367_v55 }
 0x2aa   : > { %4641 = vmatpush1.bf16.msra.mxu0 %v6362_v56  ;;  %4723 = vmatpush1.bf16.msra.mxu1 %v6365_v57  ;;  %v6422_v57 = vld [vmem:[%s7895_s5 + $0x200] ss:$16 sps:$4 sm:$0xff]  }
 0x2ab   : > { %4642 = vmatprep.subr.bf16.mxu0 %v6370_v58  ;;  %4724 = vmatprep.subr.bf16.mxu1 %v6373_v59  ;;  %v6425_v58 = vld [vmem:[%s7895_s5 + $0x208] ss:$16 sps:$4 sm:$0xff]  }
 0x2ae   : > { %4643 = vmatpush1.bf16.msra.mxu0 %v6368_v60  ;;  %4725 = vmatpush1.bf16.msra.mxu1 %v6371_v61  ;;  %v6430_v60 = vld [vmem:[%s7895_s5 + $0x224] ss:$16 sps:$4 sm:$0xff]   ;;  %v6433_v61 = vld [vmem:[%s7895_s5 + $0x22c] ss:$16 sps:$4 sm:$0xff]  }
 0x2af   : > { %4644 = vmatprep.subr.bf16.mxu0 %v6376_v62  ;;  %4726 = vmatprep.subr.bf16.mxu1 %v6379_v63  ;;  %v6428_v63 = vld [vmem:[%s7895_s5 + $0x220] ss:$16 sps:$4 sm:$0xff]  }
 0x2b2   : > { %4645 = vmatpush1.bf16.msra.mxu0 %v6374_v0  ;;  %4727 = vmatpush1.bf16.msra.mxu1 %v6377_v1  ;;  %v6431_v0 = vld [vmem:[%s7895_s5 + $0x228] ss:$16 sps:$4 sm:$0xff]   ;;  %v6436_v1 = vld [vmem:[%s7895_s5 + $0x244] ss:$16 sps:$4 sm:$0xff]  }
 0x2b3   : > { %4646 = vmatprep.subr.bf16.mxu0 %v6382_v2  ;;  %4728 = vmatprep.subr.bf16.mxu1 %v6385_v3  ;;  %v6439_v2 = vld [vmem:[%s7895_s5 + $0x24c] ss:$16 sps:$4 sm:$0xff]   ;;  %v6434_v3 = vld [vmem:[%s7895_s5 + $0x240] ss:$16 sps:$4 sm:$0xff]  }
 0x2b6   : > { %4647 = vmatpush1.bf16.msra.mxu0 %v6380_v4  ;;  %4729 = vmatpush1.bf16.msra.mxu1 %v6383_v5  ;;  %v6437_v4 = vld [vmem:[%s7895_s5 + $0x248] ss:$16 sps:$4 sm:$0xff]   ;;  %v6442_v5 = vld [vmem:[%s7895_s5 + $0x264] ss:$16 sps:$4 sm:$0xff]  }
 0x2b7   : > { %4648 = vmatprep.subr.bf16.mxu0 %v6388_v6  ;;  %4730 = vmatprep.subr.bf16.mxu1 %v6391_v7  ;;  %v6445_v6 = vld [vmem:[%s7895_s5 + $0x26c] ss:$16 sps:$4 sm:$0xff]   ;;  %v6440_v7 = vld [vmem:[%s7895_s5 + $0x260] ss:$16 sps:$4 sm:$0xff]  }
 0x2ba   : > { %4649 = vmatpush1.bf16.msra.mxu0 %v6386_v8  ;;  %4731 = vmatpush1.bf16.msra.mxu1 %v6389_v9  ;;  %v6443_v8 = vld [vmem:[%s7895_s5 + $0x268] ss:$16 sps:$4 sm:$0xff]   ;;  %v6448_v9 = vld [vmem:[%s7895_s5 + $0x284] ss:$16 sps:$4 sm:$0xff]  }
 0x2bb   : > { %4650 = vmatprep.subr.bf16.mxu0 %v6394_v11  ;;  %4732 = vmatprep.subr.bf16.mxu1 %v6397_v12  ;;  %v6451_v11 = vld [vmem:[%s7895_s5 + $0x28c] ss:$16 sps:$4 sm:$0xff]   ;;  %v6446_v12 = vld [vmem:[%s7895_s5 + $0x280] ss:$16 sps:$4 sm:$0xff]  }
 0x2be   : > { %4651 = vmatpush1.bf16.msra.mxu0 %v6392_v13  ;;  %4733 = vmatpush1.bf16.msra.mxu1 %v6395_v15  ;;  %v6449_v13 = vld [vmem:[%s7895_s5 + $0x288] ss:$16 sps:$4 sm:$0xff]   ;;  %v6454_v15 = vld [vmem:[%s7895_s5 + $0x2a4] ss:$16 sps:$4 sm:$0xff]  }
 0x2bf   : > { %4652 = vmatprep.subr.bf16.mxu0 %v6400_v17  ;;  %4734 = vmatprep.subr.bf16.mxu1 %v6403_v53  ;;  %v6457_v17 = vld [vmem:[%s7895_s5 + $0x2ac] ss:$16 sps:$4 sm:$0xff]   ;;  %v6452_v53 = vld [vmem:[%s7895_s5 + $0x2a0] ss:$16 sps:$4 sm:$0xff]  }
 0x2c2   : > { %4653 = vmatpush1.bf16.msra.mxu0 %v6398_v18  ;;  %4735 = vmatpush1.bf16.msra.mxu1 %v6401_v19  ;;  %v6455_v18 = vld [vmem:[%s7895_s5 + $0x2a8] ss:$16 sps:$4 sm:$0xff]   ;;  %v6460_v19 = vld [vmem:[%s7895_s5 + $0x2c4] ss:$16 sps:$4 sm:$0xff]  }
 0x2c3   : > { %4654 = vmatprep.subr.bf16.mxu0 %v6406_v20  ;;  %4736 = vmatprep.subr.bf16.mxu1 %v6409_v21  ;;  %v6463_v20 = vld [vmem:[%s7895_s5 + $0x2cc] ss:$16 sps:$4 sm:$0xff]   ;;  %v6458_v21 = vld [vmem:[%s7895_s5 + $0x2c0] ss:$16 sps:$4 sm:$0xff]  }
 0x2c6   : > { %4655 = vmatpush1.bf16.msra.mxu0 %v6404_v22  ;;  %4737 = vmatpush1.bf16.msra.mxu1 %v6407_v23  ;;  %v6461_v22 = vld [vmem:[%s7895_s5 + $0x2c8] ss:$16 sps:$4 sm:$0xff]   ;;  %v6466_v23 = vld [vmem:[%s7895_s5 + $0x2e4] ss:$16 sps:$4 sm:$0xff]  }
 0x2c7   : > { %4656 = vmatprep.subr.bf16.mxu0 %v6412_v24  ;;  %4738 = vmatprep.subr.bf16.mxu1 %v6415_v25  ;;  %v6469_v24 = vld [vmem:[%s7895_s5 + $0x2ec] ss:$16 sps:$4 sm:$0xff]   ;;  %v6464_v25 = vld [vmem:[%s7895_s5 + $0x2e0] ss:$16 sps:$4 sm:$0xff]  }
 0x2ca   : > { %4657 = vmatpush1.bf16.msra.mxu0 %v6410_v28  ;;  %4739 = vmatpush1.bf16.msra.mxu1 %v6413_v29  ;;  %v6467_v28 = vld [vmem:[%s7895_s5 + $0x2e8] ss:$16 sps:$4 sm:$0xff]   ;;  %v6472_v29 = vld [vmem:[%s7895_s5 + $0x304] ss:$16 sps:$4 sm:$0xff]  }
 0x2cb   : > { %4658 = vmatprep.subr.bf16.mxu0 %v6418_v30  ;;  %4740 = vmatprep.subr.bf16.mxu1 %v6421_v31  ;;  %v6475_v30 = vld [vmem:[%s7895_s5 + $0x30c] ss:$16 sps:$4 sm:$0xff]   ;;  %v6470_v31 = vld [vmem:[%s7895_s5 + $0x300] ss:$16 sps:$4 sm:$0xff]  }
 0x2ce   : > { %4659 = vmatpush1.bf16.msra.mxu0 %v6416_v16  ;;  %4741 = vmatpush1.bf16.msra.mxu1 %v6419_v32  ;;  %v6473_v16 = vld [vmem:[%s7895_s5 + $0x308] ss:$16 sps:$4 sm:$0xff]   ;;  %v6478_v32 = vld [vmem:[%s7895_s5 + $0x324] ss:$16 sps:$4 sm:$0xff]  }
 0x2cf   : > { %4669 = vmatprep.subr.bf16.mxu0 %v6424_v33  ;;  %4751 = vmatprep.subr.bf16.mxu1 %v6427_v10  ;;  %v6481_v33 = vld [vmem:[%s7895_s5 + $0x32c] ss:$16 sps:$4 sm:$0xff]   ;;  %v6476_v10 = vld [vmem:[%s7895_s5 + $0x320] ss:$16 sps:$4 sm:$0xff]  }
 0x364   : > { %v3741_v27 = vpop.f32.mrb[0].mxu0  ;;  %v7663_v40 = vpop.f32.mrb[0].mxu1 }
 0x365   : > { %v5584_v41 = vadd.f32 %v3741_v27, %v3009_v26  ;;  %v3743_v42 = vpop.f32.mrb[1].mxu0  ;;  %v3825_v43 = vpop.f32.mrb[1].mxu1  ;;  %v6479_v26 = vld [vmem:[%s7895_s5 + $0x328] ss:$16 sps:$4 sm:$0xff]   ;;  %v6482_v27 = vld [vmem:[%s7895_s5 + $0x340] ss:$16 sps:$4 sm:$0xff]  }
 0x366   : > { %v5585_v45 = vadd.f32 %v3743_v42, %v3013_v36  ;;  %v5587_v46 = vadd.f32 %v3825_v43, %v3021_v38  ;;  %v3745_v47 = vpop.f32.mrb[2].mxu0  ;;  %v3827_v48 = vpop.f32.mrb[2].mxu1  ;;  %v6484_v36 = vld [vmem:[%s7895_s5 + $0x344] ss:$16 sps:$4 sm:$0xff]   ;;  %v6487_v38 = vld [vmem:[%s7895_s5 + $0x34c] ss:$16 sps:$4 sm:$0xff]  }
 0x367   : > { %v3830_v49 = vmax.f32 %v5584_v41, 0.0  ;;  %v3746_v51 = vpop.f32.mrb[3].mxu0  ;;  %v3828_v52 = vpop.f32.mrb[3].mxu1  ;;  %v6485_v41 = vld [vmem:[%s7895_s5 + $0x348] ss:$16 sps:$4 sm:$0xff]  }
 0x368   : > { %v3831_v54 = vmax.f32 %v5585_v45, 0.0  ;;  %v3833_v55 = vmax.f32 %v5587_v46, 0.0  ;;  %v6490_v42 = vld [vmem:[%s7895_s5 + $0x364] ss:$16 sps:$4 sm:$0xff]   ;;  %v6493_v43 = vld [vmem:[%s7895_s5 + $0x36c] ss:$16 sps:$4 sm:$0xff]  }
 0x369   : > { %v3834_v59 = vpack.c.bf16 %v3830_v49, %v3830_v49  ;;  %v6488_v45 = vld [vmem:[%s7895_s5 + $0x360] ss:$16 sps:$4 sm:$0xff]   ;;  %v6491_v46 = vld [vmem:[%s7895_s5 + $0x368] ss:$16 sps:$4 sm:$0xff]   ;;  %v6496_v47 = vld [vmem:[%s7895_s5 + $0x384] ss:$16 sps:$4 sm:$0xff]  }
 0x36a   : > { %v3835_v56 = vpack.c.bf16 %v3831_v54, %v3831_v54  ;;  %v3837_v62 = vpack.c.bf16 %v3833_v55, %v3833_v55  ;;  %v6499_v48 = vld [vmem:[%s7895_s5 + $0x38c] ss:$16 sps:$4 sm:$0xff]   ;;  %v6494_v49 = vld [vmem:[%s7895_s5 + $0x380] ss:$16 sps:$4 sm:$0xff]   ;;  %v6497_v51 = vld [vmem:[%s7895_s5 + $0x388] ss:$16 sps:$4 sm:$0xff]  }
 0x36b   : > { %v6502_v52 = vld [vmem:[%s7895_s5 + $0x3a4] ss:$16 sps:$4 sm:$0xff]   ;;  %v6505_v54 = vld [vmem:[%s7895_s5 + $0x3ac] ss:$16 sps:$4 sm:$0xff]   ;;  %v6500_v55 = vld [vmem:[%s7895_s5 + $0x3a0] ss:$16 sps:$4 sm:$0xff]  }
 0x36c   : > { %4660 = vmatprep.mubr.bf16.mxu0 %v3835_v56  ;;  %4742 = vmatprep.mubr.bf16.mxu1 %v3835_v56  ;;  %v6503_v56 = vld [vmem:[%s7895_s5 + $0x3a8] ss:$16 sps:$4 sm:$0xff]  }
 0x36d   : > { %4661 = vmatmul.mubr.bf16.vlgmr.msra.gmra.mrb[4].mxu0 %v3834_v59  ;;  %4743 = vmatmul.mubr.bf16.vlgmr.msra.gmra.mrb[4].mxu1 %v3834_v59  ;;  %v6511_v59 = vld [vmem:[%s7895_s5 + $0x3cc] ss:$16 sps:$4 sm:$0xff]  }
 0x36e   : > { %4670 = vmatpush1.bf16.msra.mxu0 %v6422_v57  ;;  %4752 = vmatpush1.bf16.msra.mxu1 %v6425_v58  ;;  %v3017_v57 = vrot.slane %v7655_v34, %v7185_v37  ;;  %v6508_v58 = vld [vmem:[%s7895_s5 + $0x3c4] ss:$16 sps:$4 sm:$0xff]   ;;  %v6509_v34 = vld [vmem:[%s7895_s5 + $0x3c8] ss:$16 sps:$4 sm:$0xff]  }
 0x36f   : > { %4701 = vmatprep.mubr.bf16.mxu0 %v3837_v62  ;;  %4783 = vmatprep.mubr.bf16.mxu1 %v3837_v62  ;;  %v6514_v62 = vld [vmem:[%s7895_s5 + $0x3e4] ss:$16 sps:$4 sm:$0xff]  }
 0x370   : > { %4671 = vmatprep.subr.bf16.mxu0 %v6430_v60  ;;  %4753 = vmatprep.subr.bf16.mxu1 %v6433_v61  ;;  %v6506_v60 = vld [vmem:[%s7895_s5 + $0x3c0] ss:$16 sps:$4 sm:$0xff]   ;;  %v5586_v61 = vadd.f32 %v7663_v40, %v3017_v57  ;;  %v6515_v40 = vld [vmem:[%s7895_s5 + $0x3e8] ss:$16 sps:$4 sm:$0xff]  }
 0x372   : > { %4672 = vmatpush1.bf16.msra.mxu0 %v6428_v63  ;;  %4754 = vmatpush1.bf16.msra.mxu1 %v6431_v0  ;;  %v6517_v63 = vld [vmem:[%s7895_s5 + $0x3ec] ss:$16 sps:$4 sm:$0xff]   ;;  %v6512_v0 = vld [vmem:[%s7895_s5 + $0x3e0] ss:$16 sps:$4 sm:$0xff]  }
 0x373   : > { %4673 = vmatprep.subr.bf16.mxu0 %v6436_v1  ;;  %4755 = vmatprep.subr.bf16.mxu1 %v6439_v2  ;;  %v3832_v1 = vmax.f32 %v5586_v61, 0.0 }
 0x375   : > { %v3836_v2 = vpack.c.bf16 %v3832_v1, %v3832_v1 }
 0x376   : > { %4674 = vmatpush1.bf16.msra.mxu0 %v6434_v3  ;;  %4756 = vmatpush1.bf16.msra.mxu1 %v6437_v4  ;;  %v3966_v3 = vld [vmem:[%s7896_s6] sm:$0xf] }
 0x377   : > { %4675 = vmatprep.subr.bf16.mxu0 %v6442_v5  ;;  %4757 = vmatprep.subr.bf16.mxu1 %v6445_v6  ;;  %v3971_v4 = vrot.slane %v3966_v3, %v7176_v35  ;;  %v3979_v5 = vrot.slane %v3966_v3, %v7185_v37  ;;  %v3975_v6 = vrot.slane %v3966_v3, %v7182_v14 }
 0x37a   : > { %4676 = vmatpush1.bf16.msra.mxu0 %v6440_v7  ;;  %4758 = vmatpush1.bf16.msra.mxu1 %v6443_v8  ;;  %v3983_v7 = vrot.slane %v3966_v3, %v7191_v50 }
 0x37b   : > { %4677 = vmatprep.subr.bf16.mxu0 %v6448_v9  ;;  %4759 = vmatprep.subr.bf16.mxu1 %v6451_v11 }
 0x37e   : > { %4678 = vmatpush1.bf16.msra.mxu0 %v6446_v12  ;;  %4760 = vmatpush1.bf16.msra.mxu1 %v6449_v13 }
 0x37f   : > { %4679 = vmatprep.subr.bf16.mxu0 %v6454_v15  ;;  %4761 = vmatprep.subr.bf16.mxu1 %v6457_v17 }
 0x382   : > { %4680 = vmatpush1.bf16.msra.mxu0 %v6452_v53  ;;  %4762 = vmatpush1.bf16.msra.mxu1 %v6455_v18 }
 0x383   : > { %4681 = vmatprep.subr.bf16.mxu0 %v6460_v19  ;;  %4763 = vmatprep.subr.bf16.mxu1 %v6463_v20 }
 0x386   : > { %4682 = vmatpush1.bf16.msra.mxu0 %v6458_v21  ;;  %4764 = vmatpush1.bf16.msra.mxu1 %v6461_v22 }
 0x387   : > { %4683 = vmatprep.subr.bf16.mxu0 %v6466_v23  ;;  %4765 = vmatprep.subr.bf16.mxu1 %v6469_v24 }
 0x38a   : > { %4684 = vmatpush1.bf16.msra.mxu0 %v6464_v25  ;;  %4766 = vmatpush1.bf16.msra.mxu1 %v6467_v28 }
 0x38b   : > { %4685 = vmatprep.subr.bf16.mxu0 %v6472_v29  ;;  %4767 = vmatprep.subr.bf16.mxu1 %v6475_v30 }
 0x38e   : > { %4686 = vmatpush1.bf16.msra.mxu0 %v6470_v31  ;;  %4768 = vmatpush1.bf16.msra.mxu1 %v6473_v16 }
 0x38f   : > { %4687 = vmatprep.subr.bf16.mxu0 %v6478_v32  ;;  %4769 = vmatprep.subr.bf16.mxu1 %v6481_v33 }
 0x392   : > { %4688 = vmatpush1.bf16.msra.mxu0 %v6476_v10  ;;  %4770 = vmatpush1.bf16.msra.mxu1 %v6479_v26 }
 0x393   : > { %4689 = vmatprep.subr.bf16.mxu0 %v6484_v36  ;;  %4771 = vmatprep.subr.bf16.mxu1 %v6487_v38 }
 0x396   : > { %4690 = vmatpush1.bf16.msra.mxu0 %v6482_v27  ;;  %4772 = vmatpush1.bf16.msra.mxu1 %v6485_v41 }
 0x397   : > { %4691 = vmatprep.subr.bf16.mxu0 %v6490_v42  ;;  %4773 = vmatprep.subr.bf16.mxu1 %v6493_v43 }
 0x39a   : > { %4692 = vmatpush1.bf16.msra.mxu0 %v6488_v45  ;;  %4774 = vmatpush1.bf16.msra.mxu1 %v6491_v46 }
 0x39b   : > { %4693 = vmatprep.subr.bf16.mxu0 %v6496_v47  ;;  %4775 = vmatprep.subr.bf16.mxu1 %v6499_v48 }
 0x39e   : > { %4694 = vmatpush1.bf16.msra.mxu0 %v6494_v49  ;;  %4776 = vmatpush1.bf16.msra.mxu1 %v6497_v51 }
 0x39f   : > { %4695 = vmatprep.subr.bf16.mxu0 %v6502_v52  ;;  %4777 = vmatprep.subr.bf16.mxu1 %v6505_v54 }
 0x3a2   : > { %4696 = vmatpush1.bf16.msra.mxu0 %v6500_v55  ;;  %4778 = vmatpush1.bf16.msra.mxu1 %v6503_v56 }
 0x3a3   : > { %4697 = vmatprep.subr.bf16.mxu0 %v6508_v58  ;;  %4779 = vmatprep.subr.bf16.mxu1 %v6511_v59 }
 0x3a6   : > { %4698 = vmatpush1.bf16.msra.mxu0 %v6506_v60  ;;  %4780 = vmatpush1.bf16.msra.mxu1 %v6509_v34 }
 0x3a7   : > { %4699 = vmatprep.subr.bf16.mxu0 %v6514_v62  ;;  %4781 = vmatprep.subr.bf16.mxu1 %v6517_v63 }
 0x3aa   : > { %4700 = vmatpush1.bf16.msra.mxu0 %v6512_v0  ;;  %4782 = vmatpush1.bf16.msra.mxu1 %v6515_v40 }
 0x3ad   : > { %4702 = vmatmul.mubr.bf16.vlgmr.msra.gmra.mrb[4].mxu0 %v3836_v2  ;;  %4784 = vmatmul.mubr.bf16.vlgmr.msra.gmra.mrb[4].mxu1 %v3836_v2 }
 0x480   : > { %v4703_v8 = vpop.f32.mrb[4].mxu0  ;;  %v4785_v9 = vpop.f32.mrb[4].mxu1 }
 0x481   : > { %v5588_v11 = vadd.f32 %v4703_v8, %v3971_v4  ;;  %v5590_v12 = vadd.f32 %v4785_v9, %v3979_v5  ;;  %v4705_v13 = vpop.f32.mrb[5].mxu0  ;;  %v4787_v15 = vpop.f32.mrb[5].mxu1 }
 0x482   : > { %v5589_v17 = vadd.f32 %v4705_v13, %v3975_v6  ;;  %v5591_v53 = vadd.f32 %v4787_v15, %v3983_v7  ;;  %v4707_v18 = vpop.f32.mrb[6].mxu0  ;;  %v4789_v19 = vpop.f32.mrb[6].mxu1 }
 0x483   : > { %v4708_v20 = vpop.f32.mrb[7].mxu0  ;;  %v4790_v21 = vpop.f32.mrb[7].mxu1 }
 0x484   : > { %v4796_v35 = vcombine.low %v5588_v11, %v5589_v17  ;;  %v4797_v22 = vcombine.low %v5590_v12, %v5591_v53 }
 0x486   : > { %v4804_v37 = vrot.slane %v4796_v35, %v7037_v39  ;;  %v4811_v14 = vrot.slane %v4797_v22, %v7037_v39 }
 0x488   : > { %v4812_v50 = vcombine.low %v4804_v37, %v4811_v14 }
 0x48a   : > { %4814 = vst [vmem:[%s6657_s15] sm:$0xff] %v4812_v50 }
 0x48b PF: > { %p4815_p12 = scmp.eq.s32.totalorder %s6544_s25, 1 }
 0x48d   : > { %p4816_p13 = pnand %p4815_p12, %p2805_p9 }
 0x48e   : > { %v4821_v23 = vld [vmem:[%s6647_s22] sm:$0xf] (!%p4816_p13)  ;;  %v4825_v24 = vsub.s32 (!%p4816_p13), 0, %v6699_v44  ;;  %v4829_v25 = vsub.s32 (!%p4816_p13), 1, %v6699_v44  ;;  %v4833_v28 = vsub.s32 (!%p4816_p13), 2, %v6699_v44  ;;  %v4837_v29 = vsub.s32 (!%p4816_p13), 3, %v6699_v44 }
 0x48f   : > { %4819 = sbr.rel (%p4816_p13) target bundleno = 1179 (0x49b), region = 60 }
 0x490   : > { %v4826_v30 = vrot.slane (!%p4816_p13), %v4821_v23, %v4825_v24  ;;  %v4830_v31 = vrot.slane (!%p4816_p13), %v4821_v23, %v4829_v25  ;;  %v4834_v16 = vrot.slane (!%p4816_p13), %v4821_v23, %v4833_v28  ;;  %v4838_v32 = vrot.slane (!%p4816_p13), %v4821_v23, %v4837_v29 }
 0x491   : > { %v4820_v38 = vld [vmem:[#allocation2] sm:$0xff] (!%p4816_p13) }
 0x492   : > { %v4839_v33 = vcombine.low (!%p4816_p13), %v4826_v30, %v4830_v31  ;;  %v4840_v10 = vcombine.low (!%p4816_p13), %v4834_v16, %v4838_v32 }
 0x494   : > { %v4847_v26 = vrot.slane (!%p4816_p13), %v4839_v33, %v7037_v39  ;;  %v4854_v36 = vrot.slane (!%p4816_p13), %v4840_v10, %v7037_v39 }
 0x496   : > { %v4855_v27 = vcombine.low %v4847_v26, %v4854_v36 }
 0x498   : > { %v4857_v41 = vadd.f32 %v4855_v27, %v4820_v38 }
 0x49a   : > { %4858 = vst [vmem:[%s6657_s15] sm:$0xff] %v4857_v41 }
 0x49b PF: > { %s17_s28 = sadd.s32 1, %s6556_s28   ;;  %s7905_s24 = sld [smem:[#allocation3_spill]] }
 0x49c   : > { %p14_p0 = scmp.ge.s32.totalorder %s17_s28, 12   ;;  %s7906_s25 = sld [smem:[#allocation4_spill]] }
 0x49d   : > { %s7907_s26 = sld [smem:[#allocation5_spill]]  ;;  %s7908_s27 = sld [smem:[#allocation6_spill]] }
 0x49e   :  { %16 = sbr.rel (!%p14_p0) target bundleno = 3 (0x3), region = 96 }

</bundles_post_ra>
